<compile_context>
chip_gen: v6e
topology: v6e:2x2x1
jax: 0.10.0
libtpu: 0.0.40
codegen_flags: <defaults>
</compile_context>

<pallas_src>
import functools

import numpy as np
import jax
import jax.numpy as jnp
from jax import lax
from jax.experimental import pallas as pl
from jax.experimental.pallas import tpu as pltpu


_LANE = 128
_NEG = -1e30                      # "minus infinity" for padded vocab columns
_MXU_DTYPE = jnp.bfloat16         # MXU operand dtype (f32 accumulation); set to
                                  # jnp.float32 to recover exact-f32 numerics.


def _round_up(x, m):
    return (x + m - 1) // m * m


def _vmem_limit_bytes():
    """Generation-aware scoped-VMEM limit: ~96 MiB on v5e/v6e, ~48 MiB on v7x."""
    try:
        cap = pltpu.get_tpu_info().vmem_capacity_bytes
    except Exception:
        cap = 64 * 1024 * 1024    # conservative fallback (fits every generation)
    return int(cap * 0.75)


_VMEM_LIMIT = _vmem_limit_bytes()


def _pick_time_chunk(S, B, target_rows=512):
    """Largest TC dividing S with TC*B ~<= target_rows.

    Blocks are (TC, B, feat) so the (8,128) rule is satisfied by the full (B, feat)
    minor dims regardless of TC; TC only controls DMA chunk size / step overhead.
    """
    max_tc = max(8, target_rows // max(B, 1))
    cands = [tc for tc in range(1, min(S, max_tc) + 1) if S % tc == 0]
    return max(cands) if cands else 1


def _const_spec(shape):
    """Constant-index-map operand: fetched once, single-buffered (review item)."""
    return pl.BlockSpec(shape, lambda c: (0,) * len(shape),
                        pipeline_mode=pl.Buffered(1))


# -----------------------------------------------------------------------------
# Pallas kernels
# -----------------------------------------------------------------------------
def bigru_chunk_kernel(xf_ref, xb_ref, h0_ref,
                       wihf_ref, wihb_ref, bihf_ref, bihb_ref,
                       whhf_ref, whhb_ref, bhhf_ref, bhhb_ref,
                       outf_ref, outb_ref, hT_ref,
                       h_scr, *, hp, tc):
    """One time-chunk (TC steps) of a bidirectional GRU.

    Layout (lane-padded, Hp = round_up(H, 128), G = 3*Hp with gate blocks [r|z|n]):
      xf_ref / xb_ref : (TC, B, E)  fwd chunk c / bwd chunk nC-1-c (natural order)
      outf_ref/outb_ref: (TC, B, Hp) per-chunk outputs (real time order)
      h_scr           : (B, 2*Hp) = [h_fwd | h_bwd] carry across grid steps
      per-direction dense weights: wih (E, G) bf16, whh (Hp, G) bf16, biases f32
    """
    c = pl.program_id(0)
    nc = pl.num_programs(0)
    bsz = h0_ref.shape[0]
    G = 3 * hp

    @pl.when(c == 0)
    def _():
        h_scr[...] = h0_ref[...]

    # Hoist constant weight loads and bias broadcasts out of the recurrence
    # (JAX does not CSE broadcast_in_dim inside the loop).
    wih_f = wihf_ref[...]
    wih_b = wihb_ref[...]
    whh_f = whhf_ref[...]
    whh_b = whhb_ref[...]
    bih_f = jnp.broadcast_to(bihf_ref[...], (bsz, G))
    bih_b = jnp.broadcast_to(bihb_ref[...], (bsz, G))
    bhh_f = jnp.broadcast_to(bhhf_ref[...], (bsz, G))
    bhh_b = jnp.broadcast_to(bhhb_ref[...], (bsz, G))

    def gates(gi, gh, h_prev):
        # PyTorch GRU: r,z from gi+gh; n-gate hidden bias stays under the r multiply.
        r = jax.nn.sigmoid(gi[:, 0:hp] + gh[:, 0:hp])
        z = jax.nn.sigmoid(gi[:, hp:2 * hp] + gh[:, hp:2 * hp])
        n = jnp.tanh(gi[:, 2 * hp:3 * hp] + r * gh[:, 2 * hp:3 * hp])
        return (1.0 - z) * n + z * h_prev

    def step(j, carry):
        h_f, h_b = carry
        # Input projection for this step: independent of the carry, so its MXU
        # pushes hide under the serial h @ W_hh chain's latency.
        gi_f = jnp.dot(xf_ref[j], wih_f,
                       preferred_element_type=jnp.float32) + bih_f
        gi_b = jnp.dot(xb_ref[tc - 1 - j], wih_b,
                       preferred_element_type=jnp.float32) + bih_b
        # Serial recurrence: one dense (B,Hp)@(Hp,3Hp) matmul per direction.
        gh_f = jnp.dot(h_f.astype(whh_f.dtype), whh_f,
                       preferred_element_type=jnp.float32) + bhh_f
        gh_b = jnp.dot(h_b.astype(whh_b.dtype), whh_b,
                       preferred_element_type=jnp.float32) + bhh_b
        h_f = gates(gi_f, gh_f, h_f)
        h_b = gates(gi_b, gh_b, h_b)
        # Per-step, lane-dense, leading-dim-indexed stores: bounded live ranges.
        outf_ref[j] = h_f.astype(outf_ref.dtype)
        outb_ref[tc - 1 - j] = h_b.astype(outb_ref.dtype)
        return h_f, h_b

    h_f, h_b = lax.fori_loop(0, tc, step,
                             (h_scr[:, 0:hp], h_scr[:, hp:2 * hp]),
                             unroll=min(tc, 8))

    h_scr[:, 0:hp] = h_f
    h_scr[:, hp:2 * hp] = h_b

    @pl.when(c == nc - 1)
    def _():
        hT_ref[:, 0:hp] = h_f
        hT_ref[:, hp:2 * hp] = h_b


def fc_logsoftmax_kernel(xf_ref, xb_ref, w_ref, b_ref, out_ref, xcat_scr):
    """logits = [x_fwd | x_bwd] @ W + b (single K=2Hp matmul); stable log-softmax."""
    hp = xf_ref.shape[1]
    xcat_scr[:, 0:hp] = xf_ref[...]
    xcat_scr[:, hp:2 * hp] = xb_ref[...]
    logits = (jnp.dot(xcat_scr[...], w_ref[...],
                      preferred_element_type=jnp.float32) + b_ref[...])
    m = jnp.max(logits, axis=-1, keepdims=True)
    s = logits - m
    out_ref[...] = s - jnp.log(jnp.sum(jnp.exp(s), axis=-1, keepdims=True))


# -----------------------------------------------------------------------------
# Wrappers
# -----------------------------------------------------------------------------
def bigru(x_sbe, h0, gp, S, B, E):
    """Bidirectional GRU over time-major input.

    x_sbe : (S, B, E) embedded inputs (MXU dtype)
    h0    : (B, 2*Hp) f32 initial hidden [h_fwd | h_bwd]
    returns (out_f (S,B,Hp), out_b (S,B,Hp), hT (B,2*Hp) f32), real time order.
    """
    Hp = gp['hp']
    G = 3 * Hp
    TC = _pick_time_chunk(S, B)
    nC = S // TC

    kernel = functools.partial(bigru_chunk_kernel, hp=Hp, tc=TC)
    out_f, out_b, hT = pl.pallas_call(
        kernel,
        out_shape=(jax.ShapeDtypeStruct((S, B, Hp), x_sbe.dtype),
                   jax.ShapeDtypeStruct((S, B, Hp), x_sbe.dtype),
                   jax.ShapeDtypeStruct((B, 2 * Hp), jnp.float32)),
        grid_spec=pltpu.PrefetchScalarGridSpec(
            num_scalar_prefetch=0,
            grid=(nC,),
            in_specs=[
                pl.BlockSpec((TC, B, E), lambda c: (c, 0, 0)),            # x fwd
                pl.BlockSpec((TC, B, E), lambda c: (nC - 1 - c, 0, 0)),   # x bwd
                _const_spec((B, 2 * Hp)),        # h0
                _const_spec((E, G)),             # W_ih fwd (bf16)
                _const_spec((E, G)),             # W_ih bwd (bf16)
                _const_spec((1, G)),             # b_ih fwd
                _const_spec((1, G)),             # b_ih bwd
                _const_spec((Hp, G)),            # W_hh fwd (dense, bf16)
                _const_spec((Hp, G)),            # W_hh bwd (dense, bf16)
                _const_spec((1, G)),             # b_hh fwd
                _const_spec((1, G)),             # b_hh bwd
            ],
            out_specs=(
                pl.BlockSpec((TC, B, Hp), lambda c: (c, 0, 0)),           # out fwd
                pl.BlockSpec((TC, B, Hp), lambda c: (nC - 1 - c, 0, 0)),  # out bwd
                pl.BlockSpec((B, 2 * Hp), lambda c: (0, 0)),              # hT
            ),
            scratch_shapes=[pltpu.VMEM((B, 2 * Hp), jnp.float32)]),       # h carry
        compiler_params=pltpu.CompilerParams(
            dimension_semantics=("arbitrary",),
            vmem_limit_bytes=_VMEM_LIMIT),
    )(x_sbe, x_sbe, h0,
      gp['wih_f'], gp['wih_b'], gp['bih_f'], gp['bih_b'],
      gp['whh_f'], gp['whh_b'], gp['bhh_f'], gp['bhh_b'])
    return out_f, out_b, hT


def run_fc_logsoftmax(xf, xb, w, b):
    """xf, xb: (N, Hp) fwd/bwd decoder features; returns (N, Vp) f32 log-probs."""
    N, Hp = xf.shape
    Vp = w.shape[1]
    TN = min(512, _round_up(N, 8))
    Np = _round_up(N, TN)
    if Np != N:
        pad = ((0, Np - N), (0, 0))
        xf = jnp.pad(xf, pad)
        xb = jnp.pad(xb, pad)
    out = pl.pallas_call(
        fc_logsoftmax_kernel,
        out_shape=jax.ShapeDtypeStruct((Np, Vp), jnp.float32),
        grid_spec=pltpu.PrefetchScalarGridSpec(
            num_scalar_prefetch=0,
            grid=(Np // TN,),
            in_specs=[pl.BlockSpec((TN, Hp), lambda i: (i, 0)),
                      pl.BlockSpec((TN, Hp), lambda i: (i, 0)),
                      _const_spec((2 * Hp, Vp)),    # stacked [W1; W2] (bf16)
                      _const_spec((1, Vp))],        # bias (+ -1e30 on pad cols)
            out_specs=pl.BlockSpec((TN, Vp), lambda i: (i, 0)),
            scratch_shapes=[pltpu.VMEM((TN, 2 * Hp), xf.dtype)]),
        compiler_params=pltpu.CompilerParams(
            dimension_semantics=("parallel",),
            vmem_limit_bytes=_VMEM_LIMIT),
    )(xf, xb, w, b)
    return out[:N]


# -----------------------------------------------------------------------------
# Parameter preparation (lane-padded, gate-blocked, per-direction dense layouts)
# -----------------------------------------------------------------------------
def _place_gates(w_t, H, Hp):
    """(in_dim, 3H) -> (in_dim, 3Hp): each gate block [r|z|n] placed at g*Hp."""
    in_dim = w_t.shape[0]
    out = jnp.zeros((in_dim, 3 * Hp), jnp.float32)
    for g in range(3):
        out = out.at[:, g * Hp: g * Hp + H].set(w_t[:, g * H:(g + 1) * H])
    return out


def _prepare_gru_dir(p, H, Hp):
    wih = _place_gates(p['w_ih'].T, H, Hp).astype(_MXU_DTYPE)             # (E, 3Hp)
    bih = _place_gates(p['b_ih'].reshape(1, -1), H, Hp)                   # (1, 3Hp)
    whh = jnp.zeros((Hp, 3 * Hp), jnp.float32)
    whh = whh.at[0:H, :].set(_place_gates(p['w_hh'].T, H, Hp)).astype(_MXU_DTYPE)
    bhh = _place_gates(p['b_hh'].reshape(1, -1), H, Hp)                   # (1, 3Hp)
    return wih, bih, whh, bhh


def _prepare_bigru_params(p_fwd, p_bwd, H, Hp):
    wih_f, bih_f, whh_f, bhh_f = _prepare_gru_dir(p_fwd, H, Hp)
    wih_b, bih_b, whh_b, bhh_b = _prepare_gru_dir(p_bwd, H, Hp)
    return {'hp': Hp,
            'wih_f': wih_f, 'wih_b': wih_b, 'bih_f': bih_f, 'bih_b': bih_b,
            'whh_f': whh_f, 'whh_b': whh_b, 'bhh_f': bhh_f, 'bhh_b': bhh_b}


def _prepare_fc_params(fc_w, fc_b, H, Hp, V, Vp):
    w = jnp.zeros((2 * Hp, Vp), jnp.float32)
    w = w.at[0:H, 0:V].set(fc_w[:, 0:H].T)            # fwd-feature rows
    w = w.at[Hp:Hp + H, 0:V].set(fc_w[:, H:2 * H].T)  # bwd-feature rows
    b = jnp.full((1, Vp), _NEG, jnp.float32).at[0, 0:V].set(fc_b)
    return w.astype(_MXU_DTYPE), b


def build_model(raw, src_vocab, tgt_vocab, embd_dims, hidden_size):
    H = hidden_size
    Hp = _round_up(H, _LANE)
    V = tgt_vocab
    Vp = _round_up(V, _LANE)
    fc_w, fc_b = _prepare_fc_params(raw['fc_w'], raw['fc_b'], H, Hp, V, Vp)
    return {
        'H': H, 'Hp': Hp, 'V': V, 'Vp': Vp, 'E': embd_dims,
        'enc_emb': raw['encoder_emb'].astype(_MXU_DTYPE),
        'dec_emb': raw['decoder_emb'].astype(_MXU_DTYPE),
        'enc': _prepare_bigru_params(raw['enc_fwd'], raw['enc_bwd'], H, Hp),
        'dec': _prepare_bigru_params(raw['dec_fwd'], raw['dec_bwd'], H, Hp),
        'fc_w': fc_w, 'fc_b': fc_b,
    }


# -----------------------------------------------------------------------------
# Forward pass (mirrors RNNEncoderDecoderLM.forward)
# -----------------------------------------------------------------------------
def rnn_encoder_decoder_forward(model, inputs, decoder_inputs,
                                decoder_hidden_state=None):
    """inputs, decoder_inputs: (B, S) int32 tokens.

    Returns (log_probs (B, S_tgt, V_tgt), decoder_hidden_state (2, B, H)).
    """
    H, Hp, V, E = model['H'], model['Hp'], model['V'], model['E']
    B = inputs.shape[0]

    if decoder_hidden_state is None:
        S_src = inputs.shape[1]
        # Gather on transposed int32 token ids: embedded activations come out
        # time-major (S, B, E) with no activation transpose.
        enc_x = model['enc_emb'][inputs.T]                       # (S_src, B, E)
        h0 = jnp.zeros((B, 2 * Hp), jnp.float32)
        _, _, enc_hT = bigru(enc_x, h0, model['enc'], S_src, B, E)
        dec_h0 = enc_hT
    else:
        dec_h0 = jnp.zeros((B, 2 * Hp), jnp.float32)
        dec_h0 = dec_h0.at[:, 0:H].set(decoder_hidden_state[0])
        dec_h0 = dec_h0.at[:, Hp:Hp + H].set(decoder_hidden_state[1])

    S_tgt = decoder_inputs.shape[1]
    dec_x = model['dec_emb'][decoder_inputs.T]                   # (S_tgt, B, E)
    out_f, out_b, dec_hT = bigru(dec_x, dec_h0, model['dec'], S_tgt, B, E)

    xf = out_f.reshape(S_tgt * B, Hp)     # leading-dim merge: metadata only
    xb = out_b.reshape(S_tgt * B, Hp)
    logp_p = run_fc_logsoftmax(xf, xb, model['fc_w'], model['fc_b'])
    logp = logp_p[:, 0:V].reshape(S_tgt, B, V).transpose(1, 0, 2)  # (B, S_tgt, V)
    dec_hidden = jnp.stack([dec_hT[:, 0:H], dec_hT[:, Hp:Hp + H]], axis=0)
    return logp, dec_hidden


# -----------------------------------------------------------------------------
# Deterministic parameter init (PyTorch-style uniform bounds)
# -----------------------------------------------------------------------------
def init_params(key, src_vocab, tgt_vocab, embd_dims, hidden_size):
    E, H = embd_dims, hidden_size
    ks = jax.random.split(key, 24)
    kb = 1.0 / np.sqrt(H)

    def u(k, shape, bound):
        return jax.random.uniform(k, shape, jnp.float32, -bound, bound)

    params = {
        'encoder_emb': jax.random.normal(ks[0], (src_vocab, E), jnp.float32),
        'decoder_emb': jax.random.normal(ks[1], (tgt_vocab, E), jnp.float32),
    }
    idx = 2
    for name in ['enc_fwd', 'enc_bwd', 'dec_fwd', 'dec_bwd']:
        params[name] = {
            'w_ih': u(ks[idx + 0], (3 * H, E), kb),
            'w_hh': u(ks[idx + 1], (3 * H, H), kb),
            'b_ih': u(ks[idx + 2], (3 * H,), kb),
            'b_hh': u(ks[idx + 3], (3 * H,), kb),
        }
        idx += 4
    kfc = 1.0 / np.sqrt(2 * H)
    params['fc_w'] = u(ks[idx + 0], (tgt_vocab, 2 * H), kfc)
    params['fc_b'] = u(ks[idx + 1], (tgt_vocab,), kfc)
    return params


# -----------------------------------------------------------------------------
# Pure-JAX f32 reference (sanity check for the Pallas kernels)
# -----------------------------------------------------------------------------
def _gru_dir_ref(x_tm, h0, p):
    H = h0.shape[-1]

    def step(h, x_t):
        gi = x_t @ p['w_ih'].T + p['b_ih']
        gh = h @ p['w_hh'].T + p['b_hh']
        r = jax.nn.sigmoid(gi[:, :H] + gh[:, :H])
        z = jax.nn.sigmoid(gi[:, H:2 * H] + gh[:, H:2 * H])
        n = jnp.tanh(gi[:, 2 * H:] + r * gh[:, 2 * H:])
        h_new = (1.0 - z) * n + z * h
        return h_new, h_new

    hT, outs = lax.scan(step, h0, x_tm)
    return outs, hT


def _forward_ref(params, inputs, decoder_inputs):
    B = inputs.shape[0]
    H = params['enc_fwd']['w_hh'].shape[1]
    h0 = jnp.zeros((B, H), jnp.float32)

    def bigru_ref(x_bse, h0f, h0b, pf, pb):
        x_tm = jnp.transpose(x_bse, (1, 0, 2))
        of, hf = _gru_dir_ref(x_tm, h0f, pf)
        ob_r, hb = _gru_dir_ref(x_tm[::-1], h0b, pb)
        out = jnp.concatenate([of, ob_r[::-1]], axis=-1)
        return jnp.transpose(out, (1, 0, 2)), jnp.stack([hf, hb], axis=0)

    _, enc_h = bigru_ref(params['encoder_emb'][inputs], h0, h0,
                         params['enc_fwd'], params['enc_bwd'])
    dec_out, dec_h = bigru_ref(params['decoder_emb'][decoder_inputs],
                               enc_h[0], enc_h[1],
                               params['dec_fwd'], params['dec_bwd'])
    logits = dec_out @ params['fc_w'].T + params['fc_b']
    logp = jax.nn.log_softmax(logits, axis=-1)
    return logp, dec_h


# -----------------------------------------------------------------------------
if __name__ == "__main__":
    SRC_VOCAB, TGT_VOCAB = 16, 16
    EMBD, HIDDEN = 32, 32
    B, S_SRC, S_TGT = 2, 8, 8

    key = jax.random.PRNGKey(0)
    k_param, k_src, k_tgt = jax.random.split(key, 3)
    raw = init_params(k_param, SRC_VOCAB, TGT_VOCAB, EMBD, HIDDEN)
    model = build_model(raw, SRC_VOCAB, TGT_VOCAB, EMBD, HIDDEN)

    inputs = jax.random.randint(k_src, (B, S_SRC), 0, SRC_VOCAB, jnp.int32)
    decoder_inputs = jax.random.randint(k_tgt, (B, S_TGT), 0, TGT_VOCAB, jnp.int32)

    fwd = jax.jit(lambda a, b: rnn_encoder_decoder_forward(model, a, b))
    log_probs, dec_hidden = fwd(inputs, decoder_inputs)
    log_probs = jax.block_until_ready(log_probs)
    dec_hidden = jax.block_until_ready(dec_hidden)

    assert log_probs.shape == (B, S_TGT, TGT_VOCAB)
    assert dec_hidden.shape == (2, B, HIDDEN)

    # Sanity check against a pure-JAX f32 reference; tolerance is sized for bf16
    # MXU operands with f32 accumulation.
    ref_logp, ref_h = _forward_ref(raw, inputs, decoder_inputs)
    np.testing.assert_allclose(np.asarray(log_probs), np.asarray(ref_logp),
                               atol=3e-2, rtol=3e-2)
    np.testing.assert_allclose(np.asarray(dec_hidden), np.asarray(ref_h),
                               atol=3e-2, rtol=3e-2)

    print("KERNEL_OK")
</pallas_src>

<mosaic_0001>
module attributes {stable_mosaic.version = 11 : i64} {
  func.func @fc_logsoftmax_kernel(%arg0: i32, %arg1: memref<16x128xbf16, #tpu.memory_space<vmem>>, %arg2: memref<16x128xbf16, #tpu.memory_space<vmem>>, %arg3: memref<256x128xbf16, #tpu.memory_space<vmem>>, %arg4: memref<1x128xf32, #tpu.memory_space<vmem>>, %arg5: memref<16x128xf32, #tpu.memory_space<vmem>>, %arg6: memref<16x256xbf16, #tpu.memory_space<vmem>>) attributes {dimension_semantics = [#tpu.dimension_semantics<parallel>], iteration_bounds = array<i64: 1>, scalar_prefetch = 0 : i64, scratch_operands = 1 : i64, tpu.core_type = #tpu.core_type<tc>, window_params = [{transform_indices = @transform_0, window_bounds = array<i64: 16, 128>}, {transform_indices = @transform_1, window_bounds = array<i64: 16, 128>}, {pipeline_mode = #tpu.pipeline_mode<synchronous>, transform_indices = @transform_2, window_bounds = array<i64: 256, 128>}, {pipeline_mode = #tpu.pipeline_mode<synchronous>, transform_indices = @transform_3, window_bounds = array<i64: 1, 128>}, {transform_indices = @transform_4, window_bounds = array<i64: 16, 128>}]} {
    %c0 = arith.constant 0 : index
    %c0_0 = arith.constant 0 : index
    %0 = vector.load %arg1[%c0, %c0_0] : memref<16x128xbf16, #tpu.memory_space<vmem>>, vector<16x128xbf16>
    %c0_1 = arith.constant 0 : index
    %c0_2 = arith.constant 0 : index
    %1 = vector.load %arg6[%c0_1, %c0_2] : memref<16x256xbf16, #tpu.memory_space<vmem>>, vector<16x128xbf16>
    tpu.vector_store %arg6[%c0_1, %c0_2], %0 {strides = array<i32>} : memref<16x256xbf16, #tpu.memory_space<vmem>>, vector<16x128xbf16>,
    %c0_3 = arith.constant 0 : index
    %c0_4 = arith.constant 0 : index
    %2 = vector.load %arg2[%c0_3, %c0_4] : memref<16x128xbf16, #tpu.memory_space<vmem>>, vector<16x128xbf16>
    %c0_5 = arith.constant 0 : index
    %c128 = arith.constant 128 : index
    %3 = vector.load %arg6[%c0_5, %c128] : memref<16x256xbf16, #tpu.memory_space<vmem>>, vector<16x128xbf16>
    tpu.vector_store %arg6[%c0_5, %c128], %2 {strides = array<i32>} : memref<16x256xbf16, #tpu.memory_space<vmem>>, vector<16x128xbf16>,
    %c0_6 = arith.constant 0 : index
    %c0_7 = arith.constant 0 : index
    %4 = vector.load %arg6[%c0_6, %c0_7] : memref<16x256xbf16, #tpu.memory_space<vmem>>, vector<16x256xbf16>
    %c0_8 = arith.constant 0 : index
    %c0_9 = arith.constant 0 : index
    %5 = vector.load %arg3[%c0_8, %c0_9] : memref<256x128xbf16, #tpu.memory_space<vmem>>, vector<256x128xbf16>
    %cst = arith.constant dense<0.000000e+00> : vector<16x128xf32>
    %6 = tpu.matmul %4, %5, %cst {dimension_numbers = #tpu.dot_dimension_numbers<[1], [0], [0], [1], [0, 0, 1, 1], [], []>} : vector<16x256xbf16>, vector<256x128xbf16>, vector<16x128xf32> -> vector<16x128xf32>
    %c0_10 = arith.constant 0 : index
    %c0_11 = arith.constant 0 : index
    %7 = vector.load %arg4[%c0_10, %c0_11] : memref<1x128xf32, #tpu.memory_space<vmem>>, vector<1x128xf32>
    %8 = vector.broadcast %7 : vector<1x128xf32> to vector<16x128xf32>
    %9 = arith.addf %6, %8 : vector<16x128xf32>
    %cst_12 = arith.constant dense<0xFF800000> : vector<16xf32>
    %10 = vector.multi_reduction <maximumf>, %9, %cst_12 [1] : vector<16x128xf32> to vector<16xf32>
    %11 = vector.shape_cast %10 : vector<16xf32> to vector<16x1xf32>
    %12 = vector.broadcast %11 : vector<16x1xf32> to vector<16x128xf32>
    %13 = arith.subf %9, %12 : vector<16x128xf32>
    %14 = math.exp %13 : vector<16x128xf32>
    %cst_13 = arith.constant dense<0.000000e+00> : vector<16xf32>
    %15 = vector.multi_reduction <add>, %14, %cst_13 [1] : vector<16x128xf32> to vector<16xf32>
    %16 = vector.shape_cast %15 : vector<16xf32> to vector<16x1xf32>
    %17 = math.log %16 : vector<16x1xf32>
    %18 = vector.broadcast %17 : vector<16x1xf32> to vector<16x128xf32>
    %19 = arith.subf %13, %18 : vector<16x128xf32>
    %c0_14 = arith.constant 0 : index
    %c0_15 = arith.constant 0 : index
    %20 = vector.load %arg5[%c0_14, %c0_15] : memref<16x128xf32, #tpu.memory_space<vmem>>, vector<16x128xf32>
    tpu.vector_store %arg5[%c0_14, %c0_15], %19 {strides = array<i32>} : memref<16x128xf32, #tpu.memory_space<vmem>>, vector<16x128xf32>,
    return
  }
  func.func @transform_0(%arg0: i32) -> (i32, i32) {
    %c0_i32 = arith.constant 0 : i32
    %c0_i32_0 = arith.constant 0 : i32
    return %arg0, %c0_i32 : i32, i32
  }
  func.func @transform_1(%arg0: i32) -> (i32, i32) {
    %c0_i32 = arith.constant 0 : i32
    %c0_i32_0 = arith.constant 0 : i32
    return %arg0, %c0_i32 : i32, i32
  }
  func.func @transform_2(%arg0: i32) -> (i32, i32) {
    %c0_i32 = arith.constant 0 : i32
    %c0_i32_0 = arith.constant 0 : i32
    %c0_i32_1 = arith.constant 0 : i32
    return %c0_i32, %c0_i32_0 : i32, i32
  }
  func.func @transform_3(%arg0: i32) -> (i32, i32) {
    %c0_i32 = arith.constant 0 : i32
    %c0_i32_0 = arith.constant 0 : i32
    %c0_i32_1 = arith.constant 0 : i32
    return %c0_i32, %c0_i32_0 : i32, i32
  }
  func.func @transform_4(%arg0: i32) -> (i32, i32) {
    %c0_i32 = arith.constant 0 : i32
    %c0_i32_0 = arith.constant 0 : i32
    return %arg0, %c0_i32 : i32, i32
  }
}

module attributes {stable_mosaic.version = 11 : i64} {
  func.func @bigru_chunk_kernel(%arg0: i32, %arg1: memref<8x2x32xbf16, #tpu.memory_space<vmem>>, %arg2: memref<8x2x32xbf16, #tpu.memory_space<vmem>>, %arg3: memref<2x256xf32, #tpu.memory_space<vmem>>, %arg4: memref<32x384xbf16, #tpu.memory_space<vmem>>, %arg5: memref<32x384xbf16, #tpu.memory_space<vmem>>, %arg6: memref<1x384xf32, #tpu.memory_space<vmem>>, %arg7: memref<1x384xf32, #tpu.memory_space<vmem>>, %arg8: memref<128x384xbf16, #tpu.memory_space<vmem>>, %arg9: memref<128x384xbf16, #tpu.memory_space<vmem>>, %arg10: memref<1x384xf32, #tpu.memory_space<vmem>>, %arg11: memref<1x384xf32, #tpu.memory_space<vmem>>, %arg12: memref<8x2x128xbf16, #tpu.memory_space<vmem>>, %arg13: memref<8x2x128xbf16, #tpu.memory_space<vmem>>, %arg14: memref<2x256xf32, #tpu.memory_space<vmem>>, %arg15: memref<2x256xf32, #tpu.memory_space<vmem>>) attributes {dimension_semantics = [#tpu.dimension_semantics<arbitrary>], iteration_bounds = array<i64: 1>, scalar_prefetch = 0 : i64, scratch_operands = 1 : i64, tpu.core_type = #tpu.core_type<tc>, window_params = [{transform_indices = @transform_0, window_bounds = array<i64: 8, 2, 32>}, {transform_indices = @transform_1, window_bounds = array<i64: 8, 2, 32>}, {pipeline_mode = #tpu.pipeline_mode<synchronous>, transform_indices = @transform_2, window_bounds = array<i64: 2, 256>}, {pipeline_mode = #tpu.pipeline_mode<synchronous>, transform_indices = @transform_3, window_bounds = array<i64: 32, 384>}, {pipeline_mode = #tpu.pipeline_mode<synchronous>, transform_indices = @transform_4, window_bounds = array<i64: 32, 384>}, {pipeline_mode = #tpu.pipeline_mode<synchronous>, transform_indices = @transform_5, window_bounds = array<i64: 1, 384>}, {pipeline_mode = #tpu.pipeline_mode<synchronous>, transform_indices = @transform_6, window_bounds = array<i64: 1, 384>}, {pipeline_mode = #tpu.pipeline_mode<synchronous>, transform_indices = @transform_7, window_bounds = array<i64: 128, 384>}, {pipeline_mode = #tpu.pipeline_mode<synchronous>, transform_indices = @transform_8, window_bounds = array<i64: 128, 384>}, {pipeline_mode = #tpu.pipeline_mode<synchronous>, transform_indices = @transform_9, window_bounds = array<i64: 1, 384>}, {pipeline_mode = #tpu.pipeline_mode<synchronous>, transform_indices = @transform_10, window_bounds = array<i64: 1, 384>}, {transform_indices = @transform_11, window_bounds = array<i64: 8, 2, 128>}, {transform_indices = @transform_12, window_bounds = array<i64: 8, 2, 128>}, {pipeline_mode = #tpu.pipeline_mode<synchronous>, transform_indices = @transform_13, window_bounds = array<i64: 2, 256>}]} {
    %c0_i32 = arith.constant 0 : i32
    %0 = arith.cmpi eq, %arg0, %c0_i32 : i32
    %1 = arith.extui %0 : i1 to i32
    %c0_i32_0 = arith.constant 0 : i32
    %2 = arith.cmpi ne, %1, %c0_i32_0 : i32
    scf.if %2 {
      %c0_185 = arith.constant 0 : index
      %c0_186 = arith.constant 0 : index
      %666 = vector.load %arg3[%c0_185, %c0_186] : memref<2x256xf32, #tpu.memory_space<vmem>>, vector<2x256xf32>
      %c0_187 = arith.constant 0 : index
      %c0_188 = arith.constant 0 : index
      %667 = vector.load %arg15[%c0_187, %c0_188] : memref<2x256xf32, #tpu.memory_space<vmem>>, vector<2x256xf32>
      tpu.vector_store %arg15[%c0_187, %c0_188], %666 {strides = array<i32>} : memref<2x256xf32, #tpu.memory_space<vmem>>, vector<2x256xf32>,
    } else {
    }
    %c0 = arith.constant 0 : index
    %c0_1 = arith.constant 0 : index
    %3 = vector.load %arg4[%c0, %c0_1] : memref<32x384xbf16, #tpu.memory_space<vmem>>, vector<32x384xbf16>
    %c0_2 = arith.constant 0 : index
    %c0_3 = arith.constant 0 : index
    %4 = vector.load %arg5[%c0_2, %c0_3] : memref<32x384xbf16, #tpu.memory_space<vmem>>, vector<32x384xbf16>
    %c0_4 = arith.constant 0 : index
    %c0_5 = arith.constant 0 : index
    %5 = vector.load %arg8[%c0_4, %c0_5] : memref<128x384xbf16, #tpu.memory_space<vmem>>, vector<128x384xbf16>
    %c0_6 = arith.constant 0 : index
    %c0_7 = arith.constant 0 : index
    %6 = vector.load %arg9[%c0_6, %c0_7] : memref<128x384xbf16, #tpu.memory_space<vmem>>, vector<128x384xbf16>
    %c0_8 = arith.constant 0 : index
    %c0_9 = arith.constant 0 : index
    %7 = vector.load %arg6[%c0_8, %c0_9] : memref<1x384xf32, #tpu.memory_space<vmem>>, vector<1x384xf32>
    %8 = vector.shape_cast %7 : vector<1x384xf32> to vector<1x384xf32>
    %9 = vector.broadcast %8 : vector<1x384xf32> to vector<2x384xf32>
    %c0_10 = arith.constant 0 : index
    %c0_11 = arith.constant 0 : index
    %10 = vector.load %arg7[%c0_10, %c0_11] : memref<1x384xf32, #tpu.memory_space<vmem>>, vector<1x384xf32>
    %11 = vector.shape_cast %10 : vector<1x384xf32> to vector<1x384xf32>
    %12 = vector.broadcast %11 : vector<1x384xf32> to vector<2x384xf32>
    %c0_12 = arith.constant 0 : index
    %c0_13 = arith.constant 0 : index
    %13 = vector.load %arg10[%c0_12, %c0_13] : memref<1x384xf32, #tpu.memory_space<vmem>>, vector<1x384xf32>
    %14 = vector.shape_cast %13 : vector<1x384xf32> to vector<1x384xf32>
    %15 = vector.broadcast %14 : vector<1x384xf32> to vector<2x384xf32>
    %c0_14 = arith.constant 0 : index
    %c0_15 = arith.constant 0 : index
    %16 = vector.load %arg11[%c0_14, %c0_15] : memref<1x384xf32, #tpu.memory_space<vmem>>, vector<1x384xf32>
    %17 = vector.shape_cast %16 : vector<1x384xf32> to vector<1x384xf32>
    %18 = vector.broadcast %17 : vector<1x384xf32> to vector<2x384xf32>
    %c0_16 = arith.constant 0 : index
    %c0_17 = arith.constant 0 : index
    %19 = vector.load %arg15[%c0_16, %c0_17] : memref<2x256xf32, #tpu.memory_space<vmem>>, vector<2x128xf32>
    %c0_18 = arith.constant 0 : index
    %c128 = arith.constant 128 : index
    %20 = vector.load %arg15[%c0_18, %c128] : memref<2x256xf32, #tpu.memory_space<vmem>>, vector<2x128xf32>
    %c0_i32_19 = arith.constant 0 : i32
    %21 = arith.index_cast %c0_i32_19 : i32 to index
    %c0_20 = arith.constant 0 : index
    %c0_21 = arith.constant 0 : index
    %22 = vector.load %arg1[%21, %c0_20, %c0_21] : memref<8x2x32xbf16, #tpu.memory_space<vmem>>, vector<1x2x32xbf16>
    %23 = vector.shape_cast %22 : vector<1x2x32xbf16> to vector<2x32xbf16>
    %cst = arith.constant dense<0.000000e+00> : vector<2x384xf32>
    %24 = tpu.matmul %23, %3, %cst {dimension_numbers = #tpu.dot_dimension_numbers<[1], [0], [0], [1], [0, 0, 1, 1], [], []>} : vector<2x32xbf16>, vector<32x384xbf16>, vector<2x384xf32> -> vector<2x384xf32>
    %25 = arith.addf %24, %9 : vector<2x384xf32>
    %c7_i32 = arith.constant 7 : i32
    %26 = arith.subi %c7_i32, %c0_i32_19 : i32
    %27 = arith.index_cast %26 : i32 to index
    %c0_22 = arith.constant 0 : index
    %c0_23 = arith.constant 0 : index
    %28 = vector.load %arg2[%27, %c0_22, %c0_23] : memref<8x2x32xbf16, #tpu.memory_space<vmem>>, vector<1x2x32xbf16>
    %29 = vector.shape_cast %28 : vector<1x2x32xbf16> to vector<2x32xbf16>
    %cst_24 = arith.constant dense<0.000000e+00> : vector<2x384xf32>
    %30 = tpu.matmul %29, %4, %cst_24 {dimension_numbers = #tpu.dot_dimension_numbers<[1], [0], [0], [1], [0, 0, 1, 1], [], []>} : vector<2x32xbf16>, vector<32x384xbf16>, vector<2x384xf32> -> vector<2x384xf32>
    %31 = arith.addf %30, %12 : vector<2x384xf32>
    %32 = arith.truncf %19 : vector<2x128xf32> to vector<2x128xbf16>
    %cst_25 = arith.constant dense<0.000000e+00> : vector<2x384xf32>
    %33 = tpu.matmul %32, %5, %cst_25 {dimension_numbers = #tpu.dot_dimension_numbers<[1], [0], [0], [1], [0, 0, 1, 1], [], []>} : vector<2x128xbf16>, vector<128x384xbf16>, vector<2x384xf32> -> vector<2x384xf32>
    %34 = arith.addf %33, %15 : vector<2x384xf32>
    %35 = arith.truncf %20 : vector<2x128xf32> to vector<2x128xbf16>
    %cst_26 = arith.constant dense<0.000000e+00> : vector<2x384xf32>
    %36 = tpu.matmul %35, %6, %cst_26 {dimension_numbers = #tpu.dot_dimension_numbers<[1], [0], [0], [1], [0, 0, 1, 1], [], []>} : vector<2x128xbf16>, vector<128x384xbf16>, vector<2x384xf32> -> vector<2x384xf32>
    %37 = arith.addf %36, %18 : vector<2x384xf32>
    %38 = vector.extract_strided_slice %25 {offsets = [0, 0], sizes = [2, 128], strides = [1, 1]} : vector<2x384xf32> to vector<2x128xf32>
    %39 = vector.extract_strided_slice %34 {offsets = [0, 0], sizes = [2, 128], strides = [1, 1]} : vector<2x384xf32> to vector<2x128xf32>
    %40 = arith.addf %38, %39 : vector<2x128xf32>
    %41 = arith.negf %40 : vector<2x128xf32>
    %42 = math.exp %41 : vector<2x128xf32>
    %cst_27 = arith.constant 1.000000e+00 : f32
    %43 = vector.broadcast %cst_27 : f32 to vector<2x128xf32>
    %44 = arith.addf %43, %42 : vector<2x128xf32>
    %45 = arith.divf %43, %44 : vector<2x128xf32>
    %46 = vector.extract_strided_slice %25 {offsets = [0, 128], sizes = [2, 128], strides = [1, 1]} : vector<2x384xf32> to vector<2x128xf32>
    %47 = vector.extract_strided_slice %34 {offsets = [0, 128], sizes = [2, 128], strides = [1, 1]} : vector<2x384xf32> to vector<2x128xf32>
    %48 = arith.addf %46, %47 : vector<2x128xf32>
    %49 = arith.negf %48 : vector<2x128xf32>
    %50 = math.exp %49 : vector<2x128xf32>
    %cst_28 = arith.constant 1.000000e+00 : f32
    %51 = vector.broadcast %cst_28 : f32 to vector<2x128xf32>
    %52 = arith.addf %51, %50 : vector<2x128xf32>
    %53 = arith.divf %51, %52 : vector<2x128xf32>
    %54 = vector.extract_strided_slice %25 {offsets = [0, 256], sizes = [2, 128], strides = [1, 1]} : vector<2x384xf32> to vector<2x128xf32>
    %55 = vector.extract_strided_slice %34 {offsets = [0, 256], sizes = [2, 128], strides = [1, 1]} : vector<2x384xf32> to vector<2x128xf32>
    %56 = arith.mulf %45, %55 : vector<2x128xf32>
    %57 = arith.addf %54, %56 : vector<2x128xf32>
    %58 = math.tanh %57 : vector<2x128xf32>
    %cst_29 = arith.constant 1.000000e+00 : f32
    %59 = vector.broadcast %cst_29 : f32 to vector<2x128xf32>
    %60 = arith.subf %59, %53 : vector<2x128xf32>
    %61 = arith.mulf %60, %58 : vector<2x128xf32>
    %62 = arith.mulf %53, %19 : vector<2x128xf32>
    %63 = arith.addf %61, %62 : vector<2x128xf32>
    %64 = vector.extract_strided_slice %31 {offsets = [0, 0], sizes = [2, 128], strides = [1, 1]} : vector<2x384xf32> to vector<2x128xf32>
    %65 = vector.extract_strided_slice %37 {offsets = [0, 0], sizes = [2, 128], strides = [1, 1]} : vector<2x384xf32> to vector<2x128xf32>
    %66 = arith.addf %64, %65 : vector<2x128xf32>
    %67 = arith.negf %66 : vector<2x128xf32>
    %68 = math.exp %67 : vector<2x128xf32>
    %cst_30 = arith.constant 1.000000e+00 : f32
    %69 = vector.broadcast %cst_30 : f32 to vector<2x128xf32>
    %70 = arith.addf %69, %68 : vector<2x128xf32>
    %71 = arith.divf %69, %70 : vector<2x128xf32>
    %72 = vector.extract_strided_slice %31 {offsets = [0, 128], sizes = [2, 128], strides = [1, 1]} : vector<2x384xf32> to vector<2x128xf32>
    %73 = vector.extract_strided_slice %37 {offsets = [0, 128], sizes = [2, 128], strides = [1, 1]} : vector<2x384xf32> to vector<2x128xf32>
    %74 = arith.addf %72, %73 : vector<2x128xf32>
    %75 = arith.negf %74 : vector<2x128xf32>
    %76 = math.exp %75 : vector<2x128xf32>
    %cst_31 = arith.constant 1.000000e+00 : f32
    %77 = vector.broadcast %cst_31 : f32 to vector<2x128xf32>
    %78 = arith.addf %77, %76 : vector<2x128xf32>
    %79 = arith.divf %77, %78 : vector<2x128xf32>
    %80 = vector.extract_strided_slice %31 {offsets = [0, 256], sizes = [2, 128], strides = [1, 1]} : vector<2x384xf32> to vector<2x128xf32>
    %81 = vector.extract_strided_slice %37 {offsets = [0, 256], sizes = [2, 128], strides = [1, 1]} : vector<2x384xf32> to vector<2x128xf32>
    %82 = arith.mulf %71, %81 : vector<2x128xf32>
    %83 = arith.addf %80, %82 : vector<2x128xf32>
    %84 = math.tanh %83 : vector<2x128xf32>
    %cst_32 = arith.constant 1.000000e+00 : f32
    %85 = vector.broadcast %cst_32 : f32 to vector<2x128xf32>
    %86 = arith.subf %85, %79 : vector<2x128xf32>
    %87 = arith.mulf %86, %84 : vector<2x128xf32>
    %88 = arith.mulf %79, %20 : vector<2x128xf32>
    %89 = arith.addf %87, %88 : vector<2x128xf32>
    %90 = arith.truncf %63 : vector<2x128xf32> to vector<2x128xbf16>
    %91 = arith.index_cast %c0_i32_19 : i32 to index
    %c0_33 = arith.constant 0 : index
    %c0_34 = arith.constant 0 : index
    %92 = vector.load %arg12[%91, %c0_33, %c0_34] : memref<8x2x128xbf16, #tpu.memory_space<vmem>>, vector<1x2x128xbf16>
    %93 = vector.shape_cast %92 : vector<1x2x128xbf16> to vector<2x128xbf16>
    %94 = vector.shape_cast %90 : vector<2x128xbf16> to vector<1x2x128xbf16>
    tpu.vector_store %arg12[%91, %c0_33, %c0_34], %94 {strides = array<i32>} : memref<8x2x128xbf16, #tpu.memory_space<vmem>>, vector<1x2x128xbf16>,
    %95 = arith.truncf %89 : vector<2x128xf32> to vector<2x128xbf16>
    %c7_i32_35 = arith.constant 7 : i32
    %96 = arith.subi %c7_i32_35, %c0_i32_19 : i32
    %97 = arith.index_cast %96 : i32 to index
    %c0_36 = arith.constant 0 : index
    %c0_37 = arith.constant 0 : index
    %98 = vector.load %arg13[%97, %c0_36, %c0_37] : memref<8x2x128xbf16, #tpu.memory_space<vmem>>, vector<1x2x128xbf16>
    %99 = vector.shape_cast %98 : vector<1x2x128xbf16> to vector<2x128xbf16>
    %100 = vector.shape_cast %95 : vector<2x128xbf16> to vector<1x2x128xbf16>
    tpu.vector_store %arg13[%97, %c0_36, %c0_37], %100 {strides = array<i32>} : memref<8x2x128xbf16, #tpu.memory_space<vmem>>, vector<1x2x128xbf16>,
    %c1_i32 = arith.constant 1 : i32
    %101 = arith.index_cast %c1_i32 : i32 to index
    %c0_38 = arith.constant 0 : index
    %c0_39 = arith.constant 0 : index
    %102 = vector.load %arg1[%101, %c0_38, %c0_39] : memref<8x2x32xbf16, #tpu.memory_space<vmem>>, vector<1x2x32xbf16>
    %103 = vector.shape_cast %102 : vector<1x2x32xbf16> to vector<2x32xbf16>
    %cst_40 = arith.constant dense<0.000000e+00> : vector<2x384xf32>
    %104 = tpu.matmul %103, %3, %cst_40 {dimension_numbers = #tpu.dot_dimension_numbers<[1], [0], [0], [1], [0, 0, 1, 1], [], []>} : vector<2x32xbf16>, vector<32x384xbf16>, vector<2x384xf32> -> vector<2x384xf32>
    %105 = arith.addf %104, %9 : vector<2x384xf32>
    %c7_i32_41 = arith.constant 7 : i32
    %106 = arith.subi %c7_i32_41, %c1_i32 : i32
    %107 = arith.index_cast %106 : i32 to index
    %c0_42 = arith.constant 0 : index
    %c0_43 = arith.constant 0 : index
    %108 = vector.load %arg2[%107, %c0_42, %c0_43] : memref<8x2x32xbf16, #tpu.memory_space<vmem>>, vector<1x2x32xbf16>
    %109 = vector.shape_cast %108 : vector<1x2x32xbf16> to vector<2x32xbf16>
    %cst_44 = arith.constant dense<0.000000e+00> : vector<2x384xf32>
    %110 = tpu.matmul %109, %4, %cst_44 {dimension_numbers = #tpu.dot_dimension_numbers<[1], [0], [0], [1], [0, 0, 1, 1], [], []>} : vector<2x32xbf16>, vector<32x384xbf16>, vector<2x384xf32> -> vector<2x384xf32>
    %111 = arith.addf %110, %12 : vector<2x384xf32>
    %112 = arith.truncf %63 : vector<2x128xf32> to vector<2x128xbf16>
    %cst_45 = arith.constant dense<0.000000e+00> : vector<2x384xf32>
    %113 = tpu.matmul %112, %5, %cst_45 {dimension_numbers = #tpu.dot_dimension_numbers<[1], [0], [0], [1], [0, 0, 1, 1], [], []>} : vector<2x128xbf16>, vector<128x384xbf16>, vector<2x384xf32> -> vector<2x384xf32>
    %114 = arith.addf %113, %15 : vector<2x384xf32>
    %115 = arith.truncf %89 : vector<2x128xf32> to vector<2x128xbf16>
    %cst_46 = arith.constant dense<0.000000e+00> : vector<2x384xf32>
    %116 = tpu.matmul %115, %6, %cst_46 {dimension_numbers = #tpu.dot_dimension_numbers<[1], [0], [0], [1], [0, 0, 1, 1], [], []>} : vector<2x128xbf16>, vector<128x384xbf16>, vector<2x384xf32> -> vector<2x384xf32>
    %117 = arith.addf %116, %18 : vector<2x384xf32>
    %118 = vector.extract_strided_slice %105 {offsets = [0, 0], sizes = [2, 128], strides = [1, 1]} : vector<2x384xf32> to vector<2x128xf32>
    %119 = vector.extract_strided_slice %114 {offsets = [0, 0], sizes = [2, 128], strides = [1, 1]} : vector<2x384xf32> to vector<2x128xf32>
    %120 = arith.addf %118, %119 : vector<2x128xf32>
    %121 = arith.negf %120 : vector<2x128xf32>
    %122 = math.exp %121 : vector<2x128xf32>
    %cst_47 = arith.constant 1.000000e+00 : f32
    %123 = vector.broadcast %cst_47 : f32 to vector<2x128xf32>
    %124 = arith.addf %123, %122 : vector<2x128xf32>
    %125 = arith.divf %123, %124 : vector<2x128xf32>
    %126 = vector.extract_strided_slice %105 {offsets = [0, 128], sizes = [2, 128], strides = [1, 1]} : vector<2x384xf32> to vector<2x128xf32>
    %127 = vector.extract_strided_slice %114 {offsets = [0, 128], sizes = [2, 128], strides = [1, 1]} : vector<2x384xf32> to vector<2x128xf32>
    %128 = arith.addf %126, %127 : vector<2x128xf32>
    %129 = arith.negf %128 : vector<2x128xf32>
    %130 = math.exp %129 : vector<2x128xf32>
    %cst_48 = arith.constant 1.000000e+00 : f32
    %131 = vector.broadcast %cst_48 : f32 to vector<2x128xf32>
    %132 = arith.addf %131, %130 : vector<2x128xf32>
    %133 = arith.divf %131, %132 : vector<2x128xf32>
    %134 = vector.extract_strided_slice %105 {offsets = [0, 256], sizes = [2, 128], strides = [1, 1]} : vector<2x384xf32> to vector<2x128xf32>
    %135 = vector.extract_strided_slice %114 {offsets = [0, 256], sizes = [2, 128], strides = [1, 1]} : vector<2x384xf32> to vector<2x128xf32>
    %136 = arith.mulf %125, %135 : vector<2x128xf32>
    %137 = arith.addf %134, %136 : vector<2x128xf32>
    %138 = math.tanh %137 : vector<2x128xf32>
    %cst_49 = arith.constant 1.000000e+00 : f32
    %139 = vector.broadcast %cst_49 : f32 to vector<2x128xf32>
    %140 = arith.subf %139, %133 : vector<2x128xf32>
    %141 = arith.mulf %140, %138 : vector<2x128xf32>
    %142 = arith.mulf %133, %63 : vector<2x128xf32>
    %143 = arith.addf %141, %142 : vector<2x128xf32>
    %144 = vector.extract_strided_slice %111 {offsets = [0, 0], sizes = [2, 128], strides = [1, 1]} : vector<2x384xf32> to vector<2x128xf32>
    %145 = vector.extract_strided_slice %117 {offsets = [0, 0], sizes = [2, 128], strides = [1, 1]} : vector<2x384xf32> to vector<2x128xf32>
    %146 = arith.addf %144, %145 : vector<2x128xf32>
    %147 = arith.negf %146 : vector<2x128xf32>
    %148 = math.exp %147 : vector<2x128xf32>
    %cst_50 = arith.constant 1.000000e+00 : f32
    %149 = vector.broadcast %cst_50 : f32 to vector<2x128xf32>
    %150 = arith.addf %149, %148 : vector<2x128xf32>
    %151 = arith.divf %149, %150 : vector<2x128xf32>
    %152 = vector.extract_strided_slice %111 {offsets = [0, 128], sizes = [2, 128], strides = [1, 1]} : vector<2x384xf32> to vector<2x128xf32>
    %153 = vector.extract_strided_slice %117 {offsets = [0, 128], sizes = [2, 128], strides = [1, 1]} : vector<2x384xf32> to vector<2x128xf32>
    %154 = arith.addf %152, %153 : vector<2x128xf32>
    %155 = arith.negf %154 : vector<2x128xf32>
    %156 = math.exp %155 : vector<2x128xf32>
    %cst_51 = arith.constant 1.000000e+00 : f32
    %157 = vector.broadcast %cst_51 : f32 to vector<2x128xf32>
    %158 = arith.addf %157, %156 : vector<2x128xf32>
    %159 = arith.divf %157, %158 : vector<2x128xf32>
    %160 = vector.extract_strided_slice %111 {offsets = [0, 256], sizes = [2, 128], strides = [1, 1]} : vector<2x384xf32> to vector<2x128xf32>
    %161 = vector.extract_strided_slice %117 {offsets = [0, 256], sizes = [2, 128], strides = [1, 1]} : vector<2x384xf32> to vector<2x128xf32>
    %162 = arith.mulf %151, %161 : vector<2x128xf32>
    %163 = arith.addf %160, %162 : vector<2x128xf32>
    %164 = math.tanh %163 : vector<2x128xf32>
    %cst_52 = arith.constant 1.000000e+00 : f32
    %165 = vector.broadcast %cst_52 : f32 to vector<2x128xf32>
    %166 = arith.subf %165, %159 : vector<2x128xf32>
    %167 = arith.mulf %166, %164 : vector<2x128xf32>
    %168 = arith.mulf %159, %89 : vector<2x128xf32>
    %169 = arith.addf %167, %168 : vector<2x128xf32>
    %170 = arith.truncf %143 : vector<2x128xf32> to vector<2x128xbf16>
    %171 = arith.index_cast %c1_i32 : i32 to index
    %c0_53 = arith.constant 0 : index
    %c0_54 = arith.constant 0 : index
    %172 = vector.load %arg12[%171, %c0_53, %c0_54] : memref<8x2x128xbf16, #tpu.memory_space<vmem>>, vector<1x2x128xbf16>
    %173 = vector.shape_cast %172 : vector<1x2x128xbf16> to vector<2x128xbf16>
    %174 = vector.shape_cast %170 : vector<2x128xbf16> to vector<1x2x128xbf16>
    tpu.vector_store %arg12[%171, %c0_53, %c0_54], %174 {strides = array<i32>} : memref<8x2x128xbf16, #tpu.memory_space<vmem>>, vector<1x2x128xbf16>,
    %175 = arith.truncf %169 : vector<2x128xf32> to vector<2x128xbf16>
    %c7_i32_55 = arith.constant 7 : i32
    %176 = arith.subi %c7_i32_55, %c1_i32 : i32
    %177 = arith.index_cast %176 : i32 to index
    %c0_56 = arith.constant 0 : index
    %c0_57 = arith.constant 0 : index
    %178 = vector.load %arg13[%177, %c0_56, %c0_57] : memref<8x2x128xbf16, #tpu.memory_space<vmem>>, vector<1x2x128xbf16>
    %179 = vector.shape_cast %178 : vector<1x2x128xbf16> to vector<2x128xbf16>
    %180 = vector.shape_cast %175 : vector<2x128xbf16> to vector<1x2x128xbf16>
    tpu.vector_store %arg13[%177, %c0_56, %c0_57], %180 {strides = array<i32>} : memref<8x2x128xbf16, #tpu.memory_space<vmem>>, vector<1x2x128xbf16>,
    %c2_i32 = arith.constant 2 : i32
    %181 = arith.index_cast %c2_i32 : i32 to index
    %c0_58 = arith.constant 0 : index
    %c0_59 = arith.constant 0 : index
    %182 = vector.load %arg1[%181, %c0_58, %c0_59] : memref<8x2x32xbf16, #tpu.memory_space<vmem>>, vector<1x2x32xbf16>
    %183 = vector.shape_cast %182 : vector<1x2x32xbf16> to vector<2x32xbf16>
    %cst_60 = arith.constant dense<0.000000e+00> : vector<2x384xf32>
    %184 = tpu.matmul %183, %3, %cst_60 {dimension_numbers = #tpu.dot_dimension_numbers<[1], [0], [0], [1], [0, 0, 1, 1], [], []>} : vector<2x32xbf16>, vector<32x384xbf16>, vector<2x384xf32> -> vector<2x384xf32>
    %185 = arith.addf %184, %9 : vector<2x384xf32>
    %c7_i32_61 = arith.constant 7 : i32
    %186 = arith.subi %c7_i32_61, %c2_i32 : i32
    %187 = arith.index_cast %186 : i32 to index
    %c0_62 = arith.constant 0 : index
    %c0_63 = arith.constant 0 : index
    %188 = vector.load %arg2[%187, %c0_62, %c0_63] : memref<8x2x32xbf16, #tpu.memory_space<vmem>>, vector<1x2x32xbf16>
    %189 = vector.shape_cast %188 : vector<1x2x32xbf16> to vector<2x32xbf16>
    %cst_64 = arith.constant dense<0.000000e+00> : vector<2x384xf32>
    %190 = tpu.matmul %189, %4, %cst_64 {dimension_numbers = #tpu.dot_dimension_numbers<[1], [0], [0], [1], [0, 0, 1, 1], [], []>} : vector<2x32xbf16>, vector<32x384xbf16>, vector<2x384xf32> -> vector<2x384xf32>
    %191 = arith.addf %190, %12 : vector<2x384xf32>
    %192 = arith.truncf %143 : vector<2x128xf32> to vector<2x128xbf16>
    %cst_65 = arith.constant dense<0.000000e+00> : vector<2x384xf32>
    %193 = tpu.matmul %192, %5, %cst_65 {dimension_numbers = #tpu.dot_dimension_numbers<[1], [0], [0], [1], [0, 0, 1, 1], [], []>} : vector<2x128xbf16>, vector<128x384xbf16>, vector<2x384xf32> -> vector<2x384xf32>
    %194 = arith.addf %193, %15 : vector<2x384xf32>
    %195 = arith.truncf %169 : vector<2x128xf32> to vector<2x128xbf16>
    %cst_66 = arith.constant dense<0.000000e+00> : vector<2x384xf32>
    %196 = tpu.matmul %195, %6, %cst_66 {dimension_numbers = #tpu.dot_dimension_numbers<[1], [0], [0], [1], [0, 0, 1, 1], [], []>} : vector<2x128xbf16>, vector<128x384xbf16>, vector<2x384xf32> -> vector<2x384xf32>
    %197 = arith.addf %196, %18 : vector<2x384xf32>
    %198 = vector.extract_strided_slice %185 {offsets = [0, 0], sizes = [2, 128], strides = [1, 1]} : vector<2x384xf32> to vector<2x128xf32>
    %199 = vector.extract_strided_slice %194 {offsets = [0, 0], sizes = [2, 128], strides = [1, 1]} : vector<2x384xf32> to vector<2x128xf32>
    %200 = arith.addf %198, %199 : vector<2x128xf32>
    %201 = arith.negf %200 : vector<2x128xf32>
    %202 = math.exp %201 : vector<2x128xf32>
    %cst_67 = arith.constant 1.000000e+00 : f32
    %203 = vector.broadcast %cst_67 : f32 to vector<2x128xf32>
    %204 = arith.addf %203, %202 : vector<2x128xf32>
    %205 = arith.divf %203, %204 : vector<2x128xf32>
    %206 = vector.extract_strided_slice %185 {offsets = [0, 128], sizes = [2, 128], strides = [1, 1]} : vector<2x384xf32> to vector<2x128xf32>
    %207 = vector.extract_strided_slice %194 {offsets = [0, 128], sizes = [2, 128], strides = [1, 1]} : vector<2x384xf32> to vector<2x128xf32>
    %208 = arith.addf %206, %207 : vector<2x128xf32>
    %209 = arith.negf %208 : vector<2x128xf32>
    %210 = math.exp %209 : vector<2x128xf32>
    %cst_68 = arith.constant 1.000000e+00 : f32
    %211 = vector.broadcast %cst_68 : f32 to vector<2x128xf32>
    %212 = arith.addf %211, %210 : vector<2x128xf32>
    %213 = arith.divf %211, %212 : vector<2x128xf32>
    %214 = vector.extract_strided_slice %185 {offsets = [0, 256], sizes = [2, 128], strides = [1, 1]} : vector<2x384xf32> to vector<2x128xf32>
    %215 = vector.extract_strided_slice %194 {offsets = [0, 256], sizes = [2, 128], strides = [1, 1]} : vector<2x384xf32> to vector<2x128xf32>
    %216 = arith.mulf %205, %215 : vector<2x128xf32>
    %217 = arith.addf %214, %216 : vector<2x128xf32>
    %218 = math.tanh %217 : vector<2x128xf32>
    %cst_69 = arith.constant 1.000000e+00 : f32
    %219 = vector.broadcast %cst_69 : f32 to vector<2x128xf32>
    %220 = arith.subf %219, %213 : vector<2x128xf32>
    %221 = arith.mulf %220, %218 : vector<2x128xf32>
    %222 = arith.mulf %213, %143 : vector<2x128xf32>
    %223 = arith.addf %221, %222 : vector<2x128xf32>
    %224 = vector.extract_strided_slice %191 {offsets = [0, 0], sizes = [2, 128], strides = [1, 1]} : vector<2x384xf32> to vector<2x128xf32>
    %225 = vector.extract_strided_slice %197 {offsets = [0, 0], sizes = [2, 128], strides = [1, 1]} : vector<2x384xf32> to vector<2x128xf32>
    %226 = arith.addf %224, %225 : vector<2x128xf32>
    %227 = arith.negf %226 : vector<2x128xf32>
    %228 = math.exp %227 : vector<2x128xf32>
    %cst_70 = arith.constant 1.000000e+00 : f32
    %229 = vector.broadcast %cst_70 : f32 to vector<2x128xf32>
    %230 = arith.addf %229, %228 : vector<2x128xf32>
    %231 = arith.divf %229, %230 : vector<2x128xf32>
    %232 = vector.extract_strided_slice %191 {offsets = [0, 128], sizes = [2, 128], strides = [1, 1]} : vector<2x384xf32> to vector<2x128xf32>
    %233 = vector.extract_strided_slice %197 {offsets = [0, 128], sizes = [2, 128], strides = [1, 1]} : vector<2x384xf32> to vector<2x128xf32>
    %234 = arith.addf %232, %233 : vector<2x128xf32>
    %235 = arith.negf %234 : vector<2x128xf32>
    %236 = math.exp %235 : vector<2x128xf32>
    %cst_71 = arith.constant 1.000000e+00 : f32
    %237 = vector.broadcast %cst_71 : f32 to vector<2x128xf32>
    %238 = arith.addf %237, %236 : vector<2x128xf32>
    %239 = arith.divf %237, %238 : vector<2x128xf32>
    %240 = vector.extract_strided_slice %191 {offsets = [0, 256], sizes = [2, 128], strides = [1, 1]} : vector<2x384xf32> to vector<2x128xf32>
    %241 = vector.extract_strided_slice %197 {offsets = [0, 256], sizes = [2, 128], strides = [1, 1]} : vector<2x384xf32> to vector<2x128xf32>
    %242 = arith.mulf %231, %241 : vector<2x128xf32>
    %243 = arith.addf %240, %242 : vector<2x128xf32>
    %244 = math.tanh %243 : vector<2x128xf32>
    %cst_72 = arith.constant 1.000000e+00 : f32
    %245 = vector.broadcast %cst_72 : f32 to vector<2x128xf32>
    %246 = arith.subf %245, %239 : vector<2x128xf32>
    %247 = arith.mulf %246, %244 : vector<2x128xf32>
    %248 = arith.mulf %239, %169 : vector<2x128xf32>
    %249 = arith.addf %247, %248 : vector<2x128xf32>
    %250 = arith.truncf %223 : vector<2x128xf32> to vector<2x128xbf16>
    %251 = arith.index_cast %c2_i32 : i32 to index
    %c0_73 = arith.constant 0 : index
    %c0_74 = arith.constant 0 : index
    %252 = vector.load %arg12[%251, %c0_73, %c0_74] : memref<8x2x128xbf16, #tpu.memory_space<vmem>>, vector<1x2x128xbf16>
    %253 = vector.shape_cast %252 : vector<1x2x128xbf16> to vector<2x128xbf16>
    %254 = vector.shape_cast %250 : vector<2x128xbf16> to vector<1x2x128xbf16>
    tpu.vector_store %arg12[%251, %c0_73, %c0_74], %254 {strides = array<i32>} : memref<8x2x128xbf16, #tpu.memory_space<vmem>>, vector<1x2x128xbf16>,
    %255 = arith.truncf %249 : vector<2x128xf32> to vector<2x128xbf16>
    %c7_i32_75 = arith.constant 7 : i32
    %256 = arith.subi %c7_i32_75, %c2_i32 : i32
    %257 = arith.index_cast %256 : i32 to index
    %c0_76 = arith.constant 0 : index
    %c0_77 = arith.constant 0 : index
    %258 = vector.load %arg13[%257, %c0_76, %c0_77] : memref<8x2x128xbf16, #tpu.memory_space<vmem>>, vector<1x2x128xbf16>
    %259 = vector.shape_cast %258 : vector<1x2x128xbf16> to vector<2x128xbf16>
    %260 = vector.shape_cast %255 : vector<2x128xbf16> to vector<1x2x128xbf16>
    tpu.vector_store %arg13[%257, %c0_76, %c0_77], %260 {strides = array<i32>} : memref<8x2x128xbf16, #tpu.memory_space<vmem>>, vector<1x2x128xbf16>,
    %c3_i32 = arith.constant 3 : i32
    %261 = arith.index_cast %c3_i32 : i32 to index
    %c0_78 = arith.constant 0 : index
    %c0_79 = arith.constant 0 : index
    %262 = vector.load %arg1[%261, %c0_78, %c0_79] : memref<8x2x32xbf16, #tpu.memory_space<vmem>>, vector<1x2x32xbf16>
    %263 = vector.shape_cast %262 : vector<1x2x32xbf16> to vector<2x32xbf16>
    %cst_80 = arith.constant dense<0.000000e+00> : vector<2x384xf32>
    %264 = tpu.matmul %263, %3, %cst_80 {dimension_numbers = #tpu.dot_dimension_numbers<[1], [0], [0], [1], [0, 0, 1, 1], [], []>} : vector<2x32xbf16>, vector<32x384xbf16>, vector<2x384xf32> -> vector<2x384xf32>
    %265 = arith.addf %264, %9 : vector<2x384xf32>
    %c7_i32_81 = arith.constant 7 : i32
    %266 = arith.subi %c7_i32_81, %c3_i32 : i32
    %267 = arith.index_cast %266 : i32 to index
    %c0_82 = arith.constant 0 : index
    %c0_83 = arith.constant 0 : index
    %268 = vector.load %arg2[%267, %c0_82, %c0_83] : memref<8x2x32xbf16, #tpu.memory_space<vmem>>, vector<1x2x32xbf16>
    %269 = vector.shape_cast %268 : vector<1x2x32xbf16> to vector<2x32xbf16>
    %cst_84 = arith.constant dense<0.000000e+00> : vector<2x384xf32>
    %270 = tpu.matmul %269, %4, %cst_84 {dimension_numbers = #tpu.dot_dimension_numbers<[1], [0], [0], [1], [0, 0, 1, 1], [], []>} : vector<2x32xbf16>, vector<32x384xbf16>, vector<2x384xf32> -> vector<2x384xf32>
    %271 = arith.addf %270, %12 : vector<2x384xf32>
    %272 = arith.truncf %223 : vector<2x128xf32> to vector<2x128xbf16>
    %cst_85 = arith.constant dense<0.000000e+00> : vector<2x384xf32>
    %273 = tpu.matmul %272, %5, %cst_85 {dimension_numbers = #tpu.dot_dimension_numbers<[1], [0], [0], [1], [0, 0, 1, 1], [], []>} : vector<2x128xbf16>, vector<128x384xbf16>, vector<2x384xf32> -> vector<2x384xf32>
    %274 = arith.addf %273, %15 : vector<2x384xf32>
    %275 = arith.truncf %249 : vector<2x128xf32> to vector<2x128xbf16>
    %cst_86 = arith.constant dense<0.000000e+00> : vector<2x384xf32>
    %276 = tpu.matmul %275, %6, %cst_86 {dimension_numbers = #tpu.dot_dimension_numbers<[1], [0], [0], [1], [0, 0, 1, 1], [], []>} : vector<2x128xbf16>, vector<128x384xbf16>, vector<2x384xf32> -> vector<2x384xf32>
    %277 = arith.addf %276, %18 : vector<2x384xf32>
    %278 = vector.extract_strided_slice %265 {offsets = [0, 0], sizes = [2, 128], strides = [1, 1]} : vector<2x384xf32> to vector<2x128xf32>
    %279 = vector.extract_strided_slice %274 {offsets = [0, 0], sizes = [2, 128], strides = [1, 1]} : vector<2x384xf32> to vector<2x128xf32>
    %280 = arith.addf %278, %279 : vector<2x128xf32>
    %281 = arith.negf %280 : vector<2x128xf32>
    %282 = math.exp %281 : vector<2x128xf32>
    %cst_87 = arith.constant 1.000000e+00 : f32
    %283 = vector.broadcast %cst_87 : f32 to vector<2x128xf32>
    %284 = arith.addf %283, %282 : vector<2x128xf32>
    %285 = arith.divf %283, %284 : vector<2x128xf32>
    %286 = vector.extract_strided_slice %265 {offsets = [0, 128], sizes = [2, 128], strides = [1, 1]} : vector<2x384xf32> to vector<2x128xf32>
    %287 = vector.extract_strided_slice %274 {offsets = [0, 128], sizes = [2, 128], strides = [1, 1]} : vector<2x384xf32> to vector<2x128xf32>
    %288 = arith.addf %286, %287 : vector<2x128xf32>
    %289 = arith.negf %288 : vector<2x128xf32>
    %290 = math.exp %289 : vector<2x128xf32>
    %cst_88 = arith.constant 1.000000e+00 : f32
    %291 = vector.broadcast %cst_88 : f32 to vector<2x128xf32>
    %292 = arith.addf %291, %290 : vector<2x128xf32>
    %293 = arith.divf %291, %292 : vector<2x128xf32>
    %294 = vector.extract_strided_slice %265 {offsets = [0, 256], sizes = [2, 128], strides = [1, 1]} : vector<2x384xf32> to vector<2x128xf32>
    %295 = vector.extract_strided_slice %274 {offsets = [0, 256], sizes = [2, 128], strides = [1, 1]} : vector<2x384xf32> to vector<2x128xf32>
    %296 = arith.mulf %285, %295 : vector<2x128xf32>
    %297 = arith.addf %294, %296 : vector<2x128xf32>
    %298 = math.tanh %297 : vector<2x128xf32>
    %cst_89 = arith.constant 1.000000e+00 : f32
    %299 = vector.broadcast %cst_89 : f32 to vector<2x128xf32>
    %300 = arith.subf %299, %293 : vector<2x128xf32>
    %301 = arith.mulf %300, %298 : vector<2x128xf32>
    %302 = arith.mulf %293, %223 : vector<2x128xf32>
    %303 = arith.addf %301, %302 : vector<2x128xf32>
    %304 = vector.extract_strided_slice %271 {offsets = [0, 0], sizes = [2, 128], strides = [1, 1]} : vector<2x384xf32> to vector<2x128xf32>
    %305 = vector.extract_strided_slice %277 {offsets = [0, 0], sizes = [2, 128], strides = [1, 1]} : vector<2x384xf32> to vector<2x128xf32>
    %306 = arith.addf %304, %305 : vector<2x128xf32>
    %307 = arith.negf %306 : vector<2x128xf32>
    %308 = math.exp %307 : vector<2x128xf32>
    %cst_90 = arith.constant 1.000000e+00 : f32
    %309 = vector.broadcast %cst_90 : f32 to vector<2x128xf32>
    %310 = arith.addf %309, %308 : vector<2x128xf32>
    %311 = arith.divf %309, %310 : vector<2x128xf32>
    %312 = vector.extract_strided_slice %271 {offsets = [0, 128], sizes = [2, 128], strides = [1, 1]} : vector<2x384xf32> to vector<2x128xf32>
    %313 = vector.extract_strided_slice %277 {offsets = [0, 128], sizes = [2, 128], strides = [1, 1]} : vector<2x384xf32> to vector<2x128xf32>
    %314 = arith.addf %312, %313 : vector<2x128xf32>
    %315 = arith.negf %314 : vector<2x128xf32>
    %316 = math.exp %315 : vector<2x128xf32>
    %cst_91 = arith.constant 1.000000e+00 : f32
    %317 = vector.broadcast %cst_91 : f32 to vector<2x128xf32>
    %318 = arith.addf %317, %316 : vector<2x128xf32>
    %319 = arith.divf %317, %318 : vector<2x128xf32>
    %320 = vector.extract_strided_slice %271 {offsets = [0, 256], sizes = [2, 128], strides = [1, 1]} : vector<2x384xf32> to vector<2x128xf32>
    %321 = vector.extract_strided_slice %277 {offsets = [0, 256], sizes = [2, 128], strides = [1, 1]} : vector<2x384xf32> to vector<2x128xf32>
    %322 = arith.mulf %311, %321 : vector<2x128xf32>
    %323 = arith.addf %320, %322 : vector<2x128xf32>
    %324 = math.tanh %323 : vector<2x128xf32>
    %cst_92 = arith.constant 1.000000e+00 : f32
    %325 = vector.broadcast %cst_92 : f32 to vector<2x128xf32>
    %326 = arith.subf %325, %319 : vector<2x128xf32>
    %327 = arith.mulf %326, %324 : vector<2x128xf32>
    %328 = arith.mulf %319, %249 : vector<2x128xf32>
    %329 = arith.addf %327, %328 : vector<2x128xf32>
    %330 = arith.truncf %303 : vector<2x128xf32> to vector<2x128xbf16>
    %331 = arith.index_cast %c3_i32 : i32 to index
    %c0_93 = arith.constant 0 : index
    %c0_94 = arith.constant 0 : index
    %332 = vector.load %arg12[%331, %c0_93, %c0_94] : memref<8x2x128xbf16, #tpu.memory_space<vmem>>, vector<1x2x128xbf16>
    %333 = vector.shape_cast %332 : vector<1x2x128xbf16> to vector<2x128xbf16>
    %334 = vector.shape_cast %330 : vector<2x128xbf16> to vector<1x2x128xbf16>
    tpu.vector_store %arg12[%331, %c0_93, %c0_94], %334 {strides = array<i32>} : memref<8x2x128xbf16, #tpu.memory_space<vmem>>, vector<1x2x128xbf16>,
    %335 = arith.truncf %329 : vector<2x128xf32> to vector<2x128xbf16>
    %c7_i32_95 = arith.constant 7 : i32
    %336 = arith.subi %c7_i32_95, %c3_i32 : i32
    %337 = arith.index_cast %336 : i32 to index
    %c0_96 = arith.constant 0 : index
    %c0_97 = arith.constant 0 : index
    %338 = vector.load %arg13[%337, %c0_96, %c0_97] : memref<8x2x128xbf16, #tpu.memory_space<vmem>>, vector<1x2x128xbf16>
    %339 = vector.shape_cast %338 : vector<1x2x128xbf16> to vector<2x128xbf16>
    %340 = vector.shape_cast %335 : vector<2x128xbf16> to vector<1x2x128xbf16>
    tpu.vector_store %arg13[%337, %c0_96, %c0_97], %340 {strides = array<i32>} : memref<8x2x128xbf16, #tpu.memory_space<vmem>>, vector<1x2x128xbf16>,
    %c4_i32 = arith.constant 4 : i32
    %341 = arith.index_cast %c4_i32 : i32 to index
    %c0_98 = arith.constant 0 : index
    %c0_99 = arith.constant 0 : index
    %342 = vector.load %arg1[%341, %c0_98, %c0_99] : memref<8x2x32xbf16, #tpu.memory_space<vmem>>, vector<1x2x32xbf16>
    %343 = vector.shape_cast %342 : vector<1x2x32xbf16> to vector<2x32xbf16>
    %cst_100 = arith.constant dense<0.000000e+00> : vector<2x384xf32>
    %344 = tpu.matmul %343, %3, %cst_100 {dimension_numbers = #tpu.dot_dimension_numbers<[1], [0], [0], [1], [0, 0, 1, 1], [], []>} : vector<2x32xbf16>, vector<32x384xbf16>, vector<2x384xf32> -> vector<2x384xf32>
    %345 = arith.addf %344, %9 : vector<2x384xf32>
    %c7_i32_101 = arith.constant 7 : i32
    %346 = arith.subi %c7_i32_101, %c4_i32 : i32
    %347 = arith.index_cast %346 : i32 to index
    %c0_102 = arith.constant 0 : index
    %c0_103 = arith.constant 0 : index
    %348 = vector.load %arg2[%347, %c0_102, %c0_103] : memref<8x2x32xbf16, #tpu.memory_space<vmem>>, vector<1x2x32xbf16>
    %349 = vector.shape_cast %348 : vector<1x2x32xbf16> to vector<2x32xbf16>
    %cst_104 = arith.constant dense<0.000000e+00> : vector<2x384xf32>
    %350 = tpu.matmul %349, %4, %cst_104 {dimension_numbers = #tpu.dot_dimension_numbers<[1], [0], [0], [1], [0, 0, 1, 1], [], []>} : vector<2x32xbf16>, vector<32x384xbf16>, vector<2x384xf32> -> vector<2x384xf32>
    %351 = arith.addf %350, %12 : vector<2x384xf32>
    %352 = arith.truncf %303 : vector<2x128xf32> to vector<2x128xbf16>
    %cst_105 = arith.constant dense<0.000000e+00> : vector<2x384xf32>
    %353 = tpu.matmul %352, %5, %cst_105 {dimension_numbers = #tpu.dot_dimension_numbers<[1], [0], [0], [1], [0, 0, 1, 1], [], []>} : vector<2x128xbf16>, vector<128x384xbf16>, vector<2x384xf32> -> vector<2x384xf32>
    %354 = arith.addf %353, %15 : vector<2x384xf32>
    %355 = arith.truncf %329 : vector<2x128xf32> to vector<2x128xbf16>
    %cst_106 = arith.constant dense<0.000000e+00> : vector<2x384xf32>
    %356 = tpu.matmul %355, %6, %cst_106 {dimension_numbers = #tpu.dot_dimension_numbers<[1], [0], [0], [1], [0, 0, 1, 1], [], []>} : vector<2x128xbf16>, vector<128x384xbf16>, vector<2x384xf32> -> vector<2x384xf32>
    %357 = arith.addf %356, %18 : vector<2x384xf32>
    %358 = vector.extract_strided_slice %345 {offsets = [0, 0], sizes = [2, 128], strides = [1, 1]} : vector<2x384xf32> to vector<2x128xf32>
    %359 = vector.extract_strided_slice %354 {offsets = [0, 0], sizes = [2, 128], strides = [1, 1]} : vector<2x384xf32> to vector<2x128xf32>
    %360 = arith.addf %358, %359 : vector<2x128xf32>
    %361 = arith.negf %360 : vector<2x128xf32>
    %362 = math.exp %361 : vector<2x128xf32>
    %cst_107 = arith.constant 1.000000e+00 : f32
    %363 = vector.broadcast %cst_107 : f32 to vector<2x128xf32>
    %364 = arith.addf %363, %362 : vector<2x128xf32>
    %365 = arith.divf %363, %364 : vector<2x128xf32>
    %366 = vector.extract_strided_slice %345 {offsets = [0, 128], sizes = [2, 128], strides = [1, 1]} : vector<2x384xf32> to vector<2x128xf32>
    %367 = vector.extract_strided_slice %354 {offsets = [0, 128], sizes = [2, 128], strides = [1, 1]} : vector<2x384xf32> to vector<2x128xf32>
    %368 = arith.addf %366, %367 : vector<2x128xf32>
    %369 = arith.negf %368 : vector<2x128xf32>
    %370 = math.exp %369 : vector<2x128xf32>
    %cst_108 = arith.constant 1.000000e+00 : f32
    %371 = vector.broadcast %cst_108 : f32 to vector<2x128xf32>
    %372 = arith.addf %371, %370 : vector<2x128xf32>
    %373 = arith.divf %371, %372 : vector<2x128xf32>
    %374 = vector.extract_strided_slice %345 {offsets = [0, 256], sizes = [2, 128], strides = [1, 1]} : vector<2x384xf32> to vector<2x128xf32>
    %375 = vector.extract_strided_slice %354 {offsets = [0, 256], sizes = [2, 128], strides = [1, 1]} : vector<2x384xf32> to vector<2x128xf32>
    %376 = arith.mulf %365, %375 : vector<2x128xf32>
    %377 = arith.addf %374, %376 : vector<2x128xf32>
    %378 = math.tanh %377 : vector<2x128xf32>
    %cst_109 = arith.constant 1.000000e+00 : f32
    %379 = vector.broadcast %cst_109 : f32 to vector<2x128xf32>
    %380 = arith.subf %379, %373 : vector<2x128xf32>
    %381 = arith.mulf %380, %378 : vector<2x128xf32>
    %382 = arith.mulf %373, %303 : vector<2x128xf32>
    %383 = arith.addf %381, %382 : vector<2x128xf32>
    %384 = vector.extract_strided_slice %351 {offsets = [0, 0], sizes = [2, 128], strides = [1, 1]} : vector<2x384xf32> to vector<2x128xf32>
    %385 = vector.extract_strided_slice %357 {offsets = [0, 0], sizes = [2, 128], strides = [1, 1]} : vector<2x384xf32> to vector<2x128xf32>
    %386 = arith.addf %384, %385 : vector<2x128xf32>
    %387 = arith.negf %386 : vector<2x128xf32>
    %388 = math.exp %387 : vector<2x128xf32>
    %cst_110 = arith.constant 1.000000e+00 : f32
    %389 = vector.broadcast %cst_110 : f32 to vector<2x128xf32>
    %390 = arith.addf %389, %388 : vector<2x128xf32>
    %391 = arith.divf %389, %390 : vector<2x128xf32>
    %392 = vector.extract_strided_slice %351 {offsets = [0, 128], sizes = [2, 128], strides = [1, 1]} : vector<2x384xf32> to vector<2x128xf32>
    %393 = vector.extract_strided_slice %357 {offsets = [0, 128], sizes = [2, 128], strides = [1, 1]} : vector<2x384xf32> to vector<2x128xf32>
    %394 = arith.addf %392, %393 : vector<2x128xf32>
    %395 = arith.negf %394 : vector<2x128xf32>
    %396 = math.exp %395 : vector<2x128xf32>
    %cst_111 = arith.constant 1.000000e+00 : f32
    %397 = vector.broadcast %cst_111 : f32 to vector<2x128xf32>
    %398 = arith.addf %397, %396 : vector<2x128xf32>
    %399 = arith.divf %397, %398 : vector<2x128xf32>
    %400 = vector.extract_strided_slice %351 {offsets = [0, 256], sizes = [2, 128], strides = [1, 1]} : vector<2x384xf32> to vector<2x128xf32>
    %401 = vector.extract_strided_slice %357 {offsets = [0, 256], sizes = [2, 128], strides = [1, 1]} : vector<2x384xf32> to vector<2x128xf32>
    %402 = arith.mulf %391, %401 : vector<2x128xf32>
    %403 = arith.addf %400, %402 : vector<2x128xf32>
    %404 = math.tanh %403 : vector<2x128xf32>
    %cst_112 = arith.constant 1.000000e+00 : f32
    %405 = vector.broadcast %cst_112 : f32 to vector<2x128xf32>
    %406 = arith.subf %405, %399 : vector<2x128xf32>
    %407 = arith.mulf %406, %404 : vector<2x128xf32>
    %408 = arith.mulf %399, %329 : vector<2x128xf32>
    %409 = arith.addf %407, %408 : vector<2x128xf32>
    %410 = arith.truncf %383 : vector<2x128xf32> to vector<2x128xbf16>
    %411 = arith.index_cast %c4_i32 : i32 to index
    %c0_113 = arith.constant 0 : index
    %c0_114 = arith.constant 0 : index
    %412 = vector.load %arg12[%411, %c0_113, %c0_114] : memref<8x2x128xbf16, #tpu.memory_space<vmem>>, vector<1x2x128xbf16>
    %413 = vector.shape_cast %412 : vector<1x2x128xbf16> to vector<2x128xbf16>
    %414 = vector.shape_cast %410 : vector<2x128xbf16> to vector<1x2x128xbf16>
    tpu.vector_store %arg12[%411, %c0_113, %c0_114], %414 {strides = array<i32>} : memref<8x2x128xbf16, #tpu.memory_space<vmem>>, vector<1x2x128xbf16>,
    %415 = arith.truncf %409 : vector<2x128xf32> to vector<2x128xbf16>
    %c7_i32_115 = arith.constant 7 : i32
    %416 = arith.subi %c7_i32_115, %c4_i32 : i32
    %417 = arith.index_cast %416 : i32 to index
    %c0_116 = arith.constant 0 : index
    %c0_117 = arith.constant 0 : index
    %418 = vector.load %arg13[%417, %c0_116, %c0_117] : memref<8x2x128xbf16, #tpu.memory_space<vmem>>, vector<1x2x128xbf16>
    %419 = vector.shape_cast %418 : vector<1x2x128xbf16> to vector<2x128xbf16>
    %420 = vector.shape_cast %415 : vector<2x128xbf16> to vector<1x2x128xbf16>
    tpu.vector_store %arg13[%417, %c0_116, %c0_117], %420 {strides = array<i32>} : memref<8x2x128xbf16, #tpu.memory_space<vmem>>, vector<1x2x128xbf16>,
    %c5_i32 = arith.constant 5 : i32
    %421 = arith.index_cast %c5_i32 : i32 to index
    %c0_118 = arith.constant 0 : index
    %c0_119 = arith.constant 0 : index
    %422 = vector.load %arg1[%421, %c0_118, %c0_119] : memref<8x2x32xbf16, #tpu.memory_space<vmem>>, vector<1x2x32xbf16>
    %423 = vector.shape_cast %422 : vector<1x2x32xbf16> to vector<2x32xbf16>
    %cst_120 = arith.constant dense<0.000000e+00> : vector<2x384xf32>
    %424 = tpu.matmul %423, %3, %cst_120 {dimension_numbers = #tpu.dot_dimension_numbers<[1], [0], [0], [1], [0, 0, 1, 1], [], []>} : vector<2x32xbf16>, vector<32x384xbf16>, vector<2x384xf32> -> vector<2x384xf32>
    %425 = arith.addf %424, %9 : vector<2x384xf32>
    %c7_i32_121 = arith.constant 7 : i32
    %426 = arith.subi %c7_i32_121, %c5_i32 : i32
    %427 = arith.index_cast %426 : i32 to index
    %c0_122 = arith.constant 0 : index
    %c0_123 = arith.constant 0 : index
    %428 = vector.load %arg2[%427, %c0_122, %c0_123] : memref<8x2x32xbf16, #tpu.memory_space<vmem>>, vector<1x2x32xbf16>
    %429 = vector.shape_cast %428 : vector<1x2x32xbf16> to vector<2x32xbf16>
    %cst_124 = arith.constant dense<0.000000e+00> : vector<2x384xf32>
    %430 = tpu.matmul %429, %4, %cst_124 {dimension_numbers = #tpu.dot_dimension_numbers<[1], [0], [0], [1], [0, 0, 1, 1], [], []>} : vector<2x32xbf16>, vector<32x384xbf16>, vector<2x384xf32> -> vector<2x384xf32>
    %431 = arith.addf %430, %12 : vector<2x384xf32>
    %432 = arith.truncf %383 : vector<2x128xf32> to vector<2x128xbf16>
    %cst_125 = arith.constant dense<0.000000e+00> : vector<2x384xf32>
    %433 = tpu.matmul %432, %5, %cst_125 {dimension_numbers = #tpu.dot_dimension_numbers<[1], [0], [0], [1], [0, 0, 1, 1], [], []>} : vector<2x128xbf16>, vector<128x384xbf16>, vector<2x384xf32> -> vector<2x384xf32>
    %434 = arith.addf %433, %15 : vector<2x384xf32>
    %435 = arith.truncf %409 : vector<2x128xf32> to vector<2x128xbf16>
    %cst_126 = arith.constant dense<0.000000e+00> : vector<2x384xf32>
    %436 = tpu.matmul %435, %6, %cst_126 {dimension_numbers = #tpu.dot_dimension_numbers<[1], [0], [0], [1], [0, 0, 1, 1], [], []>} : vector<2x128xbf16>, vector<128x384xbf16>, vector<2x384xf32> -> vector<2x384xf32>
    %437 = arith.addf %436, %18 : vector<2x384xf32>
    %438 = vector.extract_strided_slice %425 {offsets = [0, 0], sizes = [2, 128], strides = [1, 1]} : vector<2x384xf32> to vector<2x128xf32>
    %439 = vector.extract_strided_slice %434 {offsets = [0, 0], sizes = [2, 128], strides = [1, 1]} : vector<2x384xf32> to vector<2x128xf32>
    %440 = arith.addf %438, %439 : vector<2x128xf32>
    %441 = arith.negf %440 : vector<2x128xf32>
    %442 = math.exp %441 : vector<2x128xf32>
    %cst_127 = arith.constant 1.000000e+00 : f32
    %443 = vector.broadcast %cst_127 : f32 to vector<2x128xf32>
    %444 = arith.addf %443, %442 : vector<2x128xf32>
    %445 = arith.divf %443, %444 : vector<2x128xf32>
    %446 = vector.extract_strided_slice %425 {offsets = [0, 128], sizes = [2, 128], strides = [1, 1]} : vector<2x384xf32> to vector<2x128xf32>
    %447 = vector.extract_strided_slice %434 {offsets = [0, 128], sizes = [2, 128], strides = [1, 1]} : vector<2x384xf32> to vector<2x128xf32>
    %448 = arith.addf %446, %447 : vector<2x128xf32>
    %449 = arith.negf %448 : vector<2x128xf32>
    %450 = math.exp %449 : vector<2x128xf32>
    %cst_128 = arith.constant 1.000000e+00 : f32
    %451 = vector.broadcast %cst_128 : f32 to vector<2x128xf32>
    %452 = arith.addf %451, %450 : vector<2x128xf32>
    %453 = arith.divf %451, %452 : vector<2x128xf32>
    %454 = vector.extract_strided_slice %425 {offsets = [0, 256], sizes = [2, 128], strides = [1, 1]} : vector<2x384xf32> to vector<2x128xf32>
    %455 = vector.extract_strided_slice %434 {offsets = [0, 256], sizes = [2, 128], strides = [1, 1]} : vector<2x384xf32> to vector<2x128xf32>
    %456 = arith.mulf %445, %455 : vector<2x128xf32>
    %457 = arith.addf %454, %456 : vector<2x128xf32>
    %458 = math.tanh %457 : vector<2x128xf32>
    %cst_129 = arith.constant 1.000000e+00 : f32
    %459 = vector.broadcast %cst_129 : f32 to vector<2x128xf32>
    %460 = arith.subf %459, %453 : vector<2x128xf32>
    %461 = arith.mulf %460, %458 : vector<2x128xf32>
    %462 = arith.mulf %453, %383 : vector<2x128xf32>
    %463 = arith.addf %461, %462 : vector<2x128xf32>
    %464 = vector.extract_strided_slice %431 {offsets = [0, 0], sizes = [2, 128], strides = [1, 1]} : vector<2x384xf32> to vector<2x128xf32>
    %465 = vector.extract_strided_slice %437 {offsets = [0, 0], sizes = [2, 128], strides = [1, 1]} : vector<2x384xf32> to vector<2x128xf32>
    %466 = arith.addf %464, %465 : vector<2x128xf32>
    %467 = arith.negf %466 : vector<2x128xf32>
    %468 = math.exp %467 : vector<2x128xf32>
    %cst_130 = arith.constant 1.000000e+00 : f32
    %469 = vector.broadcast %cst_130 : f32 to vector<2x128xf32>
    %470 = arith.addf %469, %468 : vector<2x128xf32>
    %471 = arith.divf %469, %470 : vector<2x128xf32>
    %472 = vector.extract_strided_slice %431 {offsets = [0, 128], sizes = [2, 128], strides = [1, 1]} : vector<2x384xf32> to vector<2x128xf32>
    %473 = vector.extract_strided_slice %437 {offsets = [0, 128], sizes = [2, 128], strides = [1, 1]} : vector<2x384xf32> to vector<2x128xf32>
    %474 = arith.addf %472, %473 : vector<2x128xf32>
    %475 = arith.negf %474 : vector<2x128xf32>
    %476 = math.exp %475 : vector<2x128xf32>
    %cst_131 = arith.constant 1.000000e+00 : f32
    %477 = vector.broadcast %cst_131 : f32 to vector<2x128xf32>
    %478 = arith.addf %477, %476 : vector<2x128xf32>
    %479 = arith.divf %477, %478 : vector<2x128xf32>
    %480 = vector.extract_strided_slice %431 {offsets = [0, 256], sizes = [2, 128], strides = [1, 1]} : vector<2x384xf32> to vector<2x128xf32>
    %481 = vector.extract_strided_slice %437 {offsets = [0, 256], sizes = [2, 128], strides = [1, 1]} : vector<2x384xf32> to vector<2x128xf32>
    %482 = arith.mulf %471, %481 : vector<2x128xf32>
    %483 = arith.addf %480, %482 : vector<2x128xf32>
    %484 = math.tanh %483 : vector<2x128xf32>
    %cst_132 = arith.constant 1.000000e+00 : f32
    %485 = vector.broadcast %cst_132 : f32 to vector<2x128xf32>
    %486 = arith.subf %485, %479 : vector<2x128xf32>
    %487 = arith.mulf %486, %484 : vector<2x128xf32>
    %488 = arith.mulf %479, %409 : vector<2x128xf32>
    %489 = arith.addf %487, %488 : vector<2x128xf32>
    %490 = arith.truncf %463 : vector<2x128xf32> to vector<2x128xbf16>
    %491 = arith.index_cast %c5_i32 : i32 to index
    %c0_133 = arith.constant 0 : index
    %c0_134 = arith.constant 0 : index
    %492 = vector.load %arg12[%491, %c0_133, %c0_134] : memref<8x2x128xbf16, #tpu.memory_space<vmem>>, vector<1x2x128xbf16>
    %493 = vector.shape_cast %492 : vector<1x2x128xbf16> to vector<2x128xbf16>
    %494 = vector.shape_cast %490 : vector<2x128xbf16> to vector<1x2x128xbf16>
    tpu.vector_store %arg12[%491, %c0_133, %c0_134], %494 {strides = array<i32>} : memref<8x2x128xbf16, #tpu.memory_space<vmem>>, vector<1x2x128xbf16>,
    %495 = arith.truncf %489 : vector<2x128xf32> to vector<2x128xbf16>
    %c7_i32_135 = arith.constant 7 : i32
    %496 = arith.subi %c7_i32_135, %c5_i32 : i32
    %497 = arith.index_cast %496 : i32 to index
    %c0_136 = arith.constant 0 : index
    %c0_137 = arith.constant 0 : index
    %498 = vector.load %arg13[%497, %c0_136, %c0_137] : memref<8x2x128xbf16, #tpu.memory_space<vmem>>, vector<1x2x128xbf16>
    %499 = vector.shape_cast %498 : vector<1x2x128xbf16> to vector<2x128xbf16>
    %500 = vector.shape_cast %495 : vector<2x128xbf16> to vector<1x2x128xbf16>
    tpu.vector_store %arg13[%497, %c0_136, %c0_137], %500 {strides = array<i32>} : memref<8x2x128xbf16, #tpu.memory_space<vmem>>, vector<1x2x128xbf16>,
    %c6_i32 = arith.constant 6 : i32
    %501 = arith.index_cast %c6_i32 : i32 to index
    %c0_138 = arith.constant 0 : index
    %c0_139 = arith.constant 0 : index
    %502 = vector.load %arg1[%501, %c0_138, %c0_139] : memref<8x2x32xbf16, #tpu.memory_space<vmem>>, vector<1x2x32xbf16>
    %503 = vector.shape_cast %502 : vector<1x2x32xbf16> to vector<2x32xbf16>
    %cst_140 = arith.constant dense<0.000000e+00> : vector<2x384xf32>
    %504 = tpu.matmul %503, %3, %cst_140 {dimension_numbers = #tpu.dot_dimension_numbers<[1], [0], [0], [1], [0, 0, 1, 1], [], []>} : vector<2x32xbf16>, vector<32x384xbf16>, vector<2x384xf32> -> vector<2x384xf32>
    %505 = arith.addf %504, %9 : vector<2x384xf32>
    %c7_i32_141 = arith.constant 7 : i32
    %506 = arith.subi %c7_i32_141, %c6_i32 : i32
    %507 = arith.index_cast %506 : i32 to index
    %c0_142 = arith.constant 0 : index
    %c0_143 = arith.constant 0 : index
    %508 = vector.load %arg2[%507, %c0_142, %c0_143] : memref<8x2x32xbf16, #tpu.memory_space<vmem>>, vector<1x2x32xbf16>
    %509 = vector.shape_cast %508 : vector<1x2x32xbf16> to vector<2x32xbf16>
    %cst_144 = arith.constant dense<0.000000e+00> : vector<2x384xf32>
    %510 = tpu.matmul %509, %4, %cst_144 {dimension_numbers = #tpu.dot_dimension_numbers<[1], [0], [0], [1], [0, 0, 1, 1], [], []>} : vector<2x32xbf16>, vector<32x384xbf16>, vector<2x384xf32> -> vector<2x384xf32>
    %511 = arith.addf %510, %12 : vector<2x384xf32>
    %512 = arith.truncf %463 : vector<2x128xf32> to vector<2x128xbf16>
    %cst_145 = arith.constant dense<0.000000e+00> : vector<2x384xf32>
    %513 = tpu.matmul %512, %5, %cst_145 {dimension_numbers = #tpu.dot_dimension_numbers<[1], [0], [0], [1], [0, 0, 1, 1], [], []>} : vector<2x128xbf16>, vector<128x384xbf16>, vector<2x384xf32> -> vector<2x384xf32>
    %514 = arith.addf %513, %15 : vector<2x384xf32>
    %515 = arith.truncf %489 : vector<2x128xf32> to vector<2x128xbf16>
    %cst_146 = arith.constant dense<0.000000e+00> : vector<2x384xf32>
    %516 = tpu.matmul %515, %6, %cst_146 {dimension_numbers = #tpu.dot_dimension_numbers<[1], [0], [0], [1], [0, 0, 1, 1], [], []>} : vector<2x128xbf16>, vector<128x384xbf16>, vector<2x384xf32> -> vector<2x384xf32>
    %517 = arith.addf %516, %18 : vector<2x384xf32>
    %518 = vector.extract_strided_slice %505 {offsets = [0, 0], sizes = [2, 128], strides = [1, 1]} : vector<2x384xf32> to vector<2x128xf32>
    %519 = vector.extract_strided_slice %514 {offsets = [0, 0], sizes = [2, 128], strides = [1, 1]} : vector<2x384xf32> to vector<2x128xf32>
    %520 = arith.addf %518, %519 : vector<2x128xf32>
    %521 = arith.negf %520 : vector<2x128xf32>
    %522 = math.exp %521 : vector<2x128xf32>
    %cst_147 = arith.constant 1.000000e+00 : f32
    %523 = vector.broadcast %cst_147 : f32 to vector<2x128xf32>
    %524 = arith.addf %523, %522 : vector<2x128xf32>
    %525 = arith.divf %523, %524 : vector<2x128xf32>
    %526 = vector.extract_strided_slice %505 {offsets = [0, 128], sizes = [2, 128], strides = [1, 1]} : vector<2x384xf32> to vector<2x128xf32>
    %527 = vector.extract_strided_slice %514 {offsets = [0, 128], sizes = [2, 128], strides = [1, 1]} : vector<2x384xf32> to vector<2x128xf32>
    %528 = arith.addf %526, %527 : vector<2x128xf32>
    %529 = arith.negf %528 : vector<2x128xf32>
    %530 = math.exp %529 : vector<2x128xf32>
    %cst_148 = arith.constant 1.000000e+00 : f32
    %531 = vector.broadcast %cst_148 : f32 to vector<2x128xf32>
    %532 = arith.addf %531, %530 : vector<2x128xf32>
    %533 = arith.divf %531, %532 : vector<2x128xf32>
    %534 = vector.extract_strided_slice %505 {offsets = [0, 256], sizes = [2, 128], strides = [1, 1]} : vector<2x384xf32> to vector<2x128xf32>
    %535 = vector.extract_strided_slice %514 {offsets = [0, 256], sizes = [2, 128], strides = [1, 1]} : vector<2x384xf32> to vector<2x128xf32>
    %536 = arith.mulf %525, %535 : vector<2x128xf32>
    %537 = arith.addf %534, %536 : vector<2x128xf32>
    %538 = math.tanh %537 : vector<2x128xf32>
    %cst_149 = arith.constant 1.000000e+00 : f32
    %539 = vector.broadcast %cst_149 : f32 to vector<2x128xf32>
    %540 = arith.subf %539, %533 : vector<2x128xf32>
    %541 = arith.mulf %540, %538 : vector<2x128xf32>
    %542 = arith.mulf %533, %463 : vector<2x128xf32>
    %543 = arith.addf %541, %542 : vector<2x128xf32>
    %544 = vector.extract_strided_slice %511 {offsets = [0, 0], sizes = [2, 128], strides = [1, 1]} : vector<2x384xf32> to vector<2x128xf32>
    %545 = vector.extract_strided_slice %517 {offsets = [0, 0], sizes = [2, 128], strides = [1, 1]} : vector<2x384xf32> to vector<2x128xf32>
    %546 = arith.addf %544, %545 : vector<2x128xf32>
    %547 = arith.negf %546 : vector<2x128xf32>
    %548 = math.exp %547 : vector<2x128xf32>
    %cst_150 = arith.constant 1.000000e+00 : f32
    %549 = vector.broadcast %cst_150 : f32 to vector<2x128xf32>
    %550 = arith.addf %549, %548 : vector<2x128xf32>
    %551 = arith.divf %549, %550 : vector<2x128xf32>
    %552 = vector.extract_strided_slice %511 {offsets = [0, 128], sizes = [2, 128], strides = [1, 1]} : vector<2x384xf32> to vector<2x128xf32>
    %553 = vector.extract_strided_slice %517 {offsets = [0, 128], sizes = [2, 128], strides = [1, 1]} : vector<2x384xf32> to vector<2x128xf32>
    %554 = arith.addf %552, %553 : vector<2x128xf32>
    %555 = arith.negf %554 : vector<2x128xf32>
    %556 = math.exp %555 : vector<2x128xf32>
    %cst_151 = arith.constant 1.000000e+00 : f32
    %557 = vector.broadcast %cst_151 : f32 to vector<2x128xf32>
    %558 = arith.addf %557, %556 : vector<2x128xf32>
    %559 = arith.divf %557, %558 : vector<2x128xf32>
    %560 = vector.extract_strided_slice %511 {offsets = [0, 256], sizes = [2, 128], strides = [1, 1]} : vector<2x384xf32> to vector<2x128xf32>
    %561 = vector.extract_strided_slice %517 {offsets = [0, 256], sizes = [2, 128], strides = [1, 1]} : vector<2x384xf32> to vector<2x128xf32>
    %562 = arith.mulf %551, %561 : vector<2x128xf32>
    %563 = arith.addf %560, %562 : vector<2x128xf32>
    %564 = math.tanh %563 : vector<2x128xf32>
    %cst_152 = arith.constant 1.000000e+00 : f32
    %565 = vector.broadcast %cst_152 : f32 to vector<2x128xf32>
    %566 = arith.subf %565, %559 : vector<2x128xf32>
    %567 = arith.mulf %566, %564 : vector<2x128xf32>
    %568 = arith.mulf %559, %489 : vector<2x128xf32>
    %569 = arith.addf %567, %568 : vector<2x128xf32>
    %570 = arith.truncf %543 : vector<2x128xf32> to vector<2x128xbf16>
    %571 = arith.index_cast %c6_i32 : i32 to index
    %c0_153 = arith.constant 0 : index
    %c0_154 = arith.constant 0 : index
    %572 = vector.load %arg12[%571, %c0_153, %c0_154] : memref<8x2x128xbf16, #tpu.memory_space<vmem>>, vector<1x2x128xbf16>
    %573 = vector.shape_cast %572 : vector<1x2x128xbf16> to vector<2x128xbf16>
    %574 = vector.shape_cast %570 : vector<2x128xbf16> to vector<1x2x128xbf16>
    tpu.vector_store %arg12[%571, %c0_153, %c0_154], %574 {strides = array<i32>} : memref<8x2x128xbf16, #tpu.memory_space<vmem>>, vector<1x2x128xbf16>,
    %575 = arith.truncf %569 : vector<2x128xf32> to vector<2x128xbf16>
    %c7_i32_155 = arith.constant 7 : i32
    %576 = arith.subi %c7_i32_155, %c6_i32 : i32
    %577 = arith.index_cast %576 : i32 to index
    %c0_156 = arith.constant 0 : index
    %c0_157 = arith.constant 0 : index
    %578 = vector.load %arg13[%577, %c0_156, %c0_157] : memref<8x2x128xbf16, #tpu.memory_space<vmem>>, vector<1x2x128xbf16>
    %579 = vector.shape_cast %578 : vector<1x2x128xbf16> to vector<2x128xbf16>
    %580 = vector.shape_cast %575 : vector<2x128xbf16> to vector<1x2x128xbf16>
    tpu.vector_store %arg13[%577, %c0_156, %c0_157], %580 {strides = array<i32>} : memref<8x2x128xbf16, #tpu.memory_space<vmem>>, vector<1x2x128xbf16>,
    %c7_i32_158 = arith.constant 7 : i32
    %581 = arith.index_cast %c7_i32_158 : i32 to index
    %c0_159 = arith.constant 0 : index
    %c0_160 = arith.constant 0 : index
    %582 = vector.load %arg1[%581, %c0_159, %c0_160] : memref<8x2x32xbf16, #tpu.memory_space<vmem>>, vector<1x2x32xbf16>
    %583 = vector.shape_cast %582 : vector<1x2x32xbf16> to vector<2x32xbf16>
    %cst_161 = arith.constant dense<0.000000e+00> : vector<2x384xf32>
    %584 = tpu.matmul %583, %3, %cst_161 {dimension_numbers = #tpu.dot_dimension_numbers<[1], [0], [0], [1], [0, 0, 1, 1], [], []>} : vector<2x32xbf16>, vector<32x384xbf16>, vector<2x384xf32> -> vector<2x384xf32>
    %585 = arith.addf %584, %9 : vector<2x384xf32>
    %c7_i32_162 = arith.constant 7 : i32
    %586 = arith.subi %c7_i32_162, %c7_i32_158 : i32
    %587 = arith.index_cast %586 : i32 to index
    %c0_163 = arith.constant 0 : index
    %c0_164 = arith.constant 0 : index
    %588 = vector.load %arg2[%587, %c0_163, %c0_164] : memref<8x2x32xbf16, #tpu.memory_space<vmem>>, vector<1x2x32xbf16>
    %589 = vector.shape_cast %588 : vector<1x2x32xbf16> to vector<2x32xbf16>
    %cst_165 = arith.constant dense<0.000000e+00> : vector<2x384xf32>
    %590 = tpu.matmul %589, %4, %cst_165 {dimension_numbers = #tpu.dot_dimension_numbers<[1], [0], [0], [1], [0, 0, 1, 1], [], []>} : vector<2x32xbf16>, vector<32x384xbf16>, vector<2x384xf32> -> vector<2x384xf32>
    %591 = arith.addf %590, %12 : vector<2x384xf32>
    %592 = arith.truncf %543 : vector<2x128xf32> to vector<2x128xbf16>
    %cst_166 = arith.constant dense<0.000000e+00> : vector<2x384xf32>
    %593 = tpu.matmul %592, %5, %cst_166 {dimension_numbers = #tpu.dot_dimension_numbers<[1], [0], [0], [1], [0, 0, 1, 1], [], []>} : vector<2x128xbf16>, vector<128x384xbf16>, vector<2x384xf32> -> vector<2x384xf32>
    %594 = arith.addf %593, %15 : vector<2x384xf32>
    %595 = arith.truncf %569 : vector<2x128xf32> to vector<2x128xbf16>
    %cst_167 = arith.constant dense<0.000000e+00> : vector<2x384xf32>
    %596 = tpu.matmul %595, %6, %cst_167 {dimension_numbers = #tpu.dot_dimension_numbers<[1], [0], [0], [1], [0, 0, 1, 1], [], []>} : vector<2x128xbf16>, vector<128x384xbf16>, vector<2x384xf32> -> vector<2x384xf32>
    %597 = arith.addf %596, %18 : vector<2x384xf32>
    %598 = vector.extract_strided_slice %585 {offsets = [0, 0], sizes = [2, 128], strides = [1, 1]} : vector<2x384xf32> to vector<2x128xf32>
    %599 = vector.extract_strided_slice %594 {offsets = [0, 0], sizes = [2, 128], strides = [1, 1]} : vector<2x384xf32> to vector<2x128xf32>
    %600 = arith.addf %598, %599 : vector<2x128xf32>
    %601 = arith.negf %600 : vector<2x128xf32>
    %602 = math.exp %601 : vector<2x128xf32>
    %cst_168 = arith.constant 1.000000e+00 : f32
    %603 = vector.broadcast %cst_168 : f32 to vector<2x128xf32>
    %604 = arith.addf %603, %602 : vector<2x128xf32>
    %605 = arith.divf %603, %604 : vector<2x128xf32>
    %606 = vector.extract_strided_slice %585 {offsets = [0, 128], sizes = [2, 128], strides = [1, 1]} : vector<2x384xf32> to vector<2x128xf32>
    %607 = vector.extract_strided_slice %594 {offsets = [0, 128], sizes = [2, 128], strides = [1, 1]} : vector<2x384xf32> to vector<2x128xf32>
    %608 = arith.addf %606, %607 : vector<2x128xf32>
    %609 = arith.negf %608 : vector<2x128xf32>
    %610 = math.exp %609 : vector<2x128xf32>
    %cst_169 = arith.constant 1.000000e+00 : f32
    %611 = vector.broadcast %cst_169 : f32 to vector<2x128xf32>
    %612 = arith.addf %611, %610 : vector<2x128xf32>
    %613 = arith.divf %611, %612 : vector<2x128xf32>
    %614 = vector.extract_strided_slice %585 {offsets = [0, 256], sizes = [2, 128], strides = [1, 1]} : vector<2x384xf32> to vector<2x128xf32>
    %615 = vector.extract_strided_slice %594 {offsets = [0, 256], sizes = [2, 128], strides = [1, 1]} : vector<2x384xf32> to vector<2x128xf32>
    %616 = arith.mulf %605, %615 : vector<2x128xf32>
    %617 = arith.addf %614, %616 : vector<2x128xf32>
    %618 = math.tanh %617 : vector<2x128xf32>
    %cst_170 = arith.constant 1.000000e+00 : f32
    %619 = vector.broadcast %cst_170 : f32 to vector<2x128xf32>
    %620 = arith.subf %619, %613 : vector<2x128xf32>
    %621 = arith.mulf %620, %618 : vector<2x128xf32>
    %622 = arith.mulf %613, %543 : vector<2x128xf32>
    %623 = arith.addf %621, %622 : vector<2x128xf32>
    %624 = vector.extract_strided_slice %591 {offsets = [0, 0], sizes = [2, 128], strides = [1, 1]} : vector<2x384xf32> to vector<2x128xf32>
    %625 = vector.extract_strided_slice %597 {offsets = [0, 0], sizes = [2, 128], strides = [1, 1]} : vector<2x384xf32> to vector<2x128xf32>
    %626 = arith.addf %624, %625 : vector<2x128xf32>
    %627 = arith.negf %626 : vector<2x128xf32>
    %628 = math.exp %627 : vector<2x128xf32>
    %cst_171 = arith.constant 1.000000e+00 : f32
    %629 = vector.broadcast %cst_171 : f32 to vector<2x128xf32>
    %630 = arith.addf %629, %628 : vector<2x128xf32>
    %631 = arith.divf %629, %630 : vector<2x128xf32>
    %632 = vector.extract_strided_slice %591 {offsets = [0, 128], sizes = [2, 128], strides = [1, 1]} : vector<2x384xf32> to vector<2x128xf32>
    %633 = vector.extract_strided_slice %597 {offsets = [0, 128], sizes = [2, 128], strides = [1, 1]} : vector<2x384xf32> to vector<2x128xf32>
    %634 = arith.addf %632, %633 : vector<2x128xf32>
    %635 = arith.negf %634 : vector<2x128xf32>
    %636 = math.exp %635 : vector<2x128xf32>
    %cst_172 = arith.constant 1.000000e+00 : f32
    %637 = vector.broadcast %cst_172 : f32 to vector<2x128xf32>
    %638 = arith.addf %637, %636 : vector<2x128xf32>
    %639 = arith.divf %637, %638 : vector<2x128xf32>
    %640 = vector.extract_strided_slice %591 {offsets = [0, 256], sizes = [2, 128], strides = [1, 1]} : vector<2x384xf32> to vector<2x128xf32>
    %641 = vector.extract_strided_slice %597 {offsets = [0, 256], sizes = [2, 128], strides = [1, 1]} : vector<2x384xf32> to vector<2x128xf32>
    %642 = arith.mulf %631, %641 : vector<2x128xf32>
    %643 = arith.addf %640, %642 : vector<2x128xf32>
    %644 = math.tanh %643 : vector<2x128xf32>
    %cst_173 = arith.constant 1.000000e+00 : f32
    %645 = vector.broadcast %cst_173 : f32 to vector<2x128xf32>
    %646 = arith.subf %645, %639 : vector<2x128xf32>
    %647 = arith.mulf %646, %644 : vector<2x128xf32>
    %648 = arith.mulf %639, %569 : vector<2x128xf32>
    %649 = arith.addf %647, %648 : vector<2x128xf32>
    %650 = arith.truncf %623 : vector<2x128xf32> to vector<2x128xbf16>
    %651 = arith.index_cast %c7_i32_158 : i32 to index
    %c0_174 = arith.constant 0 : index
    %c0_175 = arith.constant 0 : index
    %652 = vector.load %arg12[%651, %c0_174, %c0_175] : memref<8x2x128xbf16, #tpu.memory_space<vmem>>, vector<1x2x128xbf16>
    %653 = vector.shape_cast %652 : vector<1x2x128xbf16> to vector<2x128xbf16>
    %654 = vector.shape_cast %650 : vector<2x128xbf16> to vector<1x2x128xbf16>
    tpu.vector_store %arg12[%651, %c0_174, %c0_175], %654 {strides = array<i32>} : memref<8x2x128xbf16, #tpu.memory_space<vmem>>, vector<1x2x128xbf16>,
    %655 = arith.truncf %649 : vector<2x128xf32> to vector<2x128xbf16>
    %c7_i32_176 = arith.constant 7 : i32
    %656 = arith.subi %c7_i32_176, %c7_i32_158 : i32
    %657 = arith.index_cast %656 : i32 to index
    %c0_177 = arith.constant 0 : index
    %c0_178 = arith.constant 0 : index
    %658 = vector.load %arg13[%657, %c0_177, %c0_178] : memref<8x2x128xbf16, #tpu.memory_space<vmem>>, vector<1x2x128xbf16>
    %659 = vector.shape_cast %658 : vector<1x2x128xbf16> to vector<2x128xbf16>
    %660 = vector.shape_cast %655 : vector<2x128xbf16> to vector<1x2x128xbf16>
    tpu.vector_store %arg13[%657, %c0_177, %c0_178], %660 {strides = array<i32>} : memref<8x2x128xbf16, #tpu.memory_space<vmem>>, vector<1x2x128xbf16>,
    %c8_i32 = arith.constant 8 : i32
    %c0_179 = arith.constant 0 : index
    %c0_180 = arith.constant 0 : index
    %661 = vector.load %arg15[%c0_179, %c0_180] : memref<2x256xf32, #tpu.memory_space<vmem>>, vector<2x128xf32>
    tpu.vector_store %arg15[%c0_179, %c0_180], %623 {strides = array<i32>} : memref<2x256xf32, #tpu.memory_space<vmem>>, vector<2x128xf32>,
    %c0_181 = arith.constant 0 : index
    %c128_182 = arith.constant 128 : index
    %662 = vector.load %arg15[%c0_181, %c128_182] : memref<2x256xf32, #tpu.memory_space<vmem>>, vector<2x128xf32>
    tpu.vector_store %arg15[%c0_181, %c128_182], %649 {strides = array<i32>} : memref<2x256xf32, #tpu.memory_space<vmem>>, vector<2x128xf32>,
    %c0_i32_183 = arith.constant 0 : i32
    %663 = arith.cmpi eq, %arg0, %c0_i32_183 : i32
    %664 = arith.extui %663 : i1 to i32
    %c0_i32_184 = arith.constant 0 : i32
    %665 = arith.cmpi ne, %664, %c0_i32_184 : i32
    scf.if %665 {
      %c0_185 = arith.constant 0 : index
      %c0_186 = arith.constant 0 : index
      %666 = vector.load %arg14[%c0_185, %c0_186] : memref<2x256xf32, #tpu.memory_space<vmem>>, vector<2x128xf32>
      tpu.vector_store %arg14[%c0_185, %c0_186], %623 {strides = array<i32>} : memref<2x256xf32, #tpu.memory_space<vmem>>, vector<2x128xf32>,
      %c0_187 = arith.constant 0 : index
      %c128_188 = arith.constant 128 : index
      %667 = vector.load %arg14[%c0_187, %c128_188] : memref<2x256xf32, #tpu.memory_space<vmem>>, vector<2x128xf32>
      tpu.vector_store %arg14[%c0_187, %c128_188], %649 {strides = array<i32>} : memref<2x256xf32, #tpu.memory_space<vmem>>, vector<2x128xf32>,
    } else {
    }
    return
  }
  func.func @transform_0(%arg0: i32) -> (i32, i32, i32) {
    %c0_i32 = arith.constant 0 : i32
    %c0_i32_0 = arith.constant 0 : i32
    %c0_i32_1 = arith.constant 0 : i32
    return %arg0, %c0_i32, %c0_i32_0 : i32, i32, i32
  }
  func.func @transform_1(%arg0: i32) -> (i32, i32, i32) {
    %c0_i32 = arith.constant 0 : i32
    %0 = arith.subi %c0_i32, %arg0 : i32
    %c0_i32_0 = arith.constant 0 : i32
    %c0_i32_1 = arith.constant 0 : i32
    %c0_i32_2 = arith.constant 0 : i32
    return %0, %c0_i32_0, %c0_i32_1 : i32, i32, i32
  }
  func.func @transform_2(%arg0: i32) -> (i32, i32) {
    %c0_i32 = arith.constant 0 : i32
    %c0_i32_0 = arith.constant 0 : i32
    %c0_i32_1 = arith.constant 0 : i32
    return %c0_i32, %c0_i32_0 : i32, i32
  }
  func.func @transform_3(%arg0: i32) -> (i32, i32) {
    %c0_i32 = arith.constant 0 : i32
    %c0_i32_0 = arith.constant 0 : i32
    %c0_i32_1 = arith.constant 0 : i32
    return %c0_i32, %c0_i32_0 : i32, i32
  }
  func.func @transform_4(%arg0: i32) -> (i32, i32) {
    %c0_i32 = arith.constant 0 : i32
    %c0_i32_0 = arith.constant 0 : i32
    %c0_i32_1 = arith.constant 0 : i32
    return %c0_i32, %c0_i32_0 : i32, i32
  }
  func.func @transform_5(%arg0: i32) -> (i32, i32) {
    %c0_i32 = arith.constant 0 : i32
    %c0_i32_0 = arith.constant 0 : i32
    %c0_i32_1 = arith.constant 0 : i32
    return %c0_i32, %c0_i32_0 : i32, i32
  }
  func.func @transform_6(%arg0: i32) -> (i32, i32) {
    %c0_i32 = arith.constant 0 : i32
    %c0_i32_0 = arith.constant 0 : i32
    %c0_i32_1 = arith.constant 0 : i32
    return %c0_i32, %c0_i32_0 : i32, i32
  }
  func.func @transform_7(%arg0: i32) -> (i32, i32) {
    %c0_i32 = arith.constant 0 : i32
    %c0_i32_0 = arith.constant 0 : i32
    %c0_i32_1 = arith.constant 0 : i32
    return %c0_i32, %c0_i32_0 : i32, i32
  }
  func.func @transform_8(%arg0: i32) -> (i32, i32) {
    %c0_i32 = arith.constant 0 : i32
    %c0_i32_0 = arith.constant 0 : i32
    %c0_i32_1 = arith.constant 0 : i32
    return %c0_i32, %c0_i32_0 : i32, i32
  }
  func.func @transform_9(%arg0: i32) -> (i32, i32) {
    %c0_i32 = arith.constant 0 : i32
    %c0_i32_0 = arith.constant 0 : i32
    %c0_i32_1 = arith.constant 0 : i32
    return %c0_i32, %c0_i32_0 : i32, i32
  }
  func.func @transform_10(%arg0: i32) -> (i32, i32) {
    %c0_i32 = arith.constant 0 : i32
    %c0_i32_0 = arith.constant 0 : i32
    %c0_i32_1 = arith.constant 0 : i32
    return %c0_i32, %c0_i32_0 : i32, i32
  }
  func.func @transform_11(%arg0: i32) -> (i32, i32, i32) {
    %c0_i32 = arith.constant 0 : i32
    %c0_i32_0 = arith.constant 0 : i32
    %c0_i32_1 = arith.constant 0 : i32
    return %arg0, %c0_i32, %c0_i32_0 : i32, i32, i32
  }
  func.func @transform_12(%arg0: i32) -> (i32, i32, i32) {
    %c0_i32 = arith.constant 0 : i32
    %0 = arith.subi %c0_i32, %arg0 : i32
    %c0_i32_0 = arith.constant 0 : i32
    %c0_i32_1 = arith.constant 0 : i32
    %c0_i32_2 = arith.constant 0 : i32
    return %0, %c0_i32_0, %c0_i32_1 : i32, i32, i32
  }
  func.func @transform_13(%arg0: i32) -> (i32, i32) {
    %c0_i32 = arith.constant 0 : i32
    %c0_i32_0 = arith.constant 0 : i32
    %c0_i32_1 = arith.constant 0 : i32
    return %c0_i32, %c0_i32_0 : i32, i32
  }
}

module attributes {stable_mosaic.version = 11 : i64} {
  func.func @bigru_chunk_kernel(%arg0: i32, %arg1: memref<8x2x32xbf16, #tpu.memory_space<vmem>>, %arg2: memref<8x2x32xbf16, #tpu.memory_space<vmem>>, %arg3: memref<2x256xf32, #tpu.memory_space<vmem>>, %arg4: memref<32x384xbf16, #tpu.memory_space<vmem>>, %arg5: memref<32x384xbf16, #tpu.memory_space<vmem>>, %arg6: memref<1x384xf32, #tpu.memory_space<vmem>>, %arg7: memref<1x384xf32, #tpu.memory_space<vmem>>, %arg8: memref<128x384xbf16, #tpu.memory_space<vmem>>, %arg9: memref<128x384xbf16, #tpu.memory_space<vmem>>, %arg10: memref<1x384xf32, #tpu.memory_space<vmem>>, %arg11: memref<1x384xf32, #tpu.memory_space<vmem>>, %arg12: memref<8x2x128xbf16, #tpu.memory_space<vmem>>, %arg13: memref<8x2x128xbf16, #tpu.memory_space<vmem>>, %arg14: memref<2x256xf32, #tpu.memory_space<vmem>>, %arg15: memref<2x256xf32, #tpu.memory_space<vmem>>) attributes {dimension_semantics = [#tpu.dimension_semantics<arbitrary>], iteration_bounds = array<i64: 1>, scalar_prefetch = 0 : i64, scratch_operands = 1 : i64, tpu.core_type = #tpu.core_type<tc>, window_params = [{transform_indices = @transform_0, window_bounds = array<i64: 8, 2, 32>}, {transform_indices = @transform_1, window_bounds = array<i64: 8, 2, 32>}, {pipeline_mode = #tpu.pipeline_mode<synchronous>, transform_indices = @transform_2, window_bounds = array<i64: 2, 256>}, {pipeline_mode = #tpu.pipeline_mode<synchronous>, transform_indices = @transform_3, window_bounds = array<i64: 32, 384>}, {pipeline_mode = #tpu.pipeline_mode<synchronous>, transform_indices = @transform_4, window_bounds = array<i64: 32, 384>}, {pipeline_mode = #tpu.pipeline_mode<synchronous>, transform_indices = @transform_5, window_bounds = array<i64: 1, 384>}, {pipeline_mode = #tpu.pipeline_mode<synchronous>, transform_indices = @transform_6, window_bounds = array<i64: 1, 384>}, {pipeline_mode = #tpu.pipeline_mode<synchronous>, transform_indices = @transform_7, window_bounds = array<i64: 128, 384>}, {pipeline_mode = #tpu.pipeline_mode<synchronous>, transform_indices = @transform_8, window_bounds = array<i64: 128, 384>}, {pipeline_mode = #tpu.pipeline_mode<synchronous>, transform_indices = @transform_9, window_bounds = array<i64: 1, 384>}, {pipeline_mode = #tpu.pipeline_mode<synchronous>, transform_indices = @transform_10, window_bounds = array<i64: 1, 384>}, {transform_indices = @transform_11, window_bounds = array<i64: 8, 2, 128>}, {transform_indices = @transform_12, window_bounds = array<i64: 8, 2, 128>}, {pipeline_mode = #tpu.pipeline_mode<synchronous>, transform_indices = @transform_13, window_bounds = array<i64: 2, 256>}]} {
    %c0_i32 = arith.constant 0 : i32
    %0 = arith.cmpi eq, %arg0, %c0_i32 : i32
    %1 = arith.extui %0 : i1 to i32
    %c0_i32_0 = arith.constant 0 : i32
    %2 = arith.cmpi ne, %1, %c0_i32_0 : i32
    scf.if %2 {
      %c0_185 = arith.constant 0 : index
      %c0_186 = arith.constant 0 : index
      %666 = vector.load %arg3[%c0_185, %c0_186] : memref<2x256xf32, #tpu.memory_space<vmem>>, vector<2x256xf32>
      %c0_187 = arith.constant 0 : index
      %c0_188 = arith.constant 0 : index
      %667 = vector.load %arg15[%c0_187, %c0_188] : memref<2x256xf32, #tpu.memory_space<vmem>>, vector<2x256xf32>
      tpu.vector_store %arg15[%c0_187, %c0_188], %666 {strides = array<i32>} : memref<2x256xf32, #tpu.memory_space<vmem>>, vector<2x256xf32>,
    } else {
    }
    %c0 = arith.constant 0 : index
    %c0_1 = arith.constant 0 : index
    %3 = vector.load %arg4[%c0, %c0_1] : memref<32x384xbf16, #tpu.memory_space<vmem>>, vector<32x384xbf16>
    %c0_2 = arith.constant 0 : index
    %c0_3 = arith.constant 0 : index
    %4 = vector.load %arg5[%c0_2, %c0_3] : memref<32x384xbf16, #tpu.memory_space<vmem>>, vector<32x384xbf16>
    %c0_4 = arith.constant 0 : index
    %c0_5 = arith.constant 0 : index
    %5 = vector.load %arg8[%c0_4, %c0_5] : memref<128x384xbf16, #tpu.memory_space<vmem>>, vector<128x384xbf16>
    %c0_6 = arith.constant 0 : index
    %c0_7 = arith.constant 0 : index
    %6 = vector.load %arg9[%c0_6, %c0_7] : memref<128x384xbf16, #tpu.memory_space<vmem>>, vector<128x384xbf16>
    %c0_8 = arith.constant 0 : index
    %c0_9 = arith.constant 0 : index
    %7 = vector.load %arg6[%c0_8, %c0_9] : memref<1x384xf32, #tpu.memory_space<vmem>>, vector<1x384xf32>
    %8 = vector.shape_cast %7 : vector<1x384xf32> to vector<1x384xf32>
    %9 = vector.broadcast %8 : vector<1x384xf32> to vector<2x384xf32>
    %c0_10 = arith.constant 0 : index
    %c0_11 = arith.constant 0 : index
    %10 = vector.load %arg7[%c0_10, %c0_11] : memref<1x384xf32, #tpu.memory_space<vmem>>, vector<1x384xf32>
    %11 = vector.shape_cast %10 : vector<1x384xf32> to vector<1x384xf32>
    %12 = vector.broadcast %11 : vector<1x384xf32> to vector<2x384xf32>
    %c0_12 = arith.constant 0 : index
    %c0_13 = arith.constant 0 : index
    %13 = vector.load %arg10[%c0_12, %c0_13] : memref<1x384xf32, #tpu.memory_space<vmem>>, vector<1x384xf32>
    %14 = vector.shape_cast %13 : vector<1x384xf32> to vector<1x384xf32>
    %15 = vector.broadcast %14 : vector<1x384xf32> to vector<2x384xf32>
    %c0_14 = arith.constant 0 : index
    %c0_15 = arith.constant 0 : index
    %16 = vector.load %arg11[%c0_14, %c0_15] : memref<1x384xf32, #tpu.memory_space<vmem>>, vector<1x384xf32>
    %17 = vector.shape_cast %16 : vector<1x384xf32> to vector<1x384xf32>
    %18 = vector.broadcast %17 : vector<1x384xf32> to vector<2x384xf32>
    %c0_16 = arith.constant 0 : index
    %c0_17 = arith.constant 0 : index
    %19 = vector.load %arg15[%c0_16, %c0_17] : memref<2x256xf32, #tpu.memory_space<vmem>>, vector<2x128xf32>
    %c0_18 = arith.constant 0 : index
    %c128 = arith.constant 128 : index
    %20 = vector.load %arg15[%c0_18, %c128] : memref<2x256xf32, #tpu.memory_space<vmem>>, vector<2x128xf32>
    %c0_i32_19 = arith.constant 0 : i32
    %21 = arith.index_cast %c0_i32_19 : i32 to index
    %c0_20 = arith.constant 0 : index
    %c0_21 = arith.constant 0 : index
    %22 = vector.load %arg1[%21, %c0_20, %c0_21] : memref<8x2x32xbf16, #tpu.memory_space<vmem>>, vector<1x2x32xbf16>
    %23 = vector.shape_cast %22 : vector<1x2x32xbf16> to vector<2x32xbf16>
    %cst = arith.constant dense<0.000000e+00> : vector<2x384xf32>
    %24 = tpu.matmul %23, %3, %cst {dimension_numbers = #tpu.dot_dimension_numbers<[1], [0], [0], [1], [0, 0, 1, 1], [], []>} : vector<2x32xbf16>, vector<32x384xbf16>, vector<2x384xf32> -> vector<2x384xf32>
    %25 = arith.addf %24, %9 : vector<2x384xf32>
    %c7_i32 = arith.constant 7 : i32
    %26 = arith.subi %c7_i32, %c0_i32_19 : i32
    %27 = arith.index_cast %26 : i32 to index
    %c0_22 = arith.constant 0 : index
    %c0_23 = arith.constant 0 : index
    %28 = vector.load %arg2[%27, %c0_22, %c0_23] : memref<8x2x32xbf16, #tpu.memory_space<vmem>>, vector<1x2x32xbf16>
    %29 = vector.shape_cast %28 : vector<1x2x32xbf16> to vector<2x32xbf16>
    %cst_24 = arith.constant dense<0.000000e+00> : vector<2x384xf32>
    %30 = tpu.matmul %29, %4, %cst_24 {dimension_numbers = #tpu.dot_dimension_numbers<[1], [0], [0], [1], [0, 0, 1, 1], [], []>} : vector<2x32xbf16>, vector<32x384xbf16>, vector<2x384xf32> -> vector<2x384xf32>
    %31 = arith.addf %30, %12 : vector<2x384xf32>
    %32 = arith.truncf %19 : vector<2x128xf32> to vector<2x128xbf16>
    %cst_25 = arith.constant dense<0.000000e+00> : vector<2x384xf32>
    %33 = tpu.matmul %32, %5, %cst_25 {dimension_numbers = #tpu.dot_dimension_numbers<[1], [0], [0], [1], [0, 0, 1, 1], [], []>} : vector<2x128xbf16>, vector<128x384xbf16>, vector<2x384xf32> -> vector<2x384xf32>
    %34 = arith.addf %33, %15 : vector<2x384xf32>
    %35 = arith.truncf %20 : vector<2x128xf32> to vector<2x128xbf16>
    %cst_26 = arith.constant dense<0.000000e+00> : vector<2x384xf32>
    %36 = tpu.matmul %35, %6, %cst_26 {dimension_numbers = #tpu.dot_dimension_numbers<[1], [0], [0], [1], [0, 0, 1, 1], [], []>} : vector<2x128xbf16>, vector<128x384xbf16>, vector<2x384xf32> -> vector<2x384xf32>
    %37 = arith.addf %36, %18 : vector<2x384xf32>
    %38 = vector.extract_strided_slice %25 {offsets = [0, 0], sizes = [2, 128], strides = [1, 1]} : vector<2x384xf32> to vector<2x128xf32>
    %39 = vector.extract_strided_slice %34 {offsets = [0, 0], sizes = [2, 128], strides = [1, 1]} : vector<2x384xf32> to vector<2x128xf32>
    %40 = arith.addf %38, %39 : vector<2x128xf32>
    %41 = arith.negf %40 : vector<2x128xf32>
    %42 = math.exp %41 : vector<2x128xf32>
    %cst_27 = arith.constant 1.000000e+00 : f32
    %43 = vector.broadcast %cst_27 : f32 to vector<2x128xf32>
    %44 = arith.addf %43, %42 : vector<2x128xf32>
    %45 = arith.divf %43, %44 : vector<2x128xf32>
    %46 = vector.extract_strided_slice %25 {offsets = [0, 128], sizes = [2, 128], strides = [1, 1]} : vector<2x384xf32> to vector<2x128xf32>
    %47 = vector.extract_strided_slice %34 {offsets = [0, 128], sizes = [2, 128], strides = [1, 1]} : vector<2x384xf32> to vector<2x128xf32>
    %48 = arith.addf %46, %47 : vector<2x128xf32>
    %49 = arith.negf %48 : vector<2x128xf32>
    %50 = math.exp %49 : vector<2x128xf32>
    %cst_28 = arith.constant 1.000000e+00 : f32
    %51 = vector.broadcast %cst_28 : f32 to vector<2x128xf32>
    %52 = arith.addf %51, %50 : vector<2x128xf32>
    %53 = arith.divf %51, %52 : vector<2x128xf32>
    %54 = vector.extract_strided_slice %25 {offsets = [0, 256], sizes = [2, 128], strides = [1, 1]} : vector<2x384xf32> to vector<2x128xf32>
    %55 = vector.extract_strided_slice %34 {offsets = [0, 256], sizes = [2, 128], strides = [1, 1]} : vector<2x384xf32> to vector<2x128xf32>
    %56 = arith.mulf %45, %55 : vector<2x128xf32>
    %57 = arith.addf %54, %56 : vector<2x128xf32>
    %58 = math.tanh %57 : vector<2x128xf32>
    %cst_29 = arith.constant 1.000000e+00 : f32
    %59 = vector.broadcast %cst_29 : f32 to vector<2x128xf32>
    %60 = arith.subf %59, %53 : vector<2x128xf32>
    %61 = arith.mulf %60, %58 : vector<2x128xf32>
    %62 = arith.mulf %53, %19 : vector<2x128xf32>
    %63 = arith.addf %61, %62 : vector<2x128xf32>
    %64 = vector.extract_strided_slice %31 {offsets = [0, 0], sizes = [2, 128], strides = [1, 1]} : vector<2x384xf32> to vector<2x128xf32>
    %65 = vector.extract_strided_slice %37 {offsets = [0, 0], sizes = [2, 128], strides = [1, 1]} : vector<2x384xf32> to vector<2x128xf32>
    %66 = arith.addf %64, %65 : vector<2x128xf32>
    %67 = arith.negf %66 : vector<2x128xf32>
    %68 = math.exp %67 : vector<2x128xf32>
    %cst_30 = arith.constant 1.000000e+00 : f32
    %69 = vector.broadcast %cst_30 : f32 to vector<2x128xf32>
    %70 = arith.addf %69, %68 : vector<2x128xf32>
    %71 = arith.divf %69, %70 : vector<2x128xf32>
    %72 = vector.extract_strided_slice %31 {offsets = [0, 128], sizes = [2, 128], strides = [1, 1]} : vector<2x384xf32> to vector<2x128xf32>
    %73 = vector.extract_strided_slice %37 {offsets = [0, 128], sizes = [2, 128], strides = [1, 1]} : vector<2x384xf32> to vector<2x128xf32>
    %74 = arith.addf %72, %73 : vector<2x128xf32>
    %75 = arith.negf %74 : vector<2x128xf32>
    %76 = math.exp %75 : vector<2x128xf32>
    %cst_31 = arith.constant 1.000000e+00 : f32
    %77 = vector.broadcast %cst_31 : f32 to vector<2x128xf32>
    %78 = arith.addf %77, %76 : vector<2x128xf32>
    %79 = arith.divf %77, %78 : vector<2x128xf32>
    %80 = vector.extract_strided_slice %31 {offsets = [0, 256], sizes = [2, 128], strides = [1, 1]} : vector<2x384xf32> to vector<2x128xf32>
    %81 = vector.extract_strided_slice %37 {offsets = [0, 256], sizes = [2, 128], strides = [1, 1]} : vector<2x384xf32> to vector<2x128xf32>
    %82 = arith.mulf %71, %81 : vector<2x128xf32>
    %83 = arith.addf %80, %82 : vector<2x128xf32>
    %84 = math.tanh %83 : vector<2x128xf32>
    %cst_32 = arith.constant 1.000000e+00 : f32
    %85 = vector.broadcast %cst_32 : f32 to vector<2x128xf32>
    %86 = arith.subf %85, %79 : vector<2x128xf32>
    %87 = arith.mulf %86, %84 : vector<2x128xf32>
    %88 = arith.mulf %79, %20 : vector<2x128xf32>
    %89 = arith.addf %87, %88 : vector<2x128xf32>
    %90 = arith.truncf %63 : vector<2x128xf32> to vector<2x128xbf16>
    %91 = arith.index_cast %c0_i32_19 : i32 to index
    %c0_33 = arith.constant 0 : index
    %c0_34 = arith.constant 0 : index
    %92 = vector.load %arg12[%91, %c0_33, %c0_34] : memref<8x2x128xbf16, #tpu.memory_space<vmem>>, vector<1x2x128xbf16>
    %93 = vector.shape_cast %92 : vector<1x2x128xbf16> to vector<2x128xbf16>
    %94 = vector.shape_cast %90 : vector<2x128xbf16> to vector<1x2x128xbf16>
    tpu.vector_store %arg12[%91, %c0_33, %c0_34], %94 {strides = array<i32>} : memref<8x2x128xbf16, #tpu.memory_space<vmem>>, vector<1x2x128xbf16>,
    %95 = arith.truncf %89 : vector<2x128xf32> to vector<2x128xbf16>
    %c7_i32_35 = arith.constant 7 : i32
    %96 = arith.subi %c7_i32_35, %c0_i32_19 : i32
    %97 = arith.index_cast %96 : i32 to index
    %c0_36 = arith.constant 0 : index
    %c0_37 = arith.constant 0 : index
    %98 = vector.load %arg13[%97, %c0_36, %c0_37] : memref<8x2x128xbf16, #tpu.memory_space<vmem>>, vector<1x2x128xbf16>
    %99 = vector.shape_cast %98 : vector<1x2x128xbf16> to vector<2x128xbf16>
    %100 = vector.shape_cast %95 : vector<2x128xbf16> to vector<1x2x128xbf16>
    tpu.vector_store %arg13[%97, %c0_36, %c0_37], %100 {strides = array<i32>} : memref<8x2x128xbf16, #tpu.memory_space<vmem>>, vector<1x2x128xbf16>,
    %c1_i32 = arith.constant 1 : i32
    %101 = arith.index_cast %c1_i32 : i32 to index
    %c0_38 = arith.constant 0 : index
    %c0_39 = arith.constant 0 : index
    %102 = vector.load %arg1[%101, %c0_38, %c0_39] : memref<8x2x32xbf16, #tpu.memory_space<vmem>>, vector<1x2x32xbf16>
    %103 = vector.shape_cast %102 : vector<1x2x32xbf16> to vector<2x32xbf16>
    %cst_40 = arith.constant dense<0.000000e+00> : vector<2x384xf32>
    %104 = tpu.matmul %103, %3, %cst_40 {dimension_numbers = #tpu.dot_dimension_numbers<[1], [0], [0], [1], [0, 0, 1, 1], [], []>} : vector<2x32xbf16>, vector<32x384xbf16>, vector<2x384xf32> -> vector<2x384xf32>
    %105 = arith.addf %104, %9 : vector<2x384xf32>
    %c7_i32_41 = arith.constant 7 : i32
    %106 = arith.subi %c7_i32_41, %c1_i32 : i32
    %107 = arith.index_cast %106 : i32 to index
    %c0_42 = arith.constant 0 : index
    %c0_43 = arith.constant 0 : index
    %108 = vector.load %arg2[%107, %c0_42, %c0_43] : memref<8x2x32xbf16, #tpu.memory_space<vmem>>, vector<1x2x32xbf16>
    %109 = vector.shape_cast %108 : vector<1x2x32xbf16> to vector<2x32xbf16>
    %cst_44 = arith.constant dense<0.000000e+00> : vector<2x384xf32>
    %110 = tpu.matmul %109, %4, %cst_44 {dimension_numbers = #tpu.dot_dimension_numbers<[1], [0], [0], [1], [0, 0, 1, 1], [], []>} : vector<2x32xbf16>, vector<32x384xbf16>, vector<2x384xf32> -> vector<2x384xf32>
    %111 = arith.addf %110, %12 : vector<2x384xf32>
    %112 = arith.truncf %63 : vector<2x128xf32> to vector<2x128xbf16>
    %cst_45 = arith.constant dense<0.000000e+00> : vector<2x384xf32>
    %113 = tpu.matmul %112, %5, %cst_45 {dimension_numbers = #tpu.dot_dimension_numbers<[1], [0], [0], [1], [0, 0, 1, 1], [], []>} : vector<2x128xbf16>, vector<128x384xbf16>, vector<2x384xf32> -> vector<2x384xf32>
    %114 = arith.addf %113, %15 : vector<2x384xf32>
    %115 = arith.truncf %89 : vector<2x128xf32> to vector<2x128xbf16>
    %cst_46 = arith.constant dense<0.000000e+00> : vector<2x384xf32>
    %116 = tpu.matmul %115, %6, %cst_46 {dimension_numbers = #tpu.dot_dimension_numbers<[1], [0], [0], [1], [0, 0, 1, 1], [], []>} : vector<2x128xbf16>, vector<128x384xbf16>, vector<2x384xf32> -> vector<2x384xf32>
    %117 = arith.addf %116, %18 : vector<2x384xf32>
    %118 = vector.extract_strided_slice %105 {offsets = [0, 0], sizes = [2, 128], strides = [1, 1]} : vector<2x384xf32> to vector<2x128xf32>
    %119 = vector.extract_strided_slice %114 {offsets = [0, 0], sizes = [2, 128], strides = [1, 1]} : vector<2x384xf32> to vector<2x128xf32>
    %120 = arith.addf %118, %119 : vector<2x128xf32>
    %121 = arith.negf %120 : vector<2x128xf32>
    %122 = math.exp %121 : vector<2x128xf32>
    %cst_47 = arith.constant 1.000000e+00 : f32
    %123 = vector.broadcast %cst_47 : f32 to vector<2x128xf32>
    %124 = arith.addf %123, %122 : vector<2x128xf32>
    %125 = arith.divf %123, %124 : vector<2x128xf32>
    %126 = vector.extract_strided_slice %105 {offsets = [0, 128], sizes = [2, 128], strides = [1, 1]} : vector<2x384xf32> to vector<2x128xf32>
    %127 = vector.extract_strided_slice %114 {offsets = [0, 128], sizes = [2, 128], strides = [1, 1]} : vector<2x384xf32> to vector<2x128xf32>
    %128 = arith.addf %126, %127 : vector<2x128xf32>
    %129 = arith.negf %128 : vector<2x128xf32>
    %130 = math.exp %129 : vector<2x128xf32>
    %cst_48 = arith.constant 1.000000e+00 : f32
    %131 = vector.broadcast %cst_48 : f32 to vector<2x128xf32>
    %132 = arith.addf %131, %130 : vector<2x128xf32>
    %133 = arith.divf %131, %132 : vector<2x128xf32>
    %134 = vector.extract_strided_slice %105 {offsets = [0, 256], sizes = [2, 128], strides = [1, 1]} : vector<2x384xf32> to vector<2x128xf32>
    %135 = vector.extract_strided_slice %114 {offsets = [0, 256], sizes = [2, 128], strides = [1, 1]} : vector<2x384xf32> to vector<2x128xf32>
    %136 = arith.mulf %125, %135 : vector<2x128xf32>
    %137 = arith.addf %134, %136 : vector<2x128xf32>
    %138 = math.tanh %137 : vector<2x128xf32>
    %cst_49 = arith.constant 1.000000e+00 : f32
    %139 = vector.broadcast %cst_49 : f32 to vector<2x128xf32>
    %140 = arith.subf %139, %133 : vector<2x128xf32>
    %141 = arith.mulf %140, %138 : vector<2x128xf32>
    %142 = arith.mulf %133, %63 : vector<2x128xf32>
    %143 = arith.addf %141, %142 : vector<2x128xf32>
    %144 = vector.extract_strided_slice %111 {offsets = [0, 0], sizes = [2, 128], strides = [1, 1]} : vector<2x384xf32> to vector<2x128xf32>
    %145 = vector.extract_strided_slice %117 {offsets = [0, 0], sizes = [2, 128], strides = [1, 1]} : vector<2x384xf32> to vector<2x128xf32>
    %146 = arith.addf %144, %145 : vector<2x128xf32>
    %147 = arith.negf %146 : vector<2x128xf32>
    %148 = math.exp %147 : vector<2x128xf32>
    %cst_50 = arith.constant 1.000000e+00 : f32
    %149 = vector.broadcast %cst_50 : f32 to vector<2x128xf32>
    %150 = arith.addf %149, %148 : vector<2x128xf32>
    %151 = arith.divf %149, %150 : vector<2x128xf32>
    %152 = vector.extract_strided_slice %111 {offsets = [0, 128], sizes = [2, 128], strides = [1, 1]} : vector<2x384xf32> to vector<2x128xf32>
    %153 = vector.extract_strided_slice %117 {offsets = [0, 128], sizes = [2, 128], strides = [1, 1]} : vector<2x384xf32> to vector<2x128xf32>
    %154 = arith.addf %152, %153 : vector<2x128xf32>
    %155 = arith.negf %154 : vector<2x128xf32>
    %156 = math.exp %155 : vector<2x128xf32>
    %cst_51 = arith.constant 1.000000e+00 : f32
    %157 = vector.broadcast %cst_51 : f32 to vector<2x128xf32>
    %158 = arith.addf %157, %156 : vector<2x128xf32>
    %159 = arith.divf %157, %158 : vector<2x128xf32>
    %160 = vector.extract_strided_slice %111 {offsets = [0, 256], sizes = [2, 128], strides = [1, 1]} : vector<2x384xf32> to vector<2x128xf32>
    %161 = vector.extract_strided_slice %117 {offsets = [0, 256], sizes = [2, 128], strides = [1, 1]} : vector<2x384xf32> to vector<2x128xf32>
    %162 = arith.mulf %151, %161 : vector<2x128xf32>
    %163 = arith.addf %160, %162 : vector<2x128xf32>
    %164 = math.tanh %163 : vector<2x128xf32>
    %cst_52 = arith.constant 1.000000e+00 : f32
    %165 = vector.broadcast %cst_52 : f32 to vector<2x128xf32>
    %166 = arith.subf %165, %159 : vector<2x128xf32>
    %167 = arith.mulf %166, %164 : vector<2x128xf32>
    %168 = arith.mulf %159, %89 : vector<2x128xf32>
    %169 = arith.addf %167, %168 : vector<2x128xf32>
    %170 = arith.truncf %143 : vector<2x128xf32> to vector<2x128xbf16>
    %171 = arith.index_cast %c1_i32 : i32 to index
    %c0_53 = arith.constant 0 : index
    %c0_54 = arith.constant 0 : index
    %172 = vector.load %arg12[%171, %c0_53, %c0_54] : memref<8x2x128xbf16, #tpu.memory_space<vmem>>, vector<1x2x128xbf16>
    %173 = vector.shape_cast %172 : vector<1x2x128xbf16> to vector<2x128xbf16>
    %174 = vector.shape_cast %170 : vector<2x128xbf16> to vector<1x2x128xbf16>
    tpu.vector_store %arg12[%171, %c0_53, %c0_54], %174 {strides = array<i32>} : memref<8x2x128xbf16, #tpu.memory_space<vmem>>, vector<1x2x128xbf16>,
    %175 = arith.truncf %169 : vector<2x128xf32> to vector<2x128xbf16>
    %c7_i32_55 = arith.constant 7 : i32
    %176 = arith.subi %c7_i32_55, %c1_i32 : i32
    %177 = arith.index_cast %176 : i32 to index
    %c0_56 = arith.constant 0 : index
    %c0_57 = arith.constant 0 : index
    %178 = vector.load %arg13[%177, %c0_56, %c0_57] : memref<8x2x128xbf16, #tpu.memory_space<vmem>>, vector<1x2x128xbf16>
    %179 = vector.shape_cast %178 : vector<1x2x128xbf16> to vector<2x128xbf16>
    %180 = vector.shape_cast %175 : vector<2x128xbf16> to vector<1x2x128xbf16>
    tpu.vector_store %arg13[%177, %c0_56, %c0_57], %180 {strides = array<i32>} : memref<8x2x128xbf16, #tpu.memory_space<vmem>>, vector<1x2x128xbf16>,
    %c2_i32 = arith.constant 2 : i32
    %181 = arith.index_cast %c2_i32 : i32 to index
    %c0_58 = arith.constant 0 : index
    %c0_59 = arith.constant 0 : index
    %182 = vector.load %arg1[%181, %c0_58, %c0_59] : memref<8x2x32xbf16, #tpu.memory_space<vmem>>, vector<1x2x32xbf16>
    %183 = vector.shape_cast %182 : vector<1x2x32xbf16> to vector<2x32xbf16>
    %cst_60 = arith.constant dense<0.000000e+00> : vector<2x384xf32>
    %184 = tpu.matmul %183, %3, %cst_60 {dimension_numbers = #tpu.dot_dimension_numbers<[1], [0], [0], [1], [0, 0, 1, 1], [], []>} : vector<2x32xbf16>, vector<32x384xbf16>, vector<2x384xf32> -> vector<2x384xf32>
    %185 = arith.addf %184, %9 : vector<2x384xf32>
    %c7_i32_61 = arith.constant 7 : i32
    %186 = arith.subi %c7_i32_61, %c2_i32 : i32
    %187 = arith.index_cast %186 : i32 to index
    %c0_62 = arith.constant 0 : index
    %c0_63 = arith.constant 0 : index
    %188 = vector.load %arg2[%187, %c0_62, %c0_63] : memref<8x2x32xbf16, #tpu.memory_space<vmem>>, vector<1x2x32xbf16>
    %189 = vector.shape_cast %188 : vector<1x2x32xbf16> to vector<2x32xbf16>
    %cst_64 = arith.constant dense<0.000000e+00> : vector<2x384xf32>
    %190 = tpu.matmul %189, %4, %cst_64 {dimension_numbers = #tpu.dot_dimension_numbers<[1], [0], [0], [1], [0, 0, 1, 1], [], []>} : vector<2x32xbf16>, vector<32x384xbf16>, vector<2x384xf32> -> vector<2x384xf32>
    %191 = arith.addf %190, %12 : vector<2x384xf32>
    %192 = arith.truncf %143 : vector<2x128xf32> to vector<2x128xbf16>
    %cst_65 = arith.constant dense<0.000000e+00> : vector<2x384xf32>
    %193 = tpu.matmul %192, %5, %cst_65 {dimension_numbers = #tpu.dot_dimension_numbers<[1], [0], [0], [1], [0, 0, 1, 1], [], []>} : vector<2x128xbf16>, vector<128x384xbf16>, vector<2x384xf32> -> vector<2x384xf32>
    %194 = arith.addf %193, %15 : vector<2x384xf32>
    %195 = arith.truncf %169 : vector<2x128xf32> to vector<2x128xbf16>
    %cst_66 = arith.constant dense<0.000000e+00> : vector<2x384xf32>
    %196 = tpu.matmul %195, %6, %cst_66 {dimension_numbers = #tpu.dot_dimension_numbers<[1], [0], [0], [1], [0, 0, 1, 1], [], []>} : vector<2x128xbf16>, vector<128x384xbf16>, vector<2x384xf32> -> vector<2x384xf32>
    %197 = arith.addf %196, %18 : vector<2x384xf32>
    %198 = vector.extract_strided_slice %185 {offsets = [0, 0], sizes = [2, 128], strides = [1, 1]} : vector<2x384xf32> to vector<2x128xf32>
    %199 = vector.extract_strided_slice %194 {offsets = [0, 0], sizes = [2, 128], strides = [1, 1]} : vector<2x384xf32> to vector<2x128xf32>
    %200 = arith.addf %198, %199 : vector<2x128xf32>
    %201 = arith.negf %200 : vector<2x128xf32>
    %202 = math.exp %201 : vector<2x128xf32>
    %cst_67 = arith.constant 1.000000e+00 : f32
    %203 = vector.broadcast %cst_67 : f32 to vector<2x128xf32>
    %204 = arith.addf %203, %202 : vector<2x128xf32>
    %205 = arith.divf %203, %204 : vector<2x128xf32>
    %206 = vector.extract_strided_slice %185 {offsets = [0, 128], sizes = [2, 128], strides = [1, 1]} : vector<2x384xf32> to vector<2x128xf32>
    %207 = vector.extract_strided_slice %194 {offsets = [0, 128], sizes = [2, 128], strides = [1, 1]} : vector<2x384xf32> to vector<2x128xf32>
    %208 = arith.addf %206, %207 : vector<2x128xf32>
    %209 = arith.negf %208 : vector<2x128xf32>
    %210 = math.exp %209 : vector<2x128xf32>
    %cst_68 = arith.constant 1.000000e+00 : f32
    %211 = vector.broadcast %cst_68 : f32 to vector<2x128xf32>
    %212 = arith.addf %211, %210 : vector<2x128xf32>
    %213 = arith.divf %211, %212 : vector<2x128xf32>
    %214 = vector.extract_strided_slice %185 {offsets = [0, 256], sizes = [2, 128], strides = [1, 1]} : vector<2x384xf32> to vector<2x128xf32>
    %215 = vector.extract_strided_slice %194 {offsets = [0, 256], sizes = [2, 128], strides = [1, 1]} : vector<2x384xf32> to vector<2x128xf32>
    %216 = arith.mulf %205, %215 : vector<2x128xf32>
    %217 = arith.addf %214, %216 : vector<2x128xf32>
    %218 = math.tanh %217 : vector<2x128xf32>
    %cst_69 = arith.constant 1.000000e+00 : f32
    %219 = vector.broadcast %cst_69 : f32 to vector<2x128xf32>
    %220 = arith.subf %219, %213 : vector<2x128xf32>
    %221 = arith.mulf %220, %218 : vector<2x128xf32>
    %222 = arith.mulf %213, %143 : vector<2x128xf32>
    %223 = arith.addf %221, %222 : vector<2x128xf32>
    %224 = vector.extract_strided_slice %191 {offsets = [0, 0], sizes = [2, 128], strides = [1, 1]} : vector<2x384xf32> to vector<2x128xf32>
    %225 = vector.extract_strided_slice %197 {offsets = [0, 0], sizes = [2, 128], strides = [1, 1]} : vector<2x384xf32> to vector<2x128xf32>
    %226 = arith.addf %224, %225 : vector<2x128xf32>
    %227 = arith.negf %226 : vector<2x128xf32>
    %228 = math.exp %227 : vector<2x128xf32>
    %cst_70 = arith.constant 1.000000e+00 : f32
    %229 = vector.broadcast %cst_70 : f32 to vector<2x128xf32>
    %230 = arith.addf %229, %228 : vector<2x128xf32>
    %231 = arith.divf %229, %230 : vector<2x128xf32>
    %232 = vector.extract_strided_slice %191 {offsets = [0, 128], sizes = [2, 128], strides = [1, 1]} : vector<2x384xf32> to vector<2x128xf32>
    %233 = vector.extract_strided_slice %197 {offsets = [0, 128], sizes = [2, 128], strides = [1, 1]} : vector<2x384xf32> to vector<2x128xf32>
    %234 = arith.addf %232, %233 : vector<2x128xf32>
    %235 = arith.negf %234 : vector<2x128xf32>
    %236 = math.exp %235 : vector<2x128xf32>
    %cst_71 = arith.constant 1.000000e+00 : f32
    %237 = vector.broadcast %cst_71 : f32 to vector<2x128xf32>
    %238 = arith.addf %237, %236 : vector<2x128xf32>
    %239 = arith.divf %237, %238 : vector<2x128xf32>
    %240 = vector.extract_strided_slice %191 {offsets = [0, 256], sizes = [2, 128], strides = [1, 1]} : vector<2x384xf32> to vector<2x128xf32>
    %241 = vector.extract_strided_slice %197 {offsets = [0, 256], sizes = [2, 128], strides = [1, 1]} : vector<2x384xf32> to vector<2x128xf32>
    %242 = arith.mulf %231, %241 : vector<2x128xf32>
    %243 = arith.addf %240, %242 : vector<2x128xf32>
    %244 = math.tanh %243 : vector<2x128xf32>
    %cst_72 = arith.constant 1.000000e+00 : f32
    %245 = vector.broadcast %cst_72 : f32 to vector<2x128xf32>
    %246 = arith.subf %245, %239 : vector<2x128xf32>
    %247 = arith.mulf %246, %244 : vector<2x128xf32>
    %248 = arith.mulf %239, %169 : vector<2x128xf32>
    %249 = arith.addf %247, %248 : vector<2x128xf32>
    %250 = arith.truncf %223 : vector<2x128xf32> to vector<2x128xbf16>
    %251 = arith.index_cast %c2_i32 : i32 to index
    %c0_73 = arith.constant 0 : index
    %c0_74 = arith.constant 0 : index
    %252 = vector.load %arg12[%251, %c0_73, %c0_74] : memref<8x2x128xbf16, #tpu.memory_space<vmem>>, vector<1x2x128xbf16>
    %253 = vector.shape_cast %252 : vector<1x2x128xbf16> to vector<2x128xbf16>
    %254 = vector.shape_cast %250 : vector<2x128xbf16> to vector<1x2x128xbf16>
    tpu.vector_store %arg12[%251, %c0_73, %c0_74], %254 {strides = array<i32>} : memref<8x2x128xbf16, #tpu.memory_space<vmem>>, vector<1x2x128xbf16>,
    %255 = arith.truncf %249 : vector<2x128xf32> to vector<2x128xbf16>
    %c7_i32_75 = arith.constant 7 : i32
    %256 = arith.subi %c7_i32_75, %c2_i32 : i32
    %257 = arith.index_cast %256 : i32 to index
    %c0_76 = arith.constant 0 : index
    %c0_77 = arith.constant 0 : index
    %258 = vector.load %arg13[%257, %c0_76, %c0_77] : memref<8x2x128xbf16, #tpu.memory_space<vmem>>, vector<1x2x128xbf16>
    %259 = vector.shape_cast %258 : vector<1x2x128xbf16> to vector<2x128xbf16>
    %260 = vector.shape_cast %255 : vector<2x128xbf16> to vector<1x2x128xbf16>
    tpu.vector_store %arg13[%257, %c0_76, %c0_77], %260 {strides = array<i32>} : memref<8x2x128xbf16, #tpu.memory_space<vmem>>, vector<1x2x128xbf16>,
    %c3_i32 = arith.constant 3 : i32
    %261 = arith.index_cast %c3_i32 : i32 to index
    %c0_78 = arith.constant 0 : index
    %c0_79 = arith.constant 0 : index
    %262 = vector.load %arg1[%261, %c0_78, %c0_79] : memref<8x2x32xbf16, #tpu.memory_space<vmem>>, vector<1x2x32xbf16>
    %263 = vector.shape_cast %262 : vector<1x2x32xbf16> to vector<2x32xbf16>
    %cst_80 = arith.constant dense<0.000000e+00> : vector<2x384xf32>
    %264 = tpu.matmul %263, %3, %cst_80 {dimension_numbers = #tpu.dot_dimension_numbers<[1], [0], [0], [1], [0, 0, 1, 1], [], []>} : vector<2x32xbf16>, vector<32x384xbf16>, vector<2x384xf32> -> vector<2x384xf32>
    %265 = arith.addf %264, %9 : vector<2x384xf32>
    %c7_i32_81 = arith.constant 7 : i32
    %266 = arith.subi %c7_i32_81, %c3_i32 : i32
    %267 = arith.index_cast %266 : i32 to index
    %c0_82 = arith.constant 0 : index
    %c0_83 = arith.constant 0 : index
    %268 = vector.load %arg2[%267, %c0_82, %c0_83] : memref<8x2x32xbf16, #tpu.memory_space<vmem>>, vector<1x2x32xbf16>
    %269 = vector.shape_cast %268 : vector<1x2x32xbf16> to vector<2x32xbf16>
    %cst_84 = arith.constant dense<0.000000e+00> : vector<2x384xf32>
    %270 = tpu.matmul %269, %4, %cst_84 {dimension_numbers = #tpu.dot_dimension_numbers<[1], [0], [0], [1], [0, 0, 1, 1], [], []>} : vector<2x32xbf16>, vector<32x384xbf16>, vector<2x384xf32> -> vector<2x384xf32>
    %271 = arith.addf %270, %12 : vector<2x384xf32>
    %272 = arith.truncf %223 : vector<2x128xf32> to vector<2x128xbf16>
    %cst_85 = arith.constant dense<0.000000e+00> : vector<2x384xf32>
    %273 = tpu.matmul %272, %5, %cst_85 {dimension_numbers = #tpu.dot_dimension_numbers<[1], [0], [0], [1], [0, 0, 1, 1], [], []>} : vector<2x128xbf16>, vector<128x384xbf16>, vector<2x384xf32> -> vector<2x384xf32>
    %274 = arith.addf %273, %15 : vector<2x384xf32>
    %275 = arith.truncf %249 : vector<2x128xf32> to vector<2x128xbf16>
    %cst_86 = arith.constant dense<0.000000e+00> : vector<2x384xf32>
    %276 = tpu.matmul %275, %6, %cst_86 {dimension_numbers = #tpu.dot_dimension_numbers<[1], [0], [0], [1], [0, 0, 1, 1], [], []>} : vector<2x128xbf16>, vector<128x384xbf16>, vector<2x384xf32> -> vector<2x384xf32>
    %277 = arith.addf %276, %18 : vector<2x384xf32>
    %278 = vector.extract_strided_slice %265 {offsets = [0, 0], sizes = [2, 128], strides = [1, 1]} : vector<2x384xf32> to vector<2x128xf32>
    %279 = vector.extract_strided_slice %274 {offsets = [0, 0], sizes = [2, 128], strides = [1, 1]} : vector<2x384xf32> to vector<2x128xf32>
    %280 = arith.addf %278, %279 : vector<2x128xf32>
    %281 = arith.negf %280 : vector<2x128xf32>
    %282 = math.exp %281 : vector<2x128xf32>
    %cst_87 = arith.constant 1.000000e+00 : f32
    %283 = vector.broadcast %cst_87 : f32 to vector<2x128xf32>
    %284 = arith.addf %283, %282 : vector<2x128xf32>
    %285 = arith.divf %283, %284 : vector<2x128xf32>
    %286 = vector.extract_strided_slice %265 {offsets = [0, 128], sizes = [2, 128], strides = [1, 1]} : vector<2x384xf32> to vector<2x128xf32>
    %287 = vector.extract_strided_slice %274 {offsets = [0, 128], sizes = [2, 128], strides = [1, 1]} : vector<2x384xf32> to vector<2x128xf32>
    %288 = arith.addf %286, %287 : vector<2x128xf32>
    %289 = arith.negf %288 : vector<2x128xf32>
    %290 = math.exp %289 : vector<2x128xf32>
    %cst_88 = arith.constant 1.000000e+00 : f32
    %291 = vector.broadcast %cst_88 : f32 to vector<2x128xf32>
    %292 = arith.addf %291, %290 : vector<2x128xf32>
    %293 = arith.divf %291, %292 : vector<2x128xf32>
    %294 = vector.extract_strided_slice %265 {offsets = [0, 256], sizes = [2, 128], strides = [1, 1]} : vector<2x384xf32> to vector<2x128xf32>
    %295 = vector.extract_strided_slice %274 {offsets = [0, 256], sizes = [2, 128], strides = [1, 1]} : vector<2x384xf32> to vector<2x128xf32>
    %296 = arith.mulf %285, %295 : vector<2x128xf32>
    %297 = arith.addf %294, %296 : vector<2x128xf32>
    %298 = math.tanh %297 : vector<2x128xf32>
    %cst_89 = arith.constant 1.000000e+00 : f32
    %299 = vector.broadcast %cst_89 : f32 to vector<2x128xf32>
    %300 = arith.subf %299, %293 : vector<2x128xf32>
    %301 = arith.mulf %300, %298 : vector<2x128xf32>
    %302 = arith.mulf %293, %223 : vector<2x128xf32>
    %303 = arith.addf %301, %302 : vector<2x128xf32>
    %304 = vector.extract_strided_slice %271 {offsets = [0, 0], sizes = [2, 128], strides = [1, 1]} : vector<2x384xf32> to vector<2x128xf32>
    %305 = vector.extract_strided_slice %277 {offsets = [0, 0], sizes = [2, 128], strides = [1, 1]} : vector<2x384xf32> to vector<2x128xf32>
    %306 = arith.addf %304, %305 : vector<2x128xf32>
    %307 = arith.negf %306 : vector<2x128xf32>
    %308 = math.exp %307 : vector<2x128xf32>
    %cst_90 = arith.constant 1.000000e+00 : f32
    %309 = vector.broadcast %cst_90 : f32 to vector<2x128xf32>
    %310 = arith.addf %309, %308 : vector<2x128xf32>
    %311 = arith.divf %309, %310 : vector<2x128xf32>
    %312 = vector.extract_strided_slice %271 {offsets = [0, 128], sizes = [2, 128], strides = [1, 1]} : vector<2x384xf32> to vector<2x128xf32>
    %313 = vector.extract_strided_slice %277 {offsets = [0, 128], sizes = [2, 128], strides = [1, 1]} : vector<2x384xf32> to vector<2x128xf32>
    %314 = arith.addf %312, %313 : vector<2x128xf32>
    %315 = arith.negf %314 : vector<2x128xf32>
    %316 = math.exp %315 : vector<2x128xf32>
    %cst_91 = arith.constant 1.000000e+00 : f32
    %317 = vector.broadcast %cst_91 : f32 to vector<2x128xf32>
    %318 = arith.addf %317, %316 : vector<2x128xf32>
    %319 = arith.divf %317, %318 : vector<2x128xf32>
    %320 = vector.extract_strided_slice %271 {offsets = [0, 256], sizes = [2, 128], strides = [1, 1]} : vector<2x384xf32> to vector<2x128xf32>
    %321 = vector.extract_strided_slice %277 {offsets = [0, 256], sizes = [2, 128], strides = [1, 1]} : vector<2x384xf32> to vector<2x128xf32>
    %322 = arith.mulf %311, %321 : vector<2x128xf32>
    %323 = arith.addf %320, %322 : vector<2x128xf32>
    %324 = math.tanh %323 : vector<2x128xf32>
    %cst_92 = arith.constant 1.000000e+00 : f32
    %325 = vector.broadcast %cst_92 : f32 to vector<2x128xf32>
    %326 = arith.subf %325, %319 : vector<2x128xf32>
    %327 = arith.mulf %326, %324 : vector<2x128xf32>
    %328 = arith.mulf %319, %249 : vector<2x128xf32>
    %329 = arith.addf %327, %328 : vector<2x128xf32>
    %330 = arith.truncf %303 : vector<2x128xf32> to vector<2x128xbf16>
    %331 = arith.index_cast %c3_i32 : i32 to index
    %c0_93 = arith.constant 0 : index
    %c0_94 = arith.constant 0 : index
    %332 = vector.load %arg12[%331, %c0_93, %c0_94] : memref<8x2x128xbf16, #tpu.memory_space<vmem>>, vector<1x2x128xbf16>
    %333 = vector.shape_cast %332 : vector<1x2x128xbf16> to vector<2x128xbf16>
    %334 = vector.shape_cast %330 : vector<2x128xbf16> to vector<1x2x128xbf16>
    tpu.vector_store %arg12[%331, %c0_93, %c0_94], %334 {strides = array<i32>} : memref<8x2x128xbf16, #tpu.memory_space<vmem>>, vector<1x2x128xbf16>,
    %335 = arith.truncf %329 : vector<2x128xf32> to vector<2x128xbf16>
    %c7_i32_95 = arith.constant 7 : i32
    %336 = arith.subi %c7_i32_95, %c3_i32 : i32
    %337 = arith.index_cast %336 : i32 to index
    %c0_96 = arith.constant 0 : index
    %c0_97 = arith.constant 0 : index
    %338 = vector.load %arg13[%337, %c0_96, %c0_97] : memref<8x2x128xbf16, #tpu.memory_space<vmem>>, vector<1x2x128xbf16>
    %339 = vector.shape_cast %338 : vector<1x2x128xbf16> to vector<2x128xbf16>
    %340 = vector.shape_cast %335 : vector<2x128xbf16> to vector<1x2x128xbf16>
    tpu.vector_store %arg13[%337, %c0_96, %c0_97], %340 {strides = array<i32>} : memref<8x2x128xbf16, #tpu.memory_space<vmem>>, vector<1x2x128xbf16>,
    %c4_i32 = arith.constant 4 : i32
    %341 = arith.index_cast %c4_i32 : i32 to index
    %c0_98 = arith.constant 0 : index
    %c0_99 = arith.constant 0 : index
    %342 = vector.load %arg1[%341, %c0_98, %c0_99] : memref<8x2x32xbf16, #tpu.memory_space<vmem>>, vector<1x2x32xbf16>
    %343 = vector.shape_cast %342 : vector<1x2x32xbf16> to vector<2x32xbf16>
    %cst_100 = arith.constant dense<0.000000e+00> : vector<2x384xf32>
    %344 = tpu.matmul %343, %3, %cst_100 {dimension_numbers = #tpu.dot_dimension_numbers<[1], [0], [0], [1], [0, 0, 1, 1], [], []>} : vector<2x32xbf16>, vector<32x384xbf16>, vector<2x384xf32> -> vector<2x384xf32>
    %345 = arith.addf %344, %9 : vector<2x384xf32>
    %c7_i32_101 = arith.constant 7 : i32
    %346 = arith.subi %c7_i32_101, %c4_i32 : i32
    %347 = arith.index_cast %346 : i32 to index
    %c0_102 = arith.constant 0 : index
    %c0_103 = arith.constant 0 : index
    %348 = vector.load %arg2[%347, %c0_102, %c0_103] : memref<8x2x32xbf16, #tpu.memory_space<vmem>>, vector<1x2x32xbf16>
    %349 = vector.shape_cast %348 : vector<1x2x32xbf16> to vector<2x32xbf16>
    %cst_104 = arith.constant dense<0.000000e+00> : vector<2x384xf32>
    %350 = tpu.matmul %349, %4, %cst_104 {dimension_numbers = #tpu.dot_dimension_numbers<[1], [0], [0], [1], [0, 0, 1, 1], [], []>} : vector<2x32xbf16>, vector<32x384xbf16>, vector<2x384xf32> -> vector<2x384xf32>
    %351 = arith.addf %350, %12 : vector<2x384xf32>
    %352 = arith.truncf %303 : vector<2x128xf32> to vector<2x128xbf16>
    %cst_105 = arith.constant dense<0.000000e+00> : vector<2x384xf32>
    %353 = tpu.matmul %352, %5, %cst_105 {dimension_numbers = #tpu.dot_dimension_numbers<[1], [0], [0], [1], [0, 0, 1, 1], [], []>} : vector<2x128xbf16>, vector<128x384xbf16>, vector<2x384xf32> -> vector<2x384xf32>
    %354 = arith.addf %353, %15 : vector<2x384xf32>
    %355 = arith.truncf %329 : vector<2x128xf32> to vector<2x128xbf16>
    %cst_106 = arith.constant dense<0.000000e+00> : vector<2x384xf32>
    %356 = tpu.matmul %355, %6, %cst_106 {dimension_numbers = #tpu.dot_dimension_numbers<[1], [0], [0], [1], [0, 0, 1, 1], [], []>} : vector<2x128xbf16>, vector<128x384xbf16>, vector<2x384xf32> -> vector<2x384xf32>
    %357 = arith.addf %356, %18 : vector<2x384xf32>
    %358 = vector.extract_strided_slice %345 {offsets = [0, 0], sizes = [2, 128], strides = [1, 1]} : vector<2x384xf32> to vector<2x128xf32>
    %359 = vector.extract_strided_slice %354 {offsets = [0, 0], sizes = [2, 128], strides = [1, 1]} : vector<2x384xf32> to vector<2x128xf32>
    %360 = arith.addf %358, %359 : vector<2x128xf32>
    %361 = arith.negf %360 : vector<2x128xf32>
    %362 = math.exp %361 : vector<2x128xf32>
    %cst_107 = arith.constant 1.000000e+00 : f32
    %363 = vector.broadcast %cst_107 : f32 to vector<2x128xf32>
    %364 = arith.addf %363, %362 : vector<2x128xf32>
    %365 = arith.divf %363, %364 : vector<2x128xf32>
    %366 = vector.extract_strided_slice %345 {offsets = [0, 128], sizes = [2, 128], strides = [1, 1]} : vector<2x384xf32> to vector<2x128xf32>
    %367 = vector.extract_strided_slice %354 {offsets = [0, 128], sizes = [2, 128], strides = [1, 1]} : vector<2x384xf32> to vector<2x128xf32>
    %368 = arith.addf %366, %367 : vector<2x128xf32>
    %369 = arith.negf %368 : vector<2x128xf32>
    %370 = math.exp %369 : vector<2x128xf32>
    %cst_108 = arith.constant 1.000000e+00 : f32
    %371 = vector.broadcast %cst_108 : f32 to vector<2x128xf32>
    %372 = arith.addf %371, %370 : vector<2x128xf32>
    %373 = arith.divf %371, %372 : vector<2x128xf32>
    %374 = vector.extract_strided_slice %345 {offsets = [0, 256], sizes = [2, 128], strides = [1, 1]} : vector<2x384xf32> to vector<2x128xf32>
    %375 = vector.extract_strided_slice %354 {offsets = [0, 256], sizes = [2, 128], strides = [1, 1]} : vector<2x384xf32> to vector<2x128xf32>
    %376 = arith.mulf %365, %375 : vector<2x128xf32>
    %377 = arith.addf %374, %376 : vector<2x128xf32>
    %378 = math.tanh %377 : vector<2x128xf32>
    %cst_109 = arith.constant 1.000000e+00 : f32
    %379 = vector.broadcast %cst_109 : f32 to vector<2x128xf32>
    %380 = arith.subf %379, %373 : vector<2x128xf32>
    %381 = arith.mulf %380, %378 : vector<2x128xf32>
    %382 = arith.mulf %373, %303 : vector<2x128xf32>
    %383 = arith.addf %381, %382 : vector<2x128xf32>
    %384 = vector.extract_strided_slice %351 {offsets = [0, 0], sizes = [2, 128], strides = [1, 1]} : vector<2x384xf32> to vector<2x128xf32>
    %385 = vector.extract_strided_slice %357 {offsets = [0, 0], sizes = [2, 128], strides = [1, 1]} : vector<2x384xf32> to vector<2x128xf32>
    %386 = arith.addf %384, %385 : vector<2x128xf32>
    %387 = arith.negf %386 : vector<2x128xf32>
    %388 = math.exp %387 : vector<2x128xf32>
    %cst_110 = arith.constant 1.000000e+00 : f32
    %389 = vector.broadcast %cst_110 : f32 to vector<2x128xf32>
    %390 = arith.addf %389, %388 : vector<2x128xf32>
    %391 = arith.divf %389, %390 : vector<2x128xf32>
    %392 = vector.extract_strided_slice %351 {offsets = [0, 128], sizes = [2, 128], strides = [1, 1]} : vector<2x384xf32> to vector<2x128xf32>
    %393 = vector.extract_strided_slice %357 {offsets = [0, 128], sizes = [2, 128], strides = [1, 1]} : vector<2x384xf32> to vector<2x128xf32>
    %394 = arith.addf %392, %393 : vector<2x128xf32>
    %395 = arith.negf %394 : vector<2x128xf32>
    %396 = math.exp %395 : vector<2x128xf32>
    %cst_111 = arith.constant 1.000000e+00 : f32
    %397 = vector.broadcast %cst_111 : f32 to vector<2x128xf32>
    %398 = arith.addf %397, %396 : vector<2x128xf32>
    %399 = arith.divf %397, %398 : vector<2x128xf32>
    %400 = vector.extract_strided_slice %351 {offsets = [0, 256], sizes = [2, 128], strides = [1, 1]} : vector<2x384xf32> to vector<2x128xf32>
    %401 = vector.extract_strided_slice %357 {offsets = [0, 256], sizes = [2, 128], strides = [1, 1]} : vector<2x384xf32> to vector<2x128xf32>
    %402 = arith.mulf %391, %401 : vector<2x128xf32>
    %403 = arith.addf %400, %402 : vector<2x128xf32>
    %404 = math.tanh %403 : vector<2x128xf32>
    %cst_112 = arith.constant 1.000000e+00 : f32
    %405 = vector.broadcast %cst_112 : f32 to vector<2x128xf32>
    %406 = arith.subf %405, %399 : vector<2x128xf32>
    %407 = arith.mulf %406, %404 : vector<2x128xf32>
    %408 = arith.mulf %399, %329 : vector<2x128xf32>
    %409 = arith.addf %407, %408 : vector<2x128xf32>
    %410 = arith.truncf %383 : vector<2x128xf32> to vector<2x128xbf16>
    %411 = arith.index_cast %c4_i32 : i32 to index
    %c0_113 = arith.constant 0 : index
    %c0_114 = arith.constant 0 : index
    %412 = vector.load %arg12[%411, %c0_113, %c0_114] : memref<8x2x128xbf16, #tpu.memory_space<vmem>>, vector<1x2x128xbf16>
    %413 = vector.shape_cast %412 : vector<1x2x128xbf16> to vector<2x128xbf16>
    %414 = vector.shape_cast %410 : vector<2x128xbf16> to vector<1x2x128xbf16>
    tpu.vector_store %arg12[%411, %c0_113, %c0_114], %414 {strides = array<i32>} : memref<8x2x128xbf16, #tpu.memory_space<vmem>>, vector<1x2x128xbf16>,
    %415 = arith.truncf %409 : vector<2x128xf32> to vector<2x128xbf16>
    %c7_i32_115 = arith.constant 7 : i32
    %416 = arith.subi %c7_i32_115, %c4_i32 : i32
    %417 = arith.index_cast %416 : i32 to index
    %c0_116 = arith.constant 0 : index
    %c0_117 = arith.constant 0 : index
    %418 = vector.load %arg13[%417, %c0_116, %c0_117] : memref<8x2x128xbf16, #tpu.memory_space<vmem>>, vector<1x2x128xbf16>
    %419 = vector.shape_cast %418 : vector<1x2x128xbf16> to vector<2x128xbf16>
    %420 = vector.shape_cast %415 : vector<2x128xbf16> to vector<1x2x128xbf16>
    tpu.vector_store %arg13[%417, %c0_116, %c0_117], %420 {strides = array<i32>} : memref<8x2x128xbf16, #tpu.memory_space<vmem>>, vector<1x2x128xbf16>,
    %c5_i32 = arith.constant 5 : i32
    %421 = arith.index_cast %c5_i32 : i32 to index
    %c0_118 = arith.constant 0 : index
    %c0_119 = arith.constant 0 : index
    %422 = vector.load %arg1[%421, %c0_118, %c0_119] : memref<8x2x32xbf16, #tpu.memory_space<vmem>>, vector<1x2x32xbf16>
    %423 = vector.shape_cast %422 : vector<1x2x32xbf16> to vector<2x32xbf16>
    %cst_120 = arith.constant dense<0.000000e+00> : vector<2x384xf32>
    %424 = tpu.matmul %423, %3, %cst_120 {dimension_numbers = #tpu.dot_dimension_numbers<[1], [0], [0], [1], [0, 0, 1, 1], [], []>} : vector<2x32xbf16>, vector<32x384xbf16>, vector<2x384xf32> -> vector<2x384xf32>
    %425 = arith.addf %424, %9 : vector<2x384xf32>
    %c7_i32_121 = arith.constant 7 : i32
    %426 = arith.subi %c7_i32_121, %c5_i32 : i32
    %427 = arith.index_cast %426 : i32 to index
    %c0_122 = arith.constant 0 : index
    %c0_123 = arith.constant 0 : index
    %428 = vector.load %arg2[%427, %c0_122, %c0_123] : memref<8x2x32xbf16, #tpu.memory_space<vmem>>, vector<1x2x32xbf16>
    %429 = vector.shape_cast %428 : vector<1x2x32xbf16> to vector<2x32xbf16>
    %cst_124 = arith.constant dense<0.000000e+00> : vector<2x384xf32>
    %430 = tpu.matmul %429, %4, %cst_124 {dimension_numbers = #tpu.dot_dimension_numbers<[1], [0], [0], [1], [0, 0, 1, 1], [], []>} : vector<2x32xbf16>, vector<32x384xbf16>, vector<2x384xf32> -> vector<2x384xf32>
    %431 = arith.addf %430, %12 : vector<2x384xf32>
    %432 = arith.truncf %383 : vector<2x128xf32> to vector<2x128xbf16>
    %cst_125 = arith.constant dense<0.000000e+00> : vector<2x384xf32>
    %433 = tpu.matmul %432, %5, %cst_125 {dimension_numbers = #tpu.dot_dimension_numbers<[1], [0], [0], [1], [0, 0, 1, 1], [], []>} : vector<2x128xbf16>, vector<128x384xbf16>, vector<2x384xf32> -> vector<2x384xf32>
    %434 = arith.addf %433, %15 : vector<2x384xf32>
    %435 = arith.truncf %409 : vector<2x128xf32> to vector<2x128xbf16>
    %cst_126 = arith.constant dense<0.000000e+00> : vector<2x384xf32>
    %436 = tpu.matmul %435, %6, %cst_126 {dimension_numbers = #tpu.dot_dimension_numbers<[1], [0], [0], [1], [0, 0, 1, 1], [], []>} : vector<2x128xbf16>, vector<128x384xbf16>, vector<2x384xf32> -> vector<2x384xf32>
    %437 = arith.addf %436, %18 : vector<2x384xf32>
    %438 = vector.extract_strided_slice %425 {offsets = [0, 0], sizes = [2, 128], strides = [1, 1]} : vector<2x384xf32> to vector<2x128xf32>
    %439 = vector.extract_strided_slice %434 {offsets = [0, 0], sizes = [2, 128], strides = [1, 1]} : vector<2x384xf32> to vector<2x128xf32>
    %440 = arith.addf %438, %439 : vector<2x128xf32>
    %441 = arith.negf %440 : vector<2x128xf32>
    %442 = math.exp %441 : vector<2x128xf32>
    %cst_127 = arith.constant 1.000000e+00 : f32
    %443 = vector.broadcast %cst_127 : f32 to vector<2x128xf32>
    %444 = arith.addf %443, %442 : vector<2x128xf32>
    %445 = arith.divf %443, %444 : vector<2x128xf32>
    %446 = vector.extract_strided_slice %425 {offsets = [0, 128], sizes = [2, 128], strides = [1, 1]} : vector<2x384xf32> to vector<2x128xf32>
    %447 = vector.extract_strided_slice %434 {offsets = [0, 128], sizes = [2, 128], strides = [1, 1]} : vector<2x384xf32> to vector<2x128xf32>
    %448 = arith.addf %446, %447 : vector<2x128xf32>
    %449 = arith.negf %448 : vector<2x128xf32>
    %450 = math.exp %449 : vector<2x128xf32>
    %cst_128 = arith.constant 1.000000e+00 : f32
    %451 = vector.broadcast %cst_128 : f32 to vector<2x128xf32>
    %452 = arith.addf %451, %450 : vector<2x128xf32>
    %453 = arith.divf %451, %452 : vector<2x128xf32>
    %454 = vector.extract_strided_slice %425 {offsets = [0, 256], sizes = [2, 128], strides = [1, 1]} : vector<2x384xf32> to vector<2x128xf32>
    %455 = vector.extract_strided_slice %434 {offsets = [0, 256], sizes = [2, 128], strides = [1, 1]} : vector<2x384xf32> to vector<2x128xf32>
    %456 = arith.mulf %445, %455 : vector<2x128xf32>
    %457 = arith.addf %454, %456 : vector<2x128xf32>
    %458 = math.tanh %457 : vector<2x128xf32>
    %cst_129 = arith.constant 1.000000e+00 : f32
    %459 = vector.broadcast %cst_129 : f32 to vector<2x128xf32>
    %460 = arith.subf %459, %453 : vector<2x128xf32>
    %461 = arith.mulf %460, %458 : vector<2x128xf32>
    %462 = arith.mulf %453, %383 : vector<2x128xf32>
    %463 = arith.addf %461, %462 : vector<2x128xf32>
    %464 = vector.extract_strided_slice %431 {offsets = [0, 0], sizes = [2, 128], strides = [1, 1]} : vector<2x384xf32> to vector<2x128xf32>
    %465 = vector.extract_strided_slice %437 {offsets = [0, 0], sizes = [2, 128], strides = [1, 1]} : vector<2x384xf32> to vector<2x128xf32>
    %466 = arith.addf %464, %465 : vector<2x128xf32>
    %467 = arith.negf %466 : vector<2x128xf32>
    %468 = math.exp %467 : vector<2x128xf32>
    %cst_130 = arith.constant 1.000000e+00 : f32
    %469 = vector.broadcast %cst_130 : f32 to vector<2x128xf32>
    %470 = arith.addf %469, %468 : vector<2x128xf32>
    %471 = arith.divf %469, %470 : vector<2x128xf32>
    %472 = vector.extract_strided_slice %431 {offsets = [0, 128], sizes = [2, 128], strides = [1, 1]} : vector<2x384xf32> to vector<2x128xf32>
    %473 = vector.extract_strided_slice %437 {offsets = [0, 128], sizes = [2, 128], strides = [1, 1]} : vector<2x384xf32> to vector<2x128xf32>
    %474 = arith.addf %472, %473 : vector<2x128xf32>
    %475 = arith.negf %474 : vector<2x128xf32>
    %476 = math.exp %475 : vector<2x128xf32>
    %cst_131 = arith.constant 1.000000e+00 : f32
    %477 = vector.broadcast %cst_131 : f32 to vector<2x128xf32>
    %478 = arith.addf %477, %476 : vector<2x128xf32>
    %479 = arith.divf %477, %478 : vector<2x128xf32>
    %480 = vector.extract_strided_slice %431 {offsets = [0, 256], sizes = [2, 128], strides = [1, 1]} : vector<2x384xf32> to vector<2x128xf32>
    %481 = vector.extract_strided_slice %437 {offsets = [0, 256], sizes = [2, 128], strides = [1, 1]} : vector<2x384xf32> to vector<2x128xf32>
    %482 = arith.mulf %471, %481 : vector<2x128xf32>
    %483 = arith.addf %480, %482 : vector<2x128xf32>
    %484 = math.tanh %483 : vector<2x128xf32>
    %cst_132 = arith.constant 1.000000e+00 : f32
    %485 = vector.broadcast %cst_132 : f32 to vector<2x128xf32>
    %486 = arith.subf %485, %479 : vector<2x128xf32>
    %487 = arith.mulf %486, %484 : vector<2x128xf32>
    %488 = arith.mulf %479, %409 : vector<2x128xf32>
    %489 = arith.addf %487, %488 : vector<2x128xf32>
    %490 = arith.truncf %463 : vector<2x128xf32> to vector<2x128xbf16>
    %491 = arith.index_cast %c5_i32 : i32 to index
    %c0_133 = arith.constant 0 : index
    %c0_134 = arith.constant 0 : index
    %492 = vector.load %arg12[%491, %c0_133, %c0_134] : memref<8x2x128xbf16, #tpu.memory_space<vmem>>, vector<1x2x128xbf16>
    %493 = vector.shape_cast %492 : vector<1x2x128xbf16> to vector<2x128xbf16>
    %494 = vector.shape_cast %490 : vector<2x128xbf16> to vector<1x2x128xbf16>
    tpu.vector_store %arg12[%491, %c0_133, %c0_134], %494 {strides = array<i32>} : memref<8x2x128xbf16, #tpu.memory_space<vmem>>, vector<1x2x128xbf16>,
    %495 = arith.truncf %489 : vector<2x128xf32> to vector<2x128xbf16>
    %c7_i32_135 = arith.constant 7 : i32
    %496 = arith.subi %c7_i32_135, %c5_i32 : i32
    %497 = arith.index_cast %496 : i32 to index
    %c0_136 = arith.constant 0 : index
    %c0_137 = arith.constant 0 : index
    %498 = vector.load %arg13[%497, %c0_136, %c0_137] : memref<8x2x128xbf16, #tpu.memory_space<vmem>>, vector<1x2x128xbf16>
    %499 = vector.shape_cast %498 : vector<1x2x128xbf16> to vector<2x128xbf16>
    %500 = vector.shape_cast %495 : vector<2x128xbf16> to vector<1x2x128xbf16>
    tpu.vector_store %arg13[%497, %c0_136, %c0_137], %500 {strides = array<i32>} : memref<8x2x128xbf16, #tpu.memory_space<vmem>>, vector<1x2x128xbf16>,
    %c6_i32 = arith.constant 6 : i32
    %501 = arith.index_cast %c6_i32 : i32 to index
    %c0_138 = arith.constant 0 : index
    %c0_139 = arith.constant 0 : index
    %502 = vector.load %arg1[%501, %c0_138, %c0_139] : memref<8x2x32xbf16, #tpu.memory_space<vmem>>, vector<1x2x32xbf16>
    %503 = vector.shape_cast %502 : vector<1x2x32xbf16> to vector<2x32xbf16>
    %cst_140 = arith.constant dense<0.000000e+00> : vector<2x384xf32>
    %504 = tpu.matmul %503, %3, %cst_140 {dimension_numbers = #tpu.dot_dimension_numbers<[1], [0], [0], [1], [0, 0, 1, 1], [], []>} : vector<2x32xbf16>, vector<32x384xbf16>, vector<2x384xf32> -> vector<2x384xf32>
    %505 = arith.addf %504, %9 : vector<2x384xf32>
    %c7_i32_141 = arith.constant 7 : i32
    %506 = arith.subi %c7_i32_141, %c6_i32 : i32
    %507 = arith.index_cast %506 : i32 to index
    %c0_142 = arith.constant 0 : index
    %c0_143 = arith.constant 0 : index
    %508 = vector.load %arg2[%507, %c0_142, %c0_143] : memref<8x2x32xbf16, #tpu.memory_space<vmem>>, vector<1x2x32xbf16>
    %509 = vector.shape_cast %508 : vector<1x2x32xbf16> to vector<2x32xbf16>
    %cst_144 = arith.constant dense<0.000000e+00> : vector<2x384xf32>
    %510 = tpu.matmul %509, %4, %cst_144 {dimension_numbers = #tpu.dot_dimension_numbers<[1], [0], [0], [1], [0, 0, 1, 1], [], []>} : vector<2x32xbf16>, vector<32x384xbf16>, vector<2x384xf32> -> vector<2x384xf32>
    %511 = arith.addf %510, %12 : vector<2x384xf32>
    %512 = arith.truncf %463 : vector<2x128xf32> to vector<2x128xbf16>
    %cst_145 = arith.constant dense<0.000000e+00> : vector<2x384xf32>
    %513 = tpu.matmul %512, %5, %cst_145 {dimension_numbers = #tpu.dot_dimension_numbers<[1], [0], [0], [1], [0, 0, 1, 1], [], []>} : vector<2x128xbf16>, vector<128x384xbf16>, vector<2x384xf32> -> vector<2x384xf32>
    %514 = arith.addf %513, %15 : vector<2x384xf32>
    %515 = arith.truncf %489 : vector<2x128xf32> to vector<2x128xbf16>
    %cst_146 = arith.constant dense<0.000000e+00> : vector<2x384xf32>
    %516 = tpu.matmul %515, %6, %cst_146 {dimension_numbers = #tpu.dot_dimension_numbers<[1], [0], [0], [1], [0, 0, 1, 1], [], []>} : vector<2x128xbf16>, vector<128x384xbf16>, vector<2x384xf32> -> vector<2x384xf32>
    %517 = arith.addf %516, %18 : vector<2x384xf32>
    %518 = vector.extract_strided_slice %505 {offsets = [0, 0], sizes = [2, 128], strides = [1, 1]} : vector<2x384xf32> to vector<2x128xf32>
    %519 = vector.extract_strided_slice %514 {offsets = [0, 0], sizes = [2, 128], strides = [1, 1]} : vector<2x384xf32> to vector<2x128xf32>
    %520 = arith.addf %518, %519 : vector<2x128xf32>
    %521 = arith.negf %520 : vector<2x128xf32>
    %522 = math.exp %521 : vector<2x128xf32>
    %cst_147 = arith.constant 1.000000e+00 : f32
    %523 = vector.broadcast %cst_147 : f32 to vector<2x128xf32>
    %524 = arith.addf %523, %522 : vector<2x128xf32>
    %525 = arith.divf %523, %524 : vector<2x128xf32>
    %526 = vector.extract_strided_slice %505 {offsets = [0, 128], sizes = [2, 128], strides = [1, 1]} : vector<2x384xf32> to vector<2x128xf32>
    %527 = vector.extract_strided_slice %514 {offsets = [0, 128], sizes = [2, 128], strides = [1, 1]} : vector<2x384xf32> to vector<2x128xf32>
    %528 = arith.addf %526, %527 : vector<2x128xf32>
    %529 = arith.negf %528 : vector<2x128xf32>
    %530 = math.exp %529 : vector<2x128xf32>
    %cst_148 = arith.constant 1.000000e+00 : f32
    %531 = vector.broadcast %cst_148 : f32 to vector<2x128xf32>
    %532 = arith.addf %531, %530 : vector<2x128xf32>
    %533 = arith.divf %531, %532 : vector<2x128xf32>
    %534 = vector.extract_strided_slice %505 {offsets = [0, 256], sizes = [2, 128], strides = [1, 1]} : vector<2x384xf32> to vector<2x128xf32>
    %535 = vector.extract_strided_slice %514 {offsets = [0, 256], sizes = [2, 128], strides = [1, 1]} : vector<2x384xf32> to vector<2x128xf32>
    %536 = arith.mulf %525, %535 : vector<2x128xf32>
    %537 = arith.addf %534, %536 : vector<2x128xf32>
    %538 = math.tanh %537 : vector<2x128xf32>
    %cst_149 = arith.constant 1.000000e+00 : f32
    %539 = vector.broadcast %cst_149 : f32 to vector<2x128xf32>
    %540 = arith.subf %539, %533 : vector<2x128xf32>
    %541 = arith.mulf %540, %538 : vector<2x128xf32>
    %542 = arith.mulf %533, %463 : vector<2x128xf32>
    %543 = arith.addf %541, %542 : vector<2x128xf32>
    %544 = vector.extract_strided_slice %511 {offsets = [0, 0], sizes = [2, 128], strides = [1, 1]} : vector<2x384xf32> to vector<2x128xf32>
    %545 = vector.extract_strided_slice %517 {offsets = [0, 0], sizes = [2, 128], strides = [1, 1]} : vector<2x384xf32> to vector<2x128xf32>
    %546 = arith.addf %544, %545 : vector<2x128xf32>
    %547 = arith.negf %546 : vector<2x128xf32>
    %548 = math.exp %547 : vector<2x128xf32>
    %cst_150 = arith.constant 1.000000e+00 : f32
    %549 = vector.broadcast %cst_150 : f32 to vector<2x128xf32>
    %550 = arith.addf %549, %548 : vector<2x128xf32>
    %551 = arith.divf %549, %550 : vector<2x128xf32>
    %552 = vector.extract_strided_slice %511 {offsets = [0, 128], sizes = [2, 128], strides = [1, 1]} : vector<2x384xf32> to vector<2x128xf32>
    %553 = vector.extract_strided_slice %517 {offsets = [0, 128], sizes = [2, 128], strides = [1, 1]} : vector<2x384xf32> to vector<2x128xf32>
    %554 = arith.addf %552, %553 : vector<2x128xf32>
    %555 = arith.negf %554 : vector<2x128xf32>
    %556 = math.exp %555 : vector<2x128xf32>
    %cst_151 = arith.constant 1.000000e+00 : f32
    %557 = vector.broadcast %cst_151 : f32 to vector<2x128xf32>
    %558 = arith.addf %557, %556 : vector<2x128xf32>
    %559 = arith.divf %557, %558 : vector<2x128xf32>
    %560 = vector.extract_strided_slice %511 {offsets = [0, 256], sizes = [2, 128], strides = [1, 1]} : vector<2x384xf32> to vector<2x128xf32>
    %561 = vector.extract_strided_slice %517 {offsets = [0, 256], sizes = [2, 128], strides = [1, 1]} : vector<2x384xf32> to vector<2x128xf32>
    %562 = arith.mulf %551, %561 : vector<2x128xf32>
    %563 = arith.addf %560, %562 : vector<2x128xf32>
    %564 = math.tanh %563 : vector<2x128xf32>
    %cst_152 = arith.constant 1.000000e+00 : f32
    %565 = vector.broadcast %cst_152 : f32 to vector<2x128xf32>
    %566 = arith.subf %565, %559 : vector<2x128xf32>
    %567 = arith.mulf %566, %564 : vector<2x128xf32>
    %568 = arith.mulf %559, %489 : vector<2x128xf32>
    %569 = arith.addf %567, %568 : vector<2x128xf32>
    %570 = arith.truncf %543 : vector<2x128xf32> to vector<2x128xbf16>
    %571 = arith.index_cast %c6_i32 : i32 to index
    %c0_153 = arith.constant 0 : index
    %c0_154 = arith.constant 0 : index
    %572 = vector.load %arg12[%571, %c0_153, %c0_154] : memref<8x2x128xbf16, #tpu.memory_space<vmem>>, vector<1x2x128xbf16>
    %573 = vector.shape_cast %572 : vector<1x2x128xbf16> to vector<2x128xbf16>
    %574 = vector.shape_cast %570 : vector<2x128xbf16> to vector<1x2x128xbf16>
    tpu.vector_store %arg12[%571, %c0_153, %c0_154], %574 {strides = array<i32>} : memref<8x2x128xbf16, #tpu.memory_space<vmem>>, vector<1x2x128xbf16>,
    %575 = arith.truncf %569 : vector<2x128xf32> to vector<2x128xbf16>
    %c7_i32_155 = arith.constant 7 : i32
    %576 = arith.subi %c7_i32_155, %c6_i32 : i32
    %577 = arith.index_cast %576 : i32 to index
    %c0_156 = arith.constant 0 : index
    %c0_157 = arith.constant 0 : index
    %578 = vector.load %arg13[%577, %c0_156, %c0_157] : memref<8x2x128xbf16, #tpu.memory_space<vmem>>, vector<1x2x128xbf16>
    %579 = vector.shape_cast %578 : vector<1x2x128xbf16> to vector<2x128xbf16>
    %580 = vector.shape_cast %575 : vector<2x128xbf16> to vector<1x2x128xbf16>
    tpu.vector_store %arg13[%577, %c0_156, %c0_157], %580 {strides = array<i32>} : memref<8x2x128xbf16, #tpu.memory_space<vmem>>, vector<1x2x128xbf16>,
    %c7_i32_158 = arith.constant 7 : i32
    %581 = arith.index_cast %c7_i32_158 : i32 to index
    %c0_159 = arith.constant 0 : index
    %c0_160 = arith.constant 0 : index
    %582 = vector.load %arg1[%581, %c0_159, %c0_160] : memref<8x2x32xbf16, #tpu.memory_space<vmem>>, vector<1x2x32xbf16>
    %583 = vector.shape_cast %582 : vector<1x2x32xbf16> to vector<2x32xbf16>
    %cst_161 = arith.constant dense<0.000000e+00> : vector<2x384xf32>
    %584 = tpu.matmul %583, %3, %cst_161 {dimension_numbers = #tpu.dot_dimension_numbers<[1], [0], [0], [1], [0, 0, 1, 1], [], []>} : vector<2x32xbf16>, vector<32x384xbf16>, vector<2x384xf32> -> vector<2x384xf32>
    %585 = arith.addf %584, %9 : vector<2x384xf32>
    %c7_i32_162 = arith.constant 7 : i32
    %586 = arith.subi %c7_i32_162, %c7_i32_158 : i32
    %587 = arith.index_cast %586 : i32 to index
    %c0_163 = arith.constant 0 : index
    %c0_164 = arith.constant 0 : index
    %588 = vector.load %arg2[%587, %c0_163, %c0_164] : memref<8x2x32xbf16, #tpu.memory_space<vmem>>, vector<1x2x32xbf16>
    %589 = vector.shape_cast %588 : vector<1x2x32xbf16> to vector<2x32xbf16>
    %cst_165 = arith.constant dense<0.000000e+00> : vector<2x384xf32>
    %590 = tpu.matmul %589, %4, %cst_165 {dimension_numbers = #tpu.dot_dimension_numbers<[1], [0], [0], [1], [0, 0, 1, 1], [], []>} : vector<2x32xbf16>, vector<32x384xbf16>, vector<2x384xf32> -> vector<2x384xf32>
    %591 = arith.addf %590, %12 : vector<2x384xf32>
    %592 = arith.truncf %543 : vector<2x128xf32> to vector<2x128xbf16>
    %cst_166 = arith.constant dense<0.000000e+00> : vector<2x384xf32>
    %593 = tpu.matmul %592, %5, %cst_166 {dimension_numbers = #tpu.dot_dimension_numbers<[1], [0], [0], [1], [0, 0, 1, 1], [], []>} : vector<2x128xbf16>, vector<128x384xbf16>, vector<2x384xf32> -> vector<2x384xf32>
    %594 = arith.addf %593, %15 : vector<2x384xf32>
    %595 = arith.truncf %569 : vector<2x128xf32> to vector<2x128xbf16>
    %cst_167 = arith.constant dense<0.000000e+00> : vector<2x384xf32>
    %596 = tpu.matmul %595, %6, %cst_167 {dimension_numbers = #tpu.dot_dimension_numbers<[1], [0], [0], [1], [0, 0, 1, 1], [], []>} : vector<2x128xbf16>, vector<128x384xbf16>, vector<2x384xf32> -> vector<2x384xf32>
    %597 = arith.addf %596, %18 : vector<2x384xf32>
    %598 = vector.extract_strided_slice %585 {offsets = [0, 0], sizes = [2, 128], strides = [1, 1]} : vector<2x384xf32> to vector<2x128xf32>
    %599 = vector.extract_strided_slice %594 {offsets = [0, 0], sizes = [2, 128], strides = [1, 1]} : vector<2x384xf32> to vector<2x128xf32>
    %600 = arith.addf %598, %599 : vector<2x128xf32>
    %601 = arith.negf %600 : vector<2x128xf32>
    %602 = math.exp %601 : vector<2x128xf32>
    %cst_168 = arith.constant 1.000000e+00 : f32
    %603 = vector.broadcast %cst_168 : f32 to vector<2x128xf32>
    %604 = arith.addf %603, %602 : vector<2x128xf32>
    %605 = arith.divf %603, %604 : vector<2x128xf32>
    %606 = vector.extract_strided_slice %585 {offsets = [0, 128], sizes = [2, 128], strides = [1, 1]} : vector<2x384xf32> to vector<2x128xf32>
    %607 = vector.extract_strided_slice %594 {offsets = [0, 128], sizes = [2, 128], strides = [1, 1]} : vector<2x384xf32> to vector<2x128xf32>
    %608 = arith.addf %606, %607 : vector<2x128xf32>
    %609 = arith.negf %608 : vector<2x128xf32>
    %610 = math.exp %609 : vector<2x128xf32>
    %cst_169 = arith.constant 1.000000e+00 : f32
    %611 = vector.broadcast %cst_169 : f32 to vector<2x128xf32>
    %612 = arith.addf %611, %610 : vector<2x128xf32>
    %613 = arith.divf %611, %612 : vector<2x128xf32>
    %614 = vector.extract_strided_slice %585 {offsets = [0, 256], sizes = [2, 128], strides = [1, 1]} : vector<2x384xf32> to vector<2x128xf32>
    %615 = vector.extract_strided_slice %594 {offsets = [0, 256], sizes = [2, 128], strides = [1, 1]} : vector<2x384xf32> to vector<2x128xf32>
    %616 = arith.mulf %605, %615 : vector<2x128xf32>
    %617 = arith.addf %614, %616 : vector<2x128xf32>
    %618 = math.tanh %617 : vector<2x128xf32>
    %cst_170 = arith.constant 1.000000e+00 : f32
    %619 = vector.broadcast %cst_170 : f32 to vector<2x128xf32>
    %620 = arith.subf %619, %613 : vector<2x128xf32>
    %621 = arith.mulf %620, %618 : vector<2x128xf32>
    %622 = arith.mulf %613, %543 : vector<2x128xf32>
    %623 = arith.addf %621, %622 : vector<2x128xf32>
    %624 = vector.extract_strided_slice %591 {offsets = [0, 0], sizes = [2, 128], strides = [1, 1]} : vector<2x384xf32> to vector<2x128xf32>
    %625 = vector.extract_strided_slice %597 {offsets = [0, 0], sizes = [2, 128], strides = [1, 1]} : vector<2x384xf32> to vector<2x128xf32>
    %626 = arith.addf %624, %625 : vector<2x128xf32>
    %627 = arith.negf %626 : vector<2x128xf32>
    %628 = math.exp %627 : vector<2x128xf32>
    %cst_171 = arith.constant 1.000000e+00 : f32
    %629 = vector.broadcast %cst_171 : f32 to vector<2x128xf32>
    %630 = arith.addf %629, %628 : vector<2x128xf32>
    %631 = arith.divf %629, %630 : vector<2x128xf32>
    %632 = vector.extract_strided_slice %591 {offsets = [0, 128], sizes = [2, 128], strides = [1, 1]} : vector<2x384xf32> to vector<2x128xf32>
    %633 = vector.extract_strided_slice %597 {offsets = [0, 128], sizes = [2, 128], strides = [1, 1]} : vector<2x384xf32> to vector<2x128xf32>
    %634 = arith.addf %632, %633 : vector<2x128xf32>
    %635 = arith.negf %634 : vector<2x128xf32>
    %636 = math.exp %635 : vector<2x128xf32>
    %cst_172 = arith.constant 1.000000e+00 : f32
    %637 = vector.broadcast %cst_172 : f32 to vector<2x128xf32>
    %638 = arith.addf %637, %636 : vector<2x128xf32>
    %639 = arith.divf %637, %638 : vector<2x128xf32>
    %640 = vector.extract_strided_slice %591 {offsets = [0, 256], sizes = [2, 128], strides = [1, 1]} : vector<2x384xf32> to vector<2x128xf32>
    %641 = vector.extract_strided_slice %597 {offsets = [0, 256], sizes = [2, 128], strides = [1, 1]} : vector<2x384xf32> to vector<2x128xf32>
    %642 = arith.mulf %631, %641 : vector<2x128xf32>
    %643 = arith.addf %640, %642 : vector<2x128xf32>
    %644 = math.tanh %643 : vector<2x128xf32>
    %cst_173 = arith.constant 1.000000e+00 : f32
    %645 = vector.broadcast %cst_173 : f32 to vector<2x128xf32>
    %646 = arith.subf %645, %639 : vector<2x128xf32>
    %647 = arith.mulf %646, %644 : vector<2x128xf32>
    %648 = arith.mulf %639, %569 : vector<2x128xf32>
    %649 = arith.addf %647, %648 : vector<2x128xf32>
    %650 = arith.truncf %623 : vector<2x128xf32> to vector<2x128xbf16>
    %651 = arith.index_cast %c7_i32_158 : i32 to index
    %c0_174 = arith.constant 0 : index
    %c0_175 = arith.constant 0 : index
    %652 = vector.load %arg12[%651, %c0_174, %c0_175] : memref<8x2x128xbf16, #tpu.memory_space<vmem>>, vector<1x2x128xbf16>
    %653 = vector.shape_cast %652 : vector<1x2x128xbf16> to vector<2x128xbf16>
    %654 = vector.shape_cast %650 : vector<2x128xbf16> to vector<1x2x128xbf16>
    tpu.vector_store %arg12[%651, %c0_174, %c0_175], %654 {strides = array<i32>} : memref<8x2x128xbf16, #tpu.memory_space<vmem>>, vector<1x2x128xbf16>,
    %655 = arith.truncf %649 : vector<2x128xf32> to vector<2x128xbf16>
    %c7_i32_176 = arith.constant 7 : i32
    %656 = arith.subi %c7_i32_176, %c7_i32_158 : i32
    %657 = arith.index_cast %656 : i32 to index
    %c0_177 = arith.constant 0 : index
    %c0_178 = arith.constant 0 : index
    %658 = vector.load %arg13[%657, %c0_177, %c0_178] : memref<8x2x128xbf16, #tpu.memory_space<vmem>>, vector<1x2x128xbf16>
    %659 = vector.shape_cast %658 : vector<1x2x128xbf16> to vector<2x128xbf16>
    %660 = vector.shape_cast %655 : vector<2x128xbf16> to vector<1x2x128xbf16>
    tpu.vector_store %arg13[%657, %c0_177, %c0_178], %660 {strides = array<i32>} : memref<8x2x128xbf16, #tpu.memory_space<vmem>>, vector<1x2x128xbf16>,
    %c8_i32 = arith.constant 8 : i32
    %c0_179 = arith.constant 0 : index
    %c0_180 = arith.constant 0 : index
    %661 = vector.load %arg15[%c0_179, %c0_180] : memref<2x256xf32, #tpu.memory_space<vmem>>, vector<2x128xf32>
    tpu.vector_store %arg15[%c0_179, %c0_180], %623 {strides = array<i32>} : memref<2x256xf32, #tpu.memory_space<vmem>>, vector<2x128xf32>,
    %c0_181 = arith.constant 0 : index
    %c128_182 = arith.constant 128 : index
    %662 = vector.load %arg15[%c0_181, %c128_182] : memref<2x256xf32, #tpu.memory_space<vmem>>, vector<2x128xf32>
    tpu.vector_store %arg15[%c0_181, %c128_182], %649 {strides = array<i32>} : memref<2x256xf32, #tpu.memory_space<vmem>>, vector<2x128xf32>,
    %c0_i32_183 = arith.constant 0 : i32
    %663 = arith.cmpi eq, %arg0, %c0_i32_183 : i32
    %664 = arith.extui %663 : i1 to i32
    %c0_i32_184 = arith.constant 0 : i32
    %665 = arith.cmpi ne, %664, %c0_i32_184 : i32
    scf.if %665 {
      %c0_185 = arith.constant 0 : index
      %c0_186 = arith.constant 0 : index
      %666 = vector.load %arg14[%c0_185, %c0_186] : memref<2x256xf32, #tpu.memory_space<vmem>>, vector<2x128xf32>
      tpu.vector_store %arg14[%c0_185, %c0_186], %623 {strides = array<i32>} : memref<2x256xf32, #tpu.memory_space<vmem>>, vector<2x128xf32>,
      %c0_187 = arith.constant 0 : index
      %c128_188 = arith.constant 128 : index
      %667 = vector.load %arg14[%c0_187, %c128_188] : memref<2x256xf32, #tpu.memory_space<vmem>>, vector<2x128xf32>
      tpu.vector_store %arg14[%c0_187, %c128_188], %649 {strides = array<i32>} : memref<2x256xf32, #tpu.memory_space<vmem>>, vector<2x128xf32>,
    } else {
    }
    return
  }
  func.func @transform_0(%arg0: i32) -> (i32, i32, i32) {
    %c0_i32 = arith.constant 0 : i32
    %c0_i32_0 = arith.constant 0 : i32
    %c0_i32_1 = arith.constant 0 : i32
    return %arg0, %c0_i32, %c0_i32_0 : i32, i32, i32
  }
  func.func @transform_1(%arg0: i32) -> (i32, i32, i32) {
    %c0_i32 = arith.constant 0 : i32
    %0 = arith.subi %c0_i32, %arg0 : i32
    %c0_i32_0 = arith.constant 0 : i32
    %c0_i32_1 = arith.constant 0 : i32
    %c0_i32_2 = arith.constant 0 : i32
    return %0, %c0_i32_0, %c0_i32_1 : i32, i32, i32
  }
  func.func @transform_2(%arg0: i32) -> (i32, i32) {
    %c0_i32 = arith.constant 0 : i32
    %c0_i32_0 = arith.constant 0 : i32
    %c0_i32_1 = arith.constant 0 : i32
    return %c0_i32, %c0_i32_0 : i32, i32
  }
  func.func @transform_3(%arg0: i32) -> (i32, i32) {
    %c0_i32 = arith.constant 0 : i32
    %c0_i32_0 = arith.constant 0 : i32
    %c0_i32_1 = arith.constant 0 : i32
    return %c0_i32, %c0_i32_0 : i32, i32
  }
  func.func @transform_4(%arg0: i32) -> (i32, i32) {
    %c0_i32 = arith.constant 0 : i32
    %c0_i32_0 = arith.constant 0 : i32
    %c0_i32_1 = arith.constant 0 : i32
    return %c0_i32, %c0_i32_0 : i32, i32
  }
  func.func @transform_5(%arg0: i32) -> (i32, i32) {
    %c0_i32 = arith.constant 0 : i32
    %c0_i32_0 = arith.constant 0 : i32
    %c0_i32_1 = arith.constant 0 : i32
    return %c0_i32, %c0_i32_0 : i32, i32
  }
  func.func @transform_6(%arg0: i32) -> (i32, i32) {
    %c0_i32 = arith.constant 0 : i32
    %c0_i32_0 = arith.constant 0 : i32
    %c0_i32_1 = arith.constant 0 : i32
    return %c0_i32, %c0_i32_0 : i32, i32
  }
  func.func @transform_7(%arg0: i32) -> (i32, i32) {
    %c0_i32 = arith.constant 0 : i32
    %c0_i32_0 = arith.constant 0 : i32
    %c0_i32_1 = arith.constant 0 : i32
    return %c0_i32, %c0_i32_0 : i32, i32
  }
  func.func @transform_8(%arg0: i32) -> (i32, i32) {
    %c0_i32 = arith.constant 0 : i32
    %c0_i32_0 = arith.constant 0 : i32
    %c0_i32_1 = arith.constant 0 : i32
    return %c0_i32, %c0_i32_0 : i32, i32
  }
  func.func @transform_9(%arg0: i32) -> (i32, i32) {
    %c0_i32 = arith.constant 0 : i32
    %c0_i32_0 = arith.constant 0 : i32
    %c0_i32_1 = arith.constant 0 : i32
    return %c0_i32, %c0_i32_0 : i32, i32
  }
  func.func @transform_10(%arg0: i32) -> (i32, i32) {
    %c0_i32 = arith.constant 0 : i32
    %c0_i32_0 = arith.constant 0 : i32
    %c0_i32_1 = arith.constant 0 : i32
    return %c0_i32, %c0_i32_0 : i32, i32
  }
  func.func @transform_11(%arg0: i32) -> (i32, i32, i32) {
    %c0_i32 = arith.constant 0 : i32
    %c0_i32_0 = arith.constant 0 : i32
    %c0_i32_1 = arith.constant 0 : i32
    return %arg0, %c0_i32, %c0_i32_0 : i32, i32, i32
  }
  func.func @transform_12(%arg0: i32) -> (i32, i32, i32) {
    %c0_i32 = arith.constant 0 : i32
    %0 = arith.subi %c0_i32, %arg0 : i32
    %c0_i32_0 = arith.constant 0 : i32
    %c0_i32_1 = arith.constant 0 : i32
    %c0_i32_2 = arith.constant 0 : i32
    return %0, %c0_i32_0, %c0_i32_1 : i32, i32, i32
  }
  func.func @transform_13(%arg0: i32) -> (i32, i32) {
    %c0_i32 = arith.constant 0 : i32
    %c0_i32_0 = arith.constant 0 : i32
    %c0_i32_1 = arith.constant 0 : i32
    return %c0_i32, %c0_i32_0 : i32, i32
  }
}

</mosaic_0001>

<bundles_post_ra>
// kernel: _lambda_.5
= control target key start
LH: loop header
LB: loop body
LE: loop exit
PB: predicated region body
PF: predicated region fallthrough
CT: control target
= control target key end

     0   :  { %s402_s2 = inlined_call_operand.vmem [shape: bf16[256,128], index: 2, kind: input, shape index: {}]   ;;  %s403_s0 = inlined_call_operand.vmem [shape: bf16[16,128], index: 0, kind: input, shape index: {}]   ;;  %s404_s1 = inlined_call_operand.vmem [shape: bf16[16,128], index: 1, kind: input, shape index: {}]   ;;  %s405_s3 = inlined_call_operand.vmem [shape: f32[1,128], index: 3, kind: input, shape index: {}]   ;;  %s406_s4 = inlined_call_operand.vmem [shape: f32[16,128], index: 4, kind: output, shape index: {}]  }
   0x1   :  { %v281_v0 = vld [vmem:[%s402_s2 + $0x78] sm:$0xff]   ;;  %v283_v2 = vld [vmem:[%s402_s2 + $0x70] sm:$0xff]   ;;  %v285_v4 = vld [vmem:[%s402_s2 + $0x68] sm:$0xff]  }
   0x2   :  { %v282_v1 = vld [vmem:[%s402_s2 + $0x38] sm:$0xff]   ;;  %259 = vmatprep.subr.bf16.mxu0 %v281_v0  ;;  %v284_v3 = vld [vmem:[%s402_s2 + $0x30] sm:$0xff]   ;;  %v286_v5 = vld [vmem:[%s402_s2 + $0x28] sm:$0xff]  }
   0x3   :  { %260 = vmatpush3.bf16.msra.mxu0 %v282_v1  ;;  %v287_v6 = vld [vmem:[%s402_s2 + $0x60] sm:$0xff]   ;;  %v289_v8 = vld [vmem:[%s402_s2 + $0x58] sm:$0xff]   ;;  %v291_v10 = vld [vmem:[%s402_s2 + $0x50] sm:$0xff]  }
   0x4   :  { %261 = vmatprep.subr.bf16.mxu0 %v283_v2  ;;  %v288_v7 = vld [vmem:[%s402_s2 + $0x20] sm:$0xff]   ;;  %v290_v9 = vld [vmem:[%s402_s2 + $0x18] sm:$0xff]   ;;  %v292_v15 = vld [vmem:[%s402_s2 + $0x10] sm:$0xff]  }
   0x5   :  { %v18_v11 = vld [vmem:[%s403_s0] sm:$0xf]  ;;  %v19_v12 = vld [vmem:[%s403_s0 + $0x4] sm:$0xf]  ;;  %v293_v16 = vld [vmem:[%s402_s2 + $0x48] sm:$0xff]  }
   0x6   :  { %v22_v13 = vld [vmem:[%s404_s1] sm:$0xf]  ;;  %20 = vst [vmem:[#allocation2] sm:$0xf] %v18_v11  ;;  %21 = vst [vmem:[#allocation2 + $0x8] sm:$0xf] %v19_v12 }
   0x7   :  { %262 = vmatpush3.bf16.msra.mxu0 %v284_v3  ;;  %v23_v14 = vld [vmem:[%s404_s1 + $0x4] sm:$0xf]  ;;  %24 = vst [vmem:[#allocation2 + $0x4] sm:$0xf] %v22_v13  ;;  %v294_v17 = vld [vmem:[%s402_s2 + $0x8] sm:$0xff]  }
   0x8   :  { %263 = vmatprep.subr.bf16.mxu0 %v285_v4  ;;  %25 = vst [vmem:[#allocation2 + $0xc] sm:$0xf] %v23_v14  ;;  %v295_v18 = vld [vmem:[%s402_s2 + $0x40] sm:$0xff]  }
   0x9   :  { %v296_v20 = vld [vmem:[%s402_s2] sm:$0xff]  }
   0xa   :  { %v240_v24 = vld [vmem:[%s405_s3] ss:$0 sm:$0xff] }
   0xb   :  { %264 = vmatpush3.bf16.msra.mxu0 %v286_v5 }
   0xc   :  { %265 = vmatprep.subr.bf16.mxu0 %v287_v6 }
   0xd   :  { %v297_v21 = vld [vmem:[#allocation2] ss:$8 sps:$4 sm:$0xff]  }
   0xf   :  { %266 = vmatpush3.bf16.msra.mxu0 %v288_v7  ;;  %v299_v19 = vld [vmem:[#allocation2 + $0x4] ss:$8 sps:$4 sm:$0xff]  }
  0x10   :  { %267 = vmatprep.subr.bf16.mxu0 %v289_v8  ;;  %205 = vmatprep.mubr.bf16.mxu0 %v299_v19 }
  0x13   :  { %268 = vmatpush3.bf16.msra.mxu0 %v290_v9 }
  0x14   :  { %269 = vmatprep.subr.bf16.mxu0 %v291_v10 }
  0x17   :  { %270 = vmatpush3.bf16.msra.mxu0 %v292_v15 }
  0x18   :  { %271 = vmatprep.subr.bf16.mxu0 %v293_v16 }
  0x1b   :  { %272 = vmatpush3.bf16.msra.mxu0 %v294_v17 }
  0x1c   :  { %273 = vmatprep.subr.bf16.mxu0 %v295_v18 }
  0x1f   :  { %274 = vmatpush3.bf16.msra.mxu0 %v296_v20 }
  0x22   :  { %206 = vmatmul.mubr.bf16.vlgmr.msra.gmra.mxu0 %v297_v21 }
  0xe2   :  { %v275_v22 = vpop.f32.mrf.mxu0 }
  0xe4   :  { %v276_v23 = vpop.f32.mrf.mxu0 }
  0xe5   :  { %v277_v25 = vadd.f32 %v276_v23, %v275_v22 }
  0xe6   :  { %v278_v26 = vpop.f32.mrf.mxu0 }
  0xe7   :  { %v208_v27 = vadd.f32 %v277_v25, %v240_v24 }
  0xe8   :  { %v279_v28 = vpop.f32.mrf.mxu0 }
  0xe9   :  { %v280_v29 = vadd.f32 %v279_v28, %v278_v26  ;;  %214 = vmax.xlane.f32.xlu0 %v208_v27 }
  0xeb   :  { %v211_v30 = vadd.f32 %v280_v29, %v240_v24 }
  0xed   :  { %216 = vmax.xlane.f32.xlu0 %v211_v30 }
 0x172   :  { %v215_v31 = vpop.xlane.xlu0 %214 }
 0x173   :  { %v218_v32 = vsub.f32 %v208_v27, %v215_v31 }
 0x175   :  { %v220_v33 = vmul.f32 1.442695, %v218_v32 }
 0x176   :  { %v217_v34 = vpop.xlane.xlu0 %216 }
 0x177   :  { %v219_v35 = vsub.f32 %v211_v30, %v217_v34  ;;  %300 = vpow2.f32 %v220_v33 }
 0x179   :  { %v222_v36 = vmul.f32 1.442695, %v219_v35 }
 0x17b   :  { %302 = vpow2.f32 %v222_v36 }
 0x184   :  { %v301_v37 = vpop.eup %300 }
 0x185   :  { %224 = vadd.xlane.f32.xlu1 %v301_v37 }
 0x188   :  { %v303_v38 = vpop.eup %302 }
 0x189   :  { %226 = vadd.xlane.f32.xlu1 %v303_v38 }
 0x20e   :  { %v225_v39 = vpop.xlane.xlu1 %224 }
 0x20f   :  { %304 = vlog2.f32 %v225_v39 }
 0x212   :  { %v227_v40 = vpop.xlane.xlu1 %226 }
 0x213   :  { %306 = vlog2.f32 %v227_v40 }
 0x21c   :  { %v305_v41 = vpop.eup %304 }
 0x21d   :  { %v229_v42 = vmul.f32 0.6931472, %v305_v41 }
 0x21f   :  { %v232_v43 = vsub.f32 %v218_v32, %v229_v42 }
 0x220   :  { %v307_v44 = vpop.eup %306 }
 0x221   :  { %234 = vst [vmem:[%s406_s4] sm:$0xff] %v232_v43  ;;  %v231_v45 = vmul.f32 0.6931472, %v307_v44 }
 0x223   :  { %v233_v46 = vsub.f32 %v219_v35, %v231_v45 }
 0x225   :  { %235 = vst [vmem:[%s406_s4 + $0x8] sm:$0xff] %v233_v46 }

// kernel: _lambda_.4
= control target key start
LH: loop header
LB: loop body
LE: loop exit
PB: predicated region body
PF: predicated region fallthrough
CT: control target
= control target key end

     0   :  { %v6993_v1 = vmov 0   ;;  %v7010_v2 = vmov 0.0   ;;  %vm4799_vm0 = vmmov 0   ;;  %vm262_vm1 = vcmask 261120   ;;  %s6978_s3 = inlined_call_operand.vmem [shape: bf16[32,384], index: 3, kind: input, shape index: {}]   ;;  %s6979_s4 = inlined_call_operand.vmem [shape: bf16[32,384], index: 4, kind: input, shape index: {}]   ;;  %s6980_s0 = inlined_call_operand.vmem [shape: bf16[8,2,32], index: 0, kind: input, shape index: {}, may-alias: {0,1}]   ;;  %s6981_s7 = inlined_call_operand.vmem [shape: bf16[128,384], index: 7, kind: input, shape index: {}]   ;;  %s6982_s1 = inlined_call_operand.vmem [shape: bf16[8,2,32], index: 1, kind: input, shape index: {}, may-alias: {0,1}]   ;;  %s6983_s2 = inlined_call_operand.vmem [shape: f32[2,256], index: 2, kind: input, shape index: {}]   ;;  %s6984_s8 = inlined_call_operand.vmem [shape: bf16[128,384], index: 8, kind: input, shape index: {}]   ;;  %s6985_s5 = inlined_call_operand.vmem [shape: f32[1,384], index: 5, kind: input, shape index: {}]   ;;  %s6986_s9 = inlined_call_operand.vmem [shape: f32[1,384], index: 9, kind: input, shape index: {}]   ;;  %s6987_s6 = inlined_call_operand.vmem [shape: f32[1,384], index: 6, kind: input, shape index: {}]   ;;  %s6988_s10 = inlined_call_operand.vmem [shape: f32[1,384], index: 10, kind: input, shape index: {}]   ;;  %s6989_s11 = inlined_call_operand.vmem [shape: bf16[8,2,128], index: 11, kind: output, shape index: {0}]   ;;  %s6990_s12 = inlined_call_operand.vmem [shape: bf16[8,2,128], index: 12, kind: output, shape index: {1}]   ;;  %s6991_s13 = inlined_call_operand.vmem [shape: f32[2,256], index: 13, kind: output, shape index: {2}]  }
   0x1   :  { %v4873_v0 = vld [vmem:[%s6978_s3 + $0x1c] ss:$12 sps:$4 sm:$0xff]   ;;  %298 = vmatprep.mubr.bf16.mxu0 %v6993_v1  ;;  %3986 = vmatprep.subr.bf16.mxu1 %v7010_v2  ;;  %v4880_v3 = vld [vmem:[%s6978_s3 + $0x18] ss:$12 sps:$4 sm:$0xff]   ;;  %v4894_v5 = vld [vmem:[%s6978_s3] ss:$12 sps:$4 sm:$0xff]  }
   0x2   :  { %7119 = vst [vmem:[#allocation3_spill] sm:$0xff] %v4873_v0  ;;  %3990 = vmatprep.mubr.msk.bf16.mxu1 %vm4799_vm0, %v7010_v2  ;;  %278 = vmatprep.subr.bf16.mxu0 %v4873_v0  ;;  %v4888_v4 = vld [vmem:[%s6978_s3 + $0x4] ss:$12 sps:$4 sm:$0xff]   ;;  %v4900_v6 = vld [vmem:[%s6979_s4 + $0x1c] ss:$12 sps:$4 sm:$0xff]  }
   0x3   :  { %279 = vmatpush1.bf16.msra.mxu0 %v4880_v3  ;;  %v229_v7 = vld [vmem:[%s6980_s0] sm:$0x1]  ;;  %v4909_v8 = vld [vmem:[%s6979_s4 + $0x18] ss:$12 sps:$4 sm:$0xff]   ;;  %v4944_v14 = vld [vmem:[%s6978_s3 + $0x8] ss:$12 sps:$4 sm:$0xff]  }
   0x4   :  { %280 = vmatprep.subr.bf16.mxu0 %v4888_v4  ;;  %v4915_v9 = vld [vmem:[%s6979_s4 + $0x4] ss:$12 sps:$4 sm:$0xff]   ;;  %v4921_v10 = vld [vmem:[%s6979_s4] ss:$12 sps:$4 sm:$0xff]   ;;  %v4950_v15 = vld [vmem:[%s6981_s7 + $0xa8] ss:$12 sps:$4 sm:$0xff]  }
   0x5   :  { %7120 = vst [vmem:[#allocation4_spill] sm:$0xff] %v4921_v10  ;;  %v4928_v11 = vld [vmem:[%s6978_s3 + $0x20] ss:$12 sps:$4 sm:$0xff]   ;;  %v3650_v13 = vld [vmem:[%s6982_s1 + $0x7] sm:$0x1]  ;;  %7122 = vst [vmem:[#allocation6_spill] sm:$0xff] %v4950_v15 }
   0x6   :  { %v4934_v12 = vld [vmem:[%s6981_s7 + $0xac] ss:$12 sps:$4 sm:$0xff]   ;;  %3987 = vmatpush3.bf16.msra.mxu1 %v4928_v11  ;;  %v4956_v16 = vld [vmem:[%s6981_s7 + $0x94] ss:$12 sps:$4 sm:$0xff]   ;;  %v4970_v18 = vld [vmem:[%s6981_s7 + $0x90] ss:$12 sps:$4 sm:$0xff]  }
   0x7   :  { %281 = vmatpush1.bf16.msra.mxu0 %v4894_v5  ;;  %7121 = vst [vmem:[#allocation5_spill] sm:$0xff] %v4934_v12  ;;  %3988 = vmatprep.subr.bf16.mxu1 %v7010_v2  ;;  %7123 = vst [vmem:[#allocation7_spill] sm:$0xff] %v4956_v16  ;;  %v4962_v17 = vld [vmem:[%s6979_s4 + $0x20] ss:$12 sps:$4 sm:$0xff]   ;;  %v4977_v19 = vld [vmem:[%s6981_s7 + $0x7c] ss:$12 sps:$4 sm:$0xff]  }
   0x8   :  { %396 = vmatprep.subr.bf16.mxu0 %v4900_v6  ;;  %7124 = vst [vmem:[#allocation8_spill] sm:$0xff] %v4970_v18  ;;  %7125 = vst [vmem:[#allocation9_spill] sm:$0xff] %v4977_v19  ;;  %v4984_v20 = vld [vmem:[%s6979_s4 + $0x8] ss:$12 sps:$4 sm:$0xff]   ;;  %v77_v21 = vld [vmem:[%s6983_s2] sm:$0xf] }
   0x9   :  { %7126 = vst [vmem:[#allocation10_spill] sm:$0xff] %v4984_v20  ;;  %78 = vst [vmem:[#allocation2] sm:$0xf] %v77_v21  ;;  %v4996_v22 = vld [vmem:[%s6981_s7 + $0x78] ss:$12 sps:$4 sm:$0xff]  }
   0xa   :  { %3648 = vmatmul.mubr.msk.bf16.vlgmr.msra.gmra.mxu0 %vm262_vm1, %v229_v7  ;;  %3989 = vmatpush3.bf16.msra.mxu1 %v4944_v14  ;;  %7127 = vst [vmem:[#allocation11_spill] sm:$0xff] %v4996_v22  ;;  %v5002_v23 = vld [vmem:[%s6981_s7 + $0x64] ss:$12 sps:$4 sm:$0xff]   ;;  %v5015_v25 = vld [vmem:[%s6981_s7 + $0x60] ss:$12 sps:$4 sm:$0xff]  }
   0xb   :  { %397 = vmatpush1.bf16.msra.mxu0 %v4909_v8  ;;  %416 = vmatprep.mubr.bf16.mxu0 %v6993_v1  ;;  %7128 = vst [vmem:[#allocation12_spill] sm:$0xff] %v5002_v23  ;;  %v5008_v24 = vld [vmem:[%s6981_s7 + $0xb0] ss:$12 sps:$4 sm:$0xff]   ;;  %7130 = vst [vmem:[#allocation14_spill] sm:$0xff] %v5015_v25  ;;  %v5021_v26 = vld [vmem:[%s6981_s7 + $0x4c] ss:$12 sps:$4 sm:$0xff]  }
   0xc   :  { %398 = vmatprep.subr.bf16.mxu0 %v4915_v9  ;;  %3994 = vmatprep.subr.bf16.mxu1 %v7010_v2  ;;  %7129 = vst [vmem:[#allocation13_spill] sm:$0xff] %v5008_v24  ;;  %7131 = vst [vmem:[#allocation15_spill] sm:$0xff] %v5021_v26  ;;  %v5028_v27 = vld [vmem:[%s6981_s7 + $0x98] ss:$12 sps:$4 sm:$0xff]   ;;  %v5037_v28 = vld [vmem:[%s6981_s7 + $0x48] ss:$12 sps:$4 sm:$0xff]  }
   0xd   :  { %3991 = vmatmul.mubr.msk.bf16.vlgmr.msra.gmra.mxu1 %vm262_vm1, %v229_v7  ;;  %7132 = vst [vmem:[#allocation16_spill] sm:$0xff] %v5028_v27  ;;  %7133 = vst [vmem:[#allocation17_spill] sm:$0xff] %v5037_v28  ;;  %v5043_v29 = vld [vmem:[%s6981_s7 + $0x34] ss:$12 sps:$4 sm:$0xff]   ;;  %v5056_v31 = vld [vmem:[%s6981_s7 + $0x30] ss:$12 sps:$4 sm:$0xff]  }
   0xe   :  { %3995 = vmatpush3.bf16.msra.mxu1 %v4962_v17  ;;  %3998 = vmatprep.mubr.msk.bf16.mxu1 %vm4799_vm0, %v7010_v2  ;;  %7134 = vst [vmem:[#allocation18_spill] sm:$0xff] %v5043_v29  ;;  %v5049_v30 = vld [vmem:[%s6981_s7 + $0x80] ss:$12 sps:$4 sm:$0xff]   ;;  %7136 = vst [vmem:[#allocation20_spill] sm:$0xff] %v5056_v31  ;;  %v5062_v32 = vld [vmem:[%s6981_s7 + $0x1c] ss:$12 sps:$4 sm:$0xff]  }
   0xf   :  { %399 = vmatpush1.bf16.msra.mxu0 %v4921_v10  ;;  %3996 = vmatprep.subr.bf16.mxu1 %v7010_v2  ;;  %7135 = vst [vmem:[#allocation19_spill] sm:$0xff] %v5049_v30  ;;  %7137 = vst [vmem:[#allocation21_spill] sm:$0xff] %v5062_v32  ;;  %v5068_v33 = vld [vmem:[%s6981_s7 + $0x68] ss:$12 sps:$4 sm:$0xff]   ;;  %v5075_v34 = vld [vmem:[%s6981_s7 + $0x18] ss:$12 sps:$4 sm:$0xff]  }
  0x10   :  { %594 = vmatprep.subr.bf16.mxu0 %v4934_v12  ;;  %7138 = vst [vmem:[#allocation22_spill] sm:$0xff] %v5068_v33  ;;  %7139 = vst [vmem:[#allocation23_spill] sm:$0xff] %v5075_v34  ;;  %v5081_v35 = vld [vmem:[%s6981_s7 + $0x4] ss:$12 sps:$4 sm:$0xff]   ;;  %v5092_v37 = vld [vmem:[%s6981_s7] ss:$12 sps:$4 sm:$0xff]  }
  0x11   :  { %7140 = vst [vmem:[#allocation24_spill] sm:$0xff] %v5081_v35  ;;  %v5087_v36 = vld [vmem:[%s6981_s7 + $0x50] ss:$12 sps:$4 sm:$0xff]   ;;  %7142 = vst [vmem:[#allocation26_spill] sm:$0xff] %v5092_v37  ;;  %v5096_v38 = vld [vmem:[#allocation2] sm:$0x3] }
  0x12   :  { %3657 = vmatmul.mubr.msk.bf16.vlgmr.msra.gmra.mxu0 %vm262_vm1, %v3650_v13  ;;  %3997 = vmatpush3.bf16.msra.mxu1 %v4984_v20  ;;  %7141 = vst [vmem:[#allocation25_spill] sm:$0xff] %v5087_v36  ;;  %v5102_v39 = vld [vmem:[%s6984_s8 + $0xac] ss:$12 sps:$4 sm:$0xff]   ;;  %v465_v41 = vpack.c.bf16 %v5096_v38, %v5096_v38  ;;  %v5117_v42 = vld [vmem:[%s6984_s8 + $0xa8] ss:$12 sps:$4 sm:$0xff]  }
  0x13   :  { %595 = vmatpush1.bf16.msra.mxu0 %v4950_v15  ;;  %626 = vmatprep.mubr.bf16.mxu0 %v6993_v1  ;;  %7143 = vst [vmem:[#allocation27_spill] sm:$0xff] %v5102_v39  ;;  %v5108_v40 = vld [vmem:[%s6981_s7 + $0x38] ss:$12 sps:$4 sm:$0xff]   ;;  %v5123_v43 = vld [vmem:[%s6984_s8 + $0x94] ss:$12 sps:$4 sm:$0xff]  }
  0x14   :  { %596 = vmatprep.subr.bf16.mxu0 %v4956_v16  ;;  %4002 = vmatprep.subr.bf16.mxu1 %v7010_v2  ;;  %7144 = vst [vmem:[#allocation28_spill] sm:$0xff] %v5108_v40  ;;  %v5129_v44 = vld [vmem:[%s6981_s7 + $0x20] ss:$12 sps:$4 sm:$0xff]   ;;  %v5136_v45 = vld [vmem:[%s6984_s8 + $0x90] ss:$12 sps:$4 sm:$0xff]  }
  0x15   :  { %3999 = vmatmul.mubr.msk.bf16.vlgmr.msra.gmra.mxu1 %vm262_vm1, %v3650_v13  ;;  %7145 = vst [vmem:[#allocation29_spill] sm:$0xff] %v5129_v44  ;;  %v5143_v46 = vld [vmem:[%s6984_s8 + $0x7c] ss:$12 sps:$4 sm:$0xff]   ;;  %v5156_v48 = vld [vmem:[%s6984_s8 + $0x78] ss:$12 sps:$4 sm:$0xff]  }
  0x16   :  { %4003 = vmatpush3.bf16.msra.mxu1 %v5008_v24  ;;  %4018 = vmatprep.mubr.msk.bf16.mxu1 %vm4799_vm0, %v7010_v2  ;;  %v5149_v47 = vld [vmem:[%s6981_s7 + $0x8] ss:$12 sps:$4 sm:$0xff]   ;;  %v5162_v49 = vld [vmem:[%s6984_s8 + $0x64] ss:$12 sps:$4 sm:$0xff]   ;;  %v5175_v51 = vld [vmem:[%s6984_s8 + $0x60] ss:$12 sps:$4 sm:$0xff]  }
  0x17   :  { %597 = vmatpush1.bf16.msra.mxu0 %v4970_v18  ;;  %4004 = vmatprep.subr.bf16.mxu1 %v7010_v2  ;;  %7146 = vst [vmem:[#allocation30_spill] sm:$0xff] %v5149_v47  ;;  %v5168_v50 = vld [vmem:[%s6984_s8 + $0xb0] ss:$12 sps:$4 sm:$0xff]   ;;  %v5181_v52 = vld [vmem:[%s6984_s8 + $0x4c] ss:$12 sps:$4 sm:$0xff]  }
  0x18   :  { %598 = vmatprep.subr.bf16.mxu0 %v4977_v19  ;;  %v5187_v53 = vld [vmem:[%s6984_s8 + $0x98] ss:$12 sps:$4 sm:$0xff]   ;;  %v5196_v54 = vld [vmem:[%s6984_s8 + $0x48] ss:$12 sps:$4 sm:$0xff]   ;;  %v5208_v56 = vld [vmem:[%s6984_s8 + $0x80] ss:$12 sps:$4 sm:$0xff]  }
  0x19   :  { %v5202_v55 = vld [vmem:[%s6984_s8 + $0x34] ss:$12 sps:$4 sm:$0xff]   ;;  %v5215_v57 = vld [vmem:[%s6984_s8 + $0x30] ss:$12 sps:$4 sm:$0xff]   ;;  %v5234_v60 = vld [vmem:[%s6984_s8 + $0x18] ss:$12 sps:$4 sm:$0xff]  }
  0x1a   :  { %4005 = vmatpush3.bf16.msra.mxu1 %v5028_v27  ;;  %v5221_v58 = vld [vmem:[%s6984_s8 + $0x1c] ss:$12 sps:$4 sm:$0xff]   ;;  %v5240_v61 = vld [vmem:[%s6984_s8 + $0x4] ss:$12 sps:$4 sm:$0xff]   ;;  %v5253_v63 = vld [vmem:[%s6984_s8] ss:$12 sps:$4 sm:$0xff]  }
  0x1b   :  { %599 = vmatpush1.bf16.msra.mxu0 %v4996_v22  ;;  %4006 = vmatprep.subr.bf16.mxu1 %v7010_v2  ;;  %v5227_v59 = vld [vmem:[%s6984_s8 + $0x68] ss:$12 sps:$4 sm:$0xff]   ;;  %v5246_v62 = vld [vmem:[%s6984_s8 + $0x50] ss:$12 sps:$4 sm:$0xff]   ;;  %v5255_v7 = vld [vmem:[#allocation2 + $0x2] sm:$0x3] }
  0x1c   :  { %600 = vmatprep.subr.bf16.mxu0 %v5002_v23  ;;  %v5262_v13 = vld [vmem:[%s6984_s8 + $0x38] ss:$12 sps:$4 sm:$0xff]   ;;  %v675_v21 = vpack.c.bf16 %v5255_v7, %v5255_v7 }
  0x1e   :  { %4007 = vmatpush3.bf16.msra.mxu1 %v5049_v30 }
  0x1f   :  { %601 = vmatpush1.bf16.msra.mxu0 %v5015_v25  ;;  %4008 = vmatprep.subr.bf16.mxu1 %v7010_v2 }
  0x20   :  { %602 = vmatprep.subr.bf16.mxu0 %v5021_v26 }
  0x22   :  { %4009 = vmatpush3.bf16.msra.mxu1 %v5068_v33 }
  0x23   :  { %603 = vmatpush1.bf16.msra.mxu0 %v5037_v28  ;;  %4010 = vmatprep.subr.bf16.mxu1 %v7010_v2 }
  0x24   :  { %604 = vmatprep.subr.bf16.mxu0 %v5043_v29 }
  0x26   :  { %4011 = vmatpush3.bf16.msra.mxu1 %v5087_v36 }
  0x27   :  { %605 = vmatpush1.bf16.msra.mxu0 %v5056_v31  ;;  %4012 = vmatprep.subr.bf16.mxu1 %v7010_v2 }
  0x28   :  { %606 = vmatprep.subr.bf16.mxu0 %v5062_v32 }
  0x2a   :  { %4013 = vmatpush3.bf16.msra.mxu1 %v5108_v40 }
  0x2b   :  { %607 = vmatpush1.bf16.msra.mxu0 %v5075_v34  ;;  %4014 = vmatprep.subr.bf16.mxu1 %v7010_v2 }
  0x2c   :  { %608 = vmatprep.subr.bf16.mxu0 %v5081_v35 }
  0x2e   :  { %4015 = vmatpush3.bf16.msra.mxu1 %v5129_v44 }
  0x2f   :  { %609 = vmatpush1.bf16.msra.mxu0 %v5092_v37  ;;  %4016 = vmatprep.subr.bf16.mxu1 %v7010_v2 }
  0x30   :  { %804 = vmatprep.subr.bf16.mxu0 %v5102_v39 }
  0x32   :  { %627 = vmatmul.mubr.bf16.vlgmr.msra.gmra.mxu0 %v465_v41  ;;  %4017 = vmatpush3.bf16.msra.mxu1 %v5149_v47 }
  0x33   :  { %805 = vmatpush1.bf16.msra.mxu0 %v5117_v42  ;;  %836 = vmatprep.mubr.bf16.mxu0 %v6993_v1 }
  0x34   :  { %806 = vmatprep.subr.bf16.mxu0 %v5123_v43  ;;  %4022 = vmatprep.subr.bf16.mxu1 %v7010_v2 }
  0x35   :  { %4019 = vmatmul.mubr.bf16.vlgmr.msra.gmra.mxu1 %v465_v41  ;;  %v5273_v41 = vld [vmem:[%s6984_s8 + $0x20] ss:$12 sps:$4 sm:$0xff]  }
  0x36   :  { %4023 = vmatpush3.bf16.msra.mxu1 %v5168_v50  ;;  %4038 = vmatprep.mubr.msk.bf16.mxu1 %vm4799_vm0, %v7010_v2 }
  0x37   :  { %807 = vmatpush1.bf16.msra.mxu0 %v5136_v45  ;;  %4024 = vmatprep.subr.bf16.mxu1 %v7010_v2 }
  0x38   :  { %808 = vmatprep.subr.bf16.mxu0 %v5143_v46 }
  0x3a   :  { %4025 = vmatpush3.bf16.msra.mxu1 %v5187_v53 }
  0x3b   :  { %809 = vmatpush1.bf16.msra.mxu0 %v5156_v48  ;;  %4026 = vmatprep.subr.bf16.mxu1 %v7010_v2 }
  0x3c   :  { %810 = vmatprep.subr.bf16.mxu0 %v5162_v49 }
  0x3e   :  { %4027 = vmatpush3.bf16.msra.mxu1 %v5208_v56 }
  0x3f   :  { %811 = vmatpush1.bf16.msra.mxu0 %v5175_v51  ;;  %4028 = vmatprep.subr.bf16.mxu1 %v7010_v2 }
  0x40   :  { %812 = vmatprep.subr.bf16.mxu0 %v5181_v52 }
  0x42   :  { %4029 = vmatpush3.bf16.msra.mxu1 %v5227_v59 }
  0x43   :  { %813 = vmatpush1.bf16.msra.mxu0 %v5196_v54  ;;  %4030 = vmatprep.subr.bf16.mxu1 %v7010_v2 }
  0x44   :  { %814 = vmatprep.subr.bf16.mxu0 %v5202_v55 }
  0x46   :  { %4031 = vmatpush3.bf16.msra.mxu1 %v5246_v62 }
  0x47   :  { %815 = vmatpush1.bf16.msra.mxu0 %v5215_v57  ;;  %4032 = vmatprep.subr.bf16.mxu1 %v7010_v2 }
  0x48   :  { %816 = vmatprep.subr.bf16.mxu0 %v5221_v58 }
  0x4a   :  { %4033 = vmatpush3.bf16.msra.mxu1 %v5262_v13 }
  0x4b   :  { %817 = vmatpush1.bf16.msra.mxu0 %v5234_v60  ;;  %4034 = vmatprep.subr.bf16.mxu1 %v7010_v2 }
  0x4c   :  { %818 = vmatprep.subr.bf16.mxu0 %v5240_v61 }
  0x4e   :  { %4035 = vmatpush3.bf16.msra.mxu1 %v5273_v41 }
  0x4f   :  { %819 = vmatpush1.bf16.msra.mxu0 %v5253_v63  ;;  %4036 = vmatprep.subr.bf16.mxu1 %v7010_v2 }
  0x50   :  { %949 = vmatprep.subr.bf16.mxu0 %v4873_v0  ;;  %v5283_v0 = vld [vmem:[%s6984_s8 + $0x8] ss:$12 sps:$4 sm:$0xff]  }
  0x52   :  { %837 = vmatmul.mubr.bf16.vlgmr.msra.gmra.mxu0 %v675_v21  ;;  %4037 = vmatpush3.bf16.msra.mxu1 %v5283_v0 }
  0x53   :  { %950 = vmatpush1.bf16.msra.mxu0 %v4880_v3  ;;  %969 = vmatprep.mubr.bf16.mxu0 %v6993_v1  ;;  %v3712_v1 = vld [vmem:[%s6980_s0 + $0x1] sm:$0x1] }
  0x54   :  { %951 = vmatprep.subr.bf16.mxu0 %v4888_v4  ;;  %4042 = vmatprep.subr.bf16.mxu1 %v7010_v2 }
  0x55   :  { %4039 = vmatmul.mubr.bf16.vlgmr.msra.gmra.mxu1 %v675_v21  ;;  %v7147_v21 = vmov 0  }
  0x56   :  { %4043 = vmatpush3.bf16.msra.mxu1 %v4928_v11  ;;  %4046 = vmatprep.mubr.msk.bf16.mxu1 %vm4799_vm0, %v7010_v2 }
  0x57   :  { %952 = vmatpush1.bf16.msra.mxu0 %v4894_v5  ;;  %4044 = vmatprep.subr.bf16.mxu1 %v7010_v2 }
  0x58   :  { %1035 = vmatprep.subr.bf16.mxu0 %v4900_v6 }
  0x5a   :  { %4045 = vmatpush3.bf16.msra.mxu1 %v4944_v14  ;;  %3713 = vmatmul.mubr.msk.bf16.vlgmr.msra.gmra.mxu0 %vm262_vm1, %v3712_v1 }
  0x5b   :  { %4050 = vmatprep.subr.bf16.mxu1 %v7010_v2  ;;  %1036 = vmatpush1.bf16.msra.mxu0 %v4909_v8 }
  0x5c   :  { %1037 = vmatprep.subr.bf16.mxu0 %v4915_v9  ;;  %1055 = vmatprep.mubr.bf16.mxu0 %v7147_v21 }
  0x5d   :  { %4047 = vmatmul.mubr.msk.bf16.vlgmr.msra.gmra.mxu1 %vm262_vm1, %v3712_v1  ;;  %v3715_v1 = vld [vmem:[%s6982_s1 + $0x6] sm:$0x1] }
  0x5e   :  { %4051 = vmatpush3.bf16.msra.mxu1 %v4962_v17  ;;  %4054 = vmatprep.mubr.msk.bf16.mxu1 %vm4799_vm0, %v7010_v2 }
  0x5f   :  { %4052 = vmatprep.subr.bf16.mxu1 %v7010_v2  ;;  %1038 = vmatpush1.bf16.msra.mxu0 %v4921_v10 }
  0x60   :  { %1104 = vmatprep.subr.bf16.mxu0 %v4934_v12 }
  0x62   :  { %4053 = vmatpush3.bf16.msra.mxu1 %v4984_v20  ;;  %3716 = vmatmul.mubr.msk.bf16.vlgmr.msra.gmra.mxu0 %vm262_vm1, %v3715_v1 }
  0x63   :  { %4058 = vmatprep.subr.bf16.mxu1 %v7010_v2  ;;  %1105 = vmatpush1.bf16.msra.mxu0 %v4950_v15 }
  0x64   :  { %1106 = vmatprep.subr.bf16.mxu0 %v4956_v16  ;;  %1136 = vmatprep.mubr.bf16.mxu0 %v7147_v21 }
  0x65   :  { %4055 = vmatmul.mubr.msk.bf16.vlgmr.msra.gmra.mxu1 %vm262_vm1, %v3715_v1 }
  0x66   :  { %4059 = vmatpush3.bf16.msra.mxu1 %v5008_v24  ;;  %4074 = vmatprep.mubr.msk.bf16.mxu1 %vm4799_vm0, %v7010_v2 }
  0x67   :  { %4060 = vmatprep.subr.bf16.mxu1 %v7010_v2  ;;  %1107 = vmatpush1.bf16.msra.mxu0 %v4970_v18 }
  0x68   :  { %1108 = vmatprep.subr.bf16.mxu0 %v4977_v19 }
  0x6a   :  { %4061 = vmatpush3.bf16.msra.mxu1 %v5028_v27 }
  0x6b   :  { %4062 = vmatprep.subr.bf16.mxu1 %v7010_v2  ;;  %1109 = vmatpush1.bf16.msra.mxu0 %v4996_v22 }
  0x6c   :  { %1110 = vmatprep.subr.bf16.mxu0 %v5002_v23 }
  0x6e   :  { %4063 = vmatpush3.bf16.msra.mxu1 %v5049_v30 }
  0x6f   :  { %4064 = vmatprep.subr.bf16.mxu1 %v7010_v2  ;;  %1111 = vmatpush1.bf16.msra.mxu0 %v5015_v25 }
  0x70   :  { %1112 = vmatprep.subr.bf16.mxu0 %v5021_v26 }
  0x72   :  { %4065 = vmatpush3.bf16.msra.mxu1 %v5068_v33 }
  0x73   :  { %4066 = vmatprep.subr.bf16.mxu1 %v7010_v2  ;;  %1113 = vmatpush1.bf16.msra.mxu0 %v5037_v28 }
  0x74   :  { %1114 = vmatprep.subr.bf16.mxu0 %v5043_v29 }
  0x76   :  { %4067 = vmatpush3.bf16.msra.mxu1 %v5087_v36 }
  0x77   :  { %4068 = vmatprep.subr.bf16.mxu1 %v7010_v2  ;;  %1115 = vmatpush1.bf16.msra.mxu0 %v5056_v31 }
  0x78   :  { %1116 = vmatprep.subr.bf16.mxu0 %v5062_v32 }
  0x7a   :  { %4069 = vmatpush3.bf16.msra.mxu1 %v5108_v40 }
  0x7b   :  { %4070 = vmatprep.subr.bf16.mxu1 %v7010_v2  ;;  %1117 = vmatpush1.bf16.msra.mxu0 %v5075_v34 }
  0x7c   :  { %1118 = vmatprep.subr.bf16.mxu0 %v5081_v35 }
  0x7e   :  { %4071 = vmatpush3.bf16.msra.mxu1 %v5129_v44 }
  0x7f   :  { %4072 = vmatprep.subr.bf16.mxu1 %v7010_v2  ;;  %1119 = vmatpush1.bf16.msra.mxu0 %v5092_v37 }
  0x80   :  { %1185 = vmatprep.subr.bf16.mxu0 %v5102_v39 }
  0x82   :  { %4073 = vmatpush3.bf16.msra.mxu1 %v5149_v47 }
  0x83   :  { %4078 = vmatprep.subr.bf16.mxu1 %v7010_v2  ;;  %v161_v2 = vlaneseq }
  0x85   :  { %v162_v23 = vshrl.u32 %v161_v2, 7 }
  0x87   :  { %v163_v30 = vsub.s32 0, %v162_v23 }
  0xca   :  { %v300_v1 = vpop.f32.mrf.mxu0 }
  0xcc   :  { %v302_v32 = vpop.f32.mrf.mxu0 }
  0xcd   :  { %v5354_v44 = vpop.f32.mrf.mxu1 }
  0xce   :  { %v304_v40 = vpop.f32.mrf.mxu0 }
  0xcf   :  { %v3992_v36 = vpop.f32.mrf.mxu1 }
  0xd0   :  { %v305_v31 = vpop.f32.mrf.mxu0 }
  0xd1   :  { %v344_v26 = vpop.f32.mrf.mxu1  ;;  %v159_v31 = vld [vmem:[%s6985_s5] sm:$0x7] }
  0xd2   :  { %v418_v29 = vpop.f32.mrf.mxu0  ;;  %v5364_v36 = vrot.slane %v159_v31, %v163_v30 }
  0xd3   :  { %v3993_v37 = vpop.f32.mrf.mxu1 }
  0xd4   :  { %v5352_v34 = vpop.f32.mrf.mxu0  ;;  %7148 = vst [vmem:[#allocation31_spill] sm:$0xff] %v5364_v36 }
  0xd5   :  { %v5356_v33 = vpop.f32.mrf.mxu1 }
  0xd6   :  { %v422_v35 = vpop.f32.mrf.mxu0 }
  0xd7   :  { %v4000_v47 = vpop.f32.mrf.mxu1  ;;  %v193_v35 = vld [vmem:[%s6986_s9] sm:$0x7] }
  0xd8   :  { %v423_v28 = vpop.f32.mrf.mxu0  ;;  %v5366_v26 = vrot.slane %v193_v35, %v163_v30 }
  0xd9   :  { %v462_v39 = vpop.f32.mrf.mxu1  ;;  %v167_v28 = vsub.s32 1, %v162_v23 }
  0xda   :  { %7149 = vst [vmem:[#allocation32_spill] sm:$0xff] %v5366_v26  ;;  %v301_v39 = vadd.f32 %v300_v1, %v5364_v36 }
  0xdb   :  { %v4001_v25 = vpop.f32.mrf.mxu1  ;;  %v5370_v2 = vrot.slane %v193_v35, %v167_v28  ;;  %v5372_v47 = vrot.slane %v159_v31, %v167_v28 }
  0xdd   :  { %7150 = vst [vmem:[#allocation33_spill] sm:$0xff] %v5370_v2  ;;  %7151 = vst [vmem:[#allocation34_spill] sm:$0xff] %v5372_v47  ;;  %v303_v24 = vadd.f32 %v302_v32, %v5372_v47 }
  0xf2   :  { %v628_v37 = vpop.f32.mrf.mxu0 }
  0xf3   :  { %v629_v25 = vadd.f32 %v628_v37, %v5366_v26 }
  0xf4   :  { %v630_v40 = vpop.f32.mrf.mxu0 }
  0xf5   :  { %v885_v22 = vadd.f32 %v629_v25, %v301_v39  ;;  %v631_v18 = vadd.f32 %v630_v40, %v5370_v2  ;;  %v669_v12 = vpop.f32.mrf.mxu1 }
  0xf6   :  { %v632_v19 = vpop.f32.mrf.mxu0 }
  0xf7   :  { %v3707_v27 = vmul.f32 -1.442695, %v885_v22  ;;  %v892_v15 = vadd.f32 %v631_v18, %v303_v24  ;;  %v4020_v20 = vpop.f32.mrf.mxu1  ;;  %v176_v19 = vld [vmem:[%s6987_s6] sm:$0x7]  ;;  %v171_v22 = vsub.s32 2, %v162_v23 }
  0xf8   :  { %v633_v16 = vpop.f32.mrf.mxu0  ;;  %v5395_v40 = vrot.slane %v176_v19, %v167_v28 }
  0xf9   :  { %4517 = vpow2.f32 %v3707_v27  ;;  %v3708_v1 = vmul.f32 -1.442695, %v892_v15  ;;  %v672_v36 = vpop.f32.mrf.mxu1  ;;  %v210_v16 = vld [vmem:[%s6988_s10] sm:$0x7]  ;;  %v5382_v27 = vrot.slane %v176_v19, %v163_v30  ;;  %v5384_v18 = vrot.slane %v193_v35, %v171_v22 }
  0xfa   :  { %v5386_v15 = vrot.slane %v210_v16, %v163_v30  ;;  %v5388_v24 = vrot.slane %v159_v31, %v171_v22 }
  0xfb   :  { %v4021_v37 = vpop.f32.mrf.mxu1  ;;  %4519 = vpow2.f32 %v3708_v1  ;;  %7152 = vst [vmem:[#allocation35_spill] sm:$0xff] %v5384_v18  ;;  %v419_v36 = vadd.f32 %v418_v29, %v5382_v27  ;;  %v670_v39 = vadd.f32 %v669_v12, %v5384_v18  ;;  %v421_v12 = vadd.f32 %v5352_v34, %v5395_v40 }
  0xfc   :  { %7153 = vst [vmem:[#allocation36_spill] sm:$0xff] %v5386_v15  ;;  %v342_v30 = vadd.f32 %v5354_v44, %v5388_v24 }
 0x106   :  { %v4518_v26 = vpop.eup %4517 }
 0x107   :  { %v889_v10 = vadd.f32 1.0, %v4518_v26 }
 0x108   :  { %v4520_v20 = vpop.eup %4519 }
 0x109   :  { %4521 = vrcp.f32 %v889_v10  ;;  %v5390_v10 = vrot.slane %v210_v16, %v167_v28  ;;  %v896_v26 = vadd.f32 1.0, %v4520_v20 }
 0x10b   :  { %4523 = vrcp.f32 %v896_v26 }
 0x112   :  { %v838_v32 = vpop.f32.mrf.mxu0 }
 0x113   :  { %v839_v25 = vadd.f32 %v838_v32, %v5386_v15 }
 0x114   :  { %v840_v23 = vpop.f32.mrf.mxu0 }
 0x115   :  { %v906_v35 = vadd.f32 %v839_v25, %v419_v36  ;;  %v841_v2 = vadd.f32 %v840_v23, %v5390_v10  ;;  %v879_v32 = vpop.f32.mrf.mxu1 }
 0x116   :  { %v4522_v1 = vpop.eup %4521  ;;  %v842_v31 = vpop.f32.mrf.mxu0 }
 0x117   :  { %v899_v37 = vmul.f32 %v4522_v1, %v670_v39  ;;  %v3709_v47 = vmul.f32 -1.442695, %v906_v35  ;;  %v913_v28 = vadd.f32 %v841_v2, %v421_v12  ;;  %v4040_v36 = vpop.f32.mrf.mxu1 }
 0x118   :  { %v843_v29 = vpop.f32.mrf.mxu0  ;;  %v4524_v44 = vpop.eup %4523 }
 0x119   :  { %v900_v20 = vadd.f32 %v899_v37, %v342_v30  ;;  %4525 = vpow2.f32 %v3709_v47  ;;  %v3710_v25 = vmul.f32 -1.442695, %v913_v28  ;;  %v882_v18 = vpop.f32.mrf.mxu1  ;;  %v902_v35 = vsub.f32 1.0, %v4524_v44 }
 0x11a   :  { %v904_v31 = vmul.f32 %v4524_v44, %v5096_v38  ;;  %v5407_v47 = vrot.slane %v210_v16, %v171_v22  ;;  %v7154_v38 = vmov 0.0   ;;  %v5419_v16 = vrot.slane %v176_v19, %v171_v22 }
 0x11b   :  { %4527 = vtanh.f32 %v900_v20  ;;  %v4041_v15 = vpop.f32.mrf.mxu1 }
 0x11c   :  { %4529 = vpow2.f32 %v3710_v25  ;;  %v880_v30 = vadd.f32 %v879_v32, %v5407_v47  ;;  %v460_v29 = vadd.f32 %v5356_v33, %v5419_v16  ;;  %v5440_v33 = vpop.f32.mrf.mxu0 }
 0x11d   :  { %v5442_v22 = vpop.f32.mrf.mxu1 }
 0x11e   :  { %v5446_v28 = vpop.f32.mrf.mxu0 }
 0x11f   :  { %v4048_v32 = vpop.f32.mrf.mxu1 }
 0x120   :  { %v975_v36 = vpop.f32.mrf.mxu0  ;;  %v7163_v32 = vld [vmem:[#allocation16_spill] sm:$0xff] }
 0x121   :  { %v1015_v25 = vpop.f32.mrf.mxu1  ;;  %v7164_v36 = vld [vmem:[#allocation9_spill] sm:$0xff] }
 0x122   :  { %v7165_v25 = vld [vmem:[#allocation11_spill] sm:$0xff] }
 0x126   :  { %v4526_v26 = vpop.eup %4525 }
 0x127   :  { %v910_v39 = vadd.f32 1.0, %v4526_v26 }
 0x128   :  { %v4528_v1 = vpop.eup %4527 }
 0x129   :  { %4531 = vrcp.f32 %v910_v39  ;;  %v903_v23 = vmul.f32 %v4528_v1, %v902_v35  ;;  %v4530_v18 = vpop.eup %4529  ;;  %v976_v39 = vpop.f32.mrf.mxu0 }
 0x12a   :  { %v917_v15 = vadd.f32 1.0, %v4530_v18  ;;  %v4049_v35 = vpop.f32.mrf.mxu1  ;;  %v7168_v39 = vld [vmem:[#allocation14_spill] sm:$0xff] }
 0x12b   :  { %v5403_v34 = vadd.f32 %v904_v31, %v903_v23  ;;  %v5455_v31 = vpop.f32.mrf.mxu0  ;;  %v7169_v35 = vld [vmem:[#allocation22_spill] sm:$0xff] }
 0x12c   :  { %4533 = vrcp.f32 %v917_v15 }
 0x12d   :  { %v927_v2 = vpack.c.bf16 %v5403_v34, %v5403_v34  ;;  %v5463_v15 = vpop.f32.mrf.mxu0 }
 0x12f   :  { %928 = vst [vmem:[%s6989_s11] sm:$0x1] %v927_v2  ;;  %1137 = vmatmul.mubr.bf16.vlgmr.msra.gmra.mxu0 %v927_v2  ;;  %4075 = vmatmul.mubr.bf16.vlgmr.msra.gmra.mxu1 %v927_v2  ;;  %v5457_v2 = vpop.f32.mrf.mxu1 }
 0x130   :  { %1186 = vmatpush1.bf16.msra.mxu0 %v5117_v42  ;;  %4079 = vmatpush3.bf16.msra.mxu1 %v5168_v50 }
 0x131   :  { %1187 = vmatprep.subr.bf16.mxu0 %v5123_v43  ;;  %4080 = vmatprep.subr.bf16.mxu1 %v7154_v38 }
 0x132   :  { %1217 = vmatprep.mubr.bf16.mxu0 %v7147_v21  ;;  %4094 = vmatprep.mubr.msk.bf16.mxu1 %vm4799_vm0, %v7154_v38 }
 0x134   :  { %1188 = vmatpush1.bf16.msra.mxu0 %v5136_v45  ;;  %4081 = vmatpush3.bf16.msra.mxu1 %v5187_v53 }
 0x135   :  { %1189 = vmatprep.subr.bf16.mxu0 %v5143_v46  ;;  %4082 = vmatprep.subr.bf16.mxu1 %v7154_v38 }
 0x136   :  { %v4532_v37 = vpop.eup %4531 }
 0x137   :  { %v920_v12 = vmul.f32 %v4532_v37, %v880_v30  ;;  %v4056_v30 = vpop.f32.mrf.mxu1 }
 0x138   :  { %1190 = vmatpush1.bf16.msra.mxu0 %v5156_v48  ;;  %4083 = vmatpush3.bf16.msra.mxu1 %v5208_v56  ;;  %v7172_v30 = vld [vmem:[#allocation25_spill] sm:$0xff] }
 0x139   :  { %v921_v19 = vadd.f32 %v920_v12, %v460_v29  ;;  %1191 = vmatprep.subr.bf16.mxu0 %v5162_v49  ;;  %4084 = vmatprep.subr.bf16.mxu1 %v7154_v38  ;;  %v4534_v20 = vpop.eup %4533  ;;  %v7155_v29 = vld [vmem:[#allocation3_spill] sm:$0xff]  ;;  %v1101_v12 = vpop.f32.mrf.mxu1 }
 0x13a   :  { %v923_v44 = vsub.f32 1.0, %v4534_v20  ;;  %v925_v23 = vmul.f32 %v4534_v20, %v5255_v7  ;;  %v1061_v7 = vpop.f32.mrf.mxu0  ;;  %v7176_v12 = vld [vmem:[#allocation21_spill] sm:$0xff] }
 0x13b   :  { %4535 = vtanh.f32 %v921_v19  ;;  %v4057_v20 = vpop.f32.mrf.mxu1  ;;  %v7175_v7 = vld [vmem:[#allocation28_spill] sm:$0xff] }
 0x13c   :  { %1192 = vmatpush1.bf16.msra.mxu0 %v5175_v51  ;;  %4085 = vmatpush3.bf16.msra.mxu1 %v5227_v59  ;;  %v1062_v19 = vpop.f32.mrf.mxu0  ;;  %v7178_v20 = vld [vmem:[#allocation29_spill] sm:$0xff] }
 0x13d   :  { %1193 = vmatprep.subr.bf16.mxu0 %v5181_v52  ;;  %4086 = vmatprep.subr.bf16.mxu1 %v7154_v38  ;;  %v7177_v19 = vld [vmem:[#allocation23_spill] sm:$0xff] }
 0x140   :  { %1194 = vmatpush1.bf16.msra.mxu0 %v5196_v54  ;;  %4087 = vmatpush3.bf16.msra.mxu1 %v5246_v62 }
 0x141   :  { %1195 = vmatprep.subr.bf16.mxu0 %v5202_v55  ;;  %4088 = vmatprep.subr.bf16.mxu1 %v7154_v38 }
 0x144   :  { %1196 = vmatpush1.bf16.msra.mxu0 %v5215_v57  ;;  %4089 = vmatpush3.bf16.msra.mxu1 %v5262_v13 }
 0x145   :  { %1197 = vmatprep.subr.bf16.mxu0 %v5221_v58  ;;  %4090 = vmatprep.subr.bf16.mxu1 %v7154_v38 }
 0x148   :  { %v4536_v26 = vpop.eup %4535  ;;  %1198 = vmatpush1.bf16.msra.mxu0 %v5234_v60  ;;  %4091 = vmatpush3.bf16.msra.mxu1 %v5273_v41 }
 0x149   :  { %1199 = vmatprep.subr.bf16.mxu0 %v5240_v61  ;;  %4092 = vmatprep.subr.bf16.mxu1 %v7154_v38  ;;  %v924_v1 = vmul.f32 %v4536_v26, %v923_v44  ;;  %v7166_v44 = vld [vmem:[#allocation19_spill] sm:$0xff]  ;;  %v7167_v26 = vld [vmem:[#allocation12_spill] sm:$0xff] }
 0x14b   :  { %v5459_v18 = vadd.f32 %v925_v23, %v924_v1  ;;  %v7170_v1 = vld [vmem:[#allocation15_spill] sm:$0xff]  ;;  %v7171_v23 = vld [vmem:[#allocation17_spill] sm:$0xff] }
 0x14c   :  { %1200 = vmatpush1.bf16.msra.mxu0 %v5253_v63  ;;  %4093 = vmatpush3.bf16.msra.mxu1 %v5283_v0 }
 0x14d   :  { %v929_v37 = vpack.c.bf16 %v5459_v18, %v5459_v18  ;;  %1331 = vmatprep.subr.bf16.mxu0 %v7155_v29  ;;  %4098 = vmatprep.subr.bf16.mxu1 %v7154_v38  ;;  %v7174_v29 = vld [vmem:[#allocation20_spill] sm:$0xff] }
 0x14f   :  { %3711 = vst [vmem:[%s6990_s12 + $0x7] sm:$0x1] %v929_v37  ;;  %1218 = vmatmul.mubr.bf16.vlgmr.msra.gmra.mxu0 %v929_v37  ;;  %4095 = vmatmul.mubr.bf16.vlgmr.msra.gmra.mxu1 %v929_v37  ;;  %v7173_v37 = vld [vmem:[#allocation18_spill] sm:$0xff] }
 0x150   :  { %1332 = vmatpush1.bf16.msra.mxu0 %v4880_v3  ;;  %4099 = vmatpush3.bf16.msra.mxu1 %v4928_v11  ;;  %v3724_v3 = vld [vmem:[%s6980_s0 + $0x2] sm:$0x1]  ;;  %v7160_v11 = vld [vmem:[#allocation13_spill] sm:$0xff] }
 0x151   :  { %1333 = vmatprep.subr.bf16.mxu0 %v4888_v4  ;;  %1351 = vmatprep.mubr.bf16.mxu0 %v7147_v21  ;;  %v7156_v4 = vld [vmem:[#allocation4_spill] sm:$0xff] }
 0x152   :  { %4100 = vmatprep.subr.bf16.mxu1 %v7154_v38  ;;  %4102 = vmatprep.mubr.msk.bf16.mxu1 %vm4799_vm0, %v7154_v38 }
 0x154   :  { %1334 = vmatpush1.bf16.msra.mxu0 %v4894_v5  ;;  %4101 = vmatpush3.bf16.msra.mxu1 %v4944_v14  ;;  %v7157_v5 = vld [vmem:[#allocation10_spill] sm:$0xff]  ;;  %v7161_v14 = vld [vmem:[#allocation7_spill] sm:$0xff] }
 0x155   :  { %1417 = vmatprep.subr.bf16.mxu0 %v4900_v6  ;;  %4106 = vmatprep.subr.bf16.mxu1 %v7154_v38  ;;  %v7158_v6 = vld [vmem:[#allocation5_spill] sm:$0xff] }
 0x157   :  { %3725 = vmatmul.mubr.msk.bf16.vlgmr.msra.gmra.mxu0 %vm262_vm1, %v3724_v3  ;;  %4103 = vmatmul.mubr.msk.bf16.vlgmr.msra.gmra.mxu1 %vm262_vm1, %v3724_v3  ;;  %v7179_v3 = vld [vmem:[#allocation24_spill] sm:$0xff] }
 0x158   :  { %1418 = vmatpush1.bf16.msra.mxu0 %v4909_v8  ;;  %4107 = vmatpush3.bf16.msra.mxu1 %v4962_v17  ;;  %v3727_v8 = vld [vmem:[%s6982_s1 + $0x5] sm:$0x1]  ;;  %v7162_v17 = vld [vmem:[#allocation8_spill] sm:$0xff] }
 0x159   :  { %1419 = vmatprep.subr.bf16.mxu0 %v4915_v9  ;;  %1437 = vmatprep.mubr.bf16.mxu0 %v7147_v21  ;;  %v7159_v9 = vld [vmem:[#allocation6_spill] sm:$0xff] }
 0x15a   :  { %4108 = vmatprep.subr.bf16.mxu1 %v7154_v38  ;;  %4110 = vmatprep.mubr.msk.bf16.mxu1 %vm4799_vm0, %v7154_v38 }
 0x15c   :  { %1420 = vmatpush1.bf16.msra.mxu0 %v7156_v4  ;;  %4109 = vmatpush3.bf16.msra.mxu1 %v7157_v5  ;;  %v7180_v4 = vld [vmem:[#allocation26_spill] sm:$0xff] }
 0x15d   :  { %1486 = vmatprep.subr.bf16.mxu0 %v7158_v6  ;;  %4114 = vmatprep.subr.bf16.mxu1 %v7154_v38  ;;  %v7181_v5 = vld [vmem:[#allocation30_spill] sm:$0xff]  ;;  %v7182_v6 = vld [vmem:[#allocation27_spill] sm:$0xff] }
 0x15f   :  { %3728 = vmatmul.mubr.msk.bf16.vlgmr.msra.gmra.mxu0 %vm262_vm1, %v3727_v8  ;;  %4111 = vmatmul.mubr.msk.bf16.vlgmr.msra.gmra.mxu1 %vm262_vm1, %v3727_v8 }
 0x160   :  { %1487 = vmatpush1.bf16.msra.mxu0 %v7159_v9  ;;  %4115 = vmatpush3.bf16.msra.mxu1 %v7160_v11  ;;  %v7183_v11 = vld [vmem:[#allocation31_spill] sm:$0xff] }
 0x161   :  { %1488 = vmatprep.subr.bf16.mxu0 %v7161_v14  ;;  %4116 = vmatprep.subr.bf16.mxu1 %v7154_v38  ;;  %v972_v14 = vadd.f32 %v5440_v33, %v7183_v11 }
 0x162   :  { %1518 = vmatprep.mubr.bf16.mxu0 %v7147_v21  ;;  %4130 = vmatprep.mubr.msk.bf16.mxu1 %vm4799_vm0, %v7154_v38 }
 0x164   :  { %1489 = vmatpush1.bf16.msra.mxu0 %v7162_v17  ;;  %4117 = vmatpush3.bf16.msra.mxu1 %v7163_v32  ;;  %v7184_v17 = vld [vmem:[#allocation32_spill] sm:$0xff] }
 0x165   :  { %1490 = vmatprep.subr.bf16.mxu0 %v7164_v36  ;;  %4118 = vmatprep.subr.bf16.mxu1 %v7154_v38 }
 0x168   :  { %1491 = vmatpush1.bf16.msra.mxu0 %v7165_v25  ;;  %4119 = vmatpush3.bf16.msra.mxu1 %v7166_v44 }
 0x169   :  { %1492 = vmatprep.subr.bf16.mxu0 %v7167_v26  ;;  %4120 = vmatprep.subr.bf16.mxu1 %v7154_v38 }
 0x16c   :  { %1493 = vmatpush1.bf16.msra.mxu0 %v7168_v39  ;;  %4121 = vmatpush3.bf16.msra.mxu1 %v7169_v35 }
 0x16d   :  { %1494 = vmatprep.subr.bf16.mxu0 %v7170_v1  ;;  %4122 = vmatprep.subr.bf16.mxu1 %v7154_v38  ;;  %v7185_v1 = vld [vmem:[#allocation33_spill] sm:$0xff] }
 0x170   :  { %1495 = vmatpush1.bf16.msra.mxu0 %v7171_v23  ;;  %4123 = vmatpush3.bf16.msra.mxu1 %v7172_v30 }
 0x171   :  { %1496 = vmatprep.subr.bf16.mxu0 %v7173_v37  ;;  %4124 = vmatprep.subr.bf16.mxu1 %v7154_v38 }
 0x174   :  { %1497 = vmatpush1.bf16.msra.mxu0 %v7174_v29  ;;  %4125 = vmatpush3.bf16.msra.mxu1 %v7175_v7  ;;  %v7186_v29 = vld [vmem:[#allocation34_spill] sm:$0xff] }
 0x175   :  { %1498 = vmatprep.subr.bf16.mxu0 %v7176_v12  ;;  %4126 = vmatprep.subr.bf16.mxu1 %v7154_v38  ;;  %v974_v7 = vadd.f32 %v5446_v28, %v7186_v29 }
 0x178   :  { %1499 = vmatpush1.bf16.msra.mxu0 %v7177_v19  ;;  %4127 = vmatpush3.bf16.msra.mxu1 %v7178_v20 }
 0x179   :  { %1500 = vmatprep.subr.bf16.mxu0 %v7179_v3  ;;  %4128 = vmatprep.subr.bf16.mxu1 %v7154_v38 }
 0x17c   :  { %1501 = vmatpush1.bf16.msra.mxu0 %v7180_v4  ;;  %4129 = vmatpush3.bf16.msra.mxu1 %v7181_v5 }
 0x17d   :  { %1567 = vmatprep.subr.bf16.mxu0 %v7182_v6  ;;  %4134 = vmatprep.subr.bf16.mxu1 %v7154_v38  ;;  %v1058_v6 = vadd.f32 %v5455_v31, %v5382_v27 }
 0x1ef   :  { %v1138_v8 = vpop.f32.mrf.mxu0  ;;  %v1179_v9 = vpop.f32.mrf.mxu1 }
 0x1f0   :  { %v1139_v32 = vadd.f32 %v1138_v8, %v7184_v17 }
 0x1f1   :  { %v1140_v36 = vpop.f32.mrf.mxu0  ;;  %v4076_v25 = vpop.f32.mrf.mxu1 }
 0x1f2   :  { %v1266_v44 = vadd.f32 %v1139_v32, %v972_v14  ;;  %v1141_v23 = vadd.f32 %v1140_v36, %v7185_v1  ;;  %v7187_v14 = vld [vmem:[#allocation36_spill] sm:$0xff] }
 0x1f3   :  { %v1142_v26 = vpop.f32.mrf.mxu0  ;;  %v1182_v39 = vpop.f32.mrf.mxu1 }
 0x1f4   :  { %v3718_v35 = vmul.f32 -1.442695, %v1266_v44  ;;  %v1273_v12 = vadd.f32 %v1141_v23, %v974_v7  ;;  %v7188_v44 = vld [vmem:[#allocation35_spill] sm:$0xff] }
 0x1f5   :  { %v1143_v30 = vpop.f32.mrf.mxu0  ;;  %v4077_v37 = vpop.f32.mrf.mxu1  ;;  %v1180_v28 = vadd.f32 %v1179_v9, %v7188_v44 }
 0x1f6   :  { %4537 = vpow2.f32 %v3718_v35  ;;  %v3719_v19 = vmul.f32 -1.442695, %v1273_v12  ;;  %v1013_v35 = vadd.f32 %v5442_v22, %v5388_v24 }
 0x1f8   :  { %4539 = vpow2.f32 %v3719_v19 }
 0x203   :  { %v4538_v33 = vpop.eup %4537 }
 0x204   :  { %v1270_v20 = vadd.f32 1.0, %v4538_v33  ;;  %v1060_v33 = vadd.f32 %v5463_v15, %v5395_v40 }
 0x205   :  { %v4540_v3 = vpop.eup %4539 }
 0x206   :  { %4541 = vrcp.f32 %v1270_v20  ;;  %v1277_v8 = vadd.f32 1.0, %v4540_v3 }
 0x208   :  { %4543 = vrcp.f32 %v1277_v8 }
 0x20f   :  { %v1219_v4 = vpop.f32.mrf.mxu0  ;;  %v1260_v5 = vpop.f32.mrf.mxu1 }
 0x210   :  { %v1220_v32 = vadd.f32 %v1219_v4, %v7187_v14 }
 0x211   :  { %v1221_v36 = vpop.f32.mrf.mxu0  ;;  %v4096_v25 = vpop.f32.mrf.mxu1 }
 0x212   :  { %v1287_v26 = vadd.f32 %v1220_v32, %v1058_v6  ;;  %v1222_v12 = vadd.f32 %v1221_v36, %v5390_v10 }
 0x213   :  { %v4542_v39 = vpop.eup %4541  ;;  %v1223_v23 = vpop.f32.mrf.mxu0 }
 0x214   :  { %v1263_v30 = vpop.f32.mrf.mxu1  ;;  %v1280_v37 = vmul.f32 %v4542_v39, %v1180_v28  ;;  %v3720_v7 = vmul.f32 -1.442695, %v1287_v26  ;;  %v1294_v9 = vadd.f32 %v1222_v12, %v1060_v33  ;;  %v1261_v39 = vadd.f32 %v1260_v5, %v5407_v47  ;;  %v5628_v5 = vld [vmem:[%s6978_s3 + $0x18] ss:$12 sps:$4 sm:$0xff]   ;;  %v5634_v23 = vld [vmem:[%s6978_s3 + $0x20] ss:$12 sps:$4 sm:$0xff]  }
 0x215   :  { %v1224_v31 = vpop.f32.mrf.mxu0  ;;  %v4544_v4 = vpop.eup %4543  ;;  %v5650_v12 = vld [vmem:[%s6978_s3] ss:$12 sps:$4 sm:$0xff]  }
 0x216   :  { %v4097_v19 = vpop.f32.mrf.mxu1  ;;  %v1281_v20 = vadd.f32 %v1280_v37, %v1013_v35  ;;  %4545 = vpow2.f32 %v3720_v7  ;;  %v3721_v3 = vmul.f32 -1.442695, %v1294_v9  ;;  %v1283_v32 = vsub.f32 1.0, %v4544_v4  ;;  %v5640_v7 = vld [vmem:[%s6978_s3 + $0x4] ss:$12 sps:$4 sm:$0xff]  }
 0x217   :  { %v1285_v36 = vmul.f32 %v4544_v4, %v5403_v34  ;;  %v5656_v31 = vld [vmem:[%s6978_s3 + $0x8] ss:$12 sps:$4 sm:$0xff]   ;;  %v3736_v33 = vld [vmem:[%s6980_s0 + $0x3] sm:$0x1] }
 0x218   :  { %4547 = vtanh.f32 %v1281_v20  ;;  %v5662_v19 = vld [vmem:[%s6979_s4 + $0x1c] ss:$12 sps:$4 sm:$0xff]   ;;  %v5674_v20 = vld [vmem:[%s6979_s4 + $0x18] ss:$12 sps:$4 sm:$0xff]   ;;  %v5680_v9 = vld [vmem:[%s6979_s4 + $0x20] ss:$12 sps:$4 sm:$0xff]  }
 0x219   :  { %4549 = vpow2.f32 %v3721_v3  ;;  %v5686_v3 = vld [vmem:[%s6979_s4 + $0x4] ss:$12 sps:$4 sm:$0xff]   ;;  %v5696_v4 = vld [vmem:[%s6979_s4] ss:$12 sps:$4 sm:$0xff]  }
 0x223   :  { %v4546_v22 = vpop.eup %4545 }
 0x224   :  { %v1291_v6 = vadd.f32 1.0, %v4546_v22  ;;  %v5702_v22 = vld [vmem:[%s6979_s4 + $0x8] ss:$12 sps:$4 sm:$0xff]  }
 0x225   :  { %v4548_v25 = vpop.eup %4547 }
 0x226   :  { %4551 = vrcp.f32 %v1291_v6  ;;  %v1284_v8 = vmul.f32 %v4548_v25, %v1283_v32  ;;  %v4550_v26 = vpop.eup %4549  ;;  %v5708_v6 = vld [vmem:[%s6981_s7 + $0xac] ss:$12 sps:$4 sm:$0xff]   ;;  %v3739_v32 = vld [vmem:[%s6982_s1 + $0x4] sm:$0x1]  ;;  %v5720_v25 = vld [vmem:[%s6981_s7 + $0xa8] ss:$12 sps:$4 sm:$0xff]  }
 0x227   :  { %v1298_v34 = vadd.f32 1.0, %v4550_v26  ;;  %v5748_v26 = vld [vmem:[%s6981_s7 + $0x98] ss:$12 sps:$4 sm:$0xff]  }
 0x228   :  { %v5555_v28 = vadd.f32 %v1285_v36, %v1284_v8  ;;  %v5726_v8 = vld [vmem:[%s6981_s7 + $0xb0] ss:$12 sps:$4 sm:$0xff]   ;;  %v5732_v36 = vld [vmem:[%s6981_s7 + $0x94] ss:$12 sps:$4 sm:$0xff]   ;;  %7191 = vst [vmem:[#allocation10_spill] sm:$0xff] %v5748_v26 }
 0x229   :  { %4553 = vrcp.f32 %v1298_v34  ;;  %7189 = vst [vmem:[#allocation3_spill] sm:$0xff] %v5732_v36  ;;  %v5754_v34 = vld [vmem:[%s6981_s7 + $0x7c] ss:$12 sps:$4 sm:$0xff]  }
 0x22a   :  { %v1308_v15 = vpack.c.bf16 %v5555_v28, %v5555_v28  ;;  %7192 = vst [vmem:[#allocation5_spill] sm:$0xff] %v5754_v34 }
 0x22c   :  { %3722 = vst [vmem:[%s6989_s11 + $0x1] sm:$0x1] %v1308_v15  ;;  %1519 = vmatmul.mubr.bf16.vlgmr.msra.gmra.mxu0 %v1308_v15  ;;  %4131 = vmatmul.mubr.bf16.vlgmr.msra.gmra.mxu1 %v1308_v15  ;;  %v5742_v15 = vld [vmem:[%s6981_s7 + $0x90] ss:$12 sps:$4 sm:$0xff]  }
 0x22d   :  { %1568 = vmatpush1.bf16.msra.mxu0 %v5117_v42  ;;  %4135 = vmatpush3.bf16.msra.mxu1 %v5168_v50  ;;  %7190 = vst [vmem:[#allocation4_spill] sm:$0xff] %v5742_v15 }
 0x22e   :  { %1569 = vmatprep.subr.bf16.mxu0 %v5123_v43  ;;  %4136 = vmatprep.subr.bf16.mxu1 %v7154_v38  ;;  %v1099_v43 = vadd.f32 %v5457_v2, %v5419_v16 }
 0x22f   :  { %1599 = vmatprep.mubr.bf16.mxu0 %v7147_v21  ;;  %4150 = vmatprep.mubr.msk.bf16.mxu1 %vm4799_vm0, %v7154_v38 }
 0x231   :  { %1570 = vmatpush1.bf16.msra.mxu0 %v5136_v45  ;;  %4137 = vmatpush3.bf16.msra.mxu1 %v5187_v53  ;;  %v5588_v45 = vpop.f32.mrf.mxu0 }
 0x232   :  { %1571 = vmatprep.subr.bf16.mxu0 %v5143_v46  ;;  %4138 = vmatprep.subr.bf16.mxu1 %v7154_v38  ;;  %v5590_v46 = vpop.f32.mrf.mxu1 }
 0x233   :  { %v4552_v42 = vpop.eup %4551 }
 0x234   :  { %v1301_v50 = vmul.f32 %v4552_v42, %v1261_v39  ;;  %v5761_v39 = vld [vmem:[%s6981_s7 + $0x78] ss:$12 sps:$4 sm:$0xff]   ;;  %v5767_v42 = vld [vmem:[%s6981_s7 + $0x80] ss:$12 sps:$4 sm:$0xff]  }
 0x235   :  { %1572 = vmatpush1.bf16.msra.mxu0 %v5156_v48  ;;  %4139 = vmatpush3.bf16.msra.mxu1 %v5208_v56  ;;  %7193 = vst [vmem:[#allocation6_spill] sm:$0xff] %v5761_v39  ;;  %7194 = vst [vmem:[#allocation13_spill] sm:$0xff] %v5767_v42 }
 0x236   :  { %v1302_v35 = vadd.f32 %v1301_v50, %v1099_v43  ;;  %1573 = vmatprep.subr.bf16.mxu0 %v5162_v49  ;;  %4140 = vmatprep.subr.bf16.mxu1 %v7154_v38  ;;  %v4554_v48 = vpop.eup %4553  ;;  %v5596_v49 = vpop.f32.mrf.mxu0  ;;  %v5773_v43 = vld [vmem:[%s6981_s7 + $0x64] ss:$12 sps:$4 sm:$0xff]   ;;  %v5780_v50 = vld [vmem:[%s6981_s7 + $0x60] ss:$12 sps:$4 sm:$0xff]  }
 0x237   :  { %7195 = vst [vmem:[#allocation7_spill] sm:$0xff] %v5773_v43  ;;  %7196 = vst [vmem:[#allocation8_spill] sm:$0xff] %v5780_v50 }
 0x238   :  { %4555 = vtanh.f32 %v1302_v35  ;;  %v1357_v53 = vpop.f32.mrf.mxu0  ;;  %v5786_v35 = vld [vmem:[%s6981_s7 + $0x68] ss:$12 sps:$4 sm:$0xff]  }
 0x239   :  { %1574 = vmatpush1.bf16.msra.mxu0 %v5175_v51  ;;  %4141 = vmatpush3.bf16.msra.mxu1 %v5227_v59  ;;  %v4104_v51 = vpop.f32.mrf.mxu1  ;;  %7197 = vst [vmem:[#allocation16_spill] sm:$0xff] %v5786_v35  ;;  %v5811_v53 = vld [vmem:[%s6981_s7 + $0x34] ss:$12 sps:$4 sm:$0xff]  }
 0x23a   :  { %1575 = vmatprep.subr.bf16.mxu0 %v5181_v52  ;;  %4142 = vmatprep.subr.bf16.mxu1 %v7154_v38  ;;  %v1304_v52 = vsub.f32 1.0, %v4554_v48  ;;  %v5799_v51 = vld [vmem:[%s6981_s7 + $0x48] ss:$12 sps:$4 sm:$0xff]   ;;  %7201 = vst [vmem:[#allocation12_spill] sm:$0xff] %v5811_v53 }
 0x23b   :  { %7199 = vst [vmem:[#allocation11_spill] sm:$0xff] %v5799_v51 }
 0x23d   :  { %1576 = vmatpush1.bf16.msra.mxu0 %v5196_v54  ;;  %4143 = vmatpush3.bf16.msra.mxu1 %v5246_v62  ;;  %v1397_v54 = vpop.f32.mrf.mxu1 }
 0x23e   :  { %1577 = vmatprep.subr.bf16.mxu0 %v5202_v55  ;;  %4144 = vmatprep.subr.bf16.mxu1 %v7154_v38  ;;  %v5818_v54 = vld [vmem:[%s6981_s7 + $0x30] ss:$12 sps:$4 sm:$0xff]  }
 0x23f   :  { %v4105_v59 = vpop.f32.mrf.mxu1  ;;  %7202 = vst [vmem:[#allocation14_spill] sm:$0xff] %v5818_v54 }
 0x240   :  { %v5849_v59 = vld [vmem:[%s6981_s7 + $0x4] ss:$12 sps:$4 sm:$0xff]  }
 0x241   :  { %1578 = vmatpush1.bf16.msra.mxu0 %v5215_v57  ;;  %4145 = vmatpush3.bf16.msra.mxu1 %v5262_v13  ;;  %v1306_v57 = vmul.f32 %v4554_v48, %v5459_v18  ;;  %v5607_v2 = vpop.f32.mrf.mxu1  ;;  %v5618_v18 = vld [vmem:[%s6978_s3 + $0x1c] ss:$12 sps:$4 sm:$0xff]   ;;  %v5792_v48 = vld [vmem:[%s6981_s7 + $0x4c] ss:$12 sps:$4 sm:$0xff]   ;;  %7207 = vst [vmem:[#allocation18_spill] sm:$0xff] %v5849_v59 }
 0x242   :  { %1579 = vmatprep.subr.bf16.mxu0 %v5221_v58  ;;  %4146 = vmatprep.subr.bf16.mxu1 %v7154_v38  ;;  %v1358_v58 = vpop.f32.mrf.mxu0  ;;  %7198 = vst [vmem:[#allocation9_spill] sm:$0xff] %v5792_v48 }
 0x243   :  { %v5843_v58 = vld [vmem:[%s6981_s7 + $0x20] ss:$12 sps:$4 sm:$0xff]  }
 0x244   :  { %v5605_v13 = vpop.f32.mrf.mxu0  ;;  %7206 = vst [vmem:[#allocation25_spill] sm:$0xff] %v5843_v58 }
 0x245   :  { %v4556_v55 = vpop.eup %4555  ;;  %1580 = vmatpush1.bf16.msra.mxu0 %v5234_v60  ;;  %4147 = vmatpush3.bf16.msra.mxu1 %v5273_v41  ;;  %v4112_v41 = vpop.f32.mrf.mxu1 }
 0x246   :  { %1581 = vmatprep.subr.bf16.mxu0 %v5240_v61  ;;  %4148 = vmatprep.subr.bf16.mxu1 %v7154_v38  ;;  %v1305_v56 = vmul.f32 %v4556_v55, %v1304_v52  ;;  %v5613_v61 = vpop.f32.mrf.mxu0  ;;  %v5805_v52 = vld [vmem:[%s6981_s7 + $0x50] ss:$12 sps:$4 sm:$0xff]   ;;  %v5824_v55 = vld [vmem:[%s6981_s7 + $0x38] ss:$12 sps:$4 sm:$0xff]   ;;  %v5862_v41 = vld [vmem:[%s6981_s7 + $0x8] ss:$12 sps:$4 sm:$0xff]  }
 0x247   :  { %7200 = vst [vmem:[#allocation19_spill] sm:$0xff] %v5805_v52  ;;  %7203 = vst [vmem:[#allocation22_spill] sm:$0xff] %v5824_v55 }
 0x248   :  { %v5603_v62 = vadd.f32 %v1306_v57, %v1305_v56  ;;  %v5830_v56 = vld [vmem:[%s6981_s7 + $0x1c] ss:$12 sps:$4 sm:$0xff]   ;;  %v5837_v57 = vld [vmem:[%s6981_s7 + $0x18] ss:$12 sps:$4 sm:$0xff]   ;;  %7209 = vst [vmem:[#allocation28_spill] sm:$0xff] %v5862_v41 }
 0x249   :  { %1582 = vmatpush1.bf16.msra.mxu0 %v5253_v63  ;;  %4149 = vmatpush3.bf16.msra.mxu1 %v5283_v0  ;;  %v1443_v0 = vpop.f32.mrf.mxu0  ;;  %v1483_v63 = vpop.f32.mrf.mxu1  ;;  %7204 = vst [vmem:[#allocation15_spill] sm:$0xff] %v5830_v56  ;;  %7205 = vst [vmem:[#allocation17_spill] sm:$0xff] %v5837_v57 }
 0x24a   :  { %v1311_v60 = vpack.c.bf16 %v5603_v62, %v5603_v62  ;;  %1713 = vmatprep.subr.bf16.mxu0 %v5618_v18  ;;  %4154 = vmatprep.subr.bf16.mxu1 %v7154_v38  ;;  %v5868_v0 = vld [vmem:[%s6984_s8 + $0xac] ss:$12 sps:$4 sm:$0xff]  }
 0x24b   :  { %v1444_v30 = vpop.f32.mrf.mxu0  ;;  %v4113_v37 = vpop.f32.mrf.mxu1  ;;  %7210 = vst [vmem:[#allocation21_spill] sm:$0xff] %v5868_v0 }
 0x24c   :  { %3723 = vst [vmem:[%s6990_s12 + $0x6] sm:$0x1] %v1311_v60  ;;  %1600 = vmatmul.mubr.bf16.vlgmr.msra.gmra.mxu0 %v1311_v60  ;;  %4151 = vmatmul.mubr.bf16.vlgmr.msra.gmra.mxu1 %v1311_v60  ;;  %v5856_v60 = vld [vmem:[%s6981_s7] ss:$12 sps:$4 sm:$0xff]   ;;  %v1354_v37 = vadd.f32 %v5588_v45, %v7183_v11 }
 0x24d   :  { %1714 = vmatpush1.bf16.msra.mxu0 %v5628_v5  ;;  %4155 = vmatpush3.bf16.msra.mxu1 %v5634_v23  ;;  %7208 = vst [vmem:[#allocation20_spill] sm:$0xff] %v5856_v60 }
 0x24e   :  { %1715 = vmatprep.subr.bf16.mxu0 %v5640_v7  ;;  %1733 = vmatprep.mubr.bf16.mxu0 %v7147_v21 }
 0x24f   :  { %4156 = vmatprep.subr.bf16.mxu1 %v7154_v38  ;;  %4158 = vmatprep.mubr.msk.bf16.mxu1 %vm4799_vm0, %v7154_v38 }
 0x251   :  { %1716 = vmatpush1.bf16.msra.mxu0 %v5650_v12  ;;  %4157 = vmatpush3.bf16.msra.mxu1 %v5656_v31 }
 0x252   :  { %1799 = vmatprep.subr.bf16.mxu0 %v5662_v19  ;;  %4162 = vmatprep.subr.bf16.mxu1 %v7154_v38 }
 0x254   :  { %3737 = vmatmul.mubr.msk.bf16.vlgmr.msra.gmra.mxu0 %vm262_vm1, %v3736_v33  ;;  %4159 = vmatmul.mubr.msk.bf16.vlgmr.msra.gmra.mxu1 %vm262_vm1, %v3736_v33 }
 0x255   :  { %1800 = vmatpush1.bf16.msra.mxu0 %v5674_v20  ;;  %4163 = vmatpush3.bf16.msra.mxu1 %v5680_v9 }
 0x256   :  { %1801 = vmatprep.subr.bf16.mxu0 %v5686_v3  ;;  %1819 = vmatprep.mubr.bf16.mxu0 %v7147_v21 }
 0x257   :  { %4164 = vmatprep.subr.bf16.mxu1 %v7154_v38  ;;  %4166 = vmatprep.mubr.msk.bf16.mxu1 %vm4799_vm0, %v7154_v38 }
 0x259   :  { %1802 = vmatpush1.bf16.msra.mxu0 %v5696_v4  ;;  %4165 = vmatpush3.bf16.msra.mxu1 %v5702_v22 }
 0x25a   :  { %1868 = vmatprep.subr.bf16.mxu0 %v5708_v6  ;;  %4170 = vmatprep.subr.bf16.mxu1 %v7154_v38 }
 0x25c   :  { %3740 = vmatmul.mubr.msk.bf16.vlgmr.msra.gmra.mxu0 %vm262_vm1, %v3739_v32  ;;  %4167 = vmatmul.mubr.msk.bf16.vlgmr.msra.gmra.mxu1 %vm262_vm1, %v3739_v32 }
 0x25d   :  { %1869 = vmatpush1.bf16.msra.mxu0 %v5720_v25  ;;  %4171 = vmatpush3.bf16.msra.mxu1 %v5726_v8 }
 0x25e   :  { %1870 = vmatprep.subr.bf16.mxu0 %v5732_v36  ;;  %4172 = vmatprep.subr.bf16.mxu1 %v7154_v38 }
 0x25f   :  { %1900 = vmatprep.mubr.bf16.mxu0 %v7147_v21  ;;  %4186 = vmatprep.mubr.msk.bf16.mxu1 %vm4799_vm0, %v7154_v38 }
 0x261   :  { %1871 = vmatpush1.bf16.msra.mxu0 %v5742_v15  ;;  %4173 = vmatpush3.bf16.msra.mxu1 %v5748_v26 }
 0x262   :  { %1872 = vmatprep.subr.bf16.mxu0 %v5754_v34  ;;  %4174 = vmatprep.subr.bf16.mxu1 %v7154_v38 }
 0x265   :  { %1873 = vmatpush1.bf16.msra.mxu0 %v5761_v39  ;;  %4175 = vmatpush3.bf16.msra.mxu1 %v5767_v42 }
 0x266   :  { %1874 = vmatprep.subr.bf16.mxu0 %v5773_v43  ;;  %4176 = vmatprep.subr.bf16.mxu1 %v7154_v38 }
 0x269   :  { %1875 = vmatpush1.bf16.msra.mxu0 %v5780_v50  ;;  %4177 = vmatpush3.bf16.msra.mxu1 %v5786_v35 }
 0x26a   :  { %1876 = vmatprep.subr.bf16.mxu0 %v5792_v48  ;;  %4178 = vmatprep.subr.bf16.mxu1 %v7154_v38 }
 0x26d   :  { %1877 = vmatpush1.bf16.msra.mxu0 %v5799_v51  ;;  %4179 = vmatpush3.bf16.msra.mxu1 %v5805_v52 }
 0x26e   :  { %1878 = vmatprep.subr.bf16.mxu0 %v5811_v53  ;;  %4180 = vmatprep.subr.bf16.mxu1 %v7154_v38 }
 0x271   :  { %1879 = vmatpush1.bf16.msra.mxu0 %v5818_v54  ;;  %4181 = vmatpush3.bf16.msra.mxu1 %v5824_v55 }
 0x272   :  { %1880 = vmatprep.subr.bf16.mxu0 %v5830_v56  ;;  %4182 = vmatprep.subr.bf16.mxu1 %v7154_v38 }
 0x275   :  { %1881 = vmatpush1.bf16.msra.mxu0 %v5837_v57  ;;  %4183 = vmatpush3.bf16.msra.mxu1 %v5843_v58 }
 0x276   :  { %1882 = vmatprep.subr.bf16.mxu0 %v5849_v59  ;;  %4184 = vmatprep.subr.bf16.mxu1 %v7154_v38 }
 0x279   :  { %1883 = vmatpush1.bf16.msra.mxu0 %v5856_v60  ;;  %4185 = vmatpush3.bf16.msra.mxu1 %v5862_v41 }
 0x27a   :  { %1949 = vmatprep.subr.bf16.mxu0 %v5868_v0  ;;  %4190 = vmatprep.subr.bf16.mxu1 %v7154_v38  ;;  %v1356_v0 = vadd.f32 %v5596_v49, %v7186_v29 }
 0x2ec   :  { %v1520_v63 = vpop.f32.mrf.mxu0  ;;  %v1561_v30 = vpop.f32.mrf.mxu1 }
 0x2ed   :  { %v1521_v33 = vadd.f32 %v1520_v63, %v7184_v17  ;;  %v1562_v49 = vadd.f32 %v1561_v30, %v7188_v44 }
 0x2ee   :  { %v1522_v32 = vpop.f32.mrf.mxu0  ;;  %v4132_v60 = vpop.f32.mrf.mxu1 }
 0x2ef   :  { %v1648_v59 = vadd.f32 %v1521_v33, %v1354_v37  ;;  %v1523_v56 = vadd.f32 %v1522_v32, %v7185_v1 }
 0x2f0   :  { %v1524_v41 = vpop.f32.mrf.mxu0  ;;  %v1564_v58 = vpop.f32.mrf.mxu1 }
 0x2f1   :  { %v3730_v57 = vmul.f32 -1.442695, %v1648_v59  ;;  %v1655_v53 = vadd.f32 %v1523_v56, %v1356_v0  ;;  %v1440_v58 = vadd.f32 %v5605_v13, %v5382_v27 }
 0x2f2   :  { %v1525_v55 = vpop.f32.mrf.mxu0  ;;  %v4133_v54 = vpop.f32.mrf.mxu1 }
 0x2f3   :  { %4557 = vpow2.f32 %v3730_v57  ;;  %v3731_v52 = vmul.f32 -1.442695, %v1655_v53 }
 0x2f5   :  { %4559 = vpow2.f32 %v3731_v52  ;;  %v1395_v52 = vadd.f32 %v5590_v46, %v5388_v24 }
 0x300   :  { %v4558_v45 = vpop.eup %4557 }
 0x301   :  { %v1652_v11 = vadd.f32 1.0, %v4558_v45 }
 0x302   :  { %v4560_v63 = vpop.eup %4559 }
 0x303   :  { %4561 = vrcp.f32 %v1652_v11  ;;  %v1659_v59 = vadd.f32 1.0, %v4560_v63  ;;  %v1442_v63 = vadd.f32 %v5613_v61, %v5395_v40 }
 0x305   :  { %4563 = vrcp.f32 %v1659_v59 }
 0x30c   :  { %v1601_v60 = vpop.f32.mrf.mxu0  ;;  %v1642_v37 = vpop.f32.mrf.mxu1 }
 0x30d   :  { %v1602_v55 = vadd.f32 %v1601_v60, %v7187_v14 }
 0x30e   :  { %v1603_v54 = vpop.f32.mrf.mxu0  ;;  %v4152_v41 = vpop.f32.mrf.mxu1 }
 0x30f   :  { %v1669_v57 = vadd.f32 %v1602_v55, %v1440_v58  ;;  %v1604_v32 = vadd.f32 %v1603_v54, %v5390_v10 }
 0x310   :  { %v4562_v56 = vpop.eup %4561  ;;  %v1605_v53 = vpop.f32.mrf.mxu0 }
 0x311   :  { %v1645_v11 = vpop.f32.mrf.mxu1  ;;  %v1662_v0 = vmul.f32 %v4562_v56, %v1562_v49  ;;  %v3732_v33 = vmul.f32 -1.442695, %v1669_v57  ;;  %v1676_v30 = vadd.f32 %v1604_v32, %v1442_v63  ;;  %v5926_v32 = vld [vmem:[%s6984_s8 + $0x98] ss:$12 sps:$4 sm:$0xff]  }
 0x312   :  { %v1606_v13 = vpop.f32.mrf.mxu0  ;;  %v4564_v55 = vpop.eup %4563  ;;  %v5910_v11 = vld [vmem:[%s6984_s8 + $0x94] ss:$12 sps:$4 sm:$0xff]  }
 0x313   :  { %v4153_v45 = vpop.f32.mrf.mxu1  ;;  %v1663_v60 = vadd.f32 %v1662_v0, %v1395_v52  ;;  %4565 = vpow2.f32 %v3732_v33  ;;  %v3733_v58 = vmul.f32 -1.442695, %v1676_v30  ;;  %v1665_v53 = vsub.f32 1.0, %v4564_v55  ;;  %v5898_v52 = vld [vmem:[%s6984_s8 + $0xa8] ss:$12 sps:$4 sm:$0xff]  }
 0x314   :  { %v1667_v54 = vmul.f32 %v4564_v55, %v5555_v28  ;;  %v5904_v28 = vld [vmem:[%s6984_s8 + $0xb0] ss:$12 sps:$4 sm:$0xff]   ;;  %v1643_v13 = vadd.f32 %v1642_v37, %v5407_v47  ;;  %v5948_v37 = vld [vmem:[%s6984_s8 + $0x80] ss:$12 sps:$4 sm:$0xff]  }
 0x315   :  { %4567 = vtanh.f32 %v1663_v60  ;;  %v5920_v33 = vld [vmem:[%s6984_s8 + $0x90] ss:$12 sps:$4 sm:$0xff]   ;;  %v1481_v60 = vadd.f32 %v5607_v2, %v5419_v16 }
 0x316   :  { %4569 = vpow2.f32 %v3733_v58  ;;  %v5933_v45 = vld [vmem:[%s6984_s8 + $0x7c] ss:$12 sps:$4 sm:$0xff]   ;;  %v5942_v58 = vld [vmem:[%s6984_s8 + $0x78] ss:$12 sps:$4 sm:$0xff]  }
 0x317   :  { %v5954_v2 = vld [vmem:[%s6984_s8 + $0x64] ss:$12 sps:$4 sm:$0xff]  }
 0x318   :  { %7211 = vst [vmem:[#allocation23_spill] sm:$0xff] %v5954_v2 }
 0x320   :  { %v4566_v46 = vpop.eup %4565 }
 0x321   :  { %v1673_v41 = vadd.f32 1.0, %v4566_v46  ;;  %v5961_v46 = vld [vmem:[%s6984_s8 + $0x60] ss:$12 sps:$4 sm:$0xff]  }
 0x322   :  { %v4568_v49 = vpop.eup %4567  ;;  %7212 = vst [vmem:[#allocation29_spill] sm:$0xff] %v5961_v46 }
 0x323   :  { %4571 = vrcp.f32 %v1673_v41  ;;  %v1666_v59 = vmul.f32 %v4568_v49, %v1665_v53  ;;  %v4570_v56 = vpop.eup %4569  ;;  %v5967_v41 = vld [vmem:[%s6984_s8 + $0x68] ss:$12 sps:$4 sm:$0xff]   ;;  %v5973_v53 = vld [vmem:[%s6984_s8 + $0x4c] ss:$12 sps:$4 sm:$0xff]  }
 0x324   :  { %v1680_v0 = vadd.f32 1.0, %v4570_v56  ;;  %7213 = vst [vmem:[#allocation24_spill] sm:$0xff] %v5967_v41  ;;  %7214 = vst [vmem:[#allocation26_spill] sm:$0xff] %v5973_v53  ;;  %v5980_v49 = vld [vmem:[%s6984_s8 + $0x48] ss:$12 sps:$4 sm:$0xff]   ;;  %v5998_v56 = vpop.f32.mrf.mxu1 }
 0x325   :  { %v5888_v57 = vadd.f32 %v1667_v54, %v1666_v59  ;;  %7215 = vst [vmem:[#allocation30_spill] sm:$0xff] %v5980_v49  ;;  %v5986_v59 = vld [vmem:[%s6984_s8 + $0x50] ss:$12 sps:$4 sm:$0xff]   ;;  %v5992_v54 = vld [vmem:[%s6984_s8 + $0x34] ss:$12 sps:$4 sm:$0xff]  }
 0x326   :  { %4573 = vrcp.f32 %v1680_v0  ;;  %7216 = vst [vmem:[#allocation27_spill] sm:$0xff] %v5986_v59  ;;  %7217 = vst [vmem:[#allocation32_spill] sm:$0xff] %v5992_v54 }
 0x327   :  { %v1690_v61 = vpack.c.bf16 %v5888_v57, %v5888_v57 }
 0x329   :  { %3734 = vst [vmem:[%s6989_s11 + $0x2] sm:$0x1] %v1690_v61  ;;  %1901 = vmatmul.mubr.bf16.vlgmr.msra.gmra.mxu0 %v1690_v61  ;;  %4187 = vmatmul.mubr.bf16.vlgmr.msra.gmra.mxu1 %v1690_v61  ;;  %v5996_v61 = vpop.f32.mrf.mxu0 }
 0x32a   :  { %1950 = vmatpush1.bf16.msra.mxu0 %v5898_v52  ;;  %4191 = vmatpush3.bf16.msra.mxu1 %v5904_v28 }
 0x32b   :  { %1951 = vmatprep.subr.bf16.mxu0 %v5910_v11  ;;  %4192 = vmatprep.subr.bf16.mxu1 %v7154_v38 }
 0x32c   :  { %1981 = vmatprep.mubr.bf16.mxu0 %v7147_v21  ;;  %4206 = vmatprep.mubr.msk.bf16.mxu1 %vm4799_vm0, %v7154_v38 }
 0x32e   :  { %1952 = vmatpush1.bf16.msra.mxu0 %v5920_v33  ;;  %4193 = vmatpush3.bf16.msra.mxu1 %v5926_v32 }
 0x32f   :  { %1953 = vmatprep.subr.bf16.mxu0 %v5933_v45  ;;  %4194 = vmatprep.subr.bf16.mxu1 %v7154_v38 }
 0x330   :  { %v4572_v63 = vpop.eup %4571 }
 0x331   :  { %v1683_v30 = vmul.f32 %v4572_v63, %v1643_v13  ;;  %v6003_v13 = vld [vmem:[%s6984_s8 + $0x30] ss:$12 sps:$4 sm:$0xff]   ;;  %v6009_v63 = vld [vmem:[%s6984_s8 + $0x38] ss:$12 sps:$4 sm:$0xff]  }
 0x332   :  { %1954 = vmatpush1.bf16.msra.mxu0 %v5942_v58  ;;  %4195 = vmatpush3.bf16.msra.mxu1 %v5948_v37  ;;  %7218 = vst [vmem:[#allocation33_spill] sm:$0xff] %v6003_v13  ;;  %7219 = vst [vmem:[#allocation34_spill] sm:$0xff] %v6009_v63 }
 0x333   :  { %v1684_v55 = vadd.f32 %v1683_v30, %v1481_v60  ;;  %1955 = vmatprep.subr.bf16.mxu0 %v5954_v2  ;;  %4196 = vmatprep.subr.bf16.mxu1 %v7154_v38  ;;  %v4574_v0 = vpop.eup %4573  ;;  %v6015_v60 = vld [vmem:[%s6984_s8 + $0x1c] ss:$12 sps:$4 sm:$0xff]   ;;  %v6019_v30 = vpop.f32.mrf.mxu0 }
 0x334   :  { %7220 = vst [vmem:[#allocation36_spill] sm:$0xff] %v6015_v60 }
 0x335   :  { %4575 = vtanh.f32 %v1684_v55  ;;  %v4160_v55 = vpop.f32.mrf.mxu1 }
 0x336   :  { %1956 = vmatpush1.bf16.msra.mxu0 %v5961_v46  ;;  %4197 = vmatpush3.bf16.msra.mxu1 %v5967_v41  ;;  %v1688_v55 = vmul.f32 %v4574_v0, %v5603_v62 }
 0x337   :  { %1957 = vmatprep.subr.bf16.mxu0 %v5973_v53  ;;  %4198 = vmatprep.subr.bf16.mxu1 %v7154_v38 }
 0x33a   :  { %1958 = vmatpush1.bf16.msra.mxu0 %v5980_v49  ;;  %4199 = vmatpush3.bf16.msra.mxu1 %v5986_v59  ;;  %v1779_v59 = vpop.f32.mrf.mxu1 }
 0x33b   :  { %1959 = vmatprep.subr.bf16.mxu0 %v5992_v54  ;;  %4200 = vmatprep.subr.bf16.mxu1 %v7154_v38  ;;  %v1739_v54 = vpop.f32.mrf.mxu0 }
 0x33c   :  { %v6036_v54 = vld [vmem:[%s6984_s8 + $0x4] ss:$12 sps:$4 sm:$0xff]   ;;  %v4161_v53 = vpop.f32.mrf.mxu1 }
 0x33d   :  { %7223 = vst [vmem:[#allocation38_spill] sm:$0xff] %v6036_v54 }
 0x33e   :  { %1960 = vmatpush1.bf16.msra.mxu0 %v6003_v13  ;;  %4201 = vmatpush3.bf16.msra.mxu1 %v6009_v63  ;;  %v1686_v13 = vsub.f32 1.0, %v4574_v0  ;;  %v6024_v63 = vld [vmem:[%s6984_s8 + $0x18] ss:$12 sps:$4 sm:$0xff]   ;;  %v6045_v2 = vpop.f32.mrf.mxu1 }
 0x33f   :  { %1961 = vmatprep.subr.bf16.mxu0 %v6015_v60  ;;  %4202 = vmatprep.subr.bf16.mxu1 %v7154_v38  ;;  %7221 = vst [vmem:[#allocation35_spill] sm:$0xff] %v6024_v63  ;;  %v6030_v60 = vld [vmem:[%s6984_s8 + $0x20] ss:$12 sps:$4 sm:$0xff]  }
 0x340   :  { %7222 = vst [vmem:[#allocation37_spill] sm:$0xff] %v6030_v60  ;;  %v4168_v0 = vpop.f32.mrf.mxu1 }
 0x341   :  { %v3751_v0 = vld [vmem:[%s6982_s1 + $0x3] sm:$0x1] }
 0x342   :  { %v4576_v49 = vpop.eup %4575  ;;  %1962 = vmatpush1.bf16.msra.mxu0 %v6024_v63  ;;  %4203 = vmatpush3.bf16.msra.mxu1 %v6030_v60  ;;  %v1740_v63 = vpop.f32.mrf.mxu0  ;;  %v6050_v60 = vld [vmem:[%s6984_s8] ss:$12 sps:$4 sm:$0xff]  }
 0x343   :  { %1963 = vmatprep.subr.bf16.mxu0 %v6036_v54  ;;  %4204 = vmatprep.subr.bf16.mxu1 %v7154_v38  ;;  %v1687_v59 = vmul.f32 %v4576_v49, %v1686_v13  ;;  %v6056_v49 = vld [vmem:[%s6984_s8 + $0x8] ss:$12 sps:$4 sm:$0xff]   ;;  %v1865_v63 = vpop.f32.mrf.mxu1 }
 0x344   :  { %v6043_v46 = vpop.f32.mrf.mxu0  ;;  %v7225_v63 = vld [vmem:[#allocation12_spill] sm:$0xff] }
 0x345   :  { %v6041_v41 = vadd.f32 %v1688_v55, %v1687_v59  ;;  %v4169_v55 = vpop.f32.mrf.mxu1 }
 0x346   :  { %1964 = vmatpush1.bf16.msra.mxu0 %v6050_v60  ;;  %4205 = vmatpush3.bf16.msra.mxu1 %v6056_v49  ;;  %v6061_v53 = vpop.f32.mrf.mxu0  ;;  %v7227_v55 = vld [vmem:[#allocation22_spill] sm:$0xff] }
 0x347   :  { %v1693_v62 = vpack.c.bf16 %v6041_v41, %v6041_v41  ;;  %2095 = vmatprep.subr.bf16.mxu0 %v5618_v18  ;;  %4210 = vmatprep.subr.bf16.mxu1 %v7154_v38 }
 0x348   :  { %v1825_v13 = vpop.f32.mrf.mxu0 }
 0x349   :  { %3735 = vst [vmem:[%s6990_s12 + $0x5] sm:$0x1] %v1693_v62  ;;  %1982 = vmatmul.mubr.bf16.vlgmr.msra.gmra.mxu0 %v1693_v62  ;;  %4207 = vmatmul.mubr.bf16.vlgmr.msra.gmra.mxu1 %v1693_v62  ;;  %v3748_v62 = vld [vmem:[%s6980_s0 + $0x4] sm:$0x1] }
 0x34a   :  { %2096 = vmatpush1.bf16.msra.mxu0 %v5628_v5  ;;  %4211 = vmatpush3.bf16.msra.mxu1 %v5634_v23  ;;  %v1826_v59 = vpop.f32.mrf.mxu0  ;;  %v7224_v13 = vld [vmem:[#allocation19_spill] sm:$0xff] }
 0x34b   :  { %2097 = vmatprep.subr.bf16.mxu0 %v5640_v7  ;;  %2115 = vmatprep.mubr.bf16.mxu0 %v7147_v21  ;;  %v7226_v59 = vld [vmem:[#allocation14_spill] sm:$0xff] }
 0x34c   :  { %4212 = vmatprep.subr.bf16.mxu1 %v7154_v38  ;;  %4214 = vmatprep.mubr.msk.bf16.mxu1 %vm4799_vm0, %v7154_v38 }
 0x34e   :  { %2098 = vmatpush1.bf16.msra.mxu0 %v5650_v12  ;;  %4213 = vmatpush3.bf16.msra.mxu1 %v5656_v31 }
 0x34f   :  { %2181 = vmatprep.subr.bf16.mxu0 %v5662_v19  ;;  %4218 = vmatprep.subr.bf16.mxu1 %v7154_v38 }
 0x351   :  { %3749 = vmatmul.mubr.msk.bf16.vlgmr.msra.gmra.mxu0 %vm262_vm1, %v3748_v62  ;;  %4215 = vmatmul.mubr.msk.bf16.vlgmr.msra.gmra.mxu1 %vm262_vm1, %v3748_v62  ;;  %v7228_v62 = vld [vmem:[#allocation15_spill] sm:$0xff] }
 0x352   :  { %2182 = vmatpush1.bf16.msra.mxu0 %v5674_v20  ;;  %4219 = vmatpush3.bf16.msra.mxu1 %v5680_v9 }
 0x353   :  { %2183 = vmatprep.subr.bf16.mxu0 %v5686_v3  ;;  %2201 = vmatprep.mubr.bf16.mxu0 %v7147_v21 }
 0x354   :  { %4220 = vmatprep.subr.bf16.mxu1 %v7154_v38  ;;  %4222 = vmatprep.mubr.msk.bf16.mxu1 %vm4799_vm0, %v7154_v38 }
 0x356   :  { %2184 = vmatpush1.bf16.msra.mxu0 %v5696_v4  ;;  %4221 = vmatpush3.bf16.msra.mxu1 %v5702_v22 }
 0x357   :  { %2250 = vmatprep.subr.bf16.mxu0 %v5708_v6  ;;  %4226 = vmatprep.subr.bf16.mxu1 %v7154_v38 }
 0x359   :  { %3752 = vmatmul.mubr.msk.bf16.vlgmr.msra.gmra.mxu0 %vm262_vm1, %v3751_v0  ;;  %4223 = vmatmul.mubr.msk.bf16.vlgmr.msra.gmra.mxu1 %vm262_vm1, %v3751_v0  ;;  %v7229_v0 = vld [vmem:[#allocation17_spill] sm:$0xff] }
 0x35a   :  { %2251 = vmatpush1.bf16.msra.mxu0 %v5720_v25  ;;  %4227 = vmatpush3.bf16.msra.mxu1 %v5726_v8 }
 0x35b   :  { %2252 = vmatprep.subr.bf16.mxu0 %v5732_v36  ;;  %4228 = vmatprep.subr.bf16.mxu1 %v7154_v38 }
 0x35c   :  { %2282 = vmatprep.mubr.bf16.mxu0 %v7147_v21  ;;  %4242 = vmatprep.mubr.msk.bf16.mxu1 %vm4799_vm0, %v7154_v38 }
 0x35e   :  { %2253 = vmatpush1.bf16.msra.mxu0 %v5742_v15  ;;  %4229 = vmatpush3.bf16.msra.mxu1 %v5748_v26 }
 0x35f   :  { %2254 = vmatprep.subr.bf16.mxu0 %v5754_v34  ;;  %4230 = vmatprep.subr.bf16.mxu1 %v7154_v38 }
 0x362   :  { %2255 = vmatpush1.bf16.msra.mxu0 %v5761_v39  ;;  %4231 = vmatpush3.bf16.msra.mxu1 %v5767_v42 }
 0x363   :  { %2256 = vmatprep.subr.bf16.mxu0 %v5773_v43  ;;  %4232 = vmatprep.subr.bf16.mxu1 %v7154_v38 }
 0x366   :  { %2257 = vmatpush1.bf16.msra.mxu0 %v5780_v50  ;;  %4233 = vmatpush3.bf16.msra.mxu1 %v5786_v35  ;;  %v7231_v35 = vld [vmem:[#allocation18_spill] sm:$0xff] }
 0x367   :  { %2258 = vmatprep.subr.bf16.mxu0 %v5792_v48  ;;  %4234 = vmatprep.subr.bf16.mxu1 %v7154_v38  ;;  %v7230_v48 = vld [vmem:[#allocation25_spill] sm:$0xff] }
 0x36a   :  { %2259 = vmatpush1.bf16.msra.mxu0 %v5799_v51  ;;  %4235 = vmatpush3.bf16.msra.mxu1 %v7224_v13  ;;  %v7232_v13 = vld [vmem:[#allocation20_spill] sm:$0xff]  ;;  %v7234_v51 = vld [vmem:[#allocation21_spill] sm:$0xff] }
 0x36b   :  { %2260 = vmatprep.subr.bf16.mxu0 %v7225_v63  ;;  %4236 = vmatprep.subr.bf16.mxu1 %v7154_v38  ;;  %v7233_v63 = vld [vmem:[#allocation28_spill] sm:$0xff] }
 0x36e   :  { %2261 = vmatpush1.bf16.msra.mxu0 %v7226_v59  ;;  %4237 = vmatpush3.bf16.msra.mxu1 %v7227_v55  ;;  %v7235_v59 = vld [vmem:[#allocation31_spill] sm:$0xff] }
 0x36f   :  { %2262 = vmatprep.subr.bf16.mxu0 %v7228_v62  ;;  %4238 = vmatprep.subr.bf16.mxu1 %v7154_v38  ;;  %v1736_v50 = vadd.f32 %v5996_v61, %v7235_v59 }
 0x372   :  { %2263 = vmatpush1.bf16.msra.mxu0 %v7229_v0  ;;  %4239 = vmatpush3.bf16.msra.mxu1 %v7230_v48 }
 0x373   :  { %2264 = vmatprep.subr.bf16.mxu0 %v7231_v35  ;;  %4240 = vmatprep.subr.bf16.mxu1 %v7154_v38 }
 0x376   :  { %2265 = vmatpush1.bf16.msra.mxu0 %v7232_v13  ;;  %4241 = vmatpush3.bf16.msra.mxu1 %v7233_v63 }
 0x377   :  { %2331 = vmatprep.subr.bf16.mxu0 %v7234_v51  ;;  %4246 = vmatprep.subr.bf16.mxu1 %v7154_v38  ;;  %v1738_v51 = vadd.f32 %v6019_v30, %v7186_v29 }
 0x3e9   :  { %v1902_v55 = vpop.f32.mrf.mxu0  ;;  %v1943_v62 = vpop.f32.mrf.mxu1 }
 0x3ea   :  { %v1903_v0 = vadd.f32 %v1902_v55, %v7184_v17  ;;  %v1944_v30 = vadd.f32 %v1943_v62, %v7188_v44 }
 0x3eb   :  { %v1904_v48 = vpop.f32.mrf.mxu0  ;;  %v4188_v43 = vpop.f32.mrf.mxu1 }
 0x3ec   :  { %v2030_v35 = vadd.f32 %v1903_v0, %v1736_v50  ;;  %v1905_v13 = vadd.f32 %v1904_v48, %v7185_v1 }
 0x3ed   :  { %v1906_v42 = vpop.f32.mrf.mxu0  ;;  %v1946_v39 = vpop.f32.mrf.mxu1 }
 0x3ee   :  { %v3742_v34 = vmul.f32 -1.442695, %v2030_v35  ;;  %v2037_v15 = vadd.f32 %v1905_v13, %v1738_v51  ;;  %v1822_v39 = vadd.f32 %v6043_v46, %v5382_v27 }
 0x3ef   :  { %v1907_v63 = vpop.f32.mrf.mxu0  ;;  %v4189_v26 = vpop.f32.mrf.mxu1 }
 0x3f0   :  { %4577 = vpow2.f32 %v3742_v34  ;;  %v3743_v36 = vmul.f32 -1.442695, %v2037_v15 }
 0x3f2   :  { %4579 = vpow2.f32 %v3743_v36  ;;  %v1777_v36 = vadd.f32 %v5998_v56, %v5388_v24 }
 0x3fd   :  { %v4578_v61 = vpop.eup %4577 }
 0x3fe   :  { %v2034_v59 = vadd.f32 1.0, %v4578_v61 }
 0x3ff   :  { %v4580_v55 = vpop.eup %4579 }
 0x400   :  { %4581 = vrcp.f32 %v2034_v59  ;;  %v2041_v42 = vadd.f32 1.0, %v4580_v55  ;;  %v1824_v55 = vadd.f32 %v6061_v53, %v5395_v40 }
 0x402   :  { %4583 = vrcp.f32 %v2041_v42 }
 0x409   :  { %v1983_v43 = vpop.f32.mrf.mxu0  ;;  %v2024_v50 = vpop.f32.mrf.mxu1 }
 0x40a   :  { %v1984_v35 = vadd.f32 %v1983_v43, %v7187_v14 }
 0x40b   :  { %v1985_v26 = vpop.f32.mrf.mxu0  ;;  %v4208_v48 = vpop.f32.mrf.mxu1 }
 0x40c   :  { %v2051_v34 = vadd.f32 %v1984_v35, %v1822_v39  ;;  %v1986_v0 = vadd.f32 %v1985_v26, %v5390_v10 }
 0x40d   :  { %v4582_v51 = vpop.eup %4581  ;;  %v1987_v15 = vpop.f32.mrf.mxu0 }
 0x40e   :  { %v2027_v13 = vpop.f32.mrf.mxu1  ;;  %v2044_v63 = vmul.f32 %v4582_v51, %v1944_v30  ;;  %v3744_v59 = vmul.f32 -1.442695, %v2051_v34  ;;  %v2058_v62 = vadd.f32 %v1986_v0, %v1824_v55  ;;  %v7239_v55 = vld [vmem:[#allocation26_spill] sm:$0xff] }
 0x40f   :  { %v1988_v46 = vpop.f32.mrf.mxu0  ;;  %v4584_v35 = vpop.eup %4583 }
 0x410   :  { %v4209_v61 = vpop.f32.mrf.mxu1  ;;  %v2045_v43 = vadd.f32 %v2044_v63, %v1777_v36  ;;  %4585 = vpow2.f32 %v3744_v59  ;;  %v3745_v39 = vmul.f32 -1.442695, %v2058_v62  ;;  %v2047_v15 = vsub.f32 1.0, %v4584_v35  ;;  %v7236_v46 = vld [vmem:[#allocation23_spill] sm:$0xff]  ;;  %v7242_v62 = vld [vmem:[#allocation32_spill] sm:$0xff] }
 0x411   :  { %v2049_v26 = vmul.f32 %v4584_v35, %v5888_v57  ;;  %v2025_v36 = vadd.f32 %v2024_v50, %v5407_v47  ;;  %v1863_v63 = vadd.f32 %v6045_v2, %v5419_v16  ;;  %v7237_v50 = vld [vmem:[#allocation29_spill] sm:$0xff]  ;;  %v7238_v61 = vld [vmem:[#allocation24_spill] sm:$0xff]  ;;  %v7240_v2 = vld [vmem:[#allocation30_spill] sm:$0xff] }
 0x412   :  { %4587 = vtanh.f32 %v2045_v43  ;;  %v7241_v43 = vld [vmem:[#allocation27_spill] sm:$0xff]  ;;  %v6186_v35 = vpop.f32.mrf.mxu1 }
 0x413   :  { %4589 = vpow2.f32 %v3745_v39  ;;  %v6184_v39 = vpop.f32.mrf.mxu0 }
 0x41d   :  { %v4586_v56 = vpop.eup %4585 }
 0x41e   :  { %v2055_v48 = vadd.f32 1.0, %v4586_v56 }
 0x41f   :  { %v4588_v30 = vpop.eup %4587 }
 0x420   :  { %4591 = vrcp.f32 %v2055_v48  ;;  %v2048_v42 = vmul.f32 %v4588_v30, %v2047_v15  ;;  %v4590_v51 = vpop.eup %4589  ;;  %v7243_v48 = vld [vmem:[#allocation33_spill] sm:$0xff]  ;;  %v7244_v15 = vld [vmem:[#allocation34_spill] sm:$0xff]  ;;  %v7245_v30 = vld [vmem:[#allocation36_spill] sm:$0xff] }
 0x421   :  { %v2062_v57 = vadd.f32 1.0, %v4590_v51 }
 0x422   :  { %v6151_v34 = vadd.f32 %v2049_v26, %v2048_v42  ;;  %v6192_v42 = vpop.f32.mrf.mxu0  ;;  %v4216_v26 = vpop.f32.mrf.mxu1 }
 0x423   :  { %4593 = vrcp.f32 %v2062_v57 }
 0x424   :  { %v2072_v53 = vpack.c.bf16 %v6151_v34, %v6151_v34  ;;  %v2121_v51 = vpop.f32.mrf.mxu0  ;;  %v2161_v57 = vpop.f32.mrf.mxu1 }
 0x426   :  { %3746 = vst [vmem:[%s6989_s11 + $0x3] sm:$0x1] %v2072_v53  ;;  %2283 = vmatmul.mubr.bf16.vlgmr.msra.gmra.mxu0 %v2072_v53  ;;  %4243 = vmatmul.mubr.bf16.vlgmr.msra.gmra.mxu1 %v2072_v53 }
 0x427   :  { %2332 = vmatpush1.bf16.msra.mxu0 %v5898_v52  ;;  %4247 = vmatpush3.bf16.msra.mxu1 %v5904_v28 }
 0x428   :  { %2333 = vmatprep.subr.bf16.mxu0 %v5910_v11  ;;  %4248 = vmatprep.subr.bf16.mxu1 %v7154_v38 }
 0x429   :  { %2363 = vmatprep.mubr.bf16.mxu0 %v7147_v21  ;;  %4262 = vmatprep.mubr.msk.bf16.mxu1 %vm4799_vm0, %v7154_v38 }
 0x42b   :  { %2334 = vmatpush1.bf16.msra.mxu0 %v5920_v33  ;;  %4249 = vmatpush3.bf16.msra.mxu1 %v5926_v32 }
 0x42c   :  { %2335 = vmatprep.subr.bf16.mxu0 %v5933_v45  ;;  %4250 = vmatprep.subr.bf16.mxu1 %v7154_v38 }
 0x42d   :  { %v4592_v13 = vpop.eup %4591 }
 0x42e   :  { %v2065_v59 = vmul.f32 %v4592_v13, %v2025_v36  ;;  %v7246_v13 = vld [vmem:[#allocation35_spill] sm:$0xff] }
 0x42f   :  { %2336 = vmatpush1.bf16.msra.mxu0 %v5942_v58  ;;  %4251 = vmatpush3.bf16.msra.mxu1 %v5948_v37 }
 0x430   :  { %v2066_v0 = vadd.f32 %v2065_v59, %v1863_v63  ;;  %2337 = vmatprep.subr.bf16.mxu0 %v7236_v46  ;;  %4252 = vmatprep.subr.bf16.mxu1 %v7154_v38  ;;  %v4594_v56 = vpop.eup %4593  ;;  %v7247_v63 = vld [vmem:[#allocation37_spill] sm:$0xff] }
 0x431   :  { %v2068_v53 = vsub.f32 1.0, %v4594_v56 }
 0x432   :  { %4595 = vtanh.f32 %v2066_v0  ;;  %v2070_v0 = vmul.f32 %v4594_v56, %v6041_v41 }
 0x433   :  { %2338 = vmatpush1.bf16.msra.mxu0 %v7237_v50  ;;  %4253 = vmatpush3.bf16.msra.mxu1 %v7238_v61 }
 0x434   :  { %2339 = vmatprep.subr.bf16.mxu0 %v7239_v55  ;;  %4254 = vmatprep.subr.bf16.mxu1 %v7154_v38 }
 0x437   :  { %2340 = vmatpush1.bf16.msra.mxu0 %v7240_v2  ;;  %4255 = vmatpush3.bf16.msra.mxu1 %v7241_v43 }
 0x438   :  { %2341 = vmatprep.subr.bf16.mxu0 %v7242_v62  ;;  %4256 = vmatprep.subr.bf16.mxu1 %v7154_v38 }
 0x43b   :  { %2342 = vmatpush1.bf16.msra.mxu0 %v7243_v48  ;;  %4257 = vmatpush3.bf16.msra.mxu1 %v7244_v15  ;;  %v4217_v15 = vpop.f32.mrf.mxu1 }
 0x43c   :  { %2343 = vmatprep.subr.bf16.mxu0 %v7245_v30  ;;  %4258 = vmatprep.subr.bf16.mxu1 %v7154_v38  ;;  %v2122_v30 = vpop.f32.mrf.mxu0 }
 0x43d   :  { %v6203_v51 = vpop.f32.mrf.mxu1 }
 0x43e   :  { %v6201_v26 = vpop.f32.mrf.mxu0 }
 0x43f   :  { %v4596_v36 = vpop.eup %4595  ;;  %2344 = vmatpush1.bf16.msra.mxu0 %v7246_v13  ;;  %4259 = vmatpush3.bf16.msra.mxu1 %v7247_v63 }
 0x440   :  { %2345 = vmatprep.subr.bf16.mxu0 %v6036_v54  ;;  %4260 = vmatprep.subr.bf16.mxu1 %v7154_v38  ;;  %v2069_v59 = vmul.f32 %v4596_v36, %v2068_v53  ;;  %v6209_v54 = vpop.f32.mrf.mxu0  ;;  %v4224_v53 = vpop.f32.mrf.mxu1  ;;  %v7261_v36 = vld [vmem:[#allocation14_spill] sm:$0xff] }
 0x441   :  { %v7265_v53 = vld [vmem:[#allocation25_spill] sm:$0xff] }
 0x442   :  { %v6199_v48 = vadd.f32 %v2070_v0, %v2069_v59  ;;  %v2207_v41 = vpop.f32.mrf.mxu0  ;;  %v2247_v56 = vpop.f32.mrf.mxu1  ;;  %v7262_v59 = vld [vmem:[#allocation22_spill] sm:$0xff]  ;;  %v7263_v0 = vld [vmem:[#allocation15_spill] sm:$0xff] }
 0x443   :  { %2346 = vmatpush1.bf16.msra.mxu0 %v6050_v60  ;;  %4261 = vmatpush3.bf16.msra.mxu1 %v6056_v49  ;;  %v7266_v41 = vld [vmem:[#allocation18_spill] sm:$0xff]  ;;  %v7267_v56 = vld [vmem:[#allocation20_spill] sm:$0xff] }
 0x444   :  { %v2075_v57 = vpack.c.bf16 %v6199_v48, %v6199_v48  ;;  %2477 = vmatprep.subr.bf16.mxu0 %v5618_v18  ;;  %4266 = vmatprep.subr.bf16.mxu1 %v7154_v38  ;;  %v2208_v15 = vpop.f32.mrf.mxu0  ;;  %v4225_v30 = vpop.f32.mrf.mxu1  ;;  %v3760_v18 = vld [vmem:[%s6980_s0 + $0x5] sm:$0x1] }
 0x445   :  { %v7268_v15 = vld [vmem:[#allocation28_spill] sm:$0xff]  ;;  %v7269_v30 = vld [vmem:[#allocation21_spill] sm:$0xff] }
 0x446   :  { %3747 = vst [vmem:[%s6990_s12 + $0x4] sm:$0x1] %v2075_v57  ;;  %2364 = vmatmul.mubr.bf16.vlgmr.msra.gmra.mxu0 %v2075_v57  ;;  %4263 = vmatmul.mubr.bf16.vlgmr.msra.gmra.mxu1 %v2075_v57  ;;  %v7264_v57 = vld [vmem:[#allocation17_spill] sm:$0xff] }
 0x447   :  { %2478 = vmatpush1.bf16.msra.mxu0 %v5628_v5  ;;  %4267 = vmatpush3.bf16.msra.mxu1 %v5634_v23  ;;  %v3763_v5 = vld [vmem:[%s6982_s1 + $0x2] sm:$0x1]  ;;  %v7248_v23 = vld [vmem:[#allocation3_spill] sm:$0xff] }
 0x448   :  { %2479 = vmatprep.subr.bf16.mxu0 %v5640_v7  ;;  %2497 = vmatprep.mubr.bf16.mxu0 %v7147_v21  ;;  %v7249_v7 = vld [vmem:[#allocation4_spill] sm:$0xff] }
 0x449   :  { %4268 = vmatprep.subr.bf16.mxu1 %v7154_v38  ;;  %4270 = vmatprep.mubr.msk.bf16.mxu1 %vm4799_vm0, %v7154_v38 }
 0x44b   :  { %2480 = vmatpush1.bf16.msra.mxu0 %v5650_v12  ;;  %4269 = vmatpush3.bf16.msra.mxu1 %v5656_v31  ;;  %v7250_v12 = vld [vmem:[#allocation10_spill] sm:$0xff]  ;;  %v7251_v31 = vld [vmem:[#allocation5_spill] sm:$0xff] }
 0x44c   :  { %2563 = vmatprep.subr.bf16.mxu0 %v5662_v19  ;;  %4274 = vmatprep.subr.bf16.mxu1 %v7154_v38  ;;  %v7252_v19 = vld [vmem:[#allocation6_spill] sm:$0xff] }
 0x44e   :  { %3761 = vmatmul.mubr.msk.bf16.vlgmr.msra.gmra.mxu0 %vm262_vm1, %v3760_v18  ;;  %4271 = vmatmul.mubr.msk.bf16.vlgmr.msra.gmra.mxu1 %vm262_vm1, %v3760_v18 }
 0x44f   :  { %2564 = vmatpush1.bf16.msra.mxu0 %v5674_v20  ;;  %4275 = vmatpush3.bf16.msra.mxu1 %v5680_v9  ;;  %v7253_v20 = vld [vmem:[#allocation13_spill] sm:$0xff]  ;;  %v7254_v9 = vld [vmem:[#allocation7_spill] sm:$0xff] }
 0x450   :  { %2565 = vmatprep.subr.bf16.mxu0 %v5686_v3  ;;  %2583 = vmatprep.mubr.bf16.mxu0 %v7147_v21  ;;  %v7255_v3 = vld [vmem:[#allocation8_spill] sm:$0xff] }
 0x451   :  { %4276 = vmatprep.subr.bf16.mxu1 %v7154_v38  ;;  %4278 = vmatprep.mubr.msk.bf16.mxu1 %vm4799_vm0, %v7154_v38 }
 0x453   :  { %2566 = vmatpush1.bf16.msra.mxu0 %v5696_v4  ;;  %4277 = vmatpush3.bf16.msra.mxu1 %v5702_v22  ;;  %v7256_v4 = vld [vmem:[#allocation16_spill] sm:$0xff]  ;;  %v7257_v22 = vld [vmem:[#allocation9_spill] sm:$0xff] }
 0x454   :  { %2632 = vmatprep.subr.bf16.mxu0 %v5708_v6  ;;  %4282 = vmatprep.subr.bf16.mxu1 %v7154_v38  ;;  %v7258_v6 = vld [vmem:[#allocation11_spill] sm:$0xff] }
 0x456   :  { %3764 = vmatmul.mubr.msk.bf16.vlgmr.msra.gmra.mxu0 %vm262_vm1, %v3763_v5  ;;  %4279 = vmatmul.mubr.msk.bf16.vlgmr.msra.gmra.mxu1 %vm262_vm1, %v3763_v5 }
 0x457   :  { %2633 = vmatpush1.bf16.msra.mxu0 %v5720_v25  ;;  %4283 = vmatpush3.bf16.msra.mxu1 %v5726_v8  ;;  %v7259_v25 = vld [vmem:[#allocation19_spill] sm:$0xff]  ;;  %v7260_v8 = vld [vmem:[#allocation12_spill] sm:$0xff] }
 0x458   :  { %2634 = vmatprep.subr.bf16.mxu0 %v7248_v23  ;;  %4284 = vmatprep.subr.bf16.mxu1 %v7154_v38  ;;  %v7270_v23 = vld [vmem:[#allocation31_spill] sm:$0xff] }
 0x459   :  { %2664 = vmatprep.mubr.bf16.mxu0 %v7147_v21  ;;  %4298 = vmatprep.mubr.msk.bf16.mxu1 %vm4799_vm0, %v7154_v38 }
 0x45b   :  { %2635 = vmatpush1.bf16.msra.mxu0 %v7249_v7  ;;  %4285 = vmatpush3.bf16.msra.mxu1 %v7250_v12  ;;  %v2118_v7 = vadd.f32 %v6184_v39, %v7270_v23 }
 0x45c   :  { %2636 = vmatprep.subr.bf16.mxu0 %v7251_v31  ;;  %4286 = vmatprep.subr.bf16.mxu1 %v7154_v38 }
 0x45f   :  { %2637 = vmatpush1.bf16.msra.mxu0 %v7252_v19  ;;  %4287 = vmatpush3.bf16.msra.mxu1 %v7253_v20 }
 0x460   :  { %2638 = vmatprep.subr.bf16.mxu0 %v7254_v9  ;;  %4288 = vmatprep.subr.bf16.mxu1 %v7154_v38 }
 0x463   :  { %2639 = vmatpush1.bf16.msra.mxu0 %v7255_v3  ;;  %4289 = vmatpush3.bf16.msra.mxu1 %v7256_v4 }
 0x464   :  { %2640 = vmatprep.subr.bf16.mxu0 %v7257_v22  ;;  %4290 = vmatprep.subr.bf16.mxu1 %v7154_v38 }
 0x467   :  { %2641 = vmatpush1.bf16.msra.mxu0 %v7258_v6  ;;  %4291 = vmatpush3.bf16.msra.mxu1 %v7259_v25 }
 0x468   :  { %2642 = vmatprep.subr.bf16.mxu0 %v7260_v8  ;;  %4292 = vmatprep.subr.bf16.mxu1 %v7154_v38  ;;  %v2120_v8 = vadd.f32 %v6192_v42, %v7186_v29 }
 0x46b   :  { %2643 = vmatpush1.bf16.msra.mxu0 %v7261_v36  ;;  %4293 = vmatpush3.bf16.msra.mxu1 %v7262_v59 }
 0x46c   :  { %2644 = vmatprep.subr.bf16.mxu0 %v7263_v0  ;;  %4294 = vmatprep.subr.bf16.mxu1 %v7154_v38 }
 0x46f   :  { %2645 = vmatpush1.bf16.msra.mxu0 %v7264_v57  ;;  %4295 = vmatpush3.bf16.msra.mxu1 %v7265_v53 }
 0x470   :  { %2646 = vmatprep.subr.bf16.mxu0 %v7266_v41  ;;  %4296 = vmatprep.subr.bf16.mxu1 %v7154_v38 }
 0x473   :  { %2647 = vmatpush1.bf16.msra.mxu0 %v7267_v56  ;;  %4297 = vmatpush3.bf16.msra.mxu1 %v7268_v15  ;;  %v2204_v56 = vadd.f32 %v6201_v26, %v5382_v27 }
 0x474   :  { %2713 = vmatprep.subr.bf16.mxu0 %v7269_v30  ;;  %4302 = vmatprep.subr.bf16.mxu1 %v7154_v38 }
 0x4e6   :  { %v2284_v18 = vpop.f32.mrf.mxu0  ;;  %v2325_v5 = vpop.f32.mrf.mxu1 }
 0x4e7   :  { %v2285_v12 = vadd.f32 %v2284_v18, %v7184_v17  ;;  %v2326_v42 = vadd.f32 %v2325_v5, %v7188_v44 }
 0x4e8   :  { %v2286_v31 = vpop.f32.mrf.mxu0  ;;  %v4244_v19 = vpop.f32.mrf.mxu1 }
 0x4e9   :  { %v2412_v20 = vadd.f32 %v2285_v12, %v2118_v7  ;;  %v2287_v22 = vadd.f32 %v2286_v31, %v7185_v1  ;;  %v2159_v19 = vadd.f32 %v6186_v35, %v5388_v24 }
 0x4ea   :  { %v2288_v9 = vpop.f32.mrf.mxu0  ;;  %v2328_v3 = vpop.f32.mrf.mxu1 }
 0x4eb   :  { %v3754_v4 = vmul.f32 -1.442695, %v2412_v20  ;;  %v2419_v36 = vadd.f32 %v2287_v22, %v2120_v8 }
 0x4ec   :  { %v2289_v6 = vpop.f32.mrf.mxu0  ;;  %v4245_v25 = vpop.f32.mrf.mxu1 }
 0x4ed   :  { %4597 = vpow2.f32 %v3754_v4  ;;  %v3755_v59 = vmul.f32 -1.442695, %v2419_v36  ;;  %v2206_v25 = vadd.f32 %v6209_v54, %v5395_v40 }
 0x4ef   :  { %4599 = vpow2.f32 %v3755_v59 }
 0x4fa   :  { %v4598_v39 = vpop.eup %4597 }
 0x4fb   :  { %v2416_v0 = vadd.f32 1.0, %v4598_v39 }
 0x4fc   :  { %v4600_v57 = vpop.eup %4599 }
 0x4fd   :  { %4601 = vrcp.f32 %v2416_v0  ;;  %v2423_v15 = vadd.f32 1.0, %v4600_v57 }
 0x4ff   :  { %4603 = vrcp.f32 %v2423_v15 }
 0x506   :  { %v2365_v53 = vpop.f32.mrf.mxu0  ;;  %v2406_v41 = vpop.f32.mrf.mxu1 }
 0x507   :  { %v2366_v30 = vadd.f32 %v2365_v53, %v7187_v14 }
 0x508   :  { %v2367_v18 = vpop.f32.mrf.mxu0  ;;  %v4264_v7 = vpop.f32.mrf.mxu1 }
 0x509   :  { %v2433_v12 = vadd.f32 %v2366_v30, %v2204_v56  ;;  %v2368_v22 = vadd.f32 %v2367_v18, %v5390_v10  ;;  %v2407_v18 = vadd.f32 %v2406_v41, %v5407_v47 }
 0x50a   :  { %v4602_v31 = vpop.eup %4601  ;;  %v2369_v20 = vpop.f32.mrf.mxu0 }
 0x50b   :  { %v2409_v9 = vpop.f32.mrf.mxu1  ;;  %v2426_v3 = vmul.f32 %v4602_v31, %v2326_v42  ;;  %v3756_v4 = vmul.f32 -1.442695, %v2433_v12  ;;  %v2440_v5 = vadd.f32 %v2368_v22, %v2206_v25  ;;  %v6378_v22 = vld [vmem:[%s6978_s3 + $0x20] ss:$12 sps:$4 sm:$0xff]   ;;  %v6384_v25 = vld [vmem:[%s6978_s3 + $0x4] ss:$12 sps:$4 sm:$0xff]  }
 0x50c   :  { %v2370_v26 = vpop.f32.mrf.mxu0  ;;  %v4604_v59 = vpop.eup %4603 }
 0x50d   :  { %v4265_v6 = vpop.f32.mrf.mxu1  ;;  %v2427_v8 = vadd.f32 %v2426_v3, %v2159_v19  ;;  %4605 = vpow2.f32 %v3756_v4  ;;  %v3757_v36 = vmul.f32 -1.442695, %v2440_v5  ;;  %v2429_v0 = vsub.f32 1.0, %v4604_v59  ;;  %v6372_v4 = vld [vmem:[%s6978_s3 + $0x18] ss:$12 sps:$4 sm:$0xff]  }
 0x50e   :  { %v2431_v56 = vmul.f32 %v4604_v59, %v6151_v34  ;;  %v6400_v5 = vld [vmem:[%s6978_s3 + $0x8] ss:$12 sps:$4 sm:$0xff]   ;;  %v3772_v59 = vld [vmem:[%s6980_s0 + $0x6] sm:$0x1] }
 0x50f   :  { %4607 = vtanh.f32 %v2427_v8  ;;  %v6394_v8 = vld [vmem:[%s6978_s3] ss:$12 sps:$4 sm:$0xff]  }
 0x510   :  { %4609 = vpow2.f32 %v3757_v36  ;;  %v6406_v36 = vld [vmem:[%s6979_s4 + $0x1c] ss:$12 sps:$4 sm:$0xff]  }
 0x51a   :  { %v4606_v35 = vpop.eup %4605 }
 0x51b   :  { %v2437_v39 = vadd.f32 1.0, %v4606_v35  ;;  %v6418_v35 = vld [vmem:[%s6979_s4 + $0x18] ss:$12 sps:$4 sm:$0xff]  }
 0x51c   :  { %v4608_v57 = vpop.eup %4607 }
 0x51d   :  { %4611 = vrcp.f32 %v2437_v39  ;;  %v2430_v53 = vmul.f32 %v4608_v57, %v2429_v0  ;;  %v4610_v30 = vpop.eup %4609  ;;  %v6424_v39 = vld [vmem:[%s6979_s4 + $0x20] ss:$12 sps:$4 sm:$0xff]   ;;  %v6430_v0 = vld [vmem:[%s6979_s4 + $0x4] ss:$12 sps:$4 sm:$0xff]  }
 0x51e   :  { %v2444_v34 = vadd.f32 1.0, %v4610_v30  ;;  %v6440_v57 = vld [vmem:[%s6979_s4] ss:$12 sps:$4 sm:$0xff]   ;;  %v6464_v30 = vld [vmem:[%s6981_s7 + $0xa8] ss:$12 sps:$4 sm:$0xff]  }
 0x51f   :  { %v6299_v15 = vadd.f32 %v2431_v56, %v2430_v53  ;;  %v6446_v53 = vld [vmem:[%s6979_s4 + $0x8] ss:$12 sps:$4 sm:$0xff]   ;;  %v6452_v56 = vld [vmem:[%s6981_s7 + $0xac] ss:$12 sps:$4 sm:$0xff]  }
 0x520   :  { %4613 = vrcp.f32 %v2444_v34  ;;  %v6470_v34 = vld [vmem:[%s6981_s7 + $0xb0] ss:$12 sps:$4 sm:$0xff]  }
 0x521   :  { %v2454_v54 = vpack.c.bf16 %v6299_v15, %v6299_v15 }
 0x523   :  { %3758 = vst [vmem:[%s6989_s11 + $0x4] sm:$0x1] %v2454_v54  ;;  %2665 = vmatmul.mubr.bf16.vlgmr.msra.gmra.mxu0 %v2454_v54  ;;  %4299 = vmatmul.mubr.bf16.vlgmr.msra.gmra.mxu1 %v2454_v54  ;;  %v3775_v54 = vld [vmem:[%s6982_s1 + $0x1] sm:$0x1] }
 0x524   :  { %2714 = vmatpush1.bf16.msra.mxu0 %v5898_v52  ;;  %4303 = vmatpush3.bf16.msra.mxu1 %v5904_v28  ;;  %v2245_v28 = vadd.f32 %v6203_v51, %v5419_v16  ;;  %v7274_v51 = vld [vmem:[#allocation38_spill] sm:$0xff] }
 0x525   :  { %2715 = vmatprep.subr.bf16.mxu0 %v5910_v11  ;;  %4304 = vmatprep.subr.bf16.mxu1 %v7154_v38 }
 0x526   :  { %2745 = vmatprep.mubr.bf16.mxu0 %v7147_v21  ;;  %4318 = vmatprep.mubr.msk.bf16.mxu1 %vm4799_vm0, %v7154_v38 }
 0x528   :  { %2716 = vmatpush1.bf16.msra.mxu0 %v5920_v33  ;;  %4305 = vmatpush3.bf16.msra.mxu1 %v5926_v32  ;;  %v6332_v33 = vpop.f32.mrf.mxu0  ;;  %v6334_v32 = vpop.f32.mrf.mxu1 }
 0x529   :  { %2717 = vmatprep.subr.bf16.mxu0 %v5933_v45  ;;  %4306 = vmatprep.subr.bf16.mxu1 %v7154_v38 }
 0x52a   :  { %v4612_v52 = vpop.eup %4611 }
 0x52b   :  { %v2447_v11 = vmul.f32 %v4612_v52, %v2407_v18  ;;  %v6476_v18 = vld [vmem:[%s6981_s7 + $0x94] ss:$12 sps:$4 sm:$0xff]   ;;  %v6486_v52 = vld [vmem:[%s6981_s7 + $0x90] ss:$12 sps:$4 sm:$0xff]  }
 0x52c   :  { %2718 = vmatpush1.bf16.msra.mxu0 %v5942_v58  ;;  %4307 = vmatpush3.bf16.msra.mxu1 %v5948_v37  ;;  %v7271_v58 = vld [vmem:[#allocation33_spill] sm:$0xff]  ;;  %v7272_v37 = vld [vmem:[#allocation34_spill] sm:$0xff] }
 0x52d   :  { %v2448_v7 = vadd.f32 %v2447_v11, %v2245_v28  ;;  %2719 = vmatprep.subr.bf16.mxu0 %v7236_v46  ;;  %4308 = vmatprep.subr.bf16.mxu1 %v7154_v38  ;;  %v4614_v45 = vpop.eup %4613  ;;  %v7273_v46 = vld [vmem:[#allocation36_spill] sm:$0xff]  ;;  %v6492_v28 = vld [vmem:[%s6981_s7 + $0x98] ss:$12 sps:$4 sm:$0xff]   ;;  %v6498_v11 = vld [vmem:[%s6981_s7 + $0x7c] ss:$12 sps:$4 sm:$0xff]  }
 0x52e   :  { %v2452_v42 = vmul.f32 %v4614_v45, %v6199_v48  ;;  %v6362_v48 = vld [vmem:[%s6978_s3 + $0x1c] ss:$12 sps:$4 sm:$0xff]  }
 0x52f   :  { %4615 = vtanh.f32 %v2448_v7  ;;  %v6505_v7 = vld [vmem:[%s6981_s7 + $0x78] ss:$12 sps:$4 sm:$0xff]  }
 0x530   :  { %2720 = vmatpush1.bf16.msra.mxu0 %v7237_v50  ;;  %4309 = vmatpush3.bf16.msra.mxu1 %v7238_v61  ;;  %v6340_v50 = vpop.f32.mrf.mxu0  ;;  %v4272_v61 = vpop.f32.mrf.mxu1 }
 0x531   :  { %2721 = vmatprep.subr.bf16.mxu0 %v7239_v55  ;;  %4310 = vmatprep.subr.bf16.mxu1 %v7154_v38  ;;  %v2450_v55 = vsub.f32 1.0, %v4614_v45  ;;  %v6511_v45 = vld [vmem:[%s6981_s7 + $0x80] ss:$12 sps:$4 sm:$0xff]  }
 0x532   :  { %v6536_v61 = vld [vmem:[%s6981_s7 + $0x4c] ss:$12 sps:$4 sm:$0xff]  }
 0x534   :  { %2722 = vmatpush1.bf16.msra.mxu0 %v7240_v2  ;;  %4311 = vmatpush3.bf16.msra.mxu1 %v7241_v43  ;;  %v2503_v2 = vpop.f32.mrf.mxu0  ;;  %v2543_v43 = vpop.f32.mrf.mxu1 }
 0x535   :  { %2723 = vmatprep.subr.bf16.mxu0 %v7242_v62  ;;  %4312 = vmatprep.subr.bf16.mxu1 %v7154_v38  ;;  %v6549_v2 = vld [vmem:[%s6981_s7 + $0x50] ss:$12 sps:$4 sm:$0xff]   ;;  %v6555_v43 = vld [vmem:[%s6981_s7 + $0x34] ss:$12 sps:$4 sm:$0xff]  }
 0x536   :  { %v2504_v12 = vpop.f32.mrf.mxu0  ;;  %v4273_v31 = vpop.f32.mrf.mxu1  ;;  %7275 = vst [vmem:[#allocation23_spill] sm:$0xff] %v6549_v2  ;;  %7276 = vst [vmem:[#allocation29_spill] sm:$0xff] %v6555_v43 }
 0x537   :  { %v6587_v12 = vld [vmem:[%s6981_s7 + $0x20] ss:$12 sps:$4 sm:$0xff]   ;;  %v6593_v31 = vld [vmem:[%s6981_s7 + $0x4] ss:$12 sps:$4 sm:$0xff]  }
 0x538   :  { %2724 = vmatpush1.bf16.msra.mxu0 %v7271_v58  ;;  %4313 = vmatpush3.bf16.msra.mxu1 %v7272_v37  ;;  %v6349_v20 = vpop.f32.mrf.mxu0  ;;  %v6351_v9 = vpop.f32.mrf.mxu1  ;;  %v6517_v58 = vld [vmem:[%s6981_s7 + $0x64] ss:$12 sps:$4 sm:$0xff]   ;;  %v6524_v37 = vld [vmem:[%s6981_s7 + $0x60] ss:$12 sps:$4 sm:$0xff]   ;;  %7281 = vst [vmem:[#allocation32_spill] sm:$0xff] %v6587_v12  ;;  %7282 = vst [vmem:[#allocation35_spill] sm:$0xff] %v6593_v31 }
 0x539   :  { %2725 = vmatprep.subr.bf16.mxu0 %v7273_v46  ;;  %4314 = vmatprep.subr.bf16.mxu1 %v7154_v38  ;;  %v6530_v46 = vld [vmem:[%s6981_s7 + $0x68] ss:$12 sps:$4 sm:$0xff]  }
 0x53a   :  { %v4280_v3 = vpop.f32.mrf.mxu1 }
 0x53b   :  { %v6606_v3 = vld [vmem:[%s6981_s7 + $0x8] ss:$12 sps:$4 sm:$0xff]  }
 0x53c   :  { %v4616_v62 = vpop.eup %4615  ;;  %2726 = vmatpush1.bf16.msra.mxu0 %v7246_v13  ;;  %4315 = vmatpush3.bf16.msra.mxu1 %v7247_v63  ;;  %v6357_v63 = vpop.f32.mrf.mxu0  ;;  %7284 = vst [vmem:[#allocation3_spill] sm:$0xff] %v6606_v3 }
 0x53d   :  { %2727 = vmatprep.subr.bf16.mxu0 %v7274_v51  ;;  %4316 = vmatprep.subr.bf16.mxu1 %v7154_v38  ;;  %v2451_v41 = vmul.f32 %v4616_v62, %v2450_v55  ;;  %v6543_v55 = vld [vmem:[%s6981_s7 + $0x48] ss:$12 sps:$4 sm:$0xff]   ;;  %v6562_v62 = vld [vmem:[%s6981_s7 + $0x30] ss:$12 sps:$4 sm:$0xff]   ;;  %v6568_v51 = vld [vmem:[%s6981_s7 + $0x38] ss:$12 sps:$4 sm:$0xff]  }
 0x53e   :  { %7277 = vst [vmem:[#allocation24_spill] sm:$0xff] %v6562_v62  ;;  %7278 = vst [vmem:[#allocation26_spill] sm:$0xff] %v6568_v51 }
 0x53f   :  { %v6347_v19 = vadd.f32 %v2452_v42, %v2451_v41  ;;  %v6574_v41 = vld [vmem:[%s6981_s7 + $0x1c] ss:$12 sps:$4 sm:$0xff]   ;;  %v6581_v42 = vld [vmem:[%s6981_s7 + $0x18] ss:$12 sps:$4 sm:$0xff]  }
 0x540   :  { %2728 = vmatpush1.bf16.msra.mxu0 %v6050_v60  ;;  %4317 = vmatpush3.bf16.msra.mxu1 %v6056_v49  ;;  %v2589_v60 = vpop.f32.mrf.mxu0  ;;  %v2629_v49 = vpop.f32.mrf.mxu1  ;;  %7279 = vst [vmem:[#allocation30_spill] sm:$0xff] %v6574_v41  ;;  %7280 = vst [vmem:[#allocation27_spill] sm:$0xff] %v6581_v42 }
 0x541   :  { %v2457_v13 = vpack.c.bf16 %v6347_v19, %v6347_v19  ;;  %2859 = vmatprep.subr.bf16.mxu0 %v6362_v48  ;;  %4322 = vmatprep.subr.bf16.mxu1 %v7154_v38  ;;  %v6612_v60 = vld [vmem:[%s6984_s8 + $0xac] ss:$12 sps:$4 sm:$0xff]  }
 0x542   :  { %v2590_v26 = vpop.f32.mrf.mxu0  ;;  %v4281_v6 = vpop.f32.mrf.mxu1  ;;  %7285 = vst [vmem:[#allocation4_spill] sm:$0xff] %v6612_v60 }
 0x543   :  { %3759 = vst [vmem:[%s6990_s12 + $0x3] sm:$0x1] %v2457_v13  ;;  %2746 = vmatmul.mubr.bf16.vlgmr.msra.gmra.mxu0 %v2457_v13  ;;  %4319 = vmatmul.mubr.bf16.vlgmr.msra.gmra.mxu1 %v2457_v13  ;;  %v6600_v13 = vld [vmem:[%s6981_s7] ss:$12 sps:$4 sm:$0xff]   ;;  %v2500_v6 = vadd.f32 %v6332_v33, %v7270_v23 }
 0x544   :  { %2860 = vmatpush1.bf16.msra.mxu0 %v6372_v4  ;;  %4323 = vmatpush3.bf16.msra.mxu1 %v6378_v22  ;;  %7283 = vst [vmem:[#allocation37_spill] sm:$0xff] %v6600_v13 }
 0x545   :  { %2861 = vmatprep.subr.bf16.mxu0 %v6384_v25  ;;  %2879 = vmatprep.mubr.bf16.mxu0 %v7147_v21 }
 0x546   :  { %4324 = vmatprep.subr.bf16.mxu1 %v7154_v38  ;;  %4326 = vmatprep.mubr.msk.bf16.mxu1 %vm4799_vm0, %v7154_v38 }
 0x548   :  { %2862 = vmatpush1.bf16.msra.mxu0 %v6394_v8  ;;  %4325 = vmatpush3.bf16.msra.mxu1 %v6400_v5 }
 0x549   :  { %2945 = vmatprep.subr.bf16.mxu0 %v6406_v36  ;;  %4330 = vmatprep.subr.bf16.mxu1 %v7154_v38 }
 0x54b   :  { %3773 = vmatmul.mubr.msk.bf16.vlgmr.msra.gmra.mxu0 %vm262_vm1, %v3772_v59  ;;  %4327 = vmatmul.mubr.msk.bf16.vlgmr.msra.gmra.mxu1 %vm262_vm1, %v3772_v59 }
 0x54c   :  { %2946 = vmatpush1.bf16.msra.mxu0 %v6418_v35  ;;  %4331 = vmatpush3.bf16.msra.mxu1 %v6424_v39 }
 0x54d   :  { %2947 = vmatprep.subr.bf16.mxu0 %v6430_v0  ;;  %2965 = vmatprep.mubr.bf16.mxu0 %v7147_v21 }
 0x54e   :  { %4332 = vmatprep.subr.bf16.mxu1 %v7154_v38  ;;  %4334 = vmatprep.mubr.msk.bf16.mxu1 %vm4799_vm0, %v7154_v38 }
 0x550   :  { %2948 = vmatpush1.bf16.msra.mxu0 %v6440_v57  ;;  %4333 = vmatpush3.bf16.msra.mxu1 %v6446_v53 }
 0x551   :  { %3014 = vmatprep.subr.bf16.mxu0 %v6452_v56  ;;  %4338 = vmatprep.subr.bf16.mxu1 %v7154_v38 }
 0x553   :  { %3776 = vmatmul.mubr.msk.bf16.vlgmr.msra.gmra.mxu0 %vm262_vm1, %v3775_v54  ;;  %4335 = vmatmul.mubr.msk.bf16.vlgmr.msra.gmra.mxu1 %vm262_vm1, %v3775_v54 }
 0x554   :  { %3015 = vmatpush1.bf16.msra.mxu0 %v6464_v30  ;;  %4339 = vmatpush3.bf16.msra.mxu1 %v6470_v34 }
 0x555   :  { %3016 = vmatprep.subr.bf16.mxu0 %v6476_v18  ;;  %4340 = vmatprep.subr.bf16.mxu1 %v7154_v38 }
 0x556   :  { %3046 = vmatprep.mubr.bf16.mxu0 %v7147_v21  ;;  %4354 = vmatprep.mubr.msk.bf16.mxu1 %vm4799_vm0, %v7154_v38 }
 0x558   :  { %3017 = vmatpush1.bf16.msra.mxu0 %v6486_v52  ;;  %4341 = vmatpush3.bf16.msra.mxu1 %v6492_v28 }
 0x559   :  { %3018 = vmatprep.subr.bf16.mxu0 %v6498_v11  ;;  %4342 = vmatprep.subr.bf16.mxu1 %v7154_v38 }
 0x55c   :  { %3019 = vmatpush1.bf16.msra.mxu0 %v6505_v7  ;;  %4343 = vmatpush3.bf16.msra.mxu1 %v6511_v45 }
 0x55d   :  { %3020 = vmatprep.subr.bf16.mxu0 %v6517_v58  ;;  %4344 = vmatprep.subr.bf16.mxu1 %v7154_v38 }
 0x560   :  { %3021 = vmatpush1.bf16.msra.mxu0 %v6524_v37  ;;  %4345 = vmatpush3.bf16.msra.mxu1 %v6530_v46 }
 0x561   :  { %3022 = vmatprep.subr.bf16.mxu0 %v6536_v61  ;;  %4346 = vmatprep.subr.bf16.mxu1 %v7154_v38 }
 0x564   :  { %3023 = vmatpush1.bf16.msra.mxu0 %v6543_v55  ;;  %4347 = vmatpush3.bf16.msra.mxu1 %v6549_v2 }
 0x565   :  { %3024 = vmatprep.subr.bf16.mxu0 %v6555_v43  ;;  %4348 = vmatprep.subr.bf16.mxu1 %v7154_v38 }
 0x568   :  { %3025 = vmatpush1.bf16.msra.mxu0 %v6562_v62  ;;  %4349 = vmatpush3.bf16.msra.mxu1 %v6568_v51 }
 0x569   :  { %3026 = vmatprep.subr.bf16.mxu0 %v6574_v41  ;;  %4350 = vmatprep.subr.bf16.mxu1 %v7154_v38 }
 0x56c   :  { %3027 = vmatpush1.bf16.msra.mxu0 %v6581_v42  ;;  %4351 = vmatpush3.bf16.msra.mxu1 %v6587_v12 }
 0x56d   :  { %3028 = vmatprep.subr.bf16.mxu0 %v6593_v31  ;;  %4352 = vmatprep.subr.bf16.mxu1 %v7154_v38 }
 0x570   :  { %3029 = vmatpush1.bf16.msra.mxu0 %v6600_v13  ;;  %4353 = vmatpush3.bf16.msra.mxu1 %v6606_v3 }
 0x571   :  { %3095 = vmatprep.subr.bf16.mxu0 %v6612_v60  ;;  %4358 = vmatprep.subr.bf16.mxu1 %v7154_v38  ;;  %v2502_v60 = vadd.f32 %v6340_v50, %v7186_v29 }
 0x5e3   :  { %v2666_v49 = vpop.f32.mrf.mxu0  ;;  %v2707_v26 = vpop.f32.mrf.mxu1 }
 0x5e4   :  { %v2667_v59 = vadd.f32 %v2666_v49, %v7184_v17  ;;  %v2708_v50 = vadd.f32 %v2707_v26, %v7188_v44 }
 0x5e5   :  { %v2668_v54 = vpop.f32.mrf.mxu0  ;;  %v4300_v13 = vpop.f32.mrf.mxu1 }
 0x5e6   :  { %v2794_v31 = vadd.f32 %v2667_v59, %v2500_v6  ;;  %v2669_v41 = vadd.f32 %v2668_v54, %v7185_v1 }
 0x5e7   :  { %v2670_v3 = vpop.f32.mrf.mxu0  ;;  %v2710_v12 = vpop.f32.mrf.mxu1 }
 0x5e8   :  { %v3766_v42 = vmul.f32 -1.442695, %v2794_v31  ;;  %v2801_v43 = vadd.f32 %v2669_v41, %v2502_v60  ;;  %v2586_v12 = vadd.f32 %v6349_v20, %v5382_v27 }
 0x5e9   :  { %v2671_v51 = vpop.f32.mrf.mxu0  ;;  %v4301_v62 = vpop.f32.mrf.mxu1 }
 0x5ea   :  { %4617 = vpow2.f32 %v3766_v42  ;;  %v3767_v2 = vmul.f32 -1.442695, %v2801_v43 }
 0x5ec   :  { %4619 = vpow2.f32 %v3767_v2  ;;  %v2541_v2 = vadd.f32 %v6334_v32, %v5388_v24 }
 0x5f7   :  { %v4618_v33 = vpop.eup %4617 }
 0x5f8   :  { %v2798_v23 = vadd.f32 1.0, %v4618_v33 }
 0x5f9   :  { %v4620_v49 = vpop.eup %4619 }
 0x5fa   :  { %4621 = vrcp.f32 %v2798_v23  ;;  %v2805_v31 = vadd.f32 1.0, %v4620_v49  ;;  %v2588_v49 = vadd.f32 %v6357_v63, %v5395_v40 }
 0x5fc   :  { %4623 = vrcp.f32 %v2805_v31 }
 0x603   :  { %v2747_v13 = vpop.f32.mrf.mxu0  ;;  %v2788_v6 = vpop.f32.mrf.mxu1 }
 0x604   :  { %v2748_v51 = vadd.f32 %v2747_v13, %v7187_v14 }
 0x605   :  { %v2749_v62 = vpop.f32.mrf.mxu0  ;;  %v4320_v3 = vpop.f32.mrf.mxu1 }
 0x606   :  { %v2815_v42 = vadd.f32 %v2748_v51, %v2586_v12  ;;  %v2750_v54 = vadd.f32 %v2749_v62, %v5390_v10 }
 0x607   :  { %v4622_v41 = vpop.eup %4621  ;;  %v2751_v43 = vpop.f32.mrf.mxu0 }
 0x608   :  { %v2791_v23 = vpop.f32.mrf.mxu1  ;;  %v2808_v60 = vmul.f32 %v4622_v41, %v2708_v50  ;;  %v3768_v59 = vmul.f32 -1.442695, %v2815_v42  ;;  %v2822_v26 = vadd.f32 %v2750_v54, %v2588_v49  ;;  %v6670_v54 = vld [vmem:[%s6984_s8 + $0x98] ss:$12 sps:$4 sm:$0xff]  }
 0x609   :  { %v2752_v20 = vpop.f32.mrf.mxu0  ;;  %v4624_v51 = vpop.eup %4623  ;;  %v6654_v23 = vld [vmem:[%s6984_s8 + $0x94] ss:$12 sps:$4 sm:$0xff]  }
 0x60a   :  { %v4321_v33 = vpop.f32.mrf.mxu1  ;;  %v2809_v13 = vadd.f32 %v2808_v60, %v2541_v2  ;;  %4625 = vpow2.f32 %v3768_v59  ;;  %v3769_v12 = vmul.f32 -1.442695, %v2822_v26  ;;  %v2811_v43 = vsub.f32 1.0, %v4624_v51  ;;  %v6642_v2 = vld [vmem:[%s6984_s8 + $0xa8] ss:$12 sps:$4 sm:$0xff]  }
 0x60b   :  { %v2813_v62 = vmul.f32 %v4624_v51, %v6299_v15  ;;  %v6648_v15 = vld [vmem:[%s6984_s8 + $0xb0] ss:$12 sps:$4 sm:$0xff]   ;;  %v2789_v20 = vadd.f32 %v2788_v6, %v5407_v47  ;;  %v6692_v6 = vld [vmem:[%s6984_s8 + $0x80] ss:$12 sps:$4 sm:$0xff]  }
 0x60c   :  { %4627 = vtanh.f32 %v2809_v13  ;;  %v6664_v59 = vld [vmem:[%s6984_s8 + $0x90] ss:$12 sps:$4 sm:$0xff]   ;;  %v2627_v13 = vadd.f32 %v6351_v9, %v5419_v16 }
 0x60d   :  { %4629 = vpow2.f32 %v3769_v12  ;;  %v6677_v33 = vld [vmem:[%s6984_s8 + $0x7c] ss:$12 sps:$4 sm:$0xff]   ;;  %v6686_v12 = vld [vmem:[%s6984_s8 + $0x78] ss:$12 sps:$4 sm:$0xff]  }
 0x60e   :  { %v6698_v9 = vld [vmem:[%s6984_s8 + $0x64] ss:$12 sps:$4 sm:$0xff]  }
 0x60f   :  { %7286 = vst [vmem:[#allocation10_spill] sm:$0xff] %v6698_v9 }
 0x617   :  { %v4626_v32 = vpop.eup %4625 }
 0x618   :  { %v2819_v3 = vadd.f32 1.0, %v4626_v32  ;;  %v6705_v32 = vld [vmem:[%s6984_s8 + $0x60] ss:$12 sps:$4 sm:$0xff]  }
 0x619   :  { %v4628_v50 = vpop.eup %4627  ;;  %7287 = vst [vmem:[#allocation5_spill] sm:$0xff] %v6705_v32 }
 0x61a   :  { %4631 = vrcp.f32 %v2819_v3  ;;  %v2812_v31 = vmul.f32 %v4628_v50, %v2811_v43  ;;  %v4630_v41 = vpop.eup %4629  ;;  %v6711_v3 = vld [vmem:[%s6984_s8 + $0x68] ss:$12 sps:$4 sm:$0xff]   ;;  %v6717_v43 = vld [vmem:[%s6984_s8 + $0x4c] ss:$12 sps:$4 sm:$0xff]  }
 0x61b   :  { %v2826_v60 = vadd.f32 1.0, %v4630_v41  ;;  %7288 = vst [vmem:[#allocation6_spill] sm:$0xff] %v6711_v3  ;;  %7289 = vst [vmem:[#allocation13_spill] sm:$0xff] %v6717_v43  ;;  %v6724_v50 = vld [vmem:[%s6984_s8 + $0x48] ss:$12 sps:$4 sm:$0xff]   ;;  %v6742_v41 = vpop.f32.mrf.mxu1 }
 0x61c   :  { %v6632_v42 = vadd.f32 %v2813_v62, %v2812_v31  ;;  %7290 = vst [vmem:[#allocation7_spill] sm:$0xff] %v6724_v50  ;;  %v6730_v31 = vld [vmem:[%s6984_s8 + $0x50] ss:$12 sps:$4 sm:$0xff]   ;;  %v6736_v62 = vld [vmem:[%s6984_s8 + $0x34] ss:$12 sps:$4 sm:$0xff]  }
 0x61d   :  { %4633 = vrcp.f32 %v2826_v60  ;;  %7291 = vst [vmem:[#allocation8_spill] sm:$0xff] %v6730_v31  ;;  %7292 = vst [vmem:[#allocation16_spill] sm:$0xff] %v6736_v62 }
 0x61e   :  { %v2836_v63 = vpack.c.bf16 %v6632_v42, %v6632_v42 }
 0x620   :  { %3770 = vst [vmem:[%s6989_s11 + $0x5] sm:$0x1] %v2836_v63  ;;  %3047 = vmatmul.mubr.bf16.vlgmr.msra.gmra.mxu0 %v2836_v63  ;;  %4355 = vmatmul.mubr.bf16.vlgmr.msra.gmra.mxu1 %v2836_v63  ;;  %v6740_v63 = vpop.f32.mrf.mxu0 }
 0x621   :  { %3096 = vmatpush1.bf16.msra.mxu0 %v6642_v2  ;;  %4359 = vmatpush3.bf16.msra.mxu1 %v6648_v15 }
 0x622   :  { %3097 = vmatprep.subr.bf16.mxu0 %v6654_v23  ;;  %4360 = vmatprep.subr.bf16.mxu1 %v7154_v38 }
 0x623   :  { %3127 = vmatprep.mubr.bf16.mxu0 %v7147_v21  ;;  %4374 = vmatprep.mubr.msk.bf16.mxu1 %vm4799_vm0, %v7154_v38 }
 0x625   :  { %3098 = vmatpush1.bf16.msra.mxu0 %v6664_v59  ;;  %4361 = vmatpush3.bf16.msra.mxu1 %v6670_v54 }
 0x626   :  { %3099 = vmatprep.subr.bf16.mxu0 %v6677_v33  ;;  %4362 = vmatprep.subr.bf16.mxu1 %v7154_v38 }
 0x627   :  { %v4632_v49 = vpop.eup %4631 }
 0x628   :  { %v2829_v26 = vmul.f32 %v4632_v49, %v2789_v20  ;;  %v6747_v20 = vld [vmem:[%s6984_s8 + $0x30] ss:$12 sps:$4 sm:$0xff]   ;;  %v6753_v49 = vld [vmem:[%s6984_s8 + $0x38] ss:$12 sps:$4 sm:$0xff]  }
 0x629   :  { %3100 = vmatpush1.bf16.msra.mxu0 %v6686_v12  ;;  %4363 = vmatpush3.bf16.msra.mxu1 %v6692_v6  ;;  %7293 = vst [vmem:[#allocation9_spill] sm:$0xff] %v6747_v20  ;;  %7294 = vst [vmem:[#allocation11_spill] sm:$0xff] %v6753_v49 }
 0x62a   :  { %v2830_v51 = vadd.f32 %v2829_v26, %v2627_v13  ;;  %3101 = vmatprep.subr.bf16.mxu0 %v6698_v9  ;;  %4364 = vmatprep.subr.bf16.mxu1 %v7154_v38  ;;  %v4634_v60 = vpop.eup %4633  ;;  %v6759_v13 = vld [vmem:[%s6984_s8 + $0x1c] ss:$12 sps:$4 sm:$0xff]   ;;  %v6763_v26 = vpop.f32.mrf.mxu0 }
 0x62b   :  { %7295 = vst [vmem:[#allocation19_spill] sm:$0xff] %v6759_v13 }
 0x62c   :  { %4635 = vtanh.f32 %v2830_v51  ;;  %v4328_v51 = vpop.f32.mrf.mxu1 }
 0x62d   :  { %3102 = vmatpush1.bf16.msra.mxu0 %v6705_v32  ;;  %4365 = vmatpush3.bf16.msra.mxu1 %v6711_v3  ;;  %v2834_v51 = vmul.f32 %v4634_v60, %v6347_v19 }
 0x62e   :  { %3103 = vmatprep.subr.bf16.mxu0 %v6717_v43  ;;  %4366 = vmatprep.subr.bf16.mxu1 %v7154_v38 }
 0x631   :  { %3104 = vmatpush1.bf16.msra.mxu0 %v6724_v50  ;;  %4367 = vmatpush3.bf16.msra.mxu1 %v6730_v31  ;;  %v2925_v31 = vpop.f32.mrf.mxu1 }
 0x632   :  { %3105 = vmatprep.subr.bf16.mxu0 %v6736_v62  ;;  %4368 = vmatprep.subr.bf16.mxu1 %v7154_v38  ;;  %v2885_v62 = vpop.f32.mrf.mxu0 }
 0x633   :  { %v6780_v62 = vld [vmem:[%s6984_s8 + $0x4] ss:$12 sps:$4 sm:$0xff]   ;;  %v4329_v43 = vpop.f32.mrf.mxu1 }
 0x635   :  { %3106 = vmatpush1.bf16.msra.mxu0 %v6747_v20  ;;  %4369 = vmatpush3.bf16.msra.mxu1 %v6753_v49  ;;  %v2832_v20 = vsub.f32 1.0, %v4634_v60  ;;  %v6768_v49 = vld [vmem:[%s6984_s8 + $0x18] ss:$12 sps:$4 sm:$0xff]   ;;  %v6789_v9 = vpop.f32.mrf.mxu1 }
 0x636   :  { %3107 = vmatprep.subr.bf16.mxu0 %v6759_v13  ;;  %4370 = vmatprep.subr.bf16.mxu1 %v7154_v38  ;;  %7296 = vst [vmem:[#allocation12_spill] sm:$0xff] %v6768_v49  ;;  %v6774_v13 = vld [vmem:[%s6984_s8 + $0x20] ss:$12 sps:$4 sm:$0xff]  }
 0x637   :  { %7297 = vst [vmem:[#allocation14_spill] sm:$0xff] %v6774_v13  ;;  %v4336_v60 = vpop.f32.mrf.mxu1 }
 0x638   :  { %v2884_v60 = vadd.f32 %v6763_v26, %v7186_v29 }
 0x639   :  { %v4636_v50 = vpop.eup %4635  ;;  %3108 = vmatpush1.bf16.msra.mxu0 %v6768_v49  ;;  %4371 = vmatpush3.bf16.msra.mxu1 %v6774_v13  ;;  %v2886_v49 = vpop.f32.mrf.mxu0  ;;  %v6794_v13 = vld [vmem:[%s6984_s8] ss:$12 sps:$4 sm:$0xff]  }
 0x63a   :  { %3109 = vmatprep.subr.bf16.mxu0 %v6780_v62  ;;  %4372 = vmatprep.subr.bf16.mxu1 %v7154_v38  ;;  %v2833_v31 = vmul.f32 %v4636_v50, %v2832_v20  ;;  %v6800_v50 = vld [vmem:[%s6984_s8 + $0x8] ss:$12 sps:$4 sm:$0xff]   ;;  %v3011_v49 = vpop.f32.mrf.mxu1 }
 0x63b   :  { %v6787_v32 = vpop.f32.mrf.mxu0 }
 0x63c   :  { %v6785_v3 = vadd.f32 %v2834_v51, %v2833_v31  ;;  %v4337_v51 = vpop.f32.mrf.mxu1 }
 0x63d   :  { %3110 = vmatpush1.bf16.msra.mxu0 %v6794_v13  ;;  %4373 = vmatpush3.bf16.msra.mxu1 %v6800_v50  ;;  %v6805_v43 = vpop.f32.mrf.mxu0 }
 0x63e   :  { %v2839_v19 = vpack.c.bf16 %v6785_v3, %v6785_v3  ;;  %3241 = vmatprep.subr.bf16.mxu0 %v6362_v48  ;;  %4378 = vmatprep.subr.bf16.mxu1 %v7154_v38  ;;  %v3784_v48 = vld [vmem:[%s6980_s0 + $0x7] sm:$0x1] }
 0x63f   :  { %v2971_v20 = vpop.f32.mrf.mxu0 }
 0x640   :  { %3771 = vst [vmem:[%s6990_s12 + $0x2] sm:$0x1] %v2839_v19  ;;  %3128 = vmatmul.mubr.bf16.vlgmr.msra.gmra.mxu0 %v2839_v19  ;;  %4375 = vmatmul.mubr.bf16.vlgmr.msra.gmra.mxu1 %v2839_v19 }
 0x641   :  { %3242 = vmatpush1.bf16.msra.mxu0 %v6372_v4  ;;  %4379 = vmatpush3.bf16.msra.mxu1 %v6378_v22  ;;  %v2972_v31 = vpop.f32.mrf.mxu0  ;;  %v3310_v4 = vld [vmem:[%s6982_s1] sm:$0x1]  ;;  %v7298_v22 = vld [vmem:[#allocation23_spill] sm:$0xff] }
 0x642   :  { %3243 = vmatprep.subr.bf16.mxu0 %v6384_v25  ;;  %3261 = vmatprep.mubr.bf16.mxu0 %v7147_v21  ;;  %v7299_v25 = vld [vmem:[#allocation29_spill] sm:$0xff] }
 0x643   :  { %4380 = vmatprep.subr.bf16.mxu1 %v7154_v38  ;;  %4382 = vmatprep.mubr.msk.bf16.mxu1 %vm4799_vm0, %v7154_v38 }
 0x645   :  { %3244 = vmatpush1.bf16.msra.mxu0 %v6394_v8  ;;  %4381 = vmatpush3.bf16.msra.mxu1 %v6400_v5  ;;  %v7300_v8 = vld [vmem:[#allocation24_spill] sm:$0xff]  ;;  %v7301_v5 = vld [vmem:[#allocation26_spill] sm:$0xff] }
 0x646   :  { %3326 = vmatprep.subr.bf16.mxu0 %v6406_v36  ;;  %4386 = vmatprep.subr.bf16.mxu1 %v7154_v38  ;;  %v7302_v36 = vld [vmem:[#allocation30_spill] sm:$0xff] }
 0x648   :  { %3785 = vmatmul.mubr.msk.bf16.vlgmr.msra.gmra.mxu0 %vm262_vm1, %v3784_v48  ;;  %4383 = vmatmul.mubr.msk.bf16.vlgmr.msra.gmra.mxu1 %vm262_vm1, %v3784_v48 }
 0x649   :  { %3327 = vmatpush1.bf16.msra.mxu0 %v6418_v35  ;;  %4387 = vmatpush3.bf16.msra.mxu1 %v6424_v39  ;;  %v7303_v35 = vld [vmem:[#allocation27_spill] sm:$0xff]  ;;  %v7304_v39 = vld [vmem:[#allocation32_spill] sm:$0xff] }
 0x64a   :  { %3328 = vmatprep.subr.bf16.mxu0 %v6430_v0  ;;  %3346 = vmatprep.mubr.bf16.mxu0 %v7147_v21  ;;  %v7305_v0 = vld [vmem:[#allocation35_spill] sm:$0xff] }
 0x64b   :  { %4388 = vmatprep.subr.bf16.mxu1 %v7154_v38  ;;  %4390 = vmatprep.mubr.msk.bf16.mxu1 %vm4799_vm0, %v7154_v38 }
 0x64d   :  { %3329 = vmatpush1.bf16.msra.mxu0 %v6440_v57  ;;  %4389 = vmatpush3.bf16.msra.mxu1 %v6446_v53  ;;  %v7306_v57 = vld [vmem:[#allocation37_spill] sm:$0xff]  ;;  %v7307_v53 = vld [vmem:[#allocation3_spill] sm:$0xff] }
 0x64e   :  { %3395 = vmatprep.subr.bf16.mxu0 %v6452_v56  ;;  %4394 = vmatprep.subr.bf16.mxu1 %v7154_v38  ;;  %v7308_v56 = vld [vmem:[#allocation4_spill] sm:$0xff] }
 0x650   :  { %3787 = vmatmul.mubr.msk.bf16.vlgmr.msra.gmra.mxu0 %vm262_vm1, %v3310_v4  ;;  %4391 = vmatmul.mubr.msk.bf16.vlgmr.msra.gmra.mxu1 %vm262_vm1, %v3310_v4 }
 0x651   :  { %3396 = vmatpush1.bf16.msra.mxu0 %v6464_v30  ;;  %4395 = vmatpush3.bf16.msra.mxu1 %v6470_v34 }
 0x652   :  { %3397 = vmatprep.subr.bf16.mxu0 %v6476_v18  ;;  %4396 = vmatprep.subr.bf16.mxu1 %v7154_v38  ;;  %v7309_v18 = vld [vmem:[#allocation31_spill] sm:$0xff] }
 0x653   :  { %3427 = vmatprep.mubr.bf16.mxu0 %v7147_v21  ;;  %4410 = vmatprep.mubr.msk.bf16.mxu1 %vm4799_vm0, %v7154_v38 }
 0x655   :  { %3398 = vmatpush1.bf16.msra.mxu0 %v6486_v52  ;;  %4397 = vmatpush3.bf16.msra.mxu1 %v6492_v28  ;;  %v2882_v52 = vadd.f32 %v6740_v63, %v7309_v18 }
 0x656   :  { %3399 = vmatprep.subr.bf16.mxu0 %v6498_v11  ;;  %4398 = vmatprep.subr.bf16.mxu1 %v7154_v38 }
 0x659   :  { %3400 = vmatpush1.bf16.msra.mxu0 %v6505_v7  ;;  %4399 = vmatpush3.bf16.msra.mxu1 %v6511_v45 }
 0x65a   :  { %3401 = vmatprep.subr.bf16.mxu0 %v6517_v58  ;;  %4400 = vmatprep.subr.bf16.mxu1 %v7154_v38 }
 0x65d   :  { %3402 = vmatpush1.bf16.msra.mxu0 %v6524_v37  ;;  %4401 = vmatpush3.bf16.msra.mxu1 %v6530_v46 }
 0x65e   :  { %3403 = vmatprep.subr.bf16.mxu0 %v6536_v61  ;;  %4402 = vmatprep.subr.bf16.mxu1 %v7154_v38 }
 0x661   :  { %3404 = vmatpush1.bf16.msra.mxu0 %v6543_v55  ;;  %4403 = vmatpush3.bf16.msra.mxu1 %v7298_v22  ;;  %v2968_v22 = vadd.f32 %v6787_v32, %v5382_v27 }
 0x662   :  { %3405 = vmatprep.subr.bf16.mxu0 %v7299_v25  ;;  %4404 = vmatprep.subr.bf16.mxu1 %v7154_v38 }
 0x665   :  { %3406 = vmatpush1.bf16.msra.mxu0 %v7300_v8  ;;  %4405 = vmatpush3.bf16.msra.mxu1 %v7301_v5 }
 0x666   :  { %3407 = vmatprep.subr.bf16.mxu0 %v7302_v36  ;;  %4406 = vmatprep.subr.bf16.mxu1 %v7154_v38 }
 0x669   :  { %3408 = vmatpush1.bf16.msra.mxu0 %v7303_v35  ;;  %4407 = vmatpush3.bf16.msra.mxu1 %v7304_v39 }
 0x66a   :  { %3409 = vmatprep.subr.bf16.mxu0 %v7305_v0  ;;  %4408 = vmatprep.subr.bf16.mxu1 %v7154_v38  ;;  %v2923_v0 = vadd.f32 %v6742_v41, %v5388_v24 }
 0x66d   :  { %3410 = vmatpush1.bf16.msra.mxu0 %v7306_v57  ;;  %4409 = vmatpush3.bf16.msra.mxu1 %v7307_v53 }
 0x66e   :  { %3476 = vmatprep.subr.bf16.mxu0 %v7308_v56  ;;  %4414 = vmatprep.subr.bf16.mxu1 %v7154_v38 }
 0x6e0   :  { %v3048_v30 = vpop.f32.mrf.mxu0  ;;  %v3089_v34 = vpop.f32.mrf.mxu1 }
 0x6e1   :  { %v3049_v28 = vadd.f32 %v3048_v30, %v7184_v17  ;;  %v3090_v26 = vadd.f32 %v3089_v34, %v7188_v44 }
 0x6e2   :  { %v3050_v11 = vpop.f32.mrf.mxu0  ;;  %v4356_v7 = vpop.f32.mrf.mxu1 }
 0x6e3   :  { %v3176_v45 = vadd.f32 %v3049_v28, %v2882_v52  ;;  %v3051_v61 = vadd.f32 %v3050_v11, %v7185_v1  ;;  %v2970_v11 = vadd.f32 %v6805_v43, %v5395_v40 }
 0x6e4   :  { %v3052_v58 = vpop.f32.mrf.mxu0  ;;  %v3092_v37 = vpop.f32.mrf.mxu1 }
 0x6e5   :  { %v3778_v46 = vmul.f32 -1.442695, %v3176_v45  ;;  %v3183_v20 = vadd.f32 %v3051_v61, %v2884_v60 }
 0x6e6   :  { %v3053_v55 = vpop.f32.mrf.mxu0  ;;  %v4357_v19 = vpop.f32.mrf.mxu1 }
 0x6e7   :  { %4637 = vpow2.f32 %v3778_v46  ;;  %v3779_v49 = vmul.f32 -1.442695, %v3183_v20 }
 0x6e9   :  { %4639 = vpow2.f32 %v3779_v49 }
 0x6f4   :  { %v4638_v63 = vpop.eup %4637 }
 0x6f5   :  { %v3180_v31 = vadd.f32 1.0, %v4638_v63  ;;  %v7313_v63 = vld [vmem:[#allocation13_spill] sm:$0xff] }
 0x6f6   :  { %v4640_v51 = vpop.eup %4639 }
 0x6f7   :  { %4641 = vrcp.f32 %v3180_v31  ;;  %v3187_v25 = vadd.f32 1.0, %v4640_v51  ;;  %v7315_v31 = vld [vmem:[#allocation8_spill] sm:$0xff] }
 0x6f9   :  { %4643 = vrcp.f32 %v3187_v25  ;;  %v7319_v25 = vld [vmem:[#allocation19_spill] sm:$0xff] }
 0x700   :  { %v3129_v48 = vpop.f32.mrf.mxu0  ;;  %v3170_v4 = vpop.f32.mrf.mxu1 }
 0x701   :  { %v3130_v8 = vadd.f32 %v3129_v48, %v7187_v14  ;;  %v3171_v49 = vadd.f32 %v3170_v4, %v5407_v47  ;;  %v7317_v4 = vld [vmem:[#allocation9_spill] sm:$0xff] }
 0x702   :  { %v3131_v5 = vpop.f32.mrf.mxu0  ;;  %v4376_v36 = vpop.f32.mrf.mxu1 }
 0x703   :  { %v3197_v35 = vadd.f32 %v3130_v8, %v2968_v22  ;;  %v3132_v52 = vadd.f32 %v3131_v5, %v5390_v10  ;;  %v7318_v22 = vld [vmem:[#allocation11_spill] sm:$0xff] }
 0x704   :  { %v4642_v39 = vpop.eup %4641  ;;  %v3133_v57 = vpop.f32.mrf.mxu0 }
 0x705   :  { %v3173_v53 = vpop.f32.mrf.mxu1  ;;  %v3190_v56 = vmul.f32 %v4642_v39, %v3090_v26  ;;  %v3780_v30 = vmul.f32 -1.442695, %v3197_v35  ;;  %v3204_v34 = vadd.f32 %v3132_v52, %v2970_v11  ;;  %v7321_v57 = vld [vmem:[#allocation14_spill] sm:$0xff] }
 0x706   :  { %v3134_v32 = vpop.f32.mrf.mxu0  ;;  %v4644_v58 = vpop.eup %4643 }
 0x707   :  { %v4377_v28 = vpop.f32.mrf.mxu1  ;;  %v3191_v7 = vadd.f32 %v3190_v56, %v2923_v0  ;;  %4645 = vpow2.f32 %v3780_v30  ;;  %v3781_v45 = vmul.f32 -1.442695, %v3204_v34  ;;  %v3193_v46 = vsub.f32 1.0, %v4644_v58  ;;  %v7320_v0 = vld [vmem:[#allocation12_spill] sm:$0xff] }
 0x708   :  { %v3195_v19 = vmul.f32 %v4644_v58, %v6632_v42 }
 0x709   :  { %4647 = vtanh.f32 %v3191_v7  ;;  %v6928_v51 = vpop.f32.mrf.mxu1 }
 0x70a   :  { %4649 = vpow2.f32 %v3781_v45 }
 0x70b   :  { %v4384_v5 = vpop.f32.mrf.mxu1 }
 0x70d   :  { %v3307_v35 = vpop.f32.mrf.mxu1 }
 0x70f   :  { %v4385_v52 = vpop.f32.mrf.mxu1 }
 0x711   :  { %v6941_v11 = vpop.f32.mrf.mxu1 }
 0x713   :  { %v4392_v34 = vpop.f32.mrf.mxu1 }
 0x714   :  { %v4646_v41 = vpop.eup %4645 }
 0x715   :  { %v3201_v37 = vadd.f32 1.0, %v4646_v41 }
 0x716   :  { %v4648_v61 = vpop.eup %4647 }
 0x717   :  { %4651 = vrcp.f32 %v3201_v37  ;;  %v3194_v55 = vmul.f32 %v4648_v61, %v3193_v46  ;;  %v4650_v20 = vpop.eup %4649 }
 0x718   :  { %v3208_v42 = vadd.f32 1.0, %v4650_v20 }
 0x719   :  { %v6895_v60 = vadd.f32 %v3195_v19, %v3194_v55 }
 0x71a   :  { %4653 = vrcp.f32 %v3208_v42 }
 0x71b   :  { %v3218_v43 = vpack.c.bf16 %v6895_v60, %v6895_v60 }
 0x71d   :  { %3782 = vst [vmem:[%s6989_s11 + $0x6] sm:$0x1] %v3218_v43  ;;  %3428 = vmatmul.mubr.bf16.vlgmr.msra.gmra.mxu0 %v3218_v43  ;;  %4411 = vmatmul.mubr.bf16.vlgmr.msra.gmra.mxu1 %v3218_v43 }
 0x71e   :  { %3477 = vmatpush1.bf16.msra.mxu0 %v6642_v2  ;;  %4415 = vmatpush3.bf16.msra.mxu1 %v6648_v15  ;;  %v3009_v15 = vadd.f32 %v6789_v9, %v5419_v16  ;;  %v7314_v9 = vld [vmem:[#allocation7_spill] sm:$0xff] }
 0x71f   :  { %3478 = vmatprep.subr.bf16.mxu0 %v6654_v23  ;;  %4416 = vmatprep.subr.bf16.mxu1 %v7154_v38 }
 0x720   :  { %3508 = vmatprep.mubr.bf16.mxu0 %v7147_v21  ;;  %4430 = vmatprep.mubr.msk.bf16.mxu1 %vm4799_vm0, %v7154_v38 }
 0x722   :  { %3479 = vmatpush1.bf16.msra.mxu0 %v6664_v59  ;;  %4417 = vmatpush3.bf16.msra.mxu1 %v6670_v54  ;;  %v7310_v59 = vld [vmem:[#allocation10_spill] sm:$0xff]  ;;  %v7311_v54 = vld [vmem:[#allocation5_spill] sm:$0xff] }
 0x723   :  { %3480 = vmatprep.subr.bf16.mxu0 %v6677_v33  ;;  %4418 = vmatprep.subr.bf16.mxu1 %v7154_v38  ;;  %v7312_v33 = vld [vmem:[#allocation6_spill] sm:$0xff] }
 0x724   :  { %v4652_v2 = vpop.eup %4651 }
 0x725   :  { %v3211_v23 = vmul.f32 %v4652_v2, %v3171_v49 }
 0x726   :  { %3481 = vmatpush1.bf16.msra.mxu0 %v6686_v12  ;;  %4419 = vmatpush3.bf16.msra.mxu1 %v6692_v6  ;;  %v7316_v12 = vld [vmem:[#allocation16_spill] sm:$0xff]  ;;  %v3263_v6 = vpop.f32.mrf.mxu0 }
 0x727   :  { %v3212_v21 = vadd.f32 %v3211_v23, %v3009_v15  ;;  %3482 = vmatprep.subr.bf16.mxu0 %v7310_v59  ;;  %4420 = vmatprep.subr.bf16.mxu1 %v7154_v38  ;;  %v4654_v48 = vpop.eup %4653 }
 0x728   :  { %v3265_v8 = vpop.f32.mrf.mxu0  ;;  %v3214_v36 = vsub.f32 1.0, %v4654_v48  ;;  %v3216_v56 = vmul.f32 %v4654_v48, %v6785_v3  ;;  %v3392_v3 = vpop.f32.mrf.mxu1 }
 0x729   :  { %4655 = vtanh.f32 %v3212_v21  ;;  %v3266_v15 = vadd.f32 %v3265_v8, %v7186_v29 }
 0x72a   :  { %3483 = vmatpush1.bf16.msra.mxu0 %v7311_v54  ;;  %4421 = vmatpush3.bf16.msra.mxu1 %v7312_v33  ;;  %v3267_v26 = vpop.f32.mrf.mxu0  ;;  %v4393_v58 = vpop.f32.mrf.mxu1 }
 0x72b   :  { %3484 = vmatprep.subr.bf16.mxu0 %v7313_v63  ;;  %4422 = vmatprep.subr.bf16.mxu1 %v7154_v38 }
 0x72c   :  { %v3268_v30 = vpop.f32.mrf.mxu0 }
 0x72e   :  { %3485 = vmatpush1.bf16.msra.mxu0 %v7314_v9  ;;  %4423 = vmatpush3.bf16.msra.mxu1 %v7315_v31  ;;  %v3348_v28 = vpop.f32.mrf.mxu0 }
 0x72f   :  { %3486 = vmatprep.subr.bf16.mxu0 %v7316_v12  ;;  %4424 = vmatprep.subr.bf16.mxu1 %v7154_v38  ;;  %v3349_v63 = vadd.f32 %v3348_v28, %v5382_v27 }
 0x732   :  { %3487 = vmatpush1.bf16.msra.mxu0 %v7317_v4  ;;  %4425 = vmatpush3.bf16.msra.mxu1 %v7318_v22  ;;  %v3305_v4 = vadd.f32 %v6928_v51, %v5388_v24 }
 0x733   :  { %3488 = vmatprep.subr.bf16.mxu0 %v7319_v25  ;;  %4426 = vmatprep.subr.bf16.mxu1 %v7154_v38 }
 0x736   :  { %v4656_v39 = vpop.eup %4655  ;;  %3489 = vmatpush1.bf16.msra.mxu0 %v7320_v0  ;;  %4427 = vmatpush3.bf16.msra.mxu1 %v7321_v57 }
 0x737   :  { %3490 = vmatprep.subr.bf16.mxu0 %v6780_v62  ;;  %4428 = vmatprep.subr.bf16.mxu1 %v7154_v38  ;;  %v3215_v53 = vmul.f32 %v4656_v39, %v3214_v36  ;;  %v3350_v62 = vpop.f32.mrf.mxu0 }
 0x739   :  { %v6939_v32 = vadd.f32 %v3216_v56, %v3215_v53  ;;  %v3352_v38 = vpop.f32.mrf.mxu0 }
 0x73a   :  { %3491 = vmatpush1.bf16.msra.mxu0 %v6794_v13  ;;  %4429 = vmatpush3.bf16.msra.mxu1 %v6800_v50  ;;  %v3264_v13 = vadd.f32 %v3263_v6, %v7309_v18 }
 0x73b   :  { %v3221_v7 = vpack.c.bf16 %v6939_v32, %v6939_v32  ;;  %v3353_v45 = vpop.f32.mrf.mxu0 }
 0x73d   :  { %3783 = vst [vmem:[%s6990_s12 + $0x1] sm:$0x1] %v3221_v7  ;;  %3509 = vmatmul.mubr.bf16.vlgmr.msra.gmra.mxu0 %v3221_v7  ;;  %4431 = vmatmul.mubr.bf16.vlgmr.msra.gmra.mxu1 %v3221_v7 }
 0x7dd   :  { %v3429_v41 = vpop.f32.mrf.mxu0  ;;  %v3470_v37 = vpop.f32.mrf.mxu1 }
 0x7de   :  { %v3430_v50 = vadd.f32 %v3429_v41, %v7184_v17  ;;  %v3471_v6 = vadd.f32 %v3470_v37, %v7188_v44 }
 0x7df   :  { %v3431_v46 = vpop.f32.mrf.mxu0  ;;  %v4412_v61 = vpop.f32.mrf.mxu1 }
 0x7e0   :  { %v3557_v55 = vadd.f32 %v3430_v50, %v3264_v13  ;;  %v3432_v42 = vadd.f32 %v3431_v46, %v7185_v1 }
 0x7e1   :  { %v3433_v19 = vpop.f32.mrf.mxu0  ;;  %v3473_v43 = vpop.f32.mrf.mxu1 }
 0x7e2   :  { %v3789_v20 = vmul.f32 -1.442695, %v3557_v55  ;;  %v3564_v23 = vadd.f32 %v3432_v42, %v3266_v15 }
 0x7e3   :  { %v3434_v49 = vpop.f32.mrf.mxu0  ;;  %v4413_v2 = vpop.f32.mrf.mxu1 }
 0x7e4   :  { %4657 = vpow2.f32 %v3789_v20  ;;  %v3790_v21 = vmul.f32 -1.442695, %v3564_v23 }
 0x7e6   :  { %4659 = vpow2.f32 %v3790_v21 }
 0x7f1   :  { %v4658_v59 = vpop.eup %4657 }
 0x7f2   :  { %v3561_v18 = vadd.f32 1.0, %v4658_v59 }
 0x7f3   :  { %v4660_v17 = vpop.eup %4659 }
 0x7f4   :  { %4661 = vrcp.f32 %v3561_v18  ;;  %v3568_v9 = vadd.f32 1.0, %v4660_v17 }
 0x7f6   :  { %4663 = vrcp.f32 %v3568_v9 }
 0x7fd   :  { %v3510_v54 = vpop.f32.mrf.mxu0  ;;  %v3551_v33 = vpop.f32.mrf.mxu1 }
 0x7fe   :  { %v3511_v31 = vadd.f32 %v3510_v54, %v7187_v14  ;;  %v3351_v14 = vadd.f32 %v3350_v62, %v5395_v40  ;;  %v3552_v7 = vadd.f32 %v3551_v33, %v5407_v47 }
 0x7ff   :  { %v3512_v1 = vpop.f32.mrf.mxu0  ;;  %v4432_v12 = vpop.f32.mrf.mxu1 }
 0x800   :  { %v3578_v29 = vadd.f32 %v3511_v31, %v3349_v63  ;;  %v3513_v36 = vadd.f32 %v3512_v1, %v5390_v10 }
 0x801   :  { %v4662_v48 = vpop.eup %4661  ;;  %v3514_v22 = vpop.f32.mrf.mxu0 }
 0x802   :  { %v3554_v25 = vpop.f32.mrf.mxu1  ;;  %v3571_v8 = vmul.f32 %v4662_v48, %v3471_v6  ;;  %v3791_v5 = vmul.f32 -1.442695, %v3578_v29  ;;  %v3585_v44 = vadd.f32 %v3513_v36, %v3351_v14 }
 0x803   :  { %v3515_v27 = vpop.f32.mrf.mxu0  ;;  %v4664_v0 = vpop.eup %4663 }
 0x804   :  { %v4433_v26 = vpop.f32.mrf.mxu1  ;;  %v3572_v35 = vadd.f32 %v3571_v8, %v3305_v4  ;;  %4665 = vpow2.f32 %v3791_v5  ;;  %v3792_v39 = vmul.f32 -1.442695, %v3585_v44  ;;  %v3574_v24 = vsub.f32 1.0, %v4664_v0 }
 0x805   :  { %v3576_v30 = vmul.f32 %v4664_v0, %v6895_v60  ;;  %v3390_v60 = vadd.f32 %v6941_v11, %v5419_v16 }
 0x806   :  { %4667 = vtanh.f32 %v3572_v35 }
 0x807   :  { %4669 = vpow2.f32 %v3792_v39 }
 0x811   :  { %v4666_v57 = vpop.eup %4665 }
 0x812   :  { %v3582_v51 = vadd.f32 1.0, %v4666_v57 }
 0x813   :  { %v4668_v53 = vpop.eup %4667 }
 0x814   :  { %v3575_v56 = vmul.f32 %v4668_v53, %v3574_v24  ;;  %4671 = vrcp.f32 %v3582_v51  ;;  %v4670_v40 = vpop.eup %4669 }
 0x815   :  { %v3589_v28 = vadd.f32 1.0, %v4670_v40 }
 0x816   :  { %v3577_v10 = vadd.f32 %v3576_v30, %v3575_v56 }
 0x817   :  { %4673 = vrcp.f32 %v3589_v28 }
 0x818   :  { %v3599_v52 = vpack.c.bf16 %v3577_v10, %v3577_v10  ;;  %3604 = vst [vmem:[#allocation2] sm:$0x3] %v3577_v10  ;;  %3609 = vst [vmem:[%s6991_s13] sm:$0x3] %v3577_v10 }
 0x81a   :  { %3793 = vst [vmem:[%s6989_s11 + $0x7] sm:$0x1] %v3599_v52 }
 0x821   :  { %v4672_v62 = vpop.eup %4671 }
 0x822   :  { %v3592_v34 = vmul.f32 %v4672_v62, %v3552_v7 }
 0x824   :  { %v3593_v38 = vadd.f32 %v3592_v34, %v3390_v60  ;;  %v4674_v3 = vpop.eup %4673 }
 0x825   :  { %v3595_v45 = vsub.f32 1.0, %v4674_v3  ;;  %v3597_v37 = vmul.f32 %v4674_v3, %v6939_v32 }
 0x826   :  { %4675 = vtanh.f32 %v3593_v38 }
 0x833   :  { %v4676_v58 = vpop.eup %4675 }
 0x834   :  { %v3596_v41 = vmul.f32 %v4676_v58, %v3595_v45 }
 0x836   :  { %v3598_v13 = vadd.f32 %v3597_v37, %v3596_v41 }
 0x838   :  { %v3602_v50 = vpack.c.bf16 %v3598_v13, %v3598_v13  ;;  %3605 = vst [vmem:[#allocation2 + $0x2] sm:$0x3] %v3598_v13  ;;  %3610 = vst [vmem:[%s6991_s13 + $0x2] sm:$0x3] %v3598_v13 }
 0x83a   :  { %3603 = vst [vmem:[%s6990_s12] sm:$0x1] %v3602_v50 }

// kernel: _lambda_.3
= control target key start
LH: loop header
LB: loop body
LE: loop exit
PB: predicated region body
PF: predicated region fallthrough
CT: control target
= control target key end

     0   :  { %19 = vsyncpa [#allocation4], 0  ;;  %s6639_s0 = inlined_call_operand.vmem [shape: bf16[8,2,32], index: 0, kind: input, shape index: {}, may-alias: {0,1}]   ;;  %s6640_s1 = inlined_call_operand.vmem [shape: bf16[8,2,32], index: 1, kind: input, shape index: {}, may-alias: {0,1}]   ;;  %s6641_s2 = inlined_call_operand.vmem [shape: f32[2,256], index: 2, kind: input, shape index: {}]   ;;  %s6642_s3 = inlined_call_operand.vmem [shape: bf16[32,384], index: 3, kind: input, shape index: {}]   ;;  %s6643_s4 = inlined_call_operand.vmem [shape: bf16[32,384], index: 4, kind: input, shape index: {}]   ;;  %s6644_s5 = inlined_call_operand.vmem [shape: f32[1,384], index: 5, kind: input, shape index: {}]   ;;  %s6645_s6 = inlined_call_operand.vmem [shape: f32[1,384], index: 6, kind: input, shape index: {}]   ;;  %s6646_s7 = inlined_call_operand.hbm [shape: bf16[128,384], index: 7, kind: input, shape index: {}]   ;;  %s6647_s8 = inlined_call_operand.hbm [shape: bf16[128,384], index: 8, kind: input, shape index: {}]   ;;  %s6648_s9 = inlined_call_operand.vmem [shape: f32[1,384], index: 9, kind: input, shape index: {}]   ;;  %s6649_s10 = inlined_call_operand.vmem [shape: f32[1,384], index: 10, kind: input, shape index: {}]   ;;  %s6650_s11 = inlined_call_operand.hbm [shape: bf16[8,2,128], index: 11, kind: output, shape index: {0}]   ;;  %s6651_s12 = inlined_call_operand.hbm [shape: bf16[8,2,128], index: 12, kind: output, shape index: {1}]   ;;  %s6652_s13 = inlined_call_operand.vmem [shape: f32[2,256], index: 13, kind: output, shape index: {2}]  }
   0x1   :  { %20 = vsyncpa [#allocation7], 0 }
   0x2   :  { %21 = vsyncpa [#allocation5], 0 }
   0x3   :  { %22 = vsyncpa [#allocation10], 0  ;;  %s4915_s25 = smov [#allocation3]  }
   0x4   :  { %s49_s26 = sshll.u32 %s4915_s25, 4  ;;  %s50_s26 = int_to_ptr.vmem [resolvable:$true] %s49_s26 }
   0x5   :  { %s4835_s27 = scalar_lea.vmem %s50_s26, 3072  ;;  %p4840_p1 = scmp.lt.s32.totalorder %s50_s26, %s50_s26 }
   0x6   :  { %p4836_p0 = scmp.ne.s32.totalorder %s50_s26, %s4835_s27  ;;  %p4841_p2 = scmp.lt.s32.totalorder %s4835_s27, %s4835_s27 }
   0x8   :  { %p4842_p3 = por %p4841_p2, %p4840_p1 }
   0xa   :  { %p4843_p4 = pnand %p4842_p3, %p4836_p0 }
   0xc   :  { %4846 = shalt.err (!%p4843_p4)
}
   0xd   :  { %s4916_s28 = smov 192   ;;  %s4917_s29 = smov 12  }
   0xe   :  { %55 = dma.hbm_to_vmem [thread:$0]  %s6646_s7, 3072, %s50_s26, [#allocation4], %s4916_s28, %s4916_s28, %s4917_s29  }
   0xf   :  { %s4918_s15 = smov [#allocation6]  }
  0x10   :  { %s61_s16 = sshll.u32 %s4918_s15, 4  ;;  %s62_s16 = int_to_ptr.vmem [resolvable:$true] %s61_s16 }
  0x11   :  { %s4855_s17 = scalar_lea.vmem %s62_s16, 3072  ;;  %p4860_p6 = scmp.lt.s32.totalorder %s62_s16, %s62_s16 }
  0x12   :  { %p4856_p5 = scmp.ne.s32.totalorder %s62_s16, %s4855_s17  ;;  %p4861_p7 = scmp.lt.s32.totalorder %s4855_s17, %s4855_s17 }
  0x14   :  { %p4862_p8 = por %p4861_p7, %p4860_p6 }
  0x16   :  { %p4863_p9 = pnand %p4862_p8, %p4856_p5 }
  0x18   :  { %4866 = shalt.err (!%p4863_p9)
}
  0x19   :  { %67 = dma.hbm_to_vmem [thread:$0]  %s6647_s8, 3072, %s62_s16, [#allocation7], %s4916_s28, %s4916_s28, %s4917_s29  }
  0x1a   :  { %4907 = dma.done.wait [#allocation4], 3072  }
  0x1b   :  { %4908 = vsyncadd [#allocation4], 4294964224 }
  0x1c   :  { %4909 = dma.done.wait [#allocation7], 3072  }
  0x1d   :  { %4910 = vsyncadd [#allocation7], 4294964224  ;;  %v6654_v0 = vmov 0   ;;  %v6672_v1 = vmov 0.0   ;;  %vm4921_vm0 = vmmov 0   ;;  %vm282_vm1 = vcmask 261120  }
  0x1e   :  { %318 = vmatprep.mubr.bf16.mxu0 %v6654_v0  ;;  %4008 = vmatprep.subr.bf16.mxu1 %v6672_v1  ;;  %v5009_v2 = vld [vmem:[%s6642_s3 + $0x1c] ss:$12 sps:$4 sm:$0xff]   ;;  %v5014_v3 = vld [vmem:[%s6642_s3 + $0x18] ss:$12 sps:$4 sm:$0xff]   ;;  %v5026_v5 = vld [vmem:[%s6642_s3] ss:$12 sps:$4 sm:$0xff]  }
  0x1f   :  { %4012 = vmatprep.mubr.msk.bf16.mxu1 %vm4921_vm0, %v6672_v1  ;;  %298 = vmatprep.subr.bf16.mxu0 %v5009_v2  ;;  %v5020_v4 = vld [vmem:[%s6642_s3 + $0x4] ss:$12 sps:$4 sm:$0xff]   ;;  %v5032_v6 = vld [vmem:[%s6643_s4 + $0x1c] ss:$12 sps:$4 sm:$0xff]   ;;  %v249_v7 = vld [vmem:[%s6639_s0] sm:$0x1] }
  0x20   :  { %299 = vmatpush1.bf16.msra.mxu0 %v5014_v3  ;;  %v5041_v8 = vld [vmem:[%s6643_s4 + $0x18] ss:$12 sps:$4 sm:$0xff]   ;;  %v5053_v10 = vld [vmem:[%s6643_s4] ss:$12 sps:$4 sm:$0xff]   ;;  %v5063_v12 = vld [vmem:[#allocation3 + $0xac] ss:$12 sps:$4 sm:$0xff]  }
  0x21   :  { %300 = vmatprep.subr.bf16.mxu0 %v5020_v4  ;;  %v5047_v9 = vld [vmem:[%s6643_s4 + $0x4] ss:$12 sps:$4 sm:$0xff]   ;;  %6782 = vst [vmem:[#allocation16_spill] sm:$0xff] %v5053_v10  ;;  %v5060_v11 = vld [vmem:[%s6642_s3 + $0x20] ss:$12 sps:$4 sm:$0xff]   ;;  %6783 = vst [vmem:[#allocation17_spill] sm:$0xff] %v5063_v12 }
  0x22   :  { %6781 = vst [vmem:[#allocation15_spill] sm:$0xff] %v5047_v9  ;;  %4009 = vmatpush3.bf16.msra.mxu1 %v5060_v11  ;;  %v3686_v13 = vld [vmem:[%s6640_s1 + $0x7] sm:$0x1]  ;;  %v5073_v14 = vld [vmem:[%s6642_s3 + $0x8] ss:$12 sps:$4 sm:$0xff]  }
  0x23   :  { %4010 = vmatprep.subr.bf16.mxu1 %v6672_v1  ;;  %v5076_v15 = vld [vmem:[#allocation3 + $0xa8] ss:$12 sps:$4 sm:$0xff]   ;;  %v5090_v18 = vld [vmem:[#allocation3 + $0x90] ss:$12 sps:$4 sm:$0xff]   ;;  %v5110_v22 = vld [vmem:[#allocation3 + $0x78] ss:$12 sps:$4 sm:$0xff]  }
  0x24   :  { %301 = vmatpush1.bf16.msra.mxu0 %v5026_v5  ;;  %6784 = vst [vmem:[#allocation18_spill] sm:$0xff] %v5076_v15  ;;  %v5079_v16 = vld [vmem:[#allocation3 + $0x94] ss:$12 sps:$4 sm:$0xff]   ;;  %v5085_v17 = vld [vmem:[%s6643_s4 + $0x20] ss:$12 sps:$4 sm:$0xff]   ;;  %6786 = vst [vmem:[#allocation20_spill] sm:$0xff] %v5090_v18 }
  0x25   :  { %416 = vmatprep.subr.bf16.mxu0 %v5032_v6  ;;  %6785 = vst [vmem:[#allocation19_spill] sm:$0xff] %v5079_v16  ;;  %v5094_v19 = vld [vmem:[#allocation3 + $0x7c] ss:$12 sps:$4 sm:$0xff]   ;;  %v5101_v20 = vld [vmem:[%s6643_s4 + $0x8] ss:$12 sps:$4 sm:$0xff]   ;;  %6789 = vst [vmem:[#allocation23_spill] sm:$0xff] %v5110_v22 }
  0x26   :  { %4011 = vmatpush3.bf16.msra.mxu1 %v5073_v14  ;;  %6787 = vst [vmem:[#allocation21_spill] sm:$0xff] %v5094_v19  ;;  %6788 = vst [vmem:[#allocation22_spill] sm:$0xff] %v5101_v20  ;;  %v97_v21 = vld [vmem:[%s6641_s2] sm:$0xf]  ;;  %v5113_v23 = vld [vmem:[#allocation3 + $0x64] ss:$12 sps:$4 sm:$0xff]  }
  0x27   :  { %3684 = vmatmul.mubr.msk.bf16.vlgmr.msra.gmra.mxu0 %vm282_vm1, %v249_v7  ;;  %4016 = vmatprep.subr.bf16.mxu1 %v6672_v1  ;;  %98 = vst [vmem:[#allocation2] sm:$0xf] %v97_v21  ;;  %6790 = vst [vmem:[#allocation24_spill] sm:$0xff] %v5113_v23  ;;  %v5116_v24 = vld [vmem:[#allocation3 + $0xb0] ss:$12 sps:$4 sm:$0xff]  }
  0x28   :  { %417 = vmatpush1.bf16.msra.mxu0 %v5041_v8  ;;  %436 = vmatprep.mubr.bf16.mxu0 %v6654_v0  ;;  %6791 = vst [vmem:[#allocation25_spill] sm:$0xff] %v5116_v24  ;;  %v5120_v25 = vld [vmem:[#allocation3 + $0x60] ss:$12 sps:$4 sm:$0xff]   ;;  %v5127_v27 = vld [vmem:[#allocation3 + $0x98] ss:$12 sps:$4 sm:$0xff]  }
  0x29   :  { %418 = vmatprep.subr.bf16.mxu0 %v5047_v9  ;;  %4013 = vmatmul.mubr.msk.bf16.vlgmr.msra.gmra.mxu1 %vm282_vm1, %v249_v7  ;;  %6792 = vst [vmem:[#allocation26_spill] sm:$0xff] %v5120_v25  ;;  %v5123_v26 = vld [vmem:[#allocation3 + $0x4c] ss:$12 sps:$4 sm:$0xff]   ;;  %6794 = vst [vmem:[#allocation28_spill] sm:$0xff] %v5127_v27  ;;  %v5133_v28 = vld [vmem:[#allocation3 + $0x48] ss:$12 sps:$4 sm:$0xff]  }
  0x2a   :  { %4017 = vmatpush3.bf16.msra.mxu1 %v5085_v17  ;;  %4020 = vmatprep.mubr.msk.bf16.mxu1 %vm4921_vm0, %v6672_v1  ;;  %6793 = vst [vmem:[#allocation27_spill] sm:$0xff] %v5123_v26  ;;  %6795 = vst [vmem:[#allocation29_spill] sm:$0xff] %v5133_v28  ;;  %v5136_v29 = vld [vmem:[#allocation3 + $0x34] ss:$12 sps:$4 sm:$0xff]   ;;  %v5143_v31 = vld [vmem:[#allocation3 + $0x30] ss:$12 sps:$4 sm:$0xff]  }
  0x2b   :  { %4018 = vmatprep.subr.bf16.mxu1 %v6672_v1  ;;  %6796 = vst [vmem:[#allocation30_spill] sm:$0xff] %v5136_v29  ;;  %v5139_v30 = vld [vmem:[#allocation3 + $0x80] ss:$12 sps:$4 sm:$0xff]   ;;  %6798 = vst [vmem:[#allocation32_spill] sm:$0xff] %v5143_v31  ;;  %v5146_v32 = vld [vmem:[#allocation3 + $0x1c] ss:$12 sps:$4 sm:$0xff]  }
  0x2c   :  { %419 = vmatpush1.bf16.msra.mxu0 %v5053_v10  ;;  %6797 = vst [vmem:[#allocation31_spill] sm:$0xff] %v5139_v30  ;;  %6799 = vst [vmem:[#allocation33_spill] sm:$0xff] %v5146_v32  ;;  %v5149_v33 = vld [vmem:[#allocation3 + $0x68] ss:$12 sps:$4 sm:$0xff]   ;;  %v5153_v34 = vld [vmem:[#allocation3 + $0x18] ss:$12 sps:$4 sm:$0xff]  }
  0x2d   :  { %614 = vmatprep.subr.bf16.mxu0 %v5063_v12  ;;  %6800 = vst [vmem:[#allocation34_spill] sm:$0xff] %v5149_v33  ;;  %6801 = vst [vmem:[#allocation35_spill] sm:$0xff] %v5153_v34  ;;  %v5156_v35 = vld [vmem:[#allocation3 + $0x4] ss:$12 sps:$4 sm:$0xff]   ;;  %v5161_v37 = vld [vmem:[#allocation3] ss:$12 sps:$4 sm:$0xff]  }
  0x2e   :  { %4019 = vmatpush3.bf16.msra.mxu1 %v5101_v20  ;;  %6802 = vst [vmem:[#allocation36_spill] sm:$0xff] %v5156_v35  ;;  %v5159_v36 = vld [vmem:[#allocation3 + $0x50] ss:$12 sps:$4 sm:$0xff]   ;;  %6804 = vst [vmem:[#allocation38_spill] sm:$0xff] %v5161_v37  ;;  %v5168_v39 = vld [vmem:[#allocation6 + $0xac] ss:$12 sps:$4 sm:$0xff]  }
  0x2f   :  { %3693 = vmatmul.mubr.msk.bf16.vlgmr.msra.gmra.mxu0 %vm282_vm1, %v3686_v13  ;;  %4024 = vmatprep.subr.bf16.mxu1 %v6672_v1  ;;  %6803 = vst [vmem:[#allocation37_spill] sm:$0xff] %v5159_v36  ;;  %v5165_v38 = vld [vmem:[#allocation2] sm:$0x3]  ;;  %6805 = vst [vmem:[#allocation39_spill] sm:$0xff] %v5168_v39  ;;  %v5171_v40 = vld [vmem:[#allocation3 + $0x38] ss:$12 sps:$4 sm:$0xff]  }
  0x30   :  { %615 = vmatpush1.bf16.msra.mxu0 %v5076_v15  ;;  %646 = vmatprep.mubr.bf16.mxu0 %v6654_v0  ;;  %6806 = vst [vmem:[#allocation40_spill] sm:$0xff] %v5171_v40  ;;  %v485_v41 = vpack.c.bf16 %v5165_v38, %v5165_v38  ;;  %v5177_v42 = vld [vmem:[#allocation6 + $0xa8] ss:$12 sps:$4 sm:$0xff]   ;;  %v5183_v44 = vld [vmem:[#allocation3 + $0x20] ss:$12 sps:$4 sm:$0xff]  }
  0x31   :  { %616 = vmatprep.subr.bf16.mxu0 %v5079_v16  ;;  %4021 = vmatmul.mubr.msk.bf16.vlgmr.msra.gmra.mxu1 %vm282_vm1, %v3686_v13  ;;  %v5180_v43 = vld [vmem:[#allocation6 + $0x94] ss:$12 sps:$4 sm:$0xff]   ;;  %6807 = vst [vmem:[#allocation41_spill] sm:$0xff] %v5183_v44  ;;  %v5187_v45 = vld [vmem:[#allocation6 + $0x90] ss:$12 sps:$4 sm:$0xff]  }
  0x32   :  { %4025 = vmatpush3.bf16.msra.mxu1 %v5116_v24  ;;  %4040 = vmatprep.mubr.msk.bf16.mxu1 %vm4921_vm0, %v6672_v1  ;;  %v5191_v46 = vld [vmem:[#allocation6 + $0x7c] ss:$12 sps:$4 sm:$0xff]   ;;  %v5198_v48 = vld [vmem:[#allocation6 + $0x78] ss:$12 sps:$4 sm:$0xff]   ;;  %v5208_v51 = vld [vmem:[#allocation6 + $0x60] ss:$12 sps:$4 sm:$0xff]  }
  0x33   :  { %4026 = vmatprep.subr.bf16.mxu1 %v6672_v1  ;;  %v5194_v47 = vld [vmem:[#allocation3 + $0x8] ss:$12 sps:$4 sm:$0xff]   ;;  %v5201_v49 = vld [vmem:[#allocation6 + $0x64] ss:$12 sps:$4 sm:$0xff]   ;;  %v5211_v52 = vld [vmem:[#allocation6 + $0x4c] ss:$12 sps:$4 sm:$0xff]  }
  0x34   :  { %617 = vmatpush1.bf16.msra.mxu0 %v5090_v18  ;;  %6808 = vst [vmem:[#allocation42_spill] sm:$0xff] %v5194_v47  ;;  %v5204_v50 = vld [vmem:[#allocation6 + $0xb0] ss:$12 sps:$4 sm:$0xff]   ;;  %v5214_v53 = vld [vmem:[#allocation6 + $0x98] ss:$12 sps:$4 sm:$0xff]  }
  0x35   :  { %618 = vmatprep.subr.bf16.mxu0 %v5094_v19  ;;  %v5220_v54 = vld [vmem:[#allocation6 + $0x48] ss:$12 sps:$4 sm:$0xff]   ;;  %v5226_v56 = vld [vmem:[#allocation6 + $0x80] ss:$12 sps:$4 sm:$0xff]   ;;  %v5230_v57 = vld [vmem:[#allocation6 + $0x30] ss:$12 sps:$4 sm:$0xff]  }
  0x36   :  { %4027 = vmatpush3.bf16.msra.mxu1 %v5127_v27  ;;  %v5223_v55 = vld [vmem:[#allocation6 + $0x34] ss:$12 sps:$4 sm:$0xff]   ;;  %v5233_v58 = vld [vmem:[#allocation6 + $0x1c] ss:$12 sps:$4 sm:$0xff]   ;;  %v5240_v60 = vld [vmem:[#allocation6 + $0x18] ss:$12 sps:$4 sm:$0xff]  }
  0x37   :  { %4028 = vmatprep.subr.bf16.mxu1 %v6672_v1  ;;  %v5236_v59 = vld [vmem:[#allocation6 + $0x68] ss:$12 sps:$4 sm:$0xff]   ;;  %v5243_v61 = vld [vmem:[#allocation6 + $0x4] ss:$12 sps:$4 sm:$0xff]   ;;  %v5250_v63 = vld [vmem:[#allocation6] ss:$12 sps:$4 sm:$0xff]  }
  0x38   :  { %619 = vmatpush1.bf16.msra.mxu0 %v5110_v22  ;;  %v5246_v62 = vld [vmem:[#allocation6 + $0x50] ss:$12 sps:$4 sm:$0xff]   ;;  %v5256_v13 = vld [vmem:[#allocation6 + $0x38] ss:$12 sps:$4 sm:$0xff]  }
  0x39   :  { %620 = vmatprep.subr.bf16.mxu0 %v5113_v23  ;;  %v5252_v7 = vld [vmem:[#allocation2 + $0x2] sm:$0x3] }
  0x3a   :  { %4029 = vmatpush3.bf16.msra.mxu1 %v5139_v30  ;;  %6809 = vst [vmem:[#allocation43_spill] sm:$0xff] %v5252_v7  ;;  %v695_v21 = vpack.c.bf16 %v5252_v7, %v5252_v7  ;;  %v5271_v7 = vld [vmem:[#allocation6 + $0x8] ss:$12 sps:$4 sm:$0xff]  }
  0x3b   :  { %4030 = vmatprep.subr.bf16.mxu1 %v6672_v1 }
  0x3c   :  { %621 = vmatpush1.bf16.msra.mxu0 %v5120_v25 }
  0x3d   :  { %622 = vmatprep.subr.bf16.mxu0 %v5123_v26 }
  0x3e   :  { %4031 = vmatpush3.bf16.msra.mxu1 %v5149_v33 }
  0x3f   :  { %4032 = vmatprep.subr.bf16.mxu1 %v6672_v1 }
  0x40   :  { %623 = vmatpush1.bf16.msra.mxu0 %v5133_v28 }
  0x41   :  { %624 = vmatprep.subr.bf16.mxu0 %v5136_v29 }
  0x42   :  { %4033 = vmatpush3.bf16.msra.mxu1 %v5159_v36 }
  0x43   :  { %4034 = vmatprep.subr.bf16.mxu1 %v6672_v1 }
  0x44   :  { %625 = vmatpush1.bf16.msra.mxu0 %v5143_v31 }
  0x45   :  { %626 = vmatprep.subr.bf16.mxu0 %v5146_v32 }
  0x46   :  { %4035 = vmatpush3.bf16.msra.mxu1 %v5171_v40 }
  0x47   :  { %4036 = vmatprep.subr.bf16.mxu1 %v6672_v1 }
  0x48   :  { %627 = vmatpush1.bf16.msra.mxu0 %v5153_v34 }
  0x49   :  { %628 = vmatprep.subr.bf16.mxu0 %v5156_v35 }
  0x4a   :  { %4037 = vmatpush3.bf16.msra.mxu1 %v5183_v44 }
  0x4b   :  { %4038 = vmatprep.subr.bf16.mxu1 %v6672_v1 }
  0x4c   :  { %629 = vmatpush1.bf16.msra.mxu0 %v5161_v37 }
  0x4d   :  { %824 = vmatprep.subr.bf16.mxu0 %v5168_v39 }
  0x4e   :  { %4039 = vmatpush3.bf16.msra.mxu1 %v5194_v47 }
  0x4f   :  { %647 = vmatmul.mubr.bf16.vlgmr.msra.gmra.mxu0 %v485_v41  ;;  %4044 = vmatprep.subr.bf16.mxu1 %v6672_v1 }
  0x50   :  { %825 = vmatpush1.bf16.msra.mxu0 %v5177_v42  ;;  %856 = vmatprep.mubr.bf16.mxu0 %v6654_v0 }
  0x51   :  { %826 = vmatprep.subr.bf16.mxu0 %v5180_v43  ;;  %4041 = vmatmul.mubr.bf16.vlgmr.msra.gmra.mxu1 %v485_v41  ;;  %v5264_v41 = vld [vmem:[#allocation6 + $0x20] ss:$12 sps:$4 sm:$0xff]  }
  0x52   :  { %4045 = vmatpush3.bf16.msra.mxu1 %v5204_v50  ;;  %4060 = vmatprep.mubr.msk.bf16.mxu1 %vm4921_vm0, %v6672_v1 }
  0x53   :  { %4046 = vmatprep.subr.bf16.mxu1 %v6672_v1 }
  0x54   :  { %827 = vmatpush1.bf16.msra.mxu0 %v5187_v45 }
  0x55   :  { %828 = vmatprep.subr.bf16.mxu0 %v5191_v46 }
  0x56   :  { %4047 = vmatpush3.bf16.msra.mxu1 %v5214_v53 }
  0x57   :  { %4048 = vmatprep.subr.bf16.mxu1 %v6672_v1 }
  0x58   :  { %829 = vmatpush1.bf16.msra.mxu0 %v5198_v48 }
  0x59   :  { %830 = vmatprep.subr.bf16.mxu0 %v5201_v49 }
  0x5a   :  { %4049 = vmatpush3.bf16.msra.mxu1 %v5226_v56 }
  0x5b   :  { %4050 = vmatprep.subr.bf16.mxu1 %v6672_v1 }
  0x5c   :  { %831 = vmatpush1.bf16.msra.mxu0 %v5208_v51 }
  0x5d   :  { %832 = vmatprep.subr.bf16.mxu0 %v5211_v52 }
  0x5e   :  { %4051 = vmatpush3.bf16.msra.mxu1 %v5236_v59 }
  0x5f   :  { %4052 = vmatprep.subr.bf16.mxu1 %v6672_v1 }
  0x60   :  { %833 = vmatpush1.bf16.msra.mxu0 %v5220_v54 }
  0x61   :  { %834 = vmatprep.subr.bf16.mxu0 %v5223_v55 }
  0x62   :  { %4053 = vmatpush3.bf16.msra.mxu1 %v5246_v62 }
  0x63   :  { %4054 = vmatprep.subr.bf16.mxu1 %v6672_v1 }
  0x64   :  { %835 = vmatpush1.bf16.msra.mxu0 %v5230_v57 }
  0x65   :  { %836 = vmatprep.subr.bf16.mxu0 %v5233_v58 }
  0x66   :  { %4055 = vmatpush3.bf16.msra.mxu1 %v5256_v13 }
  0x67   :  { %4056 = vmatprep.subr.bf16.mxu1 %v6672_v1 }
  0x68   :  { %837 = vmatpush1.bf16.msra.mxu0 %v5240_v60 }
  0x69   :  { %838 = vmatprep.subr.bf16.mxu0 %v5243_v61 }
  0x6a   :  { %4057 = vmatpush3.bf16.msra.mxu1 %v5264_v41 }
  0x6b   :  { %4058 = vmatprep.subr.bf16.mxu1 %v6672_v1 }
  0x6c   :  { %839 = vmatpush1.bf16.msra.mxu0 %v5250_v63 }
  0x6d   :  { %969 = vmatprep.subr.bf16.mxu0 %v5009_v2 }
  0x6e   :  { %4059 = vmatpush3.bf16.msra.mxu1 %v5271_v7 }
  0x6f   :  { %857 = vmatmul.mubr.bf16.vlgmr.msra.gmra.mxu0 %v695_v21  ;;  %4064 = vmatprep.subr.bf16.mxu1 %v6672_v1 }
  0x70   :  { %970 = vmatpush1.bf16.msra.mxu0 %v5014_v3  ;;  %989 = vmatprep.mubr.bf16.mxu0 %v6654_v0  ;;  %v3747_v0 = vld [vmem:[%s6639_s0 + $0x1] sm:$0x1] }
  0x71   :  { %971 = vmatprep.subr.bf16.mxu0 %v5020_v4  ;;  %4061 = vmatmul.mubr.bf16.vlgmr.msra.gmra.mxu1 %v695_v21  ;;  %v6810_v21 = vmov 0  }
  0x72   :  { %4065 = vmatpush3.bf16.msra.mxu1 %v5060_v11  ;;  %4068 = vmatprep.mubr.msk.bf16.mxu1 %vm4921_vm0, %v6672_v1 }
  0x73   :  { %4066 = vmatprep.subr.bf16.mxu1 %v6672_v1 }
  0x74   :  { %972 = vmatpush1.bf16.msra.mxu0 %v5026_v5 }
  0x75   :  { %1055 = vmatprep.subr.bf16.mxu0 %v5032_v6 }
  0x76   :  { %4067 = vmatpush3.bf16.msra.mxu1 %v5073_v14 }
  0x77   :  { %4072 = vmatprep.subr.bf16.mxu1 %v6672_v1  ;;  %3748 = vmatmul.mubr.msk.bf16.vlgmr.msra.gmra.mxu0 %vm282_vm1, %v3747_v0 }
  0x78   :  { %1056 = vmatpush1.bf16.msra.mxu0 %v5041_v8  ;;  %1075 = vmatprep.mubr.bf16.mxu0 %v6810_v21 }
  0x79   :  { %4069 = vmatmul.mubr.msk.bf16.vlgmr.msra.gmra.mxu1 %vm282_vm1, %v3747_v0  ;;  %1057 = vmatprep.subr.bf16.mxu0 %v5047_v9  ;;  %v3750_v0 = vld [vmem:[%s6640_s1 + $0x6] sm:$0x1] }
  0x7a   :  { %4073 = vmatpush3.bf16.msra.mxu1 %v5085_v17  ;;  %4076 = vmatprep.mubr.msk.bf16.mxu1 %vm4921_vm0, %v6672_v1 }
  0x7b   :  { %4074 = vmatprep.subr.bf16.mxu1 %v6672_v1 }
  0x7c   :  { %1058 = vmatpush1.bf16.msra.mxu0 %v5053_v10 }
  0x7d   :  { %1124 = vmatprep.subr.bf16.mxu0 %v5063_v12 }
  0x7e   :  { %4075 = vmatpush3.bf16.msra.mxu1 %v5101_v20 }
  0x7f   :  { %4080 = vmatprep.subr.bf16.mxu1 %v6672_v1  ;;  %3751 = vmatmul.mubr.msk.bf16.vlgmr.msra.gmra.mxu0 %vm282_vm1, %v3750_v0 }
  0x80   :  { %1125 = vmatpush1.bf16.msra.mxu0 %v5076_v15  ;;  %1156 = vmatprep.mubr.bf16.mxu0 %v6810_v21 }
  0x81   :  { %4077 = vmatmul.mubr.msk.bf16.vlgmr.msra.gmra.mxu1 %vm282_vm1, %v3750_v0  ;;  %1126 = vmatprep.subr.bf16.mxu0 %v5079_v16 }
  0x82   :  { %4081 = vmatpush3.bf16.msra.mxu1 %v5116_v24  ;;  %4096 = vmatprep.mubr.msk.bf16.mxu1 %vm4921_vm0, %v6672_v1 }
  0x83   :  { %4082 = vmatprep.subr.bf16.mxu1 %v6672_v1 }
  0x84   :  { %1127 = vmatpush1.bf16.msra.mxu0 %v5090_v18 }
  0x85   :  { %1128 = vmatprep.subr.bf16.mxu0 %v5094_v19 }
  0x86   :  { %4083 = vmatpush3.bf16.msra.mxu1 %v5127_v27 }
  0x87   :  { %4084 = vmatprep.subr.bf16.mxu1 %v6672_v1 }
  0x88   :  { %1129 = vmatpush1.bf16.msra.mxu0 %v5110_v22 }
  0x89   :  { %1130 = vmatprep.subr.bf16.mxu0 %v5113_v23  ;;  %v181_v23 = vlaneseq }
  0x8a   :  { %4085 = vmatpush3.bf16.msra.mxu1 %v5139_v30 }
  0x8b   :  { %4086 = vmatprep.subr.bf16.mxu1 %v6672_v1 }
  0x8c   :  { %1131 = vmatpush1.bf16.msra.mxu0 %v5120_v25 }
  0x8d   :  { %1132 = vmatprep.subr.bf16.mxu0 %v5123_v26 }
  0x8e   :  { %4087 = vmatpush3.bf16.msra.mxu1 %v5149_v33 }
  0x8f   :  { %4088 = vmatprep.subr.bf16.mxu1 %v6672_v1 }
  0x90   :  { %1133 = vmatpush1.bf16.msra.mxu0 %v5133_v28 }
  0x91   :  { %1134 = vmatprep.subr.bf16.mxu0 %v5136_v29 }
  0x92   :  { %4089 = vmatpush3.bf16.msra.mxu1 %v5159_v36 }
  0x93   :  { %4090 = vmatprep.subr.bf16.mxu1 %v6672_v1 }
  0x94   :  { %1135 = vmatpush1.bf16.msra.mxu0 %v5143_v31 }
  0x95   :  { %1136 = vmatprep.subr.bf16.mxu0 %v5146_v32 }
  0x96   :  { %4091 = vmatpush3.bf16.msra.mxu1 %v5171_v40 }
  0x97   :  { %4092 = vmatprep.subr.bf16.mxu1 %v6672_v1 }
  0x98   :  { %1137 = vmatpush1.bf16.msra.mxu0 %v5153_v34 }
  0x99   :  { %1138 = vmatprep.subr.bf16.mxu0 %v5156_v35 }
  0x9a   :  { %4093 = vmatpush3.bf16.msra.mxu1 %v5183_v44 }
  0x9b   :  { %4094 = vmatprep.subr.bf16.mxu1 %v6672_v1 }
  0x9c   :  { %1139 = vmatpush1.bf16.msra.mxu0 %v5161_v37 }
  0x9d   :  { %1205 = vmatprep.subr.bf16.mxu0 %v5168_v39 }
  0x9e   :  { %4095 = vmatpush3.bf16.msra.mxu1 %v5194_v47 }
  0x9f   :  { %4100 = vmatprep.subr.bf16.mxu1 %v6672_v1  ;;  %v182_v1 = vshrl.u32 %v181_v23, 7 }
  0xa1   :  { %v183_v30 = vsub.s32 0, %v182_v1 }
  0xe7   :  { %v320_v0 = vpop.f32.mrf.mxu0 }
  0xe9   :  { %v322_v32 = vpop.f32.mrf.mxu0  ;;  %v361_v44 = vpop.f32.mrf.mxu1 }
  0xeb   :  { %v324_v40 = vpop.f32.mrf.mxu0  ;;  %v4014_v35 = vpop.f32.mrf.mxu1 }
  0xed   :  { %v325_v31 = vpop.f32.mrf.mxu0  ;;  %v364_v26 = vpop.f32.mrf.mxu1 }
  0xee   :  { %v179_v31 = vld [vmem:[%s6644_s5] sm:$0x7] }
  0xef   :  { %v438_v29 = vpop.f32.mrf.mxu0  ;;  %v4015_v33 = vpop.f32.mrf.mxu1  ;;  %v5350_v35 = vrot.slane %v179_v31, %v183_v30 }
  0xf1   :  { %v5340_v34 = vpop.f32.mrf.mxu0  ;;  %v5342_v37 = vpop.f32.mrf.mxu1  ;;  %6811 = vst [vmem:[#allocation44_spill] sm:$0xff] %v5350_v35 }
  0xf3   :  { %v442_v36 = vpop.f32.mrf.mxu0  ;;  %v4022_v47 = vpop.f32.mrf.mxu1 }
  0xf4   :  { %v213_v36 = vld [vmem:[%s6648_s9] sm:$0x7] }
  0xf5   :  { %v443_v28 = vpop.f32.mrf.mxu0  ;;  %v482_v25 = vpop.f32.mrf.mxu1  ;;  %v5352_v26 = vrot.slane %v213_v36, %v183_v30 }
  0xf6   :  { %v187_v28 = vsub.s32 1, %v182_v1  ;;  %v321_v25 = vadd.f32 %v320_v0, %v5350_v35 }
  0xf7   :  { %v4023_v39 = vpop.f32.mrf.mxu1  ;;  %6812 = vst [vmem:[#allocation45_spill] sm:$0xff] %v5352_v26 }
  0xf8   :  { %v5356_v23 = vrot.slane %v213_v36, %v187_v28  ;;  %v5358_v47 = vrot.slane %v179_v31, %v187_v28 }
  0xfa   :  { %6813 = vst [vmem:[#allocation46_spill] sm:$0xff] %v5356_v23  ;;  %6814 = vst [vmem:[#allocation47_spill] sm:$0xff] %v5358_v47  ;;  %v323_v24 = vadd.f32 %v322_v32, %v5358_v47 }
 0x10f   :  { %v648_v33 = vpop.f32.mrf.mxu0 }
 0x110   :  { %v649_v39 = vadd.f32 %v648_v33, %v5352_v26 }
 0x111   :  { %v650_v40 = vpop.f32.mrf.mxu0  ;;  %v689_v12 = vpop.f32.mrf.mxu1 }
 0x112   :  { %v905_v22 = vadd.f32 %v649_v39, %v321_v25  ;;  %v651_v18 = vadd.f32 %v650_v40, %v5356_v23 }
 0x113   :  { %v652_v19 = vpop.f32.mrf.mxu0  ;;  %v4042_v20 = vpop.f32.mrf.mxu1 }
 0x114   :  { %v3743_v27 = vmul.f32 -1.442695, %v905_v22  ;;  %v912_v15 = vadd.f32 %v651_v18, %v323_v24  ;;  %v196_v19 = vld [vmem:[%s6645_s6] sm:$0x7]  ;;  %v191_v22 = vsub.s32 2, %v182_v1 }
 0x115   :  { %v653_v16 = vpop.f32.mrf.mxu0  ;;  %v692_v35 = vpop.f32.mrf.mxu1  ;;  %v5381_v40 = vrot.slane %v196_v19, %v187_v28 }
 0x116   :  { %4547 = vpow2.f32 %v3743_v27  ;;  %v3744_v0 = vmul.f32 -1.442695, %v912_v15  ;;  %v230_v16 = vld [vmem:[%s6649_s10] sm:$0x7]  ;;  %v5368_v27 = vrot.slane %v196_v19, %v183_v30  ;;  %v5370_v18 = vrot.slane %v213_v36, %v191_v22 }
 0x117   :  { %v4043_v33 = vpop.f32.mrf.mxu1  ;;  %v5372_v15 = vrot.slane %v230_v16, %v183_v30  ;;  %v5374_v24 = vrot.slane %v179_v31, %v191_v22 }
 0x118   :  { %4549 = vpow2.f32 %v3744_v0  ;;  %6815 = vst [vmem:[#allocation48_spill] sm:$0xff] %v5370_v18  ;;  %v439_v35 = vadd.f32 %v438_v29, %v5368_v27  ;;  %v690_v25 = vadd.f32 %v689_v12, %v5370_v18  ;;  %v441_v29 = vadd.f32 %v5340_v34, %v5381_v40 }
 0x119   :  { %v362_v30 = vadd.f32 %v361_v44, %v5374_v24 }
 0x123   :  { %v4548_v26 = vpop.eup %4547 }
 0x124   :  { %v909_v10 = vadd.f32 1.0, %v4548_v26 }
 0x125   :  { %v4550_v20 = vpop.eup %4549 }
 0x126   :  { %4551 = vrcp.f32 %v909_v10  ;;  %v5376_v10 = vrot.slane %v230_v16, %v187_v28  ;;  %v916_v26 = vadd.f32 1.0, %v4550_v20 }
 0x128   :  { %4553 = vrcp.f32 %v916_v26 }
 0x12f   :  { %v858_v32 = vpop.f32.mrf.mxu0 }
 0x130   :  { %v859_v39 = vadd.f32 %v858_v32, %v5372_v15 }
 0x131   :  { %v860_v1 = vpop.f32.mrf.mxu0  ;;  %v899_v28 = vpop.f32.mrf.mxu1 }
 0x132   :  { %v926_v36 = vadd.f32 %v859_v39, %v439_v35  ;;  %v861_v23 = vadd.f32 %v860_v1, %v5376_v10 }
 0x133   :  { %v4552_v0 = vpop.eup %4551  ;;  %v862_v33 = vpop.f32.mrf.mxu0 }
 0x134   :  { %v919_v31 = vmul.f32 %v4552_v0, %v690_v25  ;;  %v3745_v47 = vmul.f32 -1.442695, %v926_v36  ;;  %v933_v20 = vadd.f32 %v861_v23, %v441_v29  ;;  %v4062_v32 = vpop.f32.mrf.mxu1 }
 0x135   :  { %v863_v9 = vpop.f32.mrf.mxu0  ;;  %v4554_v44 = vpop.eup %4553 }
 0x136   :  { %v920_v12 = vadd.f32 %v919_v31, %v362_v30  ;;  %4555 = vpow2.f32 %v3745_v47  ;;  %v3746_v35 = vmul.f32 -1.442695, %v933_v20  ;;  %v902_v39 = vpop.f32.mrf.mxu1  ;;  %v922_v36 = vsub.f32 1.0, %v4554_v44 }
 0x137   :  { %v924_v1 = vmul.f32 %v4554_v44, %v5165_v38  ;;  %v5392_v47 = vrot.slane %v230_v16, %v191_v22  ;;  %v6816_v30 = vmov 0.0   ;;  %v5401_v38 = vrot.slane %v196_v19, %v191_v22 }
 0x138   :  { %4557 = vtanh.f32 %v920_v12  ;;  %v4063_v18 = vpop.f32.mrf.mxu1 }
 0x139   :  { %4559 = vpow2.f32 %v3746_v35  ;;  %v900_v33 = vadd.f32 %v899_v28, %v5392_v47  ;;  %v480_v29 = vadd.f32 %v5342_v37, %v5401_v38  ;;  %v5422_v37 = vpop.f32.mrf.mxu0 }
 0x13a   :  { %v5424_v22 = vpop.f32.mrf.mxu1 }
 0x13b   :  { %v5428_v28 = vpop.f32.mrf.mxu0 }
 0x13c   :  { %v4070_v32 = vpop.f32.mrf.mxu1 }
 0x13d   :  { %v995_v35 = vpop.f32.mrf.mxu0 }
 0x13e   :  { %v1035_v39 = vpop.f32.mrf.mxu1  ;;  %v6825_v35 = vld [vmem:[#allocation20_spill] sm:$0xff] }
 0x13f   :  { %v6826_v39 = vld [vmem:[#allocation28_spill] sm:$0xff] }
 0x143   :  { %v4556_v26 = vpop.eup %4555 }
 0x144   :  { %v930_v25 = vadd.f32 1.0, %v4556_v26 }
 0x145   :  { %v4558_v0 = vpop.eup %4557 }
 0x146   :  { %4561 = vrcp.f32 %v930_v25  ;;  %v923_v9 = vmul.f32 %v4558_v0, %v922_v36  ;;  %v4560_v18 = vpop.eup %4559  ;;  %v996_v25 = vpop.f32.mrf.mxu0 }
 0x147   :  { %v937_v16 = vadd.f32 1.0, %v4560_v18  ;;  %v4071_v36 = vpop.f32.mrf.mxu1  ;;  %v6829_v25 = vld [vmem:[#allocation31_spill] sm:$0xff] }
 0x148   :  { %v5388_v34 = vadd.f32 %v924_v1, %v923_v9  ;;  %v6817_v9 = vld [vmem:[#allocation43_spill] sm:$0xff]  ;;  %v6830_v36 = vld [vmem:[#allocation24_spill] sm:$0xff] }
 0x149   :  { %4563 = vrcp.f32 %v937_v16  ;;  %v5439_v18 = vpop.f32.mrf.mxu1 }
 0x14a   :  { %v947_v23 = vpack.c.bf16 %v5388_v34, %v5388_v34 }
 0x14c   :  { %948 = vst [vmem:[#allocation8] sm:$0x1] %v947_v23  ;;  %1157 = vmatmul.mubr.bf16.vlgmr.msra.gmra.mxu0 %v947_v23  ;;  %4097 = vmatmul.mubr.bf16.vlgmr.msra.gmra.mxu1 %v947_v23  ;;  %v5437_v23 = vpop.f32.mrf.mxu0 }
 0x14d   :  { %1206 = vmatpush1.bf16.msra.mxu0 %v5177_v42  ;;  %4101 = vmatpush3.bf16.msra.mxu1 %v5204_v50 }
 0x14e   :  { %1207 = vmatprep.subr.bf16.mxu0 %v5180_v43  ;;  %4102 = vmatprep.subr.bf16.mxu1 %v6816_v30 }
 0x14f   :  { %1237 = vmatprep.mubr.bf16.mxu0 %v6810_v21  ;;  %4116 = vmatprep.mubr.msk.bf16.mxu1 %vm4921_vm0, %v6816_v30 }
 0x151   :  { %1208 = vmatpush1.bf16.msra.mxu0 %v5187_v45  ;;  %4103 = vmatpush3.bf16.msra.mxu1 %v5214_v53 }
 0x152   :  { %1209 = vmatprep.subr.bf16.mxu0 %v5191_v46  ;;  %4104 = vmatprep.subr.bf16.mxu1 %v6816_v30 }
 0x153   :  { %v4562_v31 = vpop.eup %4561 }
 0x154   :  { %v940_v12 = vmul.f32 %v4562_v31, %v900_v33  ;;  %v5445_v33 = vpop.f32.mrf.mxu0  ;;  %v4078_v31 = vpop.f32.mrf.mxu1 }
 0x155   :  { %1210 = vmatpush1.bf16.msra.mxu0 %v5198_v48  ;;  %4105 = vmatpush3.bf16.msra.mxu1 %v5226_v56  ;;  %v6834_v31 = vld [vmem:[#allocation29_spill] sm:$0xff] }
 0x156   :  { %v941_v19 = vadd.f32 %v940_v12, %v480_v29  ;;  %1211 = vmatprep.subr.bf16.mxu0 %v5201_v49  ;;  %4106 = vmatprep.subr.bf16.mxu1 %v6816_v30  ;;  %v4564_v20 = vpop.eup %4563  ;;  %v1081_v12 = vpop.f32.mrf.mxu0 }
 0x157   :  { %v943_v44 = vsub.f32 1.0, %v4564_v20  ;;  %v945_v1 = vmul.f32 %v4564_v20, %v6817_v9  ;;  %v6832_v9 = vld [vmem:[#allocation34_spill] sm:$0xff] }
 0x158   :  { %4565 = vtanh.f32 %v941_v19  ;;  %v1121_v19 = vpop.f32.mrf.mxu1  ;;  %v1082_v20 = vpop.f32.mrf.mxu0  ;;  %v6836_v12 = vld [vmem:[#allocation30_spill] sm:$0xff] }
 0x159   :  { %1212 = vmatpush1.bf16.msra.mxu0 %v5208_v51  ;;  %4107 = vmatpush3.bf16.msra.mxu1 %v5236_v59  ;;  %v6837_v19 = vld [vmem:[#allocation32_spill] sm:$0xff] }
 0x15a   :  { %1213 = vmatprep.subr.bf16.mxu0 %v5211_v52  ;;  %4108 = vmatprep.subr.bf16.mxu1 %v6816_v30  ;;  %v4079_v32 = vpop.f32.mrf.mxu1  ;;  %v6838_v20 = vld [vmem:[#allocation40_spill] sm:$0xff] }
 0x15b   :  { %v6839_v32 = vld [vmem:[#allocation33_spill] sm:$0xff] }
 0x15d   :  { %1214 = vmatpush1.bf16.msra.mxu0 %v5220_v54  ;;  %4109 = vmatpush3.bf16.msra.mxu1 %v5246_v62 }
 0x15e   :  { %1215 = vmatprep.subr.bf16.mxu0 %v5223_v55  ;;  %4110 = vmatprep.subr.bf16.mxu1 %v6816_v30 }
 0x161   :  { %1216 = vmatpush1.bf16.msra.mxu0 %v5230_v57  ;;  %4111 = vmatpush3.bf16.msra.mxu1 %v5256_v13 }
 0x162   :  { %1217 = vmatprep.subr.bf16.mxu0 %v5233_v58  ;;  %4112 = vmatprep.subr.bf16.mxu1 %v6816_v30 }
 0x165   :  { %v4566_v26 = vpop.eup %4565  ;;  %1218 = vmatpush1.bf16.msra.mxu0 %v5240_v60  ;;  %4113 = vmatpush3.bf16.msra.mxu1 %v5264_v41 }
 0x166   :  { %1219 = vmatprep.subr.bf16.mxu0 %v5243_v61  ;;  %4114 = vmatprep.subr.bf16.mxu1 %v6816_v30  ;;  %v944_v0 = vmul.f32 %v4566_v26, %v943_v44  ;;  %v6827_v44 = vld [vmem:[#allocation21_spill] sm:$0xff]  ;;  %v6828_v26 = vld [vmem:[#allocation23_spill] sm:$0xff] }
 0x168   :  { %v5441_v16 = vadd.f32 %v945_v1, %v944_v0  ;;  %v6831_v0 = vld [vmem:[#allocation26_spill] sm:$0xff]  ;;  %v6833_v1 = vld [vmem:[#allocation27_spill] sm:$0xff] }
 0x169   :  { %1220 = vmatpush1.bf16.msra.mxu0 %v5250_v63  ;;  %4115 = vmatpush3.bf16.msra.mxu1 %v5271_v7 }
 0x16a   :  { %v949_v29 = vpack.c.bf16 %v5441_v16, %v5441_v16  ;;  %1351 = vmatprep.subr.bf16.mxu0 %v5009_v2  ;;  %4120 = vmatprep.subr.bf16.mxu1 %v6816_v30  ;;  %v3757_v2 = vld [vmem:[%s6639_s0 + $0x2] sm:$0x1] }
 0x16c   :  { %951 = vst [vmem:[#allocation9 + $0x7] sm:$0x1] %v949_v29  ;;  %1238 = vmatmul.mubr.bf16.vlgmr.msra.gmra.mxu0 %v949_v29  ;;  %4117 = vmatmul.mubr.bf16.vlgmr.msra.gmra.mxu1 %v949_v29  ;;  %v6835_v29 = vld [vmem:[#allocation37_spill] sm:$0xff] }
 0x16d   :  { %1352 = vmatpush1.bf16.msra.mxu0 %v5014_v3  ;;  %4121 = vmatpush3.bf16.msra.mxu1 %v5060_v11  ;;  %v6818_v3 = vld [vmem:[#allocation15_spill] sm:$0xff]  ;;  %v6822_v11 = vld [vmem:[#allocation18_spill] sm:$0xff] }
 0x16e   :  { %1353 = vmatprep.subr.bf16.mxu0 %v5020_v4  ;;  %1371 = vmatprep.mubr.bf16.mxu0 %v6810_v21  ;;  %v6819_v4 = vld [vmem:[#allocation16_spill] sm:$0xff] }
 0x16f   :  { %4122 = vmatprep.subr.bf16.mxu1 %v6816_v30  ;;  %4124 = vmatprep.mubr.msk.bf16.mxu1 %vm4921_vm0, %v6816_v30 }
 0x171   :  { %1354 = vmatpush1.bf16.msra.mxu0 %v5026_v5  ;;  %4123 = vmatpush3.bf16.msra.mxu1 %v5073_v14  ;;  %v6820_v5 = vld [vmem:[#allocation22_spill] sm:$0xff]  ;;  %v6823_v14 = vld [vmem:[#allocation25_spill] sm:$0xff] }
 0x172   :  { %1437 = vmatprep.subr.bf16.mxu0 %v5032_v6  ;;  %4128 = vmatprep.subr.bf16.mxu1 %v6816_v30  ;;  %v6821_v6 = vld [vmem:[#allocation17_spill] sm:$0xff] }
 0x174   :  { %3758 = vmatmul.mubr.msk.bf16.vlgmr.msra.gmra.mxu0 %vm282_vm1, %v3757_v2  ;;  %4125 = vmatmul.mubr.msk.bf16.vlgmr.msra.gmra.mxu1 %vm282_vm1, %v3757_v2  ;;  %v6840_v2 = vld [vmem:[#allocation35_spill] sm:$0xff] }
 0x175   :  { %1438 = vmatpush1.bf16.msra.mxu0 %v5041_v8  ;;  %4129 = vmatpush3.bf16.msra.mxu1 %v5085_v17  ;;  %v3760_v8 = vld [vmem:[%s6640_s1 + $0x5] sm:$0x1]  ;;  %v6824_v17 = vld [vmem:[#allocation19_spill] sm:$0xff] }
 0x176   :  { %1439 = vmatprep.subr.bf16.mxu0 %v6818_v3  ;;  %1457 = vmatprep.mubr.bf16.mxu0 %v6810_v21  ;;  %v6841_v3 = vld [vmem:[#allocation41_spill] sm:$0xff] }
 0x177   :  { %4130 = vmatprep.subr.bf16.mxu1 %v6816_v30  ;;  %4132 = vmatprep.mubr.msk.bf16.mxu1 %vm4921_vm0, %v6816_v30 }
 0x179   :  { %1440 = vmatpush1.bf16.msra.mxu0 %v6819_v4  ;;  %4131 = vmatpush3.bf16.msra.mxu1 %v6820_v5  ;;  %v6842_v4 = vld [vmem:[#allocation36_spill] sm:$0xff]  ;;  %v6843_v5 = vld [vmem:[#allocation38_spill] sm:$0xff] }
 0x17a   :  { %1506 = vmatprep.subr.bf16.mxu0 %v6821_v6  ;;  %4136 = vmatprep.subr.bf16.mxu1 %v6816_v30  ;;  %v6844_v6 = vld [vmem:[#allocation42_spill] sm:$0xff] }
 0x17c   :  { %3761 = vmatmul.mubr.msk.bf16.vlgmr.msra.gmra.mxu0 %vm282_vm1, %v3760_v8  ;;  %4133 = vmatmul.mubr.msk.bf16.vlgmr.msra.gmra.mxu1 %vm282_vm1, %v3760_v8  ;;  %v6845_v8 = vld [vmem:[#allocation39_spill] sm:$0xff] }
 0x17d   :  { %1507 = vmatpush1.bf16.msra.mxu0 %v6822_v11  ;;  %4137 = vmatpush3.bf16.msra.mxu1 %v6823_v14 }
 0x17e   :  { %1508 = vmatprep.subr.bf16.mxu0 %v6824_v17  ;;  %4138 = vmatprep.subr.bf16.mxu1 %v6816_v30  ;;  %v6846_v17 = vld [vmem:[#allocation44_spill] sm:$0xff] }
 0x17f   :  { %1538 = vmatprep.mubr.bf16.mxu0 %v6810_v21  ;;  %4152 = vmatprep.mubr.msk.bf16.mxu1 %vm4921_vm0, %v6816_v30 }
 0x181   :  { %1509 = vmatpush1.bf16.msra.mxu0 %v6825_v35  ;;  %4139 = vmatpush3.bf16.msra.mxu1 %v6826_v39  ;;  %v992_v35 = vadd.f32 %v5422_v37, %v6846_v17  ;;  %v6847_v39 = vld [vmem:[#allocation45_spill] sm:$0xff] }
 0x182   :  { %1510 = vmatprep.subr.bf16.mxu0 %v6827_v44  ;;  %4140 = vmatprep.subr.bf16.mxu1 %v6816_v30 }
 0x185   :  { %1511 = vmatpush1.bf16.msra.mxu0 %v6828_v26  ;;  %4141 = vmatpush3.bf16.msra.mxu1 %v6829_v25 }
 0x186   :  { %1512 = vmatprep.subr.bf16.mxu0 %v6830_v36  ;;  %4142 = vmatprep.subr.bf16.mxu1 %v6816_v30 }
 0x189   :  { %1513 = vmatpush1.bf16.msra.mxu0 %v6831_v0  ;;  %4143 = vmatpush3.bf16.msra.mxu1 %v6832_v9 }
 0x18a   :  { %1514 = vmatprep.subr.bf16.mxu0 %v6833_v1  ;;  %4144 = vmatprep.subr.bf16.mxu1 %v6816_v30 }
 0x18d   :  { %1515 = vmatpush1.bf16.msra.mxu0 %v6834_v31  ;;  %4145 = vmatpush3.bf16.msra.mxu1 %v6835_v29  ;;  %v6848_v31 = vld [vmem:[#allocation46_spill] sm:$0xff] }
 0x18e   :  { %1516 = vmatprep.subr.bf16.mxu0 %v6836_v12  ;;  %4146 = vmatprep.subr.bf16.mxu1 %v6816_v30 }
 0x191   :  { %1517 = vmatpush1.bf16.msra.mxu0 %v6837_v19  ;;  %4147 = vmatpush3.bf16.msra.mxu1 %v6838_v20  ;;  %v6849_v20 = vld [vmem:[#allocation47_spill] sm:$0xff] }
 0x192   :  { %1518 = vmatprep.subr.bf16.mxu0 %v6839_v32  ;;  %4148 = vmatprep.subr.bf16.mxu1 %v6816_v30  ;;  %v994_v32 = vadd.f32 %v5428_v28, %v6849_v20 }
 0x195   :  { %1519 = vmatpush1.bf16.msra.mxu0 %v6840_v2  ;;  %4149 = vmatpush3.bf16.msra.mxu1 %v6841_v3 }
 0x196   :  { %1520 = vmatprep.subr.bf16.mxu0 %v6842_v4  ;;  %4150 = vmatprep.subr.bf16.mxu1 %v6816_v30 }
 0x199   :  { %1521 = vmatpush1.bf16.msra.mxu0 %v6843_v5  ;;  %4151 = vmatpush3.bf16.msra.mxu1 %v6844_v6 }
 0x19a   :  { %1587 = vmatprep.subr.bf16.mxu0 %v6845_v8  ;;  %4156 = vmatprep.subr.bf16.mxu1 %v6816_v30 }
 0x20c   :  { %v1158_v11 = vpop.f32.mrf.mxu0  ;;  %v1199_v14 = vpop.f32.mrf.mxu1 }
 0x20d   :  { %v1159_v44 = vadd.f32 %v1158_v11, %v6847_v39  ;;  %v1078_v11 = vadd.f32 %v5437_v23, %v5368_v27 }
 0x20e   :  { %v1160_v26 = vpop.f32.mrf.mxu0  ;;  %v4098_v25 = vpop.f32.mrf.mxu1 }
 0x20f   :  { %v1286_v36 = vadd.f32 %v1159_v44, %v992_v35  ;;  %v1161_v29 = vadd.f32 %v1160_v26, %v6848_v31 }
 0x210   :  { %v1162_v0 = vpop.f32.mrf.mxu0  ;;  %v1202_v9 = vpop.f32.mrf.mxu1 }
 0x211   :  { %v3753_v1 = vmul.f32 -1.442695, %v1286_v36  ;;  %v1293_v2 = vadd.f32 %v1161_v29, %v994_v32  ;;  %v6850_v36 = vld [vmem:[#allocation48_spill] sm:$0xff] }
 0x212   :  { %v1163_v12 = vpop.f32.mrf.mxu0  ;;  %v4099_v19 = vpop.f32.mrf.mxu1  ;;  %v1200_v28 = vadd.f32 %v1199_v14, %v6850_v36 }
 0x213   :  { %4567 = vpow2.f32 %v3753_v1  ;;  %v3754_v3 = vmul.f32 -1.442695, %v1293_v2  ;;  %v1033_v1 = vadd.f32 %v5424_v22, %v5374_v24 }
 0x215   :  { %4569 = vpow2.f32 %v3754_v3 }
 0x220   :  { %v4568_v37 = vpop.eup %4567 }
 0x221   :  { %v1290_v4 = vadd.f32 1.0, %v4568_v37  ;;  %v1080_v37 = vadd.f32 %v5445_v33, %v5381_v40 }
 0x222   :  { %v4570_v5 = vpop.eup %4569 }
 0x223   :  { %4571 = vrcp.f32 %v1290_v4  ;;  %v1297_v35 = vadd.f32 1.0, %v4570_v5 }
 0x225   :  { %4573 = vrcp.f32 %v1297_v35 }
 0x22c   :  { %v1239_v6 = vpop.f32.mrf.mxu0  ;;  %v1280_v8 = vpop.f32.mrf.mxu1 }
 0x22d   :  { %v1240_v44 = vadd.f32 %v1239_v6, %v5372_v15 }
 0x22e   :  { %v1241_v26 = vpop.f32.mrf.mxu0  ;;  %v4118_v25 = vpop.f32.mrf.mxu1 }
 0x22f   :  { %v1307_v0 = vadd.f32 %v1240_v44, %v1078_v11  ;;  %v1242_v2 = vadd.f32 %v1241_v26, %v5376_v10 }
 0x230   :  { %v4572_v9 = vpop.eup %4571  ;;  %v1243_v29 = vpop.f32.mrf.mxu0 }
 0x231   :  { %v1283_v12 = vpop.f32.mrf.mxu1  ;;  %v1300_v19 = vmul.f32 %v4572_v9, %v1200_v28  ;;  %v3755_v32 = vmul.f32 -1.442695, %v1307_v0  ;;  %v1314_v14 = vadd.f32 %v1242_v2, %v1080_v37  ;;  %v1281_v9 = vadd.f32 %v1280_v8, %v5392_v47  ;;  %v5601_v8 = vld [vmem:[%s6642_s3 + $0x18] ss:$12 sps:$4 sm:$0xff]   ;;  %v5607_v29 = vld [vmem:[%s6642_s3 + $0x20] ss:$12 sps:$4 sm:$0xff]  }
 0x232   :  { %v1244_v23 = vpop.f32.mrf.mxu0  ;;  %v4574_v6 = vpop.eup %4573  ;;  %v5623_v2 = vld [vmem:[%s6642_s3] ss:$12 sps:$4 sm:$0xff]  }
 0x233   :  { %v4119_v3 = vpop.f32.mrf.mxu1  ;;  %v1301_v4 = vadd.f32 %v1300_v19, %v1033_v1  ;;  %4575 = vpow2.f32 %v3755_v32  ;;  %v3756_v5 = vmul.f32 -1.442695, %v1314_v14  ;;  %v1303_v44 = vsub.f32 1.0, %v4574_v6  ;;  %v5613_v32 = vld [vmem:[%s6642_s3 + $0x4] ss:$12 sps:$4 sm:$0xff]  }
 0x234   :  { %v1305_v26 = vmul.f32 %v4574_v6, %v5388_v34  ;;  %v5629_v23 = vld [vmem:[%s6642_s3 + $0x8] ss:$12 sps:$4 sm:$0xff]   ;;  %v3767_v37 = vld [vmem:[%s6639_s0 + $0x3] sm:$0x1] }
 0x235   :  { %4577 = vtanh.f32 %v1301_v4  ;;  %v5635_v3 = vld [vmem:[%s6643_s4 + $0x1c] ss:$12 sps:$4 sm:$0xff]   ;;  %v5647_v4 = vld [vmem:[%s6643_s4 + $0x18] ss:$12 sps:$4 sm:$0xff]   ;;  %v5653_v14 = vld [vmem:[%s6643_s4 + $0x20] ss:$12 sps:$4 sm:$0xff]  }
 0x236   :  { %4579 = vpow2.f32 %v3756_v5  ;;  %v5659_v5 = vld [vmem:[%s6643_s4 + $0x4] ss:$12 sps:$4 sm:$0xff]   ;;  %v5669_v6 = vld [vmem:[%s6643_s4] ss:$12 sps:$4 sm:$0xff]  }
 0x240   :  { %v4576_v22 = vpop.eup %4575 }
 0x241   :  { %v1311_v11 = vadd.f32 1.0, %v4576_v22  ;;  %v5675_v22 = vld [vmem:[%s6643_s4 + $0x8] ss:$12 sps:$4 sm:$0xff]  }
 0x242   :  { %v4578_v25 = vpop.eup %4577 }
 0x243   :  { %4581 = vrcp.f32 %v1311_v11  ;;  %v1304_v35 = vmul.f32 %v4578_v25, %v1303_v44  ;;  %v4580_v0 = vpop.eup %4579  ;;  %v5678_v11 = vld [vmem:[#allocation3 + $0xac] ss:$12 sps:$4 sm:$0xff]   ;;  %v3770_v44 = vld [vmem:[%s6640_s1 + $0x4] sm:$0x1]  ;;  %v5687_v25 = vld [vmem:[#allocation3 + $0xa8] ss:$12 sps:$4 sm:$0xff]  }
 0x244   :  { %v1318_v34 = vadd.f32 1.0, %v4580_v0  ;;  %v5703_v0 = vld [vmem:[#allocation3 + $0x98] ss:$12 sps:$4 sm:$0xff]  }
 0x245   :  { %v5534_v28 = vadd.f32 %v1305_v26, %v1304_v35  ;;  %v5690_v35 = vld [vmem:[#allocation3 + $0xb0] ss:$12 sps:$4 sm:$0xff]   ;;  %v5693_v26 = vld [vmem:[#allocation3 + $0x94] ss:$12 sps:$4 sm:$0xff]   ;;  %6852 = vst [vmem:[#allocation15_spill] sm:$0xff] %v5703_v0 }
 0x246   :  { %4583 = vrcp.f32 %v1318_v34  ;;  %v5706_v34 = vld [vmem:[#allocation3 + $0x7c] ss:$12 sps:$4 sm:$0xff]  }
 0x247   :  { %v1328_v33 = vpack.c.bf16 %v5534_v28, %v5534_v28  ;;  %6853 = vst [vmem:[#allocation16_spill] sm:$0xff] %v5706_v34 }
 0x249   :  { %1330 = vst [vmem:[#allocation8 + $0x1] sm:$0x1] %v1328_v33  ;;  %1539 = vmatmul.mubr.bf16.vlgmr.msra.gmra.mxu0 %v1328_v33  ;;  %4153 = vmatmul.mubr.bf16.vlgmr.msra.gmra.mxu1 %v1328_v33  ;;  %v5700_v33 = vld [vmem:[#allocation3 + $0x90] ss:$12 sps:$4 sm:$0xff]  }
 0x24a   :  { %1588 = vmatpush1.bf16.msra.mxu0 %v5177_v42  ;;  %4157 = vmatpush3.bf16.msra.mxu1 %v5204_v50  ;;  %6851 = vst [vmem:[#allocation43_spill] sm:$0xff] %v5700_v33 }
 0x24b   :  { %1589 = vmatprep.subr.bf16.mxu0 %v5180_v43  ;;  %4158 = vmatprep.subr.bf16.mxu1 %v6816_v30  ;;  %v1119_v43 = vadd.f32 %v5439_v18, %v5401_v38 }
 0x24c   :  { %1619 = vmatprep.mubr.bf16.mxu0 %v6810_v21  ;;  %4172 = vmatprep.mubr.msk.bf16.mxu1 %vm4921_vm0, %v6816_v30 }
 0x24e   :  { %1590 = vmatpush1.bf16.msra.mxu0 %v5187_v45  ;;  %4159 = vmatpush3.bf16.msra.mxu1 %v5214_v53  ;;  %v5564_v45 = vpop.f32.mrf.mxu0 }
 0x24f   :  { %1591 = vmatprep.subr.bf16.mxu0 %v5191_v46  ;;  %4160 = vmatprep.subr.bf16.mxu1 %v6816_v30  ;;  %v5566_v46 = vpop.f32.mrf.mxu1 }
 0x250   :  { %v4582_v42 = vpop.eup %4581 }
 0x251   :  { %v1321_v50 = vmul.f32 %v4582_v42, %v1281_v9  ;;  %v5710_v9 = vld [vmem:[#allocation3 + $0x78] ss:$12 sps:$4 sm:$0xff]   ;;  %v5713_v42 = vld [vmem:[#allocation3 + $0x80] ss:$12 sps:$4 sm:$0xff]  }
 0x252   :  { %1592 = vmatpush1.bf16.msra.mxu0 %v5198_v48  ;;  %4161 = vmatpush3.bf16.msra.mxu1 %v5226_v56  ;;  %6854 = vst [vmem:[#allocation22_spill] sm:$0xff] %v5710_v9  ;;  %6855 = vst [vmem:[#allocation17_spill] sm:$0xff] %v5713_v42 }
 0x253   :  { %v1322_v1 = vadd.f32 %v1321_v50, %v1119_v43  ;;  %1593 = vmatprep.subr.bf16.mxu0 %v5201_v49  ;;  %4162 = vmatprep.subr.bf16.mxu1 %v6816_v30  ;;  %v4584_v48 = vpop.eup %4583  ;;  %v5572_v49 = vpop.f32.mrf.mxu0  ;;  %v5716_v43 = vld [vmem:[#allocation3 + $0x64] ss:$12 sps:$4 sm:$0xff]   ;;  %v5720_v50 = vld [vmem:[#allocation3 + $0x60] ss:$12 sps:$4 sm:$0xff]  }
 0x254   :  { %6856 = vst [vmem:[#allocation18_spill] sm:$0xff] %v5716_v43  ;;  %6857 = vst [vmem:[#allocation25_spill] sm:$0xff] %v5720_v50 }
 0x255   :  { %4585 = vtanh.f32 %v1322_v1  ;;  %v1377_v53 = vpop.f32.mrf.mxu0  ;;  %v5723_v1 = vld [vmem:[#allocation3 + $0x68] ss:$12 sps:$4 sm:$0xff]  }
 0x256   :  { %1594 = vmatpush1.bf16.msra.mxu0 %v5208_v51  ;;  %4163 = vmatpush3.bf16.msra.mxu1 %v5236_v59  ;;  %v4126_v51 = vpop.f32.mrf.mxu1  ;;  %6858 = vst [vmem:[#allocation19_spill] sm:$0xff] %v5723_v1  ;;  %v5736_v53 = vld [vmem:[#allocation3 + $0x34] ss:$12 sps:$4 sm:$0xff]  }
 0x257   :  { %1595 = vmatprep.subr.bf16.mxu0 %v5211_v52  ;;  %4164 = vmatprep.subr.bf16.mxu1 %v6816_v30  ;;  %v1324_v52 = vsub.f32 1.0, %v4584_v48  ;;  %v5730_v51 = vld [vmem:[#allocation3 + $0x48] ss:$12 sps:$4 sm:$0xff]   ;;  %6862 = vst [vmem:[#allocation23_spill] sm:$0xff] %v5736_v53 }
 0x258   :  { %6860 = vst [vmem:[#allocation28_spill] sm:$0xff] %v5730_v51 }
 0x25a   :  { %1596 = vmatpush1.bf16.msra.mxu0 %v5220_v54  ;;  %4165 = vmatpush3.bf16.msra.mxu1 %v5246_v62  ;;  %v1417_v54 = vpop.f32.mrf.mxu1 }
 0x25b   :  { %1597 = vmatprep.subr.bf16.mxu0 %v5223_v55  ;;  %4166 = vmatprep.subr.bf16.mxu1 %v6816_v30  ;;  %v5740_v54 = vld [vmem:[#allocation3 + $0x30] ss:$12 sps:$4 sm:$0xff]  }
 0x25c   :  { %v4127_v59 = vpop.f32.mrf.mxu1  ;;  %6863 = vst [vmem:[#allocation31_spill] sm:$0xff] %v5740_v54 }
 0x25d   :  { %v5756_v59 = vld [vmem:[#allocation3 + $0x4] ss:$12 sps:$4 sm:$0xff]  }
 0x25e   :  { %1598 = vmatpush1.bf16.msra.mxu0 %v5230_v57  ;;  %4167 = vmatpush3.bf16.msra.mxu1 %v5256_v13  ;;  %v1326_v57 = vmul.f32 %v4584_v48, %v5441_v16  ;;  %v5583_v18 = vpop.f32.mrf.mxu1  ;;  %v5594_v16 = vld [vmem:[%s6642_s3 + $0x1c] ss:$12 sps:$4 sm:$0xff]   ;;  %6868 = vst [vmem:[#allocation29_spill] sm:$0xff] %v5756_v59 }
 0x25f   :  { %1599 = vmatprep.subr.bf16.mxu0 %v5233_v58  ;;  %4168 = vmatprep.subr.bf16.mxu1 %v6816_v30  ;;  %v1378_v58 = vpop.f32.mrf.mxu0  ;;  %v5726_v48 = vld [vmem:[#allocation3 + $0x4c] ss:$12 sps:$4 sm:$0xff]  }
 0x260   :  { %6859 = vst [vmem:[#allocation20_spill] sm:$0xff] %v5726_v48  ;;  %v5753_v58 = vld [vmem:[#allocation3 + $0x20] ss:$12 sps:$4 sm:$0xff]  }
 0x261   :  { %v5581_v13 = vpop.f32.mrf.mxu0  ;;  %6867 = vst [vmem:[#allocation27_spill] sm:$0xff] %v5753_v58 }
 0x262   :  { %v4586_v55 = vpop.eup %4585  ;;  %1600 = vmatpush1.bf16.msra.mxu0 %v5240_v60  ;;  %4169 = vmatpush3.bf16.msra.mxu1 %v5264_v41  ;;  %v4134_v41 = vpop.f32.mrf.mxu1 }
 0x263   :  { %1601 = vmatprep.subr.bf16.mxu0 %v5243_v61  ;;  %4170 = vmatprep.subr.bf16.mxu1 %v6816_v30  ;;  %v1325_v56 = vmul.f32 %v4586_v55, %v1324_v52  ;;  %v5589_v61 = vpop.f32.mrf.mxu0  ;;  %v5733_v52 = vld [vmem:[#allocation3 + $0x50] ss:$12 sps:$4 sm:$0xff]   ;;  %v5743_v55 = vld [vmem:[#allocation3 + $0x38] ss:$12 sps:$4 sm:$0xff]   ;;  %v5763_v41 = vld [vmem:[#allocation3 + $0x8] ss:$12 sps:$4 sm:$0xff]  }
 0x264   :  { %6861 = vst [vmem:[#allocation21_spill] sm:$0xff] %v5733_v52  ;;  %6864 = vst [vmem:[#allocation24_spill] sm:$0xff] %v5743_v55 }
 0x265   :  { %v5579_v62 = vadd.f32 %v1326_v57, %v1325_v56  ;;  %v5746_v56 = vld [vmem:[#allocation3 + $0x1c] ss:$12 sps:$4 sm:$0xff]   ;;  %v5750_v57 = vld [vmem:[#allocation3 + $0x18] ss:$12 sps:$4 sm:$0xff]   ;;  %6870 = vst [vmem:[#allocation30_spill] sm:$0xff] %v5763_v41 }
 0x266   :  { %1602 = vmatpush1.bf16.msra.mxu0 %v5250_v63  ;;  %4171 = vmatpush3.bf16.msra.mxu1 %v5271_v7  ;;  %v1463_v63 = vpop.f32.mrf.mxu0  ;;  %v1503_v7 = vpop.f32.mrf.mxu1  ;;  %6865 = vst [vmem:[#allocation26_spill] sm:$0xff] %v5746_v56  ;;  %6866 = vst [vmem:[#allocation34_spill] sm:$0xff] %v5750_v57 }
 0x267   :  { %v1331_v60 = vpack.c.bf16 %v5579_v62, %v5579_v62  ;;  %1733 = vmatprep.subr.bf16.mxu0 %v5594_v16  ;;  %4176 = vmatprep.subr.bf16.mxu1 %v6816_v30  ;;  %v5766_v63 = vld [vmem:[#allocation6 + $0xac] ss:$12 sps:$4 sm:$0xff]  }
 0x268   :  { %v1464_v12 = vpop.f32.mrf.mxu0  ;;  %v4135_v19 = vpop.f32.mrf.mxu1  ;;  %6871 = vst [vmem:[#allocation32_spill] sm:$0xff] %v5766_v63 }
 0x269   :  { %1333 = vst [vmem:[#allocation9 + $0x6] sm:$0x1] %v1331_v60  ;;  %1620 = vmatmul.mubr.bf16.vlgmr.msra.gmra.mxu0 %v1331_v60  ;;  %4173 = vmatmul.mubr.bf16.vlgmr.msra.gmra.mxu1 %v1331_v60  ;;  %v5760_v60 = vld [vmem:[#allocation3] ss:$12 sps:$4 sm:$0xff]   ;;  %v1374_v19 = vadd.f32 %v5564_v45, %v6846_v17 }
 0x26a   :  { %1734 = vmatpush1.bf16.msra.mxu0 %v5601_v8  ;;  %4177 = vmatpush3.bf16.msra.mxu1 %v5607_v29  ;;  %6869 = vst [vmem:[#allocation37_spill] sm:$0xff] %v5760_v60 }
 0x26b   :  { %1735 = vmatprep.subr.bf16.mxu0 %v5613_v32  ;;  %1753 = vmatprep.mubr.bf16.mxu0 %v6810_v21 }
 0x26c   :  { %4178 = vmatprep.subr.bf16.mxu1 %v6816_v30  ;;  %4180 = vmatprep.mubr.msk.bf16.mxu1 %vm4921_vm0, %v6816_v30 }
 0x26e   :  { %1736 = vmatpush1.bf16.msra.mxu0 %v5623_v2  ;;  %4179 = vmatpush3.bf16.msra.mxu1 %v5629_v23 }
 0x26f   :  { %1819 = vmatprep.subr.bf16.mxu0 %v5635_v3  ;;  %4184 = vmatprep.subr.bf16.mxu1 %v6816_v30 }
 0x271   :  { %3768 = vmatmul.mubr.msk.bf16.vlgmr.msra.gmra.mxu0 %vm282_vm1, %v3767_v37  ;;  %4181 = vmatmul.mubr.msk.bf16.vlgmr.msra.gmra.mxu1 %vm282_vm1, %v3767_v37 }
 0x272   :  { %1820 = vmatpush1.bf16.msra.mxu0 %v5647_v4  ;;  %4185 = vmatpush3.bf16.msra.mxu1 %v5653_v14 }
 0x273   :  { %1821 = vmatprep.subr.bf16.mxu0 %v5659_v5  ;;  %1839 = vmatprep.mubr.bf16.mxu0 %v6810_v21 }
 0x274   :  { %4186 = vmatprep.subr.bf16.mxu1 %v6816_v30  ;;  %4188 = vmatprep.mubr.msk.bf16.mxu1 %vm4921_vm0, %v6816_v30 }
 0x276   :  { %1822 = vmatpush1.bf16.msra.mxu0 %v5669_v6  ;;  %4187 = vmatpush3.bf16.msra.mxu1 %v5675_v22 }
 0x277   :  { %1888 = vmatprep.subr.bf16.mxu0 %v5678_v11  ;;  %4192 = vmatprep.subr.bf16.mxu1 %v6816_v30 }
 0x279   :  { %3771 = vmatmul.mubr.msk.bf16.vlgmr.msra.gmra.mxu0 %vm282_vm1, %v3770_v44  ;;  %4189 = vmatmul.mubr.msk.bf16.vlgmr.msra.gmra.mxu1 %vm282_vm1, %v3770_v44 }
 0x27a   :  { %1889 = vmatpush1.bf16.msra.mxu0 %v5687_v25  ;;  %4193 = vmatpush3.bf16.msra.mxu1 %v5690_v35 }
 0x27b   :  { %1890 = vmatprep.subr.bf16.mxu0 %v5693_v26  ;;  %4194 = vmatprep.subr.bf16.mxu1 %v6816_v30 }
 0x27c   :  { %1920 = vmatprep.mubr.bf16.mxu0 %v6810_v21  ;;  %4208 = vmatprep.mubr.msk.bf16.mxu1 %vm4921_vm0, %v6816_v30 }
 0x27e   :  { %1891 = vmatpush1.bf16.msra.mxu0 %v5700_v33  ;;  %4195 = vmatpush3.bf16.msra.mxu1 %v5703_v0 }
 0x27f   :  { %1892 = vmatprep.subr.bf16.mxu0 %v5706_v34  ;;  %4196 = vmatprep.subr.bf16.mxu1 %v6816_v30 }
 0x282   :  { %1893 = vmatpush1.bf16.msra.mxu0 %v5710_v9  ;;  %4197 = vmatpush3.bf16.msra.mxu1 %v5713_v42 }
 0x283   :  { %1894 = vmatprep.subr.bf16.mxu0 %v5716_v43  ;;  %4198 = vmatprep.subr.bf16.mxu1 %v6816_v30 }
 0x286   :  { %1895 = vmatpush1.bf16.msra.mxu0 %v5720_v50  ;;  %4199 = vmatpush3.bf16.msra.mxu1 %v5723_v1 }
 0x287   :  { %1896 = vmatprep.subr.bf16.mxu0 %v5726_v48  ;;  %4200 = vmatprep.subr.bf16.mxu1 %v6816_v30 }
 0x28a   :  { %1897 = vmatpush1.bf16.msra.mxu0 %v5730_v51  ;;  %4201 = vmatpush3.bf16.msra.mxu1 %v5733_v52 }
 0x28b   :  { %1898 = vmatprep.subr.bf16.mxu0 %v5736_v53  ;;  %4202 = vmatprep.subr.bf16.mxu1 %v6816_v30 }
 0x28e   :  { %1899 = vmatpush1.bf16.msra.mxu0 %v5740_v54  ;;  %4203 = vmatpush3.bf16.msra.mxu1 %v5743_v55 }
 0x28f   :  { %1900 = vmatprep.subr.bf16.mxu0 %v5746_v56  ;;  %4204 = vmatprep.subr.bf16.mxu1 %v6816_v30 }
 0x292   :  { %1901 = vmatpush1.bf16.msra.mxu0 %v5750_v57  ;;  %4205 = vmatpush3.bf16.msra.mxu1 %v5753_v58 }
 0x293   :  { %1902 = vmatprep.subr.bf16.mxu0 %v5756_v59  ;;  %4206 = vmatprep.subr.bf16.mxu1 %v6816_v30 }
 0x296   :  { %1903 = vmatpush1.bf16.msra.mxu0 %v5760_v60  ;;  %4207 = vmatpush3.bf16.msra.mxu1 %v5763_v41 }
 0x297   :  { %1969 = vmatprep.subr.bf16.mxu0 %v5766_v63  ;;  %4212 = vmatprep.subr.bf16.mxu1 %v6816_v30  ;;  %v1376_v63 = vadd.f32 %v5572_v49, %v6849_v20 }
 0x309   :  { %v1540_v7 = vpop.f32.mrf.mxu0  ;;  %v1581_v12 = vpop.f32.mrf.mxu1 }
 0x30a   :  { %v1541_v37 = vadd.f32 %v1540_v7, %v6847_v39  ;;  %v1582_v49 = vadd.f32 %v1581_v12, %v6850_v36 }
 0x30b   :  { %v1542_v44 = vpop.f32.mrf.mxu0  ;;  %v4154_v59 = vpop.f32.mrf.mxu1 }
 0x30c   :  { %v1668_v60 = vadd.f32 %v1541_v37, %v1374_v19  ;;  %v1543_v41 = vadd.f32 %v1542_v44, %v6848_v31 }
 0x30d   :  { %v1544_v58 = vpop.f32.mrf.mxu0  ;;  %v1584_v57 = vpop.f32.mrf.mxu1 }
 0x30e   :  { %v3763_v56 = vmul.f32 -1.442695, %v1668_v60  ;;  %v1675_v53 = vadd.f32 %v1543_v41, %v1376_v63  ;;  %v1460_v57 = vadd.f32 %v5581_v13, %v5368_v27 }
 0x30f   :  { %v1545_v55 = vpop.f32.mrf.mxu0  ;;  %v4155_v54 = vpop.f32.mrf.mxu1 }
 0x310   :  { %4587 = vpow2.f32 %v3763_v56  ;;  %v3764_v52 = vmul.f32 -1.442695, %v1675_v53 }
 0x312   :  { %4589 = vpow2.f32 %v3764_v52  ;;  %v1415_v52 = vadd.f32 %v5566_v46, %v5374_v24 }
 0x31d   :  { %v4588_v45 = vpop.eup %4587 }
 0x31e   :  { %v1672_v17 = vadd.f32 1.0, %v4588_v45 }
 0x31f   :  { %v4590_v7 = vpop.eup %4589 }
 0x320   :  { %4591 = vrcp.f32 %v1672_v17  ;;  %v1679_v58 = vadd.f32 1.0, %v4590_v7  ;;  %v1462_v7 = vadd.f32 %v5589_v61, %v5381_v40 }
 0x322   :  { %4593 = vrcp.f32 %v1679_v58 }
 0x329   :  { %v1621_v59 = vpop.f32.mrf.mxu0  ;;  %v1662_v19 = vpop.f32.mrf.mxu1 }
 0x32a   :  { %v1622_v55 = vadd.f32 %v1621_v59, %v5372_v15 }
 0x32b   :  { %v1623_v54 = vpop.f32.mrf.mxu0  ;;  %v4174_v60 = vpop.f32.mrf.mxu1 }
 0x32c   :  { %v1689_v56 = vadd.f32 %v1622_v55, %v1460_v57  ;;  %v1624_v44 = vadd.f32 %v1623_v54, %v5376_v10 }
 0x32d   :  { %v4592_v41 = vpop.eup %4591  ;;  %v1625_v53 = vpop.f32.mrf.mxu0 }
 0x32e   :  { %v1665_v17 = vpop.f32.mrf.mxu1  ;;  %v1682_v63 = vmul.f32 %v4592_v41, %v1582_v49  ;;  %v3765_v37 = vmul.f32 -1.442695, %v1689_v56  ;;  %v1696_v12 = vadd.f32 %v1624_v44, %v1462_v7  ;;  %v5806_v44 = vld [vmem:[#allocation6 + $0x98] ss:$12 sps:$4 sm:$0xff]  }
 0x32f   :  { %v1626_v13 = vpop.f32.mrf.mxu0  ;;  %v4594_v55 = vpop.eup %4593  ;;  %v5793_v17 = vld [vmem:[#allocation6 + $0xb0] ss:$12 sps:$4 sm:$0xff]  }
 0x330   :  { %v4175_v45 = vpop.f32.mrf.mxu1  ;;  %v1683_v59 = vadd.f32 %v1682_v63, %v1415_v52  ;;  %4595 = vpow2.f32 %v3765_v37  ;;  %v3766_v57 = vmul.f32 -1.442695, %v1696_v12  ;;  %v1685_v53 = vsub.f32 1.0, %v4594_v55  ;;  %v5790_v52 = vld [vmem:[#allocation6 + $0xa8] ss:$12 sps:$4 sm:$0xff]  }
 0x331   :  { %v1687_v54 = vmul.f32 %v4594_v55, %v5534_v28  ;;  %v5796_v63 = vld [vmem:[#allocation6 + $0x94] ss:$12 sps:$4 sm:$0xff]   ;;  %v5803_v37 = vld [vmem:[#allocation6 + $0x90] ss:$12 sps:$4 sm:$0xff]   ;;  %v1663_v13 = vadd.f32 %v1662_v19, %v5392_v47 }
 0x332   :  { %4597 = vtanh.f32 %v1683_v59  ;;  %v5810_v45 = vld [vmem:[#allocation6 + $0x7c] ss:$12 sps:$4 sm:$0xff]   ;;  %v1501_v59 = vadd.f32 %v5583_v18, %v5401_v38  ;;  %v5819_v55 = vld [vmem:[#allocation6 + $0x80] ss:$12 sps:$4 sm:$0xff]  }
 0x333   :  { %4599 = vpow2.f32 %v3766_v57  ;;  %v5816_v57 = vld [vmem:[#allocation6 + $0x78] ss:$12 sps:$4 sm:$0xff]   ;;  %6872 = vst [vmem:[#allocation40_spill] sm:$0xff] %v5819_v55  ;;  %v5829_v18 = vld [vmem:[#allocation6 + $0x68] ss:$12 sps:$4 sm:$0xff]  }
 0x334   :  { %6875 = vst [vmem:[#allocation41_spill] sm:$0xff] %v5829_v18 }
 0x33d   :  { %v4596_v46 = vpop.eup %4595 }
 0x33e   :  { %v1693_v60 = vadd.f32 1.0, %v4596_v46  ;;  %v5822_v46 = vld [vmem:[#allocation6 + $0x64] ss:$12 sps:$4 sm:$0xff]  }
 0x33f   :  { %v4598_v49 = vpop.eup %4597  ;;  %6873 = vst [vmem:[#allocation33_spill] sm:$0xff] %v5822_v46 }
 0x340   :  { %4601 = vrcp.f32 %v1693_v60  ;;  %v1686_v58 = vmul.f32 %v4598_v49, %v1685_v53  ;;  %v4600_v41 = vpop.eup %4599  ;;  %v5826_v60 = vld [vmem:[#allocation6 + $0x60] ss:$12 sps:$4 sm:$0xff]   ;;  %v5836_v49 = vld [vmem:[#allocation6 + $0x48] ss:$12 sps:$4 sm:$0xff]  }
 0x341   :  { %v1700_v28 = vadd.f32 1.0, %v4600_v41  ;;  %6874 = vst [vmem:[#allocation35_spill] sm:$0xff] %v5826_v60  ;;  %v5832_v53 = vld [vmem:[#allocation6 + $0x4c] ss:$12 sps:$4 sm:$0xff]   ;;  %6877 = vst [vmem:[#allocation38_spill] sm:$0xff] %v5836_v49  ;;  %v5848_v41 = vpop.f32.mrf.mxu1 }
 0x342   :  { %v5786_v56 = vadd.f32 %v1687_v54, %v1686_v58  ;;  %6876 = vst [vmem:[#allocation36_spill] sm:$0xff] %v5832_v53  ;;  %v5839_v58 = vld [vmem:[#allocation6 + $0x50] ss:$12 sps:$4 sm:$0xff]   ;;  %v5842_v54 = vld [vmem:[#allocation6 + $0x34] ss:$12 sps:$4 sm:$0xff]  }
 0x343   :  { %4603 = vrcp.f32 %v1700_v28  ;;  %6878 = vst [vmem:[#allocation42_spill] sm:$0xff] %v5839_v58  ;;  %6879 = vst [vmem:[#allocation39_spill] sm:$0xff] %v5842_v54 }
 0x344   :  { %v1710_v61 = vpack.c.bf16 %v5786_v56, %v5786_v56 }
 0x346   :  { %1712 = vst [vmem:[#allocation8 + $0x2] sm:$0x1] %v1710_v61  ;;  %1921 = vmatmul.mubr.bf16.vlgmr.msra.gmra.mxu0 %v1710_v61  ;;  %4209 = vmatmul.mubr.bf16.vlgmr.msra.gmra.mxu1 %v1710_v61  ;;  %v5846_v61 = vpop.f32.mrf.mxu0 }
 0x347   :  { %1970 = vmatpush1.bf16.msra.mxu0 %v5790_v52  ;;  %4213 = vmatpush3.bf16.msra.mxu1 %v5793_v17 }
 0x348   :  { %1971 = vmatprep.subr.bf16.mxu0 %v5796_v63  ;;  %4214 = vmatprep.subr.bf16.mxu1 %v6816_v30 }
 0x349   :  { %2001 = vmatprep.mubr.bf16.mxu0 %v6810_v21  ;;  %4228 = vmatprep.mubr.msk.bf16.mxu1 %vm4921_vm0, %v6816_v30 }
 0x34b   :  { %1972 = vmatpush1.bf16.msra.mxu0 %v5803_v37  ;;  %4215 = vmatpush3.bf16.msra.mxu1 %v5806_v44 }
 0x34c   :  { %1973 = vmatprep.subr.bf16.mxu0 %v5810_v45  ;;  %4216 = vmatprep.subr.bf16.mxu1 %v6816_v30 }
 0x34d   :  { %v4602_v7 = vpop.eup %4601 }
 0x34e   :  { %v1703_v12 = vmul.f32 %v4602_v7, %v1663_v13  ;;  %v5850_v13 = vld [vmem:[#allocation6 + $0x30] ss:$12 sps:$4 sm:$0xff]   ;;  %v5853_v7 = vld [vmem:[#allocation6 + $0x38] ss:$12 sps:$4 sm:$0xff]  }
 0x34f   :  { %1974 = vmatpush1.bf16.msra.mxu0 %v5816_v57  ;;  %4217 = vmatpush3.bf16.msra.mxu1 %v5819_v55  ;;  %6880 = vst [vmem:[#allocation45_spill] sm:$0xff] %v5850_v13  ;;  %6881 = vst [vmem:[#allocation46_spill] sm:$0xff] %v5853_v7  ;;  %v5879_v55 = vld [vmem:[#allocation6] ss:$12 sps:$4 sm:$0xff]  }
 0x350   :  { %v1704_v19 = vadd.f32 %v1703_v12, %v1501_v59  ;;  %1975 = vmatprep.subr.bf16.mxu0 %v5822_v46  ;;  %4218 = vmatprep.subr.bf16.mxu1 %v6816_v30  ;;  %v4604_v28 = vpop.eup %4603  ;;  %v5856_v59 = vld [vmem:[#allocation6 + $0x1c] ss:$12 sps:$4 sm:$0xff]   ;;  %v5860_v12 = vpop.f32.mrf.mxu0 }
 0x351   :  { %6882 = vst [vmem:[#allocation47_spill] sm:$0xff] %v5856_v59 }
 0x352   :  { %4605 = vtanh.f32 %v1704_v19  ;;  %v4182_v19 = vpop.f32.mrf.mxu1 }
 0x353   :  { %1976 = vmatpush1.bf16.msra.mxu0 %v5826_v60  ;;  %4219 = vmatpush3.bf16.msra.mxu1 %v5829_v18  ;;  %v5862_v18 = vld [vmem:[#allocation6 + $0x18] ss:$12 sps:$4 sm:$0xff]   ;;  %v1708_v19 = vmul.f32 %v4604_v28, %v5579_v62 }
 0x354   :  { %1977 = vmatprep.subr.bf16.mxu0 %v5832_v53  ;;  %4220 = vmatprep.subr.bf16.mxu1 %v6816_v30  ;;  %6883 = vst [vmem:[#allocation48_spill] sm:$0xff] %v5862_v18 }
 0x357   :  { %1978 = vmatpush1.bf16.msra.mxu0 %v5836_v49  ;;  %4221 = vmatpush3.bf16.msra.mxu1 %v5839_v58  ;;  %v1759_v58 = vpop.f32.mrf.mxu0  ;;  %v1799_v49 = vpop.f32.mrf.mxu1 }
 0x358   :  { %1979 = vmatprep.subr.bf16.mxu0 %v5842_v54  ;;  %4222 = vmatprep.subr.bf16.mxu1 %v6816_v30  ;;  %v1706_v54 = vsub.f32 1.0, %v4604_v28 }
 0x359   :  { %v1760_v58 = vpop.f32.mrf.mxu0  ;;  %v4183_v49 = vpop.f32.mrf.mxu1 }
 0x35a   :  { %v3777_v49 = vld [vmem:[%s6639_s0 + $0x4] sm:$0x1] }
 0x35b   :  { %1980 = vmatpush1.bf16.msra.mxu0 %v5850_v13  ;;  %4223 = vmatpush3.bf16.msra.mxu1 %v5853_v7  ;;  %v5865_v13 = vld [vmem:[#allocation6 + $0x20] ss:$12 sps:$4 sm:$0xff]   ;;  %v5868_v7 = vld [vmem:[#allocation6 + $0x4] ss:$12 sps:$4 sm:$0xff]   ;;  %v5875_v46 = vpop.f32.mrf.mxu0 }
 0x35c   :  { %1981 = vmatprep.subr.bf16.mxu0 %v5856_v59  ;;  %4224 = vmatprep.subr.bf16.mxu1 %v6816_v30  ;;  %6884 = vst [vmem:[#allocation49_spill] sm:$0xff] %v5865_v13  ;;  %6885 = vst [vmem:[#allocation50_spill] sm:$0xff] %v5868_v7 }
 0x35d   :  { %v5887_v62 = vpop.f32.mrf.mxu0 }
 0x35f   :  { %v4606_v53 = vpop.eup %4605  ;;  %1982 = vmatpush1.bf16.msra.mxu0 %v5862_v18  ;;  %4225 = vmatpush3.bf16.msra.mxu1 %v5865_v13  ;;  %v5877_v18 = vpop.f32.mrf.mxu1  ;;  %v5882_v13 = vld [vmem:[#allocation6 + $0x8] ss:$12 sps:$4 sm:$0xff]  }
 0x360   :  { %1983 = vmatprep.subr.bf16.mxu0 %v5868_v7  ;;  %4226 = vmatprep.subr.bf16.mxu1 %v6816_v30  ;;  %v1707_v59 = vmul.f32 %v4606_v53, %v1706_v54  ;;  %v1845_v28 = vpop.f32.mrf.mxu0 }
 0x361   :  { %v4190_v54 = vpop.f32.mrf.mxu1  ;;  %v6887_v28 = vld [vmem:[#allocation23_spill] sm:$0xff] }
 0x362   :  { %v5873_v60 = vadd.f32 %v1708_v19, %v1707_v59  ;;  %v1846_v19 = vpop.f32.mrf.mxu0  ;;  %v6886_v54 = vld [vmem:[#allocation21_spill] sm:$0xff] }
 0x363   :  { %1984 = vmatpush1.bf16.msra.mxu0 %v5879_v55  ;;  %4227 = vmatpush3.bf16.msra.mxu1 %v5882_v13  ;;  %v1885_v59 = vpop.f32.mrf.mxu1  ;;  %v6889_v19 = vld [vmem:[#allocation24_spill] sm:$0xff] }
 0x364   :  { %v1713_v53 = vpack.c.bf16 %v5873_v60, %v5873_v60  ;;  %2115 = vmatprep.subr.bf16.mxu0 %v5594_v16  ;;  %4232 = vmatprep.subr.bf16.mxu1 %v6816_v30  ;;  %v6888_v59 = vld [vmem:[#allocation31_spill] sm:$0xff] }
 0x365   :  { %v4191_v58 = vpop.f32.mrf.mxu1 }
 0x366   :  { %1715 = vst [vmem:[#allocation9 + $0x5] sm:$0x1] %v1713_v53  ;;  %2002 = vmatmul.mubr.bf16.vlgmr.msra.gmra.mxu0 %v1713_v53  ;;  %4229 = vmatmul.mubr.bf16.vlgmr.msra.gmra.mxu1 %v1713_v53  ;;  %v3780_v53 = vld [vmem:[%s6640_s1 + $0x3] sm:$0x1]  ;;  %v6890_v58 = vld [vmem:[#allocation26_spill] sm:$0xff] }
 0x367   :  { %2116 = vmatpush1.bf16.msra.mxu0 %v5601_v8  ;;  %4233 = vmatpush3.bf16.msra.mxu1 %v5607_v29 }
 0x368   :  { %2117 = vmatprep.subr.bf16.mxu0 %v5613_v32  ;;  %2135 = vmatprep.mubr.bf16.mxu0 %v6810_v21 }
 0x369   :  { %4234 = vmatprep.subr.bf16.mxu1 %v6816_v30  ;;  %4236 = vmatprep.mubr.msk.bf16.mxu1 %vm4921_vm0, %v6816_v30 }
 0x36b   :  { %2118 = vmatpush1.bf16.msra.mxu0 %v5623_v2  ;;  %4235 = vmatpush3.bf16.msra.mxu1 %v5629_v23 }
 0x36c   :  { %2201 = vmatprep.subr.bf16.mxu0 %v5635_v3  ;;  %4240 = vmatprep.subr.bf16.mxu1 %v6816_v30 }
 0x36e   :  { %3778 = vmatmul.mubr.msk.bf16.vlgmr.msra.gmra.mxu0 %vm282_vm1, %v3777_v49  ;;  %4237 = vmatmul.mubr.msk.bf16.vlgmr.msra.gmra.mxu1 %vm282_vm1, %v3777_v49  ;;  %v6891_v49 = vld [vmem:[#allocation34_spill] sm:$0xff] }
 0x36f   :  { %2202 = vmatpush1.bf16.msra.mxu0 %v5647_v4  ;;  %4241 = vmatpush3.bf16.msra.mxu1 %v5653_v14 }
 0x370   :  { %2203 = vmatprep.subr.bf16.mxu0 %v5659_v5  ;;  %2221 = vmatprep.mubr.bf16.mxu0 %v6810_v21 }
 0x371   :  { %4242 = vmatprep.subr.bf16.mxu1 %v6816_v30  ;;  %4244 = vmatprep.mubr.msk.bf16.mxu1 %vm4921_vm0, %v6816_v30 }
 0x373   :  { %2204 = vmatpush1.bf16.msra.mxu0 %v5669_v6  ;;  %4243 = vmatpush3.bf16.msra.mxu1 %v5675_v22 }
 0x374   :  { %2270 = vmatprep.subr.bf16.mxu0 %v5678_v11  ;;  %4248 = vmatprep.subr.bf16.mxu1 %v6816_v30 }
 0x376   :  { %3781 = vmatmul.mubr.msk.bf16.vlgmr.msra.gmra.mxu0 %vm282_vm1, %v3780_v53  ;;  %4245 = vmatmul.mubr.msk.bf16.vlgmr.msra.gmra.mxu1 %vm282_vm1, %v3780_v53  ;;  %v6892_v53 = vld [vmem:[#allocation27_spill] sm:$0xff] }
 0x377   :  { %2271 = vmatpush1.bf16.msra.mxu0 %v5687_v25  ;;  %4249 = vmatpush3.bf16.msra.mxu1 %v5690_v35 }
 0x378   :  { %2272 = vmatprep.subr.bf16.mxu0 %v5693_v26  ;;  %4250 = vmatprep.subr.bf16.mxu1 %v6816_v30 }
 0x379   :  { %2302 = vmatprep.mubr.bf16.mxu0 %v6810_v21  ;;  %4264 = vmatprep.mubr.msk.bf16.mxu1 %vm4921_vm0, %v6816_v30 }
 0x37b   :  { %2273 = vmatpush1.bf16.msra.mxu0 %v5700_v33  ;;  %4251 = vmatpush3.bf16.msra.mxu1 %v5703_v0 }
 0x37c   :  { %2274 = vmatprep.subr.bf16.mxu0 %v5706_v34  ;;  %4252 = vmatprep.subr.bf16.mxu1 %v6816_v30 }
 0x37f   :  { %2275 = vmatpush1.bf16.msra.mxu0 %v5710_v9  ;;  %4253 = vmatpush3.bf16.msra.mxu1 %v5713_v42 }
 0x380   :  { %2276 = vmatprep.subr.bf16.mxu0 %v5716_v43  ;;  %4254 = vmatprep.subr.bf16.mxu1 %v6816_v30 }
 0x383   :  { %2277 = vmatpush1.bf16.msra.mxu0 %v5720_v50  ;;  %4255 = vmatpush3.bf16.msra.mxu1 %v5723_v1 }
 0x384   :  { %2278 = vmatprep.subr.bf16.mxu0 %v5726_v48  ;;  %4256 = vmatprep.subr.bf16.mxu1 %v6816_v30  ;;  %v6893_v48 = vld [vmem:[#allocation29_spill] sm:$0xff] }
 0x387   :  { %2279 = vmatpush1.bf16.msra.mxu0 %v5730_v51  ;;  %4257 = vmatpush3.bf16.msra.mxu1 %v6886_v54  ;;  %v6894_v54 = vld [vmem:[#allocation37_spill] sm:$0xff]  ;;  %v6896_v51 = vld [vmem:[#allocation32_spill] sm:$0xff] }
 0x388   :  { %2280 = vmatprep.subr.bf16.mxu0 %v6887_v28  ;;  %4258 = vmatprep.subr.bf16.mxu1 %v6816_v30  ;;  %v6895_v28 = vld [vmem:[#allocation30_spill] sm:$0xff] }
 0x38b   :  { %2281 = vmatpush1.bf16.msra.mxu0 %v6888_v59  ;;  %4259 = vmatpush3.bf16.msra.mxu1 %v6889_v19  ;;  %v6897_v59 = vld [vmem:[#allocation44_spill] sm:$0xff] }
 0x38c   :  { %2282 = vmatprep.subr.bf16.mxu0 %v6890_v58  ;;  %4260 = vmatprep.subr.bf16.mxu1 %v6816_v30  ;;  %v1756_v1 = vadd.f32 %v5846_v61, %v6897_v59 }
 0x38f   :  { %2283 = vmatpush1.bf16.msra.mxu0 %v6891_v49  ;;  %4261 = vmatpush3.bf16.msra.mxu1 %v6892_v53 }
 0x390   :  { %2284 = vmatprep.subr.bf16.mxu0 %v6893_v48  ;;  %4262 = vmatprep.subr.bf16.mxu1 %v6816_v30 }
 0x393   :  { %2285 = vmatpush1.bf16.msra.mxu0 %v6894_v54  ;;  %4263 = vmatpush3.bf16.msra.mxu1 %v6895_v28 }
 0x394   :  { %2351 = vmatprep.subr.bf16.mxu0 %v6896_v51  ;;  %4268 = vmatprep.subr.bf16.mxu1 %v6816_v30  ;;  %v1758_v51 = vadd.f32 %v5860_v12, %v6849_v20 }
 0x406   :  { %v1922_v19 = vpop.f32.mrf.mxu0  ;;  %v1963_v58 = vpop.f32.mrf.mxu1 }
 0x407   :  { %v1923_v49 = vadd.f32 %v1922_v19, %v6847_v39  ;;  %v1964_v12 = vadd.f32 %v1963_v58, %v6850_v36 }
 0x408   :  { %v1924_v53 = vpop.f32.mrf.mxu0  ;;  %v4210_v50 = vpop.f32.mrf.mxu1 }
 0x409   :  { %v2050_v48 = vadd.f32 %v1923_v49, %v1756_v1  ;;  %v1925_v54 = vadd.f32 %v1924_v53, %v6848_v31 }
 0x40a   :  { %v1926_v43 = vpop.f32.mrf.mxu0  ;;  %v1966_v42 = vpop.f32.mrf.mxu1 }
 0x40b   :  { %v3773_v9 = vmul.f32 -1.442695, %v2050_v48  ;;  %v2057_v0 = vadd.f32 %v1925_v54, %v1758_v51  ;;  %v1842_v42 = vadd.f32 %v5875_v46, %v5368_v27 }
 0x40c   :  { %v1927_v28 = vpop.f32.mrf.mxu0  ;;  %v4211_v34 = vpop.f32.mrf.mxu1 }
 0x40d   :  { %4607 = vpow2.f32 %v3773_v9  ;;  %v3774_v33 = vmul.f32 -1.442695, %v2057_v0 }
 0x40f   :  { %4609 = vpow2.f32 %v3774_v33  ;;  %v1797_v33 = vadd.f32 %v5848_v41, %v5374_v24 }
 0x41a   :  { %v4608_v61 = vpop.eup %4607 }
 0x41b   :  { %v2054_v59 = vadd.f32 1.0, %v4608_v61 }
 0x41c   :  { %v4610_v19 = vpop.eup %4609 }
 0x41d   :  { %4611 = vrcp.f32 %v2054_v59  ;;  %v2061_v43 = vadd.f32 1.0, %v4610_v19  ;;  %v1844_v19 = vadd.f32 %v5887_v62, %v5381_v40 }
 0x41f   :  { %4613 = vrcp.f32 %v2061_v43 }
 0x426   :  { %v2003_v50 = vpop.f32.mrf.mxu0  ;;  %v2044_v1 = vpop.f32.mrf.mxu1 }
 0x427   :  { %v2004_v48 = vadd.f32 %v2003_v50, %v5372_v15 }
 0x428   :  { %v2005_v34 = vpop.f32.mrf.mxu0  ;;  %v4230_v28 = vpop.f32.mrf.mxu1 }
 0x429   :  { %v2071_v9 = vadd.f32 %v2004_v48, %v1842_v42  ;;  %v2006_v53 = vadd.f32 %v2005_v34, %v5376_v10 }
 0x42a   :  { %v4612_v51 = vpop.eup %4611  ;;  %v2007_v0 = vpop.f32.mrf.mxu0 }
 0x42b   :  { %v2047_v54 = vpop.f32.mrf.mxu1  ;;  %v2064_v59 = vmul.f32 %v4612_v51, %v1964_v12  ;;  %v3775_v49 = vmul.f32 -1.442695, %v2071_v9  ;;  %v2078_v58 = vadd.f32 %v2006_v53, %v1844_v19  ;;  %v6898_v53 = vld [vmem:[#allocation40_spill] sm:$0xff]  ;;  %v6901_v19 = vld [vmem:[#allocation41_spill] sm:$0xff] }
 0x42c   :  { %v2008_v46 = vpop.f32.mrf.mxu0  ;;  %v4614_v48 = vpop.eup %4613 }
 0x42d   :  { %v4231_v61 = vpop.f32.mrf.mxu1  ;;  %v2065_v50 = vadd.f32 %v2064_v59, %v1797_v33  ;;  %4615 = vpow2.f32 %v3775_v49  ;;  %v3776_v42 = vmul.f32 -1.442695, %v2078_v58  ;;  %v2067_v0 = vsub.f32 1.0, %v4614_v48  ;;  %v6904_v58 = vld [vmem:[#allocation42_spill] sm:$0xff] }
 0x42e   :  { %v2069_v34 = vmul.f32 %v4614_v48, %v5786_v56  ;;  %v2045_v33 = vadd.f32 %v2044_v1, %v5392_v47  ;;  %v1883_v59 = vadd.f32 %v5877_v18, %v5401_v38  ;;  %v6899_v61 = vld [vmem:[#allocation33_spill] sm:$0xff]  ;;  %v6900_v1 = vld [vmem:[#allocation35_spill] sm:$0xff]  ;;  %v6903_v18 = vld [vmem:[#allocation38_spill] sm:$0xff]  ;;  %v6004_v48 = vpop.f32.mrf.mxu0 }
 0x42f   :  { %4617 = vtanh.f32 %v2065_v50  ;;  %v6902_v50 = vld [vmem:[#allocation36_spill] sm:$0xff] }
 0x430   :  { %4619 = vpow2.f32 %v3776_v42  ;;  %v6905_v42 = vld [vmem:[#allocation39_spill] sm:$0xff] }
 0x43a   :  { %v4616_v41 = vpop.eup %4615 }
 0x43b   :  { %v2075_v28 = vadd.f32 1.0, %v4616_v41  ;;  %v6006_v41 = vpop.f32.mrf.mxu1 }
 0x43c   :  { %v4618_v12 = vpop.eup %4617 }
 0x43d   :  { %4621 = vrcp.f32 %v2075_v28  ;;  %v2068_v43 = vmul.f32 %v4618_v12, %v2067_v0  ;;  %v4620_v51 = vpop.eup %4619  ;;  %v6906_v0 = vld [vmem:[#allocation45_spill] sm:$0xff]  ;;  %v6907_v12 = vld [vmem:[#allocation46_spill] sm:$0xff] }
 0x43e   :  { %v2082_v56 = vadd.f32 1.0, %v4620_v51 }
 0x43f   :  { %v5974_v9 = vadd.f32 %v2069_v34, %v2068_v43  ;;  %v6908_v43 = vld [vmem:[#allocation47_spill] sm:$0xff]  ;;  %v6012_v34 = vpop.f32.mrf.mxu0 }
 0x440   :  { %4623 = vrcp.f32 %v2082_v56 }
 0x441   :  { %v2092_v62 = vpack.c.bf16 %v5974_v9, %v5974_v9  ;;  %v2141_v56 = vpop.f32.mrf.mxu0 }
 0x443   :  { %2094 = vst [vmem:[#allocation8 + $0x3] sm:$0x1] %v2092_v62  ;;  %2303 = vmatmul.mubr.bf16.vlgmr.msra.gmra.mxu0 %v2092_v62  ;;  %4265 = vmatmul.mubr.bf16.vlgmr.msra.gmra.mxu1 %v2092_v62  ;;  %v4238_v62 = vpop.f32.mrf.mxu1 }
 0x444   :  { %2352 = vmatpush1.bf16.msra.mxu0 %v5790_v52  ;;  %4269 = vmatpush3.bf16.msra.mxu1 %v5793_v17 }
 0x445   :  { %2353 = vmatprep.subr.bf16.mxu0 %v5796_v63  ;;  %4270 = vmatprep.subr.bf16.mxu1 %v6816_v30 }
 0x446   :  { %2383 = vmatprep.mubr.bf16.mxu0 %v6810_v21  ;;  %4284 = vmatprep.mubr.msk.bf16.mxu1 %vm4921_vm0, %v6816_v30 }
 0x448   :  { %2354 = vmatpush1.bf16.msra.mxu0 %v5803_v37  ;;  %4271 = vmatpush3.bf16.msra.mxu1 %v5806_v44 }
 0x449   :  { %2355 = vmatprep.subr.bf16.mxu0 %v5810_v45  ;;  %4272 = vmatprep.subr.bf16.mxu1 %v6816_v30 }
 0x44a   :  { %v4622_v54 = vpop.eup %4621 }
 0x44b   :  { %v2085_v49 = vmul.f32 %v4622_v54, %v2045_v33  ;;  %v2181_v33 = vpop.f32.mrf.mxu1 }
 0x44c   :  { %2356 = vmatpush1.bf16.msra.mxu0 %v5816_v57  ;;  %4273 = vmatpush3.bf16.msra.mxu1 %v6898_v53 }
 0x44d   :  { %v2086_v46 = vadd.f32 %v2085_v49, %v1883_v59  ;;  %2357 = vmatprep.subr.bf16.mxu0 %v6899_v61  ;;  %4274 = vmatprep.subr.bf16.mxu1 %v6816_v30  ;;  %v4624_v28 = vpop.eup %4623  ;;  %v6909_v59 = vld [vmem:[#allocation48_spill] sm:$0xff]  ;;  %v6910_v49 = vld [vmem:[#allocation49_spill] sm:$0xff] }
 0x44e   :  { %v2088_v51 = vsub.f32 1.0, %v4624_v28 }
 0x44f   :  { %4625 = vtanh.f32 %v2086_v46 }
 0x450   :  { %2358 = vmatpush1.bf16.msra.mxu0 %v6900_v1  ;;  %4275 = vmatpush3.bf16.msra.mxu1 %v6901_v19 }
 0x451   :  { %2359 = vmatprep.subr.bf16.mxu0 %v6902_v50  ;;  %4276 = vmatprep.subr.bf16.mxu1 %v6816_v30 }
 0x454   :  { %2360 = vmatpush1.bf16.msra.mxu0 %v6903_v18  ;;  %4277 = vmatpush3.bf16.msra.mxu1 %v6904_v58 }
 0x455   :  { %2361 = vmatprep.subr.bf16.mxu0 %v6905_v42  ;;  %4278 = vmatprep.subr.bf16.mxu1 %v6816_v30 }
 0x458   :  { %2362 = vmatpush1.bf16.msra.mxu0 %v6906_v0  ;;  %4279 = vmatpush3.bf16.msra.mxu1 %v6907_v12  ;;  %v2142_v12 = vpop.f32.mrf.mxu0  ;;  %v4239_v0 = vpop.f32.mrf.mxu1 }
 0x459   :  { %2363 = vmatprep.subr.bf16.mxu0 %v6908_v43  ;;  %4280 = vmatprep.subr.bf16.mxu1 %v6816_v30  ;;  %v2090_v43 = vmul.f32 %v4624_v28, %v5873_v60 }
 0x45a   :  { %v6021_v62 = vpop.f32.mrf.mxu0  ;;  %v6023_v56 = vpop.f32.mrf.mxu1 }
 0x45c   :  { %v4626_v54 = vpop.eup %4625  ;;  %2364 = vmatpush1.bf16.msra.mxu0 %v6909_v59  ;;  %4281 = vmatpush3.bf16.msra.mxu1 %v6910_v49 }
 0x45d   :  { %2365 = vmatprep.subr.bf16.mxu0 %v5868_v7  ;;  %4282 = vmatprep.subr.bf16.mxu1 %v6816_v30  ;;  %v2089_v46 = vmul.f32 %v4626_v54, %v2088_v51  ;;  %v6029_v7 = vpop.f32.mrf.mxu0  ;;  %v4246_v51 = vpop.f32.mrf.mxu1  ;;  %v6926_v54 = vld [vmem:[#allocation34_spill] sm:$0xff] }
 0x45e   :  { %v6929_v51 = vld [vmem:[#allocation37_spill] sm:$0xff] }
 0x45f   :  { %v6019_v42 = vadd.f32 %v2090_v43, %v2089_v46  ;;  %v2227_v60 = vpop.f32.mrf.mxu0  ;;  %v2267_v28 = vpop.f32.mrf.mxu1  ;;  %v6925_v43 = vld [vmem:[#allocation26_spill] sm:$0xff]  ;;  %v6927_v46 = vld [vmem:[#allocation27_spill] sm:$0xff] }
 0x460   :  { %2366 = vmatpush1.bf16.msra.mxu0 %v5879_v55  ;;  %4283 = vmatpush3.bf16.msra.mxu1 %v5882_v13  ;;  %v6930_v60 = vld [vmem:[#allocation30_spill] sm:$0xff]  ;;  %v6931_v28 = vld [vmem:[#allocation32_spill] sm:$0xff] }
 0x461   :  { %v2095_v33 = vpack.c.bf16 %v6019_v42, %v6019_v42  ;;  %2497 = vmatprep.subr.bf16.mxu0 %v5594_v16  ;;  %4288 = vmatprep.subr.bf16.mxu1 %v6816_v30  ;;  %v2228_v0 = vpop.f32.mrf.mxu0  ;;  %v4247_v12 = vpop.f32.mrf.mxu1  ;;  %v3787_v16 = vld [vmem:[%s6639_s0 + $0x5] sm:$0x1] }
 0x463   :  { %2097 = vst [vmem:[#allocation9 + $0x4] sm:$0x1] %v2095_v33  ;;  %2384 = vmatmul.mubr.bf16.vlgmr.msra.gmra.mxu0 %v2095_v33  ;;  %4285 = vmatmul.mubr.bf16.vlgmr.msra.gmra.mxu1 %v2095_v33  ;;  %v6928_v33 = vld [vmem:[#allocation29_spill] sm:$0xff] }
 0x464   :  { %2498 = vmatpush1.bf16.msra.mxu0 %v5601_v8  ;;  %4289 = vmatpush3.bf16.msra.mxu1 %v5607_v29  ;;  %v3790_v8 = vld [vmem:[%s6640_s1 + $0x2] sm:$0x1]  ;;  %v6911_v29 = vld [vmem:[#allocation43_spill] sm:$0xff] }
 0x465   :  { %2499 = vmatprep.subr.bf16.mxu0 %v5613_v32  ;;  %2517 = vmatprep.mubr.bf16.mxu0 %v6810_v21  ;;  %v6912_v32 = vld [vmem:[#allocation15_spill] sm:$0xff] }
 0x466   :  { %4290 = vmatprep.subr.bf16.mxu1 %v6816_v30  ;;  %4292 = vmatprep.mubr.msk.bf16.mxu1 %vm4921_vm0, %v6816_v30 }
 0x468   :  { %2500 = vmatpush1.bf16.msra.mxu0 %v5623_v2  ;;  %4291 = vmatpush3.bf16.msra.mxu1 %v5629_v23  ;;  %v6913_v2 = vld [vmem:[#allocation16_spill] sm:$0xff]  ;;  %v6914_v23 = vld [vmem:[#allocation22_spill] sm:$0xff] }
 0x469   :  { %2583 = vmatprep.subr.bf16.mxu0 %v5635_v3  ;;  %4296 = vmatprep.subr.bf16.mxu1 %v6816_v30  ;;  %v6915_v3 = vld [vmem:[#allocation17_spill] sm:$0xff] }
 0x46b   :  { %3788 = vmatmul.mubr.msk.bf16.vlgmr.msra.gmra.mxu0 %vm282_vm1, %v3787_v16  ;;  %4293 = vmatmul.mubr.msk.bf16.vlgmr.msra.gmra.mxu1 %vm282_vm1, %v3787_v16  ;;  %v6932_v16 = vld [vmem:[#allocation44_spill] sm:$0xff] }
 0x46c   :  { %2584 = vmatpush1.bf16.msra.mxu0 %v5647_v4  ;;  %4297 = vmatpush3.bf16.msra.mxu1 %v5653_v14  ;;  %v6916_v4 = vld [vmem:[#allocation18_spill] sm:$0xff]  ;;  %v6917_v14 = vld [vmem:[#allocation25_spill] sm:$0xff] }
 0x46d   :  { %2585 = vmatprep.subr.bf16.mxu0 %v5659_v5  ;;  %2603 = vmatprep.mubr.bf16.mxu0 %v6810_v21  ;;  %v6918_v5 = vld [vmem:[#allocation19_spill] sm:$0xff] }
 0x46e   :  { %4298 = vmatprep.subr.bf16.mxu1 %v6816_v30  ;;  %4300 = vmatprep.mubr.msk.bf16.mxu1 %vm4921_vm0, %v6816_v30 }
 0x470   :  { %2586 = vmatpush1.bf16.msra.mxu0 %v5669_v6  ;;  %4299 = vmatpush3.bf16.msra.mxu1 %v5675_v22  ;;  %v6919_v6 = vld [vmem:[#allocation20_spill] sm:$0xff] }
 0x471   :  { %2652 = vmatprep.subr.bf16.mxu0 %v5678_v11  ;;  %4304 = vmatprep.subr.bf16.mxu1 %v6816_v30  ;;  %v6920_v22 = vld [vmem:[#allocation28_spill] sm:$0xff]  ;;  %v6921_v11 = vld [vmem:[#allocation21_spill] sm:$0xff] }
 0x473   :  { %3791 = vmatmul.mubr.msk.bf16.vlgmr.msra.gmra.mxu0 %vm282_vm1, %v3790_v8  ;;  %4301 = vmatmul.mubr.msk.bf16.vlgmr.msra.gmra.mxu1 %vm282_vm1, %v3790_v8  ;;  %v2138_v8 = vadd.f32 %v6004_v48, %v6932_v16 }
 0x474   :  { %2653 = vmatpush1.bf16.msra.mxu0 %v5687_v25  ;;  %4305 = vmatpush3.bf16.msra.mxu1 %v5690_v35  ;;  %v6922_v25 = vld [vmem:[#allocation23_spill] sm:$0xff] }
 0x475   :  { %2654 = vmatprep.subr.bf16.mxu0 %v5693_v26  ;;  %4306 = vmatprep.subr.bf16.mxu1 %v6816_v30  ;;  %v6923_v35 = vld [vmem:[#allocation31_spill] sm:$0xff]  ;;  %v6924_v26 = vld [vmem:[#allocation24_spill] sm:$0xff] }
 0x476   :  { %2684 = vmatprep.mubr.bf16.mxu0 %v6810_v21  ;;  %4320 = vmatprep.mubr.msk.bf16.mxu1 %vm4921_vm0, %v6816_v30 }
 0x478   :  { %2655 = vmatpush1.bf16.msra.mxu0 %v6911_v29  ;;  %4307 = vmatpush3.bf16.msra.mxu1 %v6912_v32 }
 0x479   :  { %2656 = vmatprep.subr.bf16.mxu0 %v6913_v2  ;;  %4308 = vmatprep.subr.bf16.mxu1 %v6816_v30 }
 0x47c   :  { %2657 = vmatpush1.bf16.msra.mxu0 %v6914_v23  ;;  %4309 = vmatpush3.bf16.msra.mxu1 %v6915_v3 }
 0x47d   :  { %2658 = vmatprep.subr.bf16.mxu0 %v6916_v4  ;;  %4310 = vmatprep.subr.bf16.mxu1 %v6816_v30 }
 0x480   :  { %2659 = vmatpush1.bf16.msra.mxu0 %v6917_v14  ;;  %4311 = vmatpush3.bf16.msra.mxu1 %v6918_v5 }
 0x481   :  { %2660 = vmatprep.subr.bf16.mxu0 %v6919_v6  ;;  %4312 = vmatprep.subr.bf16.mxu1 %v6816_v30 }
 0x484   :  { %2661 = vmatpush1.bf16.msra.mxu0 %v6920_v22  ;;  %4313 = vmatpush3.bf16.msra.mxu1 %v6921_v11  ;;  %v2140_v11 = vadd.f32 %v6012_v34, %v6849_v20 }
 0x485   :  { %2662 = vmatprep.subr.bf16.mxu0 %v6922_v25  ;;  %4314 = vmatprep.subr.bf16.mxu1 %v6816_v30 }
 0x488   :  { %2663 = vmatpush1.bf16.msra.mxu0 %v6923_v35  ;;  %4315 = vmatpush3.bf16.msra.mxu1 %v6924_v26 }
 0x489   :  { %2664 = vmatprep.subr.bf16.mxu0 %v6925_v43  ;;  %4316 = vmatprep.subr.bf16.mxu1 %v6816_v30 }
 0x48c   :  { %2665 = vmatpush1.bf16.msra.mxu0 %v6926_v54  ;;  %4317 = vmatpush3.bf16.msra.mxu1 %v6927_v46 }
 0x48d   :  { %2666 = vmatprep.subr.bf16.mxu0 %v6928_v33  ;;  %4318 = vmatprep.subr.bf16.mxu1 %v6816_v30  ;;  %v2224_v33 = vadd.f32 %v6021_v62, %v5368_v27 }
 0x490   :  { %2667 = vmatpush1.bf16.msra.mxu0 %v6929_v51  ;;  %4319 = vmatpush3.bf16.msra.mxu1 %v6930_v60 }
 0x491   :  { %2733 = vmatprep.subr.bf16.mxu0 %v6931_v28  ;;  %4324 = vmatprep.subr.bf16.mxu1 %v6816_v30 }
 0x503   :  { %v2304_v0 = vpop.f32.mrf.mxu0  ;;  %v2345_v12 = vpop.f32.mrf.mxu1 }
 0x504   :  { %v2305_v29 = vadd.f32 %v2304_v0, %v6847_v39  ;;  %v2346_v34 = vadd.f32 %v2345_v12, %v6850_v36 }
 0x505   :  { %v2306_v32 = vpop.f32.mrf.mxu0  ;;  %v4266_v2 = vpop.f32.mrf.mxu1 }
 0x506   :  { %v2432_v23 = vadd.f32 %v2305_v29, %v2138_v8  ;;  %v2307_v5 = vadd.f32 %v2306_v32, %v6848_v31  ;;  %v2179_v32 = vadd.f32 %v6006_v41, %v5374_v24 }
 0x507   :  { %v2308_v3 = vpop.f32.mrf.mxu0  ;;  %v2348_v4 = vpop.f32.mrf.mxu1 }
 0x508   :  { %v3783_v14 = vmul.f32 -1.442695, %v2432_v23  ;;  %v2439_v25 = vadd.f32 %v2307_v5, %v2140_v11 }
 0x509   :  { %v2309_v6 = vpop.f32.mrf.mxu0  ;;  %v4267_v22 = vpop.f32.mrf.mxu1 }
 0x50a   :  { %4627 = vpow2.f32 %v3783_v14  ;;  %v3784_v35 = vmul.f32 -1.442695, %v2439_v25  ;;  %v2226_v6 = vadd.f32 %v6029_v7, %v5381_v40 }
 0x50c   :  { %4629 = vpow2.f32 %v3784_v35 }
 0x517   :  { %v4628_v48 = vpop.eup %4627 }
 0x518   :  { %v2436_v26 = vadd.f32 1.0, %v4628_v48 }
 0x519   :  { %v4630_v43 = vpop.eup %4629 }
 0x51a   :  { %4631 = vrcp.f32 %v2436_v26  ;;  %v2443_v51 = vadd.f32 1.0, %v4630_v43 }
 0x51c   :  { %4633 = vrcp.f32 %v2443_v51 }
 0x523   :  { %v2385_v54 = vpop.f32.mrf.mxu0  ;;  %v2426_v46 = vpop.f32.mrf.mxu1 }
 0x524   :  { %v2386_v60 = vadd.f32 %v2385_v54, %v5372_v15 }
 0x525   :  { %v2387_v28 = vpop.f32.mrf.mxu0  ;;  %v4286_v0 = vpop.f32.mrf.mxu1 }
 0x526   :  { %v2453_v8 = vadd.f32 %v2386_v60, %v2224_v33  ;;  %v2388_v14 = vadd.f32 %v2387_v28, %v5376_v10  ;;  %v2427_v60 = vadd.f32 %v2426_v46, %v5392_v47  ;;  %v6937_v0 = vld [vmem:[#allocation50_spill] sm:$0xff] }
 0x527   :  { %v4632_v29 = vpop.eup %4631  ;;  %v2389_v2 = vpop.f32.mrf.mxu0 }
 0x528   :  { %v2429_v23 = vpop.f32.mrf.mxu1  ;;  %v2446_v3 = vmul.f32 %v4632_v29, %v2346_v34  ;;  %v3785_v4 = vmul.f32 -1.442695, %v2453_v8  ;;  %v2460_v12 = vadd.f32 %v2388_v14, %v2226_v6  ;;  %v6183_v14 = vld [vmem:[%s6642_s3 + $0x18] ss:$12 sps:$4 sm:$0xff]  }
 0x529   :  { %v2390_v62 = vpop.f32.mrf.mxu0  ;;  %v4634_v25 = vpop.eup %4633 }
 0x52a   :  { %v4287_v5 = vpop.f32.mrf.mxu1  ;;  %v2447_v22 = vadd.f32 %v2446_v3, %v2179_v32  ;;  %4635 = vpow2.f32 %v3785_v4  ;;  %v3786_v11 = vmul.f32 -1.442695, %v2460_v12  ;;  %v2449_v48 = vsub.f32 1.0, %v4634_v25  ;;  %v6189_v62 = vld [vmem:[%s6642_s3 + $0x20] ss:$12 sps:$4 sm:$0xff]  }
 0x52b   :  { %v2451_v54 = vmul.f32 %v4634_v25, %v5974_v9  ;;  %v6205_v12 = vld [vmem:[%s6642_s3] ss:$12 sps:$4 sm:$0xff]   ;;  %v6217_v25 = vld [vmem:[%s6643_s4 + $0x1c] ss:$12 sps:$4 sm:$0xff]  }
 0x52c   :  { %4637 = vtanh.f32 %v2447_v22  ;;  %v6195_v22 = vld [vmem:[%s6642_s3 + $0x4] ss:$12 sps:$4 sm:$0xff]  }
 0x52d   :  { %4639 = vpow2.f32 %v3786_v11  ;;  %v6211_v11 = vld [vmem:[%s6642_s3 + $0x8] ss:$12 sps:$4 sm:$0xff]  }
 0x537   :  { %v4636_v41 = vpop.eup %4635 }
 0x538   :  { %v2457_v35 = vadd.f32 1.0, %v4636_v41  ;;  %v3797_v41 = vld [vmem:[%s6639_s0 + $0x6] sm:$0x1] }
 0x539   :  { %v4638_v26 = vpop.eup %4637 }
 0x53a   :  { %4641 = vrcp.f32 %v2457_v35  ;;  %v2450_v43 = vmul.f32 %v4638_v26, %v2449_v48  ;;  %v4640_v51 = vpop.eup %4639  ;;  %v6229_v35 = vld [vmem:[%s6643_s4 + $0x18] ss:$12 sps:$4 sm:$0xff]   ;;  %v6235_v48 = vld [vmem:[%s6643_s4 + $0x20] ss:$12 sps:$4 sm:$0xff]  }
 0x53b   :  { %v2464_v9 = vadd.f32 1.0, %v4640_v51  ;;  %v6241_v26 = vld [vmem:[%s6643_s4 + $0x4] ss:$12 sps:$4 sm:$0xff]   ;;  %v3800_v51 = vld [vmem:[%s6640_s1 + $0x1] sm:$0x1] }
 0x53c   :  { %v6116_v33 = vadd.f32 %v2451_v54, %v2450_v43  ;;  %v6251_v43 = vld [vmem:[%s6643_s4] ss:$12 sps:$4 sm:$0xff]   ;;  %v6257_v54 = vld [vmem:[%s6643_s4 + $0x8] ss:$12 sps:$4 sm:$0xff]  }
 0x53d   :  { %4643 = vrcp.f32 %v2464_v9  ;;  %v6269_v9 = vld [vmem:[#allocation3 + $0xa8] ss:$12 sps:$4 sm:$0xff]  }
 0x53e   :  { %v2474_v7 = vpack.c.bf16 %v6116_v33, %v6116_v33 }
 0x540   :  { %2476 = vst [vmem:[#allocation8 + $0x4] sm:$0x1] %v2474_v7  ;;  %2685 = vmatmul.mubr.bf16.vlgmr.msra.gmra.mxu0 %v2474_v7  ;;  %4321 = vmatmul.mubr.bf16.vlgmr.msra.gmra.mxu1 %v2474_v7  ;;  %v6260_v7 = vld [vmem:[#allocation3 + $0xac] ss:$12 sps:$4 sm:$0xff]  }
 0x541   :  { %2734 = vmatpush1.bf16.msra.mxu0 %v5790_v52  ;;  %4325 = vmatpush3.bf16.msra.mxu1 %v5793_v17  ;;  %v2265_v17 = vadd.f32 %v6023_v56, %v5401_v38 }
 0x542   :  { %2735 = vmatprep.subr.bf16.mxu0 %v5796_v63  ;;  %4326 = vmatprep.subr.bf16.mxu1 %v6816_v30 }
 0x543   :  { %2765 = vmatprep.mubr.bf16.mxu0 %v6810_v21  ;;  %4340 = vmatprep.mubr.msk.bf16.mxu1 %vm4921_vm0, %v6816_v30 }
 0x545   :  { %2736 = vmatpush1.bf16.msra.mxu0 %v5803_v37  ;;  %4327 = vmatpush3.bf16.msra.mxu1 %v5806_v44  ;;  %v6933_v37 = vld [vmem:[#allocation39_spill] sm:$0xff]  ;;  %v6146_v44 = vpop.f32.mrf.mxu0 }
 0x546   :  { %2737 = vmatprep.subr.bf16.mxu0 %v5810_v45  ;;  %4328 = vmatprep.subr.bf16.mxu1 %v6816_v30  ;;  %v6148_v45 = vpop.f32.mrf.mxu1 }
 0x547   :  { %v4642_v52 = vpop.eup %4641 }
 0x548   :  { %v2467_v63 = vmul.f32 %v4642_v52, %v2427_v60  ;;  %v6272_v60 = vld [vmem:[#allocation3 + $0xb0] ss:$12 sps:$4 sm:$0xff]   ;;  %v6275_v52 = vld [vmem:[#allocation3 + $0x94] ss:$12 sps:$4 sm:$0xff]  }
 0x549   :  { %2738 = vmatpush1.bf16.msra.mxu0 %v5816_v57  ;;  %4329 = vmatpush3.bf16.msra.mxu1 %v6898_v53  ;;  %v6934_v53 = vld [vmem:[#allocation45_spill] sm:$0xff] }
 0x54a   :  { %v2468_v28 = vadd.f32 %v2467_v63, %v2265_v17  ;;  %2739 = vmatprep.subr.bf16.mxu0 %v6899_v61  ;;  %4330 = vmatprep.subr.bf16.mxu1 %v6816_v30  ;;  %v4644_v57 = vpop.eup %4643  ;;  %v6935_v61 = vld [vmem:[#allocation46_spill] sm:$0xff]  ;;  %v6282_v17 = vld [vmem:[#allocation3 + $0x90] ss:$12 sps:$4 sm:$0xff]   ;;  %v6285_v63 = vld [vmem:[#allocation3 + $0x98] ss:$12 sps:$4 sm:$0xff]  }
 0x54b   :  { %v2472_v8 = vmul.f32 %v4644_v57, %v6019_v42  ;;  %v6176_v42 = vld [vmem:[%s6642_s3 + $0x1c] ss:$12 sps:$4 sm:$0xff]  }
 0x54c   :  { %4645 = vtanh.f32 %v2468_v28  ;;  %v6288_v28 = vld [vmem:[#allocation3 + $0x7c] ss:$12 sps:$4 sm:$0xff]  }
 0x54d   :  { %2740 = vmatpush1.bf16.msra.mxu0 %v6900_v1  ;;  %4331 = vmatpush3.bf16.msra.mxu1 %v6901_v19  ;;  %v6936_v1 = vld [vmem:[#allocation47_spill] sm:$0xff]  ;;  %v6154_v19 = vpop.f32.mrf.mxu0 }
 0x54e   :  { %2741 = vmatprep.subr.bf16.mxu0 %v6902_v50  ;;  %4332 = vmatprep.subr.bf16.mxu1 %v6816_v30  ;;  %v4294_v50 = vpop.f32.mrf.mxu1 }
 0x54f   :  { %v6308_v50 = vld [vmem:[#allocation3 + $0x4c] ss:$12 sps:$4 sm:$0xff]  }
 0x550   :  { %v2563_v56 = vpop.f32.mrf.mxu1 }
 0x551   :  { %2742 = vmatpush1.bf16.msra.mxu0 %v6903_v18  ;;  %4333 = vmatpush3.bf16.msra.mxu1 %v6904_v58  ;;  %v2470_v18 = vsub.f32 1.0, %v4644_v57  ;;  %v2523_v58 = vpop.f32.mrf.mxu0  ;;  %v6295_v57 = vld [vmem:[#allocation3 + $0x80] ss:$12 sps:$4 sm:$0xff]  }
 0x552   :  { %2743 = vmatprep.subr.bf16.mxu0 %v6933_v37  ;;  %4334 = vmatprep.subr.bf16.mxu1 %v6816_v30  ;;  %v4295_v32 = vpop.f32.mrf.mxu1  ;;  %v6292_v37 = vld [vmem:[#allocation3 + $0x78] ss:$12 sps:$4 sm:$0xff]   ;;  %v6315_v58 = vld [vmem:[#allocation3 + $0x50] ss:$12 sps:$4 sm:$0xff]   ;;  %v6318_v56 = vld [vmem:[#allocation3 + $0x34] ss:$12 sps:$4 sm:$0xff]  }
 0x553   :  { %v2524_v29 = vpop.f32.mrf.mxu0  ;;  %6938 = vst [vmem:[#allocation40_spill] sm:$0xff] %v6315_v58  ;;  %6939 = vst [vmem:[#allocation33_spill] sm:$0xff] %v6318_v56  ;;  %v6338_v32 = vld [vmem:[#allocation3 + $0x4] ss:$12 sps:$4 sm:$0xff]  }
 0x554   :  { %v6165_v3 = vpop.f32.mrf.mxu1  ;;  %v6335_v29 = vld [vmem:[#allocation3 + $0x20] ss:$12 sps:$4 sm:$0xff]   ;;  %6945 = vst [vmem:[#allocation48_spill] sm:$0xff] %v6338_v32 }
 0x555   :  { %2744 = vmatpush1.bf16.msra.mxu0 %v6934_v53  ;;  %4335 = vmatpush3.bf16.msra.mxu1 %v6935_v61  ;;  %v6163_v23 = vpop.f32.mrf.mxu0  ;;  %v6298_v53 = vld [vmem:[#allocation3 + $0x64] ss:$12 sps:$4 sm:$0xff]   ;;  %v6302_v61 = vld [vmem:[#allocation3 + $0x60] ss:$12 sps:$4 sm:$0xff]   ;;  %6944 = vst [vmem:[#allocation42_spill] sm:$0xff] %v6335_v29 }
 0x556   :  { %2745 = vmatprep.subr.bf16.mxu0 %v6936_v1  ;;  %4336 = vmatprep.subr.bf16.mxu1 %v6816_v30  ;;  %v4302_v4 = vpop.f32.mrf.mxu1  ;;  %v6305_v1 = vld [vmem:[#allocation3 + $0x68] ss:$12 sps:$4 sm:$0xff]  }
 0x557   :  { %v6345_v4 = vld [vmem:[#allocation3 + $0x8] ss:$12 sps:$4 sm:$0xff]  }
 0x558   :  { %6947 = vst [vmem:[#allocation43_spill] sm:$0xff] %v6345_v4 }
 0x559   :  { %v4646_v46 = vpop.eup %4645  ;;  %2746 = vmatpush1.bf16.msra.mxu0 %v6909_v59  ;;  %4337 = vmatpush3.bf16.msra.mxu1 %v6910_v49  ;;  %v6171_v49 = vpop.f32.mrf.mxu0 }
 0x55a   :  { %2747 = vmatprep.subr.bf16.mxu0 %v6937_v0  ;;  %4338 = vmatprep.subr.bf16.mxu1 %v6816_v30  ;;  %v2471_v34 = vmul.f32 %v4646_v46, %v2470_v18  ;;  %v6312_v18 = vld [vmem:[#allocation3 + $0x48] ss:$12 sps:$4 sm:$0xff]   ;;  %v6322_v46 = vld [vmem:[#allocation3 + $0x30] ss:$12 sps:$4 sm:$0xff]   ;;  %v6325_v0 = vld [vmem:[#allocation3 + $0x38] ss:$12 sps:$4 sm:$0xff]  }
 0x55b   :  { %6940 = vst [vmem:[#allocation35_spill] sm:$0xff] %v6322_v46  ;;  %6941 = vst [vmem:[#allocation41_spill] sm:$0xff] %v6325_v0 }
 0x55c   :  { %v6161_v2 = vadd.f32 %v2472_v8, %v2471_v34  ;;  %v6328_v34 = vld [vmem:[#allocation3 + $0x1c] ss:$12 sps:$4 sm:$0xff]   ;;  %v6332_v8 = vld [vmem:[#allocation3 + $0x18] ss:$12 sps:$4 sm:$0xff]  }
 0x55d   :  { %2748 = vmatpush1.bf16.msra.mxu0 %v5879_v55  ;;  %4339 = vmatpush3.bf16.msra.mxu1 %v5882_v13  ;;  %v2609_v55 = vpop.f32.mrf.mxu0  ;;  %v2649_v13 = vpop.f32.mrf.mxu1  ;;  %6942 = vst [vmem:[#allocation36_spill] sm:$0xff] %v6328_v34  ;;  %6943 = vst [vmem:[#allocation38_spill] sm:$0xff] %v6332_v8 }
 0x55e   :  { %v2477_v59 = vpack.c.bf16 %v6161_v2, %v6161_v2  ;;  %2879 = vmatprep.subr.bf16.mxu0 %v6176_v42  ;;  %4344 = vmatprep.subr.bf16.mxu1 %v6816_v30  ;;  %v6348_v55 = vld [vmem:[#allocation6 + $0xac] ss:$12 sps:$4 sm:$0xff]  }
 0x55f   :  { %v2610_v5 = vpop.f32.mrf.mxu0  ;;  %v4303_v6 = vpop.f32.mrf.mxu1  ;;  %6948 = vst [vmem:[#allocation15_spill] sm:$0xff] %v6348_v55 }
 0x560   :  { %2479 = vst [vmem:[#allocation9 + $0x3] sm:$0x1] %v2477_v59  ;;  %2766 = vmatmul.mubr.bf16.vlgmr.msra.gmra.mxu0 %v2477_v59  ;;  %4341 = vmatmul.mubr.bf16.vlgmr.msra.gmra.mxu1 %v2477_v59  ;;  %v6342_v59 = vld [vmem:[#allocation3] ss:$12 sps:$4 sm:$0xff]   ;;  %v2520_v6 = vadd.f32 %v6146_v44, %v6932_v16 }
 0x561   :  { %2880 = vmatpush1.bf16.msra.mxu0 %v6183_v14  ;;  %4345 = vmatpush3.bf16.msra.mxu1 %v6189_v62  ;;  %6946 = vst [vmem:[#allocation49_spill] sm:$0xff] %v6342_v59 }
 0x562   :  { %2881 = vmatprep.subr.bf16.mxu0 %v6195_v22  ;;  %2899 = vmatprep.mubr.bf16.mxu0 %v6810_v21 }
 0x563   :  { %4346 = vmatprep.subr.bf16.mxu1 %v6816_v30  ;;  %4348 = vmatprep.mubr.msk.bf16.mxu1 %vm4921_vm0, %v6816_v30 }
 0x565   :  { %2882 = vmatpush1.bf16.msra.mxu0 %v6205_v12  ;;  %4347 = vmatpush3.bf16.msra.mxu1 %v6211_v11 }
 0x566   :  { %2965 = vmatprep.subr.bf16.mxu0 %v6217_v25  ;;  %4352 = vmatprep.subr.bf16.mxu1 %v6816_v30 }
 0x568   :  { %3798 = vmatmul.mubr.msk.bf16.vlgmr.msra.gmra.mxu0 %vm282_vm1, %v3797_v41  ;;  %4349 = vmatmul.mubr.msk.bf16.vlgmr.msra.gmra.mxu1 %vm282_vm1, %v3797_v41 }
 0x569   :  { %2966 = vmatpush1.bf16.msra.mxu0 %v6229_v35  ;;  %4353 = vmatpush3.bf16.msra.mxu1 %v6235_v48 }
 0x56a   :  { %2967 = vmatprep.subr.bf16.mxu0 %v6241_v26  ;;  %2985 = vmatprep.mubr.bf16.mxu0 %v6810_v21 }
 0x56b   :  { %4354 = vmatprep.subr.bf16.mxu1 %v6816_v30  ;;  %4356 = vmatprep.mubr.msk.bf16.mxu1 %vm4921_vm0, %v6816_v30 }
 0x56d   :  { %2968 = vmatpush1.bf16.msra.mxu0 %v6251_v43  ;;  %4355 = vmatpush3.bf16.msra.mxu1 %v6257_v54 }
 0x56e   :  { %3034 = vmatprep.subr.bf16.mxu0 %v6260_v7  ;;  %4360 = vmatprep.subr.bf16.mxu1 %v6816_v30 }
 0x570   :  { %3801 = vmatmul.mubr.msk.bf16.vlgmr.msra.gmra.mxu0 %vm282_vm1, %v3800_v51  ;;  %4357 = vmatmul.mubr.msk.bf16.vlgmr.msra.gmra.mxu1 %vm282_vm1, %v3800_v51 }
 0x571   :  { %3035 = vmatpush1.bf16.msra.mxu0 %v6269_v9  ;;  %4361 = vmatpush3.bf16.msra.mxu1 %v6272_v60 }
 0x572   :  { %3036 = vmatprep.subr.bf16.mxu0 %v6275_v52  ;;  %4362 = vmatprep.subr.bf16.mxu1 %v6816_v30 }
 0x573   :  { %3066 = vmatprep.mubr.bf16.mxu0 %v6810_v21  ;;  %4376 = vmatprep.mubr.msk.bf16.mxu1 %vm4921_vm0, %v6816_v30 }
 0x575   :  { %3037 = vmatpush1.bf16.msra.mxu0 %v6282_v17  ;;  %4363 = vmatpush3.bf16.msra.mxu1 %v6285_v63 }
 0x576   :  { %3038 = vmatprep.subr.bf16.mxu0 %v6288_v28  ;;  %4364 = vmatprep.subr.bf16.mxu1 %v6816_v30 }
 0x579   :  { %3039 = vmatpush1.bf16.msra.mxu0 %v6292_v37  ;;  %4365 = vmatpush3.bf16.msra.mxu1 %v6295_v57 }
 0x57a   :  { %3040 = vmatprep.subr.bf16.mxu0 %v6298_v53  ;;  %4366 = vmatprep.subr.bf16.mxu1 %v6816_v30 }
 0x57d   :  { %3041 = vmatpush1.bf16.msra.mxu0 %v6302_v61  ;;  %4367 = vmatpush3.bf16.msra.mxu1 %v6305_v1 }
 0x57e   :  { %3042 = vmatprep.subr.bf16.mxu0 %v6308_v50  ;;  %4368 = vmatprep.subr.bf16.mxu1 %v6816_v30 }
 0x581   :  { %3043 = vmatpush1.bf16.msra.mxu0 %v6312_v18  ;;  %4369 = vmatpush3.bf16.msra.mxu1 %v6315_v58 }
 0x582   :  { %3044 = vmatprep.subr.bf16.mxu0 %v6318_v56  ;;  %4370 = vmatprep.subr.bf16.mxu1 %v6816_v30 }
 0x585   :  { %3045 = vmatpush1.bf16.msra.mxu0 %v6322_v46  ;;  %4371 = vmatpush3.bf16.msra.mxu1 %v6325_v0 }
 0x586   :  { %3046 = vmatprep.subr.bf16.mxu0 %v6328_v34  ;;  %4372 = vmatprep.subr.bf16.mxu1 %v6816_v30 }
 0x589   :  { %3047 = vmatpush1.bf16.msra.mxu0 %v6332_v8  ;;  %4373 = vmatpush3.bf16.msra.mxu1 %v6335_v29 }
 0x58a   :  { %3048 = vmatprep.subr.bf16.mxu0 %v6338_v32  ;;  %4374 = vmatprep.subr.bf16.mxu1 %v6816_v30 }
 0x58d   :  { %3049 = vmatpush1.bf16.msra.mxu0 %v6342_v59  ;;  %4375 = vmatpush3.bf16.msra.mxu1 %v6345_v4 }
 0x58e   :  { %3115 = vmatprep.subr.bf16.mxu0 %v6348_v55  ;;  %4380 = vmatprep.subr.bf16.mxu1 %v6816_v30  ;;  %v2522_v55 = vadd.f32 %v6154_v19, %v6849_v20 }
 0x600   :  { %v2686_v13 = vpop.f32.mrf.mxu0  ;;  %v2727_v5 = vpop.f32.mrf.mxu1 }
 0x601   :  { %v2687_v41 = vadd.f32 %v2686_v13, %v6847_v39  ;;  %v2728_v19 = vadd.f32 %v2727_v5, %v6850_v36 }
 0x602   :  { %v2688_v51 = vpop.f32.mrf.mxu0  ;;  %v4322_v32 = vpop.f32.mrf.mxu1 }
 0x603   :  { %v2814_v59 = vadd.f32 %v2687_v41, %v2520_v6  ;;  %v2689_v4 = vadd.f32 %v2688_v51, %v6848_v31 }
 0x604   :  { %v2690_v29 = vpop.f32.mrf.mxu0  ;;  %v2730_v8 = vpop.f32.mrf.mxu1 }
 0x605   :  { %v3793_v34 = vmul.f32 -1.442695, %v2814_v59  ;;  %v2821_v56 = vadd.f32 %v2689_v4, %v2522_v55  ;;  %v2606_v8 = vadd.f32 %v6163_v23, %v5368_v27 }
 0x606   :  { %v2691_v0 = vpop.f32.mrf.mxu0  ;;  %v4323_v46 = vpop.f32.mrf.mxu1 }
 0x607   :  { %4647 = vpow2.f32 %v3793_v34  ;;  %v3794_v58 = vmul.f32 -1.442695, %v2821_v56 }
 0x609   :  { %4649 = vpow2.f32 %v3794_v58  ;;  %v2561_v58 = vadd.f32 %v6148_v45, %v5374_v24 }
 0x614   :  { %v4648_v44 = vpop.eup %4647 }
 0x615   :  { %v2818_v16 = vadd.f32 1.0, %v4648_v44 }
 0x616   :  { %v4650_v13 = vpop.eup %4649 }
 0x617   :  { %4651 = vrcp.f32 %v2818_v16  ;;  %v2825_v29 = vadd.f32 1.0, %v4650_v13  ;;  %v2608_v13 = vadd.f32 %v6171_v49, %v5381_v40 }
 0x619   :  { %4653 = vrcp.f32 %v2825_v29 }
 0x620   :  { %v2767_v32 = vpop.f32.mrf.mxu0  ;;  %v2808_v6 = vpop.f32.mrf.mxu1 }
 0x621   :  { %v2768_v0 = vadd.f32 %v2767_v32, %v5372_v15 }
 0x622   :  { %v2769_v46 = vpop.f32.mrf.mxu0  ;;  %v4342_v59 = vpop.f32.mrf.mxu1 }
 0x623   :  { %v2835_v34 = vadd.f32 %v2768_v0, %v2606_v8  ;;  %v2770_v51 = vadd.f32 %v2769_v46, %v5376_v10 }
 0x624   :  { %v4652_v4 = vpop.eup %4651  ;;  %v2771_v56 = vpop.f32.mrf.mxu0 }
 0x625   :  { %v2811_v16 = vpop.f32.mrf.mxu1  ;;  %v2828_v55 = vmul.f32 %v4652_v4, %v2728_v19  ;;  %v3795_v41 = vmul.f32 -1.442695, %v2835_v34  ;;  %v2842_v5 = vadd.f32 %v2770_v51, %v2608_v13  ;;  %v6388_v51 = vld [vmem:[#allocation6 + $0x98] ss:$12 sps:$4 sm:$0xff]  }
 0x626   :  { %v2772_v23 = vpop.f32.mrf.mxu0  ;;  %v4654_v0 = vpop.eup %4653  ;;  %v6375_v16 = vld [vmem:[#allocation6 + $0xb0] ss:$12 sps:$4 sm:$0xff]  }
 0x627   :  { %v4343_v44 = vpop.f32.mrf.mxu1  ;;  %v2829_v32 = vadd.f32 %v2828_v55, %v2561_v58  ;;  %4655 = vpow2.f32 %v3795_v41  ;;  %v3796_v8 = vmul.f32 -1.442695, %v2842_v5  ;;  %v2831_v56 = vsub.f32 1.0, %v4654_v0  ;;  %v6372_v58 = vld [vmem:[#allocation6 + $0xa8] ss:$12 sps:$4 sm:$0xff]  }
 0x628   :  { %v2833_v46 = vmul.f32 %v4654_v0, %v6116_v33  ;;  %v6378_v55 = vld [vmem:[#allocation6 + $0x94] ss:$12 sps:$4 sm:$0xff]   ;;  %v6385_v41 = vld [vmem:[#allocation6 + $0x90] ss:$12 sps:$4 sm:$0xff]   ;;  %v2809_v23 = vadd.f32 %v2808_v6, %v5392_v47 }
 0x629   :  { %4657 = vtanh.f32 %v2829_v32  ;;  %v6392_v44 = vld [vmem:[#allocation6 + $0x7c] ss:$12 sps:$4 sm:$0xff]   ;;  %v2647_v32 = vadd.f32 %v6165_v3, %v5401_v38  ;;  %v6401_v0 = vld [vmem:[#allocation6 + $0x80] ss:$12 sps:$4 sm:$0xff]  }
 0x62a   :  { %4659 = vpow2.f32 %v3796_v8  ;;  %v6398_v8 = vld [vmem:[#allocation6 + $0x78] ss:$12 sps:$4 sm:$0xff]   ;;  %6949 = vst [vmem:[#allocation16_spill] sm:$0xff] %v6401_v0  ;;  %v6411_v3 = vld [vmem:[#allocation6 + $0x68] ss:$12 sps:$4 sm:$0xff]  }
 0x62b   :  { %6952 = vst [vmem:[#allocation18_spill] sm:$0xff] %v6411_v3 }
 0x634   :  { %v4656_v45 = vpop.eup %4655 }
 0x635   :  { %v2839_v59 = vadd.f32 1.0, %v4656_v45  ;;  %v6404_v45 = vld [vmem:[#allocation6 + $0x64] ss:$12 sps:$4 sm:$0xff]  }
 0x636   :  { %v4658_v19 = vpop.eup %4657  ;;  %6950 = vst [vmem:[#allocation22_spill] sm:$0xff] %v6404_v45 }
 0x637   :  { %4661 = vrcp.f32 %v2839_v59  ;;  %v2832_v29 = vmul.f32 %v4658_v19, %v2831_v56  ;;  %v4660_v4 = vpop.eup %4659  ;;  %v6408_v59 = vld [vmem:[#allocation6 + $0x60] ss:$12 sps:$4 sm:$0xff]   ;;  %v6418_v19 = vld [vmem:[#allocation6 + $0x48] ss:$12 sps:$4 sm:$0xff]  }
 0x638   :  { %v2846_v33 = vadd.f32 1.0, %v4660_v4  ;;  %6951 = vst [vmem:[#allocation17_spill] sm:$0xff] %v6408_v59  ;;  %v6414_v56 = vld [vmem:[#allocation6 + $0x4c] ss:$12 sps:$4 sm:$0xff]   ;;  %6954 = vst [vmem:[#allocation19_spill] sm:$0xff] %v6418_v19  ;;  %v6430_v4 = vpop.f32.mrf.mxu1 }
 0x639   :  { %v6368_v34 = vadd.f32 %v2833_v46, %v2832_v29  ;;  %6953 = vst [vmem:[#allocation25_spill] sm:$0xff] %v6414_v56  ;;  %v6421_v29 = vld [vmem:[#allocation6 + $0x50] ss:$12 sps:$4 sm:$0xff]   ;;  %v6424_v46 = vld [vmem:[#allocation6 + $0x34] ss:$12 sps:$4 sm:$0xff]  }
 0x63a   :  { %4663 = vrcp.f32 %v2846_v33  ;;  %6955 = vst [vmem:[#allocation20_spill] sm:$0xff] %v6421_v29  ;;  %6956 = vst [vmem:[#allocation28_spill] sm:$0xff] %v6424_v46 }
 0x63b   :  { %v2856_v49 = vpack.c.bf16 %v6368_v34, %v6368_v34 }
 0x63d   :  { %2858 = vst [vmem:[#allocation8 + $0x5] sm:$0x1] %v2856_v49  ;;  %3067 = vmatmul.mubr.bf16.vlgmr.msra.gmra.mxu0 %v2856_v49  ;;  %4377 = vmatmul.mubr.bf16.vlgmr.msra.gmra.mxu1 %v2856_v49  ;;  %v6428_v49 = vpop.f32.mrf.mxu0 }
 0x63e   :  { %3116 = vmatpush1.bf16.msra.mxu0 %v6372_v58  ;;  %4381 = vmatpush3.bf16.msra.mxu1 %v6375_v16 }
 0x63f   :  { %3117 = vmatprep.subr.bf16.mxu0 %v6378_v55  ;;  %4382 = vmatprep.subr.bf16.mxu1 %v6816_v30 }
 0x640   :  { %3147 = vmatprep.mubr.bf16.mxu0 %v6810_v21  ;;  %4396 = vmatprep.mubr.msk.bf16.mxu1 %vm4921_vm0, %v6816_v30 }
 0x642   :  { %3118 = vmatpush1.bf16.msra.mxu0 %v6385_v41  ;;  %4383 = vmatpush3.bf16.msra.mxu1 %v6388_v51 }
 0x643   :  { %3119 = vmatprep.subr.bf16.mxu0 %v6392_v44  ;;  %4384 = vmatprep.subr.bf16.mxu1 %v6816_v30 }
 0x644   :  { %v4662_v13 = vpop.eup %4661 }
 0x645   :  { %v2849_v5 = vmul.f32 %v4662_v13, %v2809_v23  ;;  %v6432_v23 = vld [vmem:[#allocation6 + $0x30] ss:$12 sps:$4 sm:$0xff]   ;;  %v6435_v13 = vld [vmem:[#allocation6 + $0x38] ss:$12 sps:$4 sm:$0xff]  }
 0x646   :  { %3120 = vmatpush1.bf16.msra.mxu0 %v6398_v8  ;;  %4385 = vmatpush3.bf16.msra.mxu1 %v6401_v0  ;;  %6957 = vst [vmem:[#allocation21_spill] sm:$0xff] %v6432_v23  ;;  %6958 = vst [vmem:[#allocation23_spill] sm:$0xff] %v6435_v13  ;;  %v6461_v0 = vld [vmem:[#allocation6] ss:$12 sps:$4 sm:$0xff]  }
 0x647   :  { %v2850_v6 = vadd.f32 %v2849_v5, %v2647_v32  ;;  %3121 = vmatprep.subr.bf16.mxu0 %v6404_v45  ;;  %4386 = vmatprep.subr.bf16.mxu1 %v6816_v30  ;;  %v4664_v33 = vpop.eup %4663  ;;  %v6438_v32 = vld [vmem:[#allocation6 + $0x1c] ss:$12 sps:$4 sm:$0xff]   ;;  %v6442_v5 = vpop.f32.mrf.mxu0 }
 0x648   :  { %6959 = vst [vmem:[#allocation31_spill] sm:$0xff] %v6438_v32 }
 0x649   :  { %4665 = vtanh.f32 %v2850_v6  ;;  %v4350_v6 = vpop.f32.mrf.mxu1 }
 0x64a   :  { %3122 = vmatpush1.bf16.msra.mxu0 %v6408_v59  ;;  %4387 = vmatpush3.bf16.msra.mxu1 %v6411_v3  ;;  %v6444_v3 = vld [vmem:[#allocation6 + $0x18] ss:$12 sps:$4 sm:$0xff]   ;;  %v2854_v6 = vmul.f32 %v4664_v33, %v6161_v2 }
 0x64b   :  { %3123 = vmatprep.subr.bf16.mxu0 %v6414_v56  ;;  %4388 = vmatprep.subr.bf16.mxu1 %v6816_v30  ;;  %6960 = vst [vmem:[#allocation24_spill] sm:$0xff] %v6444_v3 }
 0x64e   :  { %3124 = vmatpush1.bf16.msra.mxu0 %v6418_v19  ;;  %4389 = vmatpush3.bf16.msra.mxu1 %v6421_v29  ;;  %v2905_v29 = vpop.f32.mrf.mxu0  ;;  %v2945_v19 = vpop.f32.mrf.mxu1 }
 0x64f   :  { %3125 = vmatprep.subr.bf16.mxu0 %v6424_v46  ;;  %4390 = vmatprep.subr.bf16.mxu1 %v6816_v30  ;;  %v2852_v46 = vsub.f32 1.0, %v4664_v33 }
 0x650   :  { %v2906_v29 = vpop.f32.mrf.mxu0  ;;  %v4351_v19 = vpop.f32.mrf.mxu1 }
 0x652   :  { %3126 = vmatpush1.bf16.msra.mxu0 %v6432_v23  ;;  %4391 = vmatpush3.bf16.msra.mxu1 %v6435_v13  ;;  %v6447_v23 = vld [vmem:[#allocation6 + $0x20] ss:$12 sps:$4 sm:$0xff]   ;;  %v6450_v13 = vld [vmem:[#allocation6 + $0x4] ss:$12 sps:$4 sm:$0xff]   ;;  %v6457_v45 = vpop.f32.mrf.mxu0 }
 0x653   :  { %3127 = vmatprep.subr.bf16.mxu0 %v6438_v32  ;;  %4392 = vmatprep.subr.bf16.mxu1 %v6816_v30  ;;  %6961 = vst [vmem:[#allocation26_spill] sm:$0xff] %v6447_v23 }
 0x654   :  { %v6469_v2 = vpop.f32.mrf.mxu0 }
 0x656   :  { %v4666_v56 = vpop.eup %4665  ;;  %3128 = vmatpush1.bf16.msra.mxu0 %v6444_v3  ;;  %4393 = vmatpush3.bf16.msra.mxu1 %v6447_v23  ;;  %v6459_v3 = vpop.f32.mrf.mxu1  ;;  %v6464_v23 = vld [vmem:[#allocation6 + $0x8] ss:$12 sps:$4 sm:$0xff]  }
 0x657   :  { %3129 = vmatprep.subr.bf16.mxu0 %v6450_v13  ;;  %4394 = vmatprep.subr.bf16.mxu1 %v6816_v30  ;;  %v2853_v32 = vmul.f32 %v4666_v56, %v2852_v46  ;;  %v2991_v33 = vpop.f32.mrf.mxu0 }
 0x658   :  { %v4358_v46 = vpop.f32.mrf.mxu1 }
 0x659   :  { %v6455_v59 = vadd.f32 %v2854_v6, %v2853_v32  ;;  %v2992_v6 = vpop.f32.mrf.mxu0 }
 0x65a   :  { %3130 = vmatpush1.bf16.msra.mxu0 %v6461_v0  ;;  %4395 = vmatpush3.bf16.msra.mxu1 %v6464_v23  ;;  %v3031_v32 = vpop.f32.mrf.mxu1 }
 0x65b   :  { %v2859_v56 = vpack.c.bf16 %v6455_v59, %v6455_v59  ;;  %3261 = vmatprep.subr.bf16.mxu0 %v6176_v42  ;;  %4400 = vmatprep.subr.bf16.mxu1 %v6816_v30  ;;  %v3807_v42 = vld [vmem:[%s6639_s0 + $0x7] sm:$0x1] }
 0x65c   :  { %v4359_v29 = vpop.f32.mrf.mxu1 }
 0x65d   :  { %2861 = vst [vmem:[#allocation9 + $0x2] sm:$0x1] %v2859_v56  ;;  %3148 = vmatmul.mubr.bf16.vlgmr.msra.gmra.mxu0 %v2859_v56  ;;  %4397 = vmatmul.mubr.bf16.vlgmr.msra.gmra.mxu1 %v2859_v56  ;;  %v2904_v56 = vadd.f32 %v6442_v5, %v6849_v20 }
 0x65e   :  { %3262 = vmatpush1.bf16.msra.mxu0 %v6183_v14  ;;  %4401 = vmatpush3.bf16.msra.mxu1 %v6189_v62  ;;  %v3330_v14 = vld [vmem:[%s6640_s1] sm:$0x1]  ;;  %s4922_s1 = smov [#allocation8]  }
 0x65f   :  { %3263 = vmatprep.subr.bf16.mxu0 %v6195_v22  ;;  %3281 = vmatprep.mubr.bf16.mxu0 %v6810_v21  ;;  %v6962_v62 = vld [vmem:[#allocation40_spill] sm:$0xff]  ;;  %v6963_v22 = vld [vmem:[#allocation33_spill] sm:$0xff]  ;;  %s3636_s9 = sshll.u32 %s4922_s1, 4  ;;  %s3637_s9 = int_to_ptr.vmem [resolvable:$true] %s3636_s9 }
 0x660   :  { %4402 = vmatprep.subr.bf16.mxu1 %v6816_v30  ;;  %4404 = vmatprep.mubr.msk.bf16.mxu1 %vm4921_vm0, %v6816_v30  ;;  %s4867_s6 = scalar_lea.vmem %s3637_s9, 128  ;;  %p4872_p11 = scmp.lt.s32.totalorder %s3637_s9, %s3637_s9 }
 0x661   :  { %p4868_p10 = scmp.ne.s32.totalorder %s3637_s9, %s4867_s6  ;;  %p4873_p12 = scmp.lt.s32.totalorder %s4867_s6, %s4867_s6 }
 0x662   :  { %3264 = vmatpush1.bf16.msra.mxu0 %v6205_v12  ;;  %4403 = vmatpush3.bf16.msra.mxu1 %v6211_v11  ;;  %v6964_v12 = vld [vmem:[#allocation35_spill] sm:$0xff]  ;;  %v6965_v11 = vld [vmem:[#allocation41_spill] sm:$0xff] }
 0x663   :  { %3346 = vmatprep.subr.bf16.mxu0 %v6217_v25  ;;  %4408 = vmatprep.subr.bf16.mxu1 %v6816_v30  ;;  %v6966_v25 = vld [vmem:[#allocation36_spill] sm:$0xff]  ;;  %p4874_p13 = por %p4873_p12, %p4872_p11 }
 0x665   :  { %3808 = vmatmul.mubr.msk.bf16.vlgmr.msra.gmra.mxu0 %vm282_vm1, %v3807_v42  ;;  %4405 = vmatmul.mubr.msk.bf16.vlgmr.msra.gmra.mxu1 %vm282_vm1, %v3807_v42  ;;  %p4875_p0 = pnand %p4874_p13, %p4868_p10 }
 0x666   :  { %3347 = vmatpush1.bf16.msra.mxu0 %v6229_v35  ;;  %4409 = vmatpush3.bf16.msra.mxu1 %v6235_v48  ;;  %v6967_v35 = vld [vmem:[#allocation38_spill] sm:$0xff] }
 0x667   :  { %3348 = vmatprep.subr.bf16.mxu0 %v6241_v26  ;;  %3366 = vmatprep.mubr.bf16.mxu0 %v6810_v21  ;;  %v6968_v48 = vld [vmem:[#allocation42_spill] sm:$0xff]  ;;  %v6969_v26 = vld [vmem:[#allocation48_spill] sm:$0xff] }
 0x668   :  { %4410 = vmatprep.subr.bf16.mxu1 %v6816_v30  ;;  %4412 = vmatprep.mubr.msk.bf16.mxu1 %vm4921_vm0, %v6816_v30 }
 0x66a   :  { %3349 = vmatpush1.bf16.msra.mxu0 %v6251_v43  ;;  %4411 = vmatpush3.bf16.msra.mxu1 %v6257_v54  ;;  %v6970_v43 = vld [vmem:[#allocation49_spill] sm:$0xff]  ;;  %v6971_v54 = vld [vmem:[#allocation43_spill] sm:$0xff] }
 0x66b   :  { %3415 = vmatprep.subr.bf16.mxu0 %v6260_v7  ;;  %4416 = vmatprep.subr.bf16.mxu1 %v6816_v30  ;;  %v6972_v7 = vld [vmem:[#allocation15_spill] sm:$0xff] }
 0x66d   :  { %3810 = vmatmul.mubr.msk.bf16.vlgmr.msra.gmra.mxu0 %vm282_vm1, %v3330_v14  ;;  %4413 = vmatmul.mubr.msk.bf16.vlgmr.msra.gmra.mxu1 %vm282_vm1, %v3330_v14  ;;  %v2988_v14 = vadd.f32 %v6457_v45, %v5368_v27 }
 0x66e   :  { %3416 = vmatpush1.bf16.msra.mxu0 %v6269_v9  ;;  %4417 = vmatpush3.bf16.msra.mxu1 %v6272_v60 }
 0x66f   :  { %3417 = vmatprep.subr.bf16.mxu0 %v6275_v52  ;;  %4418 = vmatprep.subr.bf16.mxu1 %v6816_v30  ;;  %v6973_v52 = vld [vmem:[#allocation44_spill] sm:$0xff] }
 0x670   :  { %3447 = vmatprep.mubr.bf16.mxu0 %v6810_v21  ;;  %4432 = vmatprep.mubr.msk.bf16.mxu1 %vm4921_vm0, %v6816_v30 }
 0x672   :  { %3418 = vmatpush1.bf16.msra.mxu0 %v6282_v17  ;;  %4419 = vmatpush3.bf16.msra.mxu1 %v6285_v63  ;;  %v2902_v17 = vadd.f32 %v6428_v49, %v6973_v52 }
 0x673   :  { %3419 = vmatprep.subr.bf16.mxu0 %v6288_v28  ;;  %4420 = vmatprep.subr.bf16.mxu1 %v6816_v30 }
 0x676   :  { %3420 = vmatpush1.bf16.msra.mxu0 %v6292_v37  ;;  %4421 = vmatpush3.bf16.msra.mxu1 %v6295_v57 }
 0x677   :  { %3421 = vmatprep.subr.bf16.mxu0 %v6298_v53  ;;  %4422 = vmatprep.subr.bf16.mxu1 %v6816_v30 }
 0x67a   :  { %3422 = vmatpush1.bf16.msra.mxu0 %v6302_v61  ;;  %4423 = vmatpush3.bf16.msra.mxu1 %v6305_v1 }
 0x67b   :  { %3423 = vmatprep.subr.bf16.mxu0 %v6308_v50  ;;  %4424 = vmatprep.subr.bf16.mxu1 %v6816_v30 }
 0x67e   :  { %3424 = vmatpush1.bf16.msra.mxu0 %v6312_v18  ;;  %4425 = vmatpush3.bf16.msra.mxu1 %v6962_v62 }
 0x67f   :  { %3425 = vmatprep.subr.bf16.mxu0 %v6963_v22  ;;  %4426 = vmatprep.subr.bf16.mxu1 %v6816_v30 }
 0x682   :  { %3426 = vmatpush1.bf16.msra.mxu0 %v6964_v12  ;;  %4427 = vmatpush3.bf16.msra.mxu1 %v6965_v11 }
 0x683   :  { %3427 = vmatprep.subr.bf16.mxu0 %v6966_v25  ;;  %4428 = vmatprep.subr.bf16.mxu1 %v6816_v30 }
 0x686   :  { %3428 = vmatpush1.bf16.msra.mxu0 %v6967_v35  ;;  %4429 = vmatpush3.bf16.msra.mxu1 %v6968_v48  ;;  %v2943_v48 = vadd.f32 %v6430_v4, %v5374_v24 }
 0x687   :  { %3429 = vmatprep.subr.bf16.mxu0 %v6969_v26  ;;  %4430 = vmatprep.subr.bf16.mxu1 %v6816_v30 }
 0x68a   :  { %3430 = vmatpush1.bf16.msra.mxu0 %v6970_v43  ;;  %4431 = vmatpush3.bf16.msra.mxu1 %v6971_v54 }
 0x68b   :  { %3496 = vmatprep.subr.bf16.mxu0 %v6972_v7  ;;  %4436 = vmatprep.subr.bf16.mxu1 %v6816_v30 }
 0x6fd   :  { %v3068_v9 = vpop.f32.mrf.mxu0  ;;  %v3109_v60 = vpop.f32.mrf.mxu1 }
 0x6fe   :  { %v3069_v63 = vadd.f32 %v3068_v9, %v6847_v39  ;;  %v3110_v5 = vadd.f32 %v3109_v60, %v6850_v36 }
 0x6ff   :  { %v3070_v28 = vpop.f32.mrf.mxu0  ;;  %v4378_v37 = vpop.f32.mrf.mxu1 }
 0x700   :  { %v3196_v57 = vadd.f32 %v3069_v63, %v2902_v17  ;;  %v3071_v50 = vadd.f32 %v3070_v28, %v6848_v31  ;;  %v2990_v63 = vadd.f32 %v6469_v2, %v5381_v40 }
 0x701   :  { %v3072_v53 = vpop.f32.mrf.mxu0  ;;  %v3112_v61 = vpop.f32.mrf.mxu1 }
 0x702   :  { %v3803_v1 = vmul.f32 -1.442695, %v3196_v57  ;;  %v3203_v46 = vadd.f32 %v3071_v50, %v2904_v56 }
 0x703   :  { %v3073_v18 = vpop.f32.mrf.mxu0  ;;  %v4379_v19 = vpop.f32.mrf.mxu1 }
 0x704   :  { %4667 = vpow2.f32 %v3803_v1  ;;  %v3804_v33 = vmul.f32 -1.442695, %v3203_v46 }
 0x706   :  { %4669 = vpow2.f32 %v3804_v33 }
 0x711   :  { %v4668_v49 = vpop.eup %4667 }
 0x712   :  { %v3200_v32 = vadd.f32 1.0, %v4668_v49  ;;  %v6978_v49 = vld [vmem:[#allocation25_spill] sm:$0xff] }
 0x713   :  { %v4670_v6 = vpop.eup %4669 }
 0x714   :  { %4671 = vrcp.f32 %v3200_v32  ;;  %v3207_v62 = vadd.f32 1.0, %v4670_v6  ;;  %v6980_v32 = vld [vmem:[#allocation20_spill] sm:$0xff] }
 0x716   :  { %4673 = vrcp.f32 %v3207_v62  ;;  %v6983_v62 = vld [vmem:[#allocation23_spill] sm:$0xff] }
 0x71d   :  { %v3149_v29 = vpop.f32.mrf.mxu0  ;;  %v3190_v42 = vpop.f32.mrf.mxu1 }
 0x71e   :  { %v3150_v22 = vadd.f32 %v3149_v29, %v5372_v15  ;;  %v3191_v46 = vadd.f32 %v3190_v42, %v5392_v47 }
 0x71f   :  { %v3151_v12 = vpop.f32.mrf.mxu0  ;;  %v4398_v11 = vpop.f32.mrf.mxu1 }
 0x720   :  { %v3217_v25 = vadd.f32 %v3150_v22, %v2988_v14  ;;  %v3152_v9 = vadd.f32 %v3151_v12, %v5376_v10  ;;  %v6982_v14 = vld [vmem:[#allocation21_spill] sm:$0xff]  ;;  %v6984_v22 = vld [vmem:[#allocation31_spill] sm:$0xff] }
 0x721   :  { %v4672_v35 = vpop.eup %4671  ;;  %v3153_v26 = vpop.f32.mrf.mxu0 }
 0x722   :  { %v3193_v43 = vpop.f32.mrf.mxu1  ;;  %v3210_v54 = vmul.f32 %v4672_v35, %v3110_v5  ;;  %v3805_v7 = vmul.f32 -1.442695, %v3217_v25  ;;  %v3224_v60 = vadd.f32 %v3152_v9, %v2990_v63  ;;  %v6985_v26 = vld [vmem:[#allocation24_spill] sm:$0xff] }
 0x723   :  { %v3154_v45 = vpop.f32.mrf.mxu0  ;;  %v4674_v57 = vpop.eup %4673  ;;  %v6986_v43 = vld [vmem:[#allocation26_spill] sm:$0xff] }
 0x724   :  { %v4399_v17 = vpop.f32.mrf.mxu1  ;;  %v3211_v28 = vadd.f32 %v3210_v54, %v2943_v48  ;;  %4675 = vpow2.f32 %v3805_v7  ;;  %v3806_v37 = vmul.f32 -1.442695, %v3224_v60  ;;  %v3213_v61 = vsub.f32 1.0, %v4674_v57 }
 0x725   :  { %v3215_v18 = vmul.f32 %v4674_v57, %v6368_v34  ;;  %v3283_v6 = vpop.f32.mrf.mxu0 }
 0x726   :  { %4677 = vtanh.f32 %v3211_v28  ;;  %v6586_v29 = vpop.f32.mrf.mxu1 }
 0x727   :  { %4679 = vpow2.f32 %v3806_v37  ;;  %v3285_v12 = vpop.f32.mrf.mxu0 }
 0x728   :  { %v4406_v11 = vpop.f32.mrf.mxu1 }
 0x729   :  { %v3287_v25 = vpop.f32.mrf.mxu0 }
 0x72a   :  { %v3327_v35 = vpop.f32.mrf.mxu1 }
 0x72b   :  { %v3288_v9 = vpop.f32.mrf.mxu0 }
 0x72c   :  { %v4407_v45 = vpop.f32.mrf.mxu1 }
 0x72d   :  { %v3368_v63 = vpop.f32.mrf.mxu0 }
 0x72e   :  { %v6599_v28 = vpop.f32.mrf.mxu1 }
 0x730   :  { %v4414_v37 = vpop.f32.mrf.mxu1 }
 0x731   :  { %v4676_v4 = vpop.eup %4675 }
 0x732   :  { %v3221_v53 = vadd.f32 1.0, %v4676_v4 }
 0x733   :  { %v4678_v1 = vpop.eup %4677 }
 0x734   :  { %4681 = vrcp.f32 %v3221_v53  ;;  %v3214_v50 = vmul.f32 %v4678_v1, %v3213_v61  ;;  %v4680_v56 = vpop.eup %4679  ;;  %v3284_v1 = vadd.f32 %v3283_v6, %v6973_v52 }
 0x735   :  { %v3228_v34 = vadd.f32 1.0, %v4680_v56 }
 0x736   :  { %v6556_v19 = vadd.f32 %v3215_v18, %v3214_v50 }
 0x737   :  { %4683 = vrcp.f32 %v3228_v34 }
 0x738   :  { %v3238_v2 = vpack.c.bf16 %v6556_v19, %v6556_v19 }
 0x73a   :  { %3240 = vst [vmem:[#allocation8 + $0x6] sm:$0x1] %v3238_v2  ;;  %3448 = vmatmul.mubr.bf16.vlgmr.msra.gmra.mxu0 %v3238_v2  ;;  %4433 = vmatmul.mubr.bf16.vlgmr.msra.gmra.mxu1 %v3238_v2 }
 0x73b   :  { %3497 = vmatpush1.bf16.msra.mxu0 %v6372_v58  ;;  %4437 = vmatpush3.bf16.msra.mxu1 %v6375_v16  ;;  %v3029_v16 = vadd.f32 %v6459_v3, %v5401_v38  ;;  %v6979_v3 = vld [vmem:[#allocation19_spill] sm:$0xff] }
 0x73c   :  { %3498 = vmatprep.subr.bf16.mxu0 %v6378_v55  ;;  %4438 = vmatprep.subr.bf16.mxu1 %v6816_v30 }
 0x73d   :  { %3528 = vmatprep.mubr.bf16.mxu0 %v6810_v21  ;;  %4452 = vmatprep.mubr.msk.bf16.mxu1 %vm4921_vm0, %v6816_v30  ;;  %v6974_v21 = vld [vmem:[#allocation16_spill] sm:$0xff] }
 0x73f   :  { %3499 = vmatpush1.bf16.msra.mxu0 %v6385_v41  ;;  %4439 = vmatpush3.bf16.msra.mxu1 %v6388_v51  ;;  %v6975_v41 = vld [vmem:[#allocation22_spill] sm:$0xff]  ;;  %v6976_v51 = vld [vmem:[#allocation17_spill] sm:$0xff] }
 0x740   :  { %3500 = vmatprep.subr.bf16.mxu0 %v6392_v44  ;;  %4440 = vmatprep.subr.bf16.mxu1 %v6816_v30  ;;  %v6977_v44 = vld [vmem:[#allocation18_spill] sm:$0xff] }
 0x741   :  { %v4682_v58 = vpop.eup %4681 }
 0x742   :  { %v3231_v55 = vmul.f32 %v4682_v58, %v3191_v46 }
 0x743   :  { %3501 = vmatpush1.bf16.msra.mxu0 %v6398_v8  ;;  %4441 = vmatpush3.bf16.msra.mxu1 %v6974_v21  ;;  %v6981_v8 = vld [vmem:[#allocation28_spill] sm:$0xff] }
 0x744   :  { %v3232_v33 = vadd.f32 %v3231_v55, %v3029_v16  ;;  %3502 = vmatprep.subr.bf16.mxu0 %v6975_v41  ;;  %4442 = vmatprep.subr.bf16.mxu1 %v6816_v30  ;;  %v4684_v42 = vpop.eup %4683  ;;  %v3286_v55 = vadd.f32 %v3285_v12, %v6849_v20 }
 0x745   :  { %v3234_v5 = vsub.f32 1.0, %v4684_v42  ;;  %v3236_v7 = vmul.f32 %v4684_v42, %v6455_v59  ;;  %v3412_v59 = vpop.f32.mrf.mxu1 }
 0x746   :  { %4685 = vtanh.f32 %v3232_v33 }
 0x747   :  { %3503 = vmatpush1.bf16.msra.mxu0 %v6976_v51  ;;  %4443 = vmatpush3.bf16.msra.mxu1 %v6977_v44  ;;  %v4415_v4 = vpop.f32.mrf.mxu1 }
 0x748   :  { %3504 = vmatprep.subr.bf16.mxu0 %v6978_v49  ;;  %4444 = vmatprep.subr.bf16.mxu1 %v6816_v30  ;;  %v3369_v49 = vadd.f32 %v3368_v63, %v5368_v27 }
 0x74b   :  { %3505 = vmatpush1.bf16.msra.mxu0 %v6979_v3  ;;  %4445 = vmatpush3.bf16.msra.mxu1 %v6980_v32 }
 0x74c   :  { %3506 = vmatprep.subr.bf16.mxu0 %v6981_v8  ;;  %4446 = vmatprep.subr.bf16.mxu1 %v6816_v30 }
 0x74f   :  { %3507 = vmatpush1.bf16.msra.mxu0 %v6982_v14  ;;  %4447 = vmatpush3.bf16.msra.mxu1 %v6983_v62  ;;  %v3325_v14 = vadd.f32 %v6586_v29, %v5374_v24 }
 0x750   :  { %3508 = vmatprep.subr.bf16.mxu0 %v6984_v22  ;;  %4448 = vmatprep.subr.bf16.mxu1 %v6816_v30 }
 0x753   :  { %v4686_v48 = vpop.eup %4685  ;;  %3509 = vmatpush1.bf16.msra.mxu0 %v6985_v26  ;;  %4449 = vmatpush3.bf16.msra.mxu1 %v6986_v43 }
 0x754   :  { %3510 = vmatprep.subr.bf16.mxu0 %v6450_v13  ;;  %4450 = vmatprep.subr.bf16.mxu1 %v6816_v30  ;;  %v3235_v54 = vmul.f32 %v4686_v48, %v3234_v5  ;;  %v3370_v13 = vpop.f32.mrf.mxu0 }
 0x756   :  { %v6597_v17 = vadd.f32 %v3236_v7, %v3235_v54  ;;  %v3372_v30 = vpop.f32.mrf.mxu0 }
 0x757   :  { %3511 = vmatpush1.bf16.msra.mxu0 %v6461_v0  ;;  %4451 = vmatpush3.bf16.msra.mxu1 %v6464_v23 }
 0x758   :  { %v3241_v60 = vpack.c.bf16 %v6597_v17, %v6597_v17  ;;  %v3373_v57 = vpop.f32.mrf.mxu0 }
 0x75a   :  { %3243 = vst [vmem:[#allocation9 + $0x1] sm:$0x1] %v3241_v60  ;;  %3529 = vmatmul.mubr.bf16.vlgmr.msra.gmra.mxu0 %v3241_v60  ;;  %4453 = vmatmul.mubr.bf16.vlgmr.msra.gmra.mxu1 %v3241_v60 }
 0x7fa   :  { %v3449_v53 = vpop.f32.mrf.mxu0  ;;  %v3490_v61 = vpop.f32.mrf.mxu1 }
 0x7fb   :  { %v3450_v0 = vadd.f32 %v3449_v53, %v6847_v39  ;;  %v3491_v6 = vadd.f32 %v3490_v61, %v6850_v36 }
 0x7fc   :  { %v3451_v50 = vpop.f32.mrf.mxu0  ;;  %v4434_v23 = vpop.f32.mrf.mxu1 }
 0x7fd   :  { %v3577_v18 = vadd.f32 %v3450_v0, %v3284_v1  ;;  %v3452_v46 = vadd.f32 %v3451_v50, %v6848_v31 }
 0x7fe   :  { %v3453_v2 = vpop.f32.mrf.mxu0  ;;  %v3493_v56 = vpop.f32.mrf.mxu1 }
 0x7ff   :  { %v3812_v34 = vmul.f32 -1.442695, %v3577_v18  ;;  %v3584_v21 = vadd.f32 %v3452_v46, %v3286_v55 }
 0x800   :  { %v3454_v58 = vpop.f32.mrf.mxu0  ;;  %v4435_v16 = vpop.f32.mrf.mxu1 }
 0x801   :  { %4687 = vpow2.f32 %v3812_v34  ;;  %v3813_v33 = vmul.f32 -1.442695, %v3584_v21 }
 0x803   :  { %4689 = vpow2.f32 %v3813_v33 }
 0x80e   :  { %v4688_v41 = vpop.eup %4687 }
 0x80f   :  { %v3581_v52 = vadd.f32 1.0, %v4688_v41 }
 0x810   :  { %v4690_v39 = vpop.eup %4689 }
 0x811   :  { %4691 = vrcp.f32 %v3581_v52  ;;  %v3588_v3 = vadd.f32 1.0, %v4690_v39 }
 0x813   :  { %4693 = vrcp.f32 %v3588_v3 }
 0x81a   :  { %v3530_v51 = vpop.f32.mrf.mxu0  ;;  %v3571_v44 = vpop.f32.mrf.mxu1 }
 0x81b   :  { %v3531_v32 = vadd.f32 %v3530_v51, %v5372_v15  ;;  %v3371_v15 = vadd.f32 %v3370_v13, %v5381_v40 }
 0x81c   :  { %v3532_v31 = vpop.f32.mrf.mxu0  ;;  %v4454_v8 = vpop.f32.mrf.mxu1 }
 0x81d   :  { %v3598_v20 = vadd.f32 %v3531_v32, %v3369_v49  ;;  %v3533_v5 = vadd.f32 %v3532_v31, %v5376_v10 }
 0x81e   :  { %v4692_v42 = vpop.eup %4691  ;;  %v3534_v62 = vpop.f32.mrf.mxu0 }
 0x81f   :  { %v3574_v22 = vpop.f32.mrf.mxu1  ;;  %v3591_v12 = vmul.f32 %v4692_v42, %v3491_v6  ;;  %v3814_v11 = vmul.f32 -1.442695, %v3598_v20  ;;  %v3605_v36 = vadd.f32 %v3533_v5, %v3371_v15 }
 0x820   :  { %v3535_v27 = vpop.f32.mrf.mxu0  ;;  %v4694_v26 = vpop.eup %4693 }
 0x821   :  { %v4455_v25 = vpop.f32.mrf.mxu1  ;;  %v3592_v35 = vadd.f32 %v3591_v12, %v3325_v14  ;;  %4695 = vpow2.f32 %v3814_v11  ;;  %v3815_v48 = vmul.f32 -1.442695, %v3605_v36  ;;  %v3594_v24 = vsub.f32 1.0, %v4694_v26 }
 0x822   :  { %v3596_v9 = vmul.f32 %v4694_v26, %v6556_v19 }
 0x823   :  { %4697 = vtanh.f32 %v3592_v35 }
 0x824   :  { %4699 = vpow2.f32 %v3815_v48 }
 0x82e   :  { %v4696_v43 = vpop.eup %4695 }
 0x82f   :  { %v3602_v29 = vadd.f32 1.0, %v4696_v43 }
 0x830   :  { %v4698_v54 = vpop.eup %4697 }
 0x831   :  { %v3595_v7 = vmul.f32 %v4698_v54, %v3594_v24  ;;  %4701 = vrcp.f32 %v3602_v29  ;;  %v4700_v40 = vpop.eup %4699 }
 0x833   :  { %v3597_v10 = vadd.f32 %v3596_v9, %v3595_v7 }
 0x835   :  { %v3619_v45 = vpack.c.bf16 %v3597_v10, %v3597_v10  ;;  %3624 = vst [vmem:[#allocation2] sm:$0x3] %v3597_v10  ;;  %3629 = vst [vmem:[%s6652_s13] sm:$0x3] %v3597_v10 }
 0x837   :  { %3621 = vst [vmem:[#allocation8 + $0x7] sm:$0x1] %v3619_v45 }
 0x838   :  { %4878 = shalt.err (!%p4875_p0)
}
 0x839   :  { %s4923_s10 = smov 16   ;;  %s4924_s20 = smov 1   ;;  %v3609_v19 = vadd.f32 1.0, %v4700_v40  ;;  %v3572_v63 = vadd.f32 %v3571_v44, %v5392_v47  ;;  %v3410_v13 = vadd.f32 %v6599_v28, %v5401_v38 }
 0x83a   :  { %3642 = dma.vmem_to_hbm [thread:$0]  %s3637_s9, 128, %s6650_s11, [#allocation5], %s4923_s10, %s4923_s10, %s4924_s20  }
 0x83b   :  { %4703 = vrcp.f32 %v3609_v19  ;;  %s4925_s22 = smov [#allocation9]  }
 0x83c   :  { %s3652_s23 = sshll.u32 %s4925_s22, 4  ;;  %s3653_s23 = int_to_ptr.vmem [resolvable:$true] %s3652_s23 }
 0x83d   :  { %s4887_s3 = scalar_lea.vmem %s3653_s23, 128  ;;  %p4892_p2 = scmp.lt.s32.totalorder %s3653_s23, %s3653_s23 }
 0x83e   :  { %v4702_v60 = vpop.eup %4701  ;;  %p4888_p1 = scmp.ne.s32.totalorder %s3653_s23, %s4887_s3  ;;  %p4893_p3 = scmp.lt.s32.totalorder %s4887_s3, %s4887_s3 }
 0x83f   :  { %v3612_v37 = vmul.f32 %v4702_v60, %v3572_v63 }
 0x840   :  { %p4894_p4 = por %p4893_p3, %p4892_p2 }
 0x841   :  { %v3613_v30 = vadd.f32 %v3612_v37, %v3410_v13 }
 0x842   :  { %p4895_p5 = pnand %p4894_p4, %p4888_p1 }
 0x843   :  { %4705 = vtanh.f32 %v3613_v30 }
 0x848   :  { %v4704_v59 = vpop.eup %4703 }
 0x849   :  { %v3615_v57 = vsub.f32 1.0, %v4704_v59  ;;  %v3617_v61 = vmul.f32 %v4704_v59, %v6597_v17 }
 0x850   :  { %v4706_v4 = vpop.eup %4705 }
 0x851   :  { %v3616_v53 = vmul.f32 %v4706_v4, %v3615_v57 }
 0x853   :  { %v3618_v1 = vadd.f32 %v3617_v61, %v3616_v53 }
 0x855   :  { %v3622_v0 = vpack.c.bf16 %v3618_v1, %v3618_v1  ;;  %3625 = vst [vmem:[#allocation2 + $0x2] sm:$0x3] %v3618_v1  ;;  %3630 = vst [vmem:[%s6652_s13 + $0x2] sm:$0x3] %v3618_v1 }
 0x857   :  { %3623 = vst [vmem:[#allocation9] sm:$0x1] %v3622_v0 }
 0x858   :  { %4898 = shalt.err (!%p4895_p5)
}
 0x859   :  { %3658 = dma.vmem_to_hbm [thread:$0]  %s3653_s23, 128, %s6651_s12, [#allocation10], %s4923_s10, %s4923_s10, %s4924_s20  }
 0x85a   :  { %4911 = dma.done.wait [#allocation5], 128  }
 0x85b   :  { %4912 = vsyncadd [#allocation5], 4294967168 }
 0x85c   :  { %4913 = dma.done.wait [#allocation10], 128  }
 0x85d   :  { %4914 = vsyncadd [#allocation10], 4294967168 }
 0x85e   :  { %3669 = vsyncpa [#allocation4], 1 }
 0x85f   :  { %3670 = vsyncpa [#allocation7], 1 }
 0x860   :  { %3671 = vsyncpa [#allocation5], 1 }
 0x861   :  { %3672 = vsyncpa [#allocation10], 1 }

</bundles_post_ra>
